<compile_context>
chip_gen: v5e
topology: v5e:2x2
jax: 0.10.0
libtpu: 0.0.40
codegen_flags: <defaults>
</compile_context>

<pallas_src>
import functools

import jax
import jax.numpy as jnp
from jax.experimental import pallas as pl
from jax.experimental.pallas import tpu as pltpu


def _transformer_block_kernel(
    x_ref, g1_ref, be1_ref, wqkv_ref, bqkv_ref, wproj_ref, bproj_ref,
    g2_ref, be2_ref, w1_ref, b1_ref, w2_ref, b2_ref, o_ref,
    *, num_heads, ln_eps, compute_dtype):
  """Fully fused transformer block for one batch element's (N, C) slab."""
  x = x_ref[0].astype(jnp.float32)               # (N, C) f32
  n, c = x.shape
  head_dim = c // num_heads
  scale = float(head_dim) ** -0.5

  def layer_norm(v, g_ref, b_ref):
    mu = jnp.mean(v, axis=-1, keepdims=True)
    cen = v - mu
    var = jnp.mean(cen * cen, axis=-1, keepdims=True)
    return cen * jax.lax.rsqrt(var + ln_eps) * g_ref[...] + b_ref[...]

  # ---------------- attention branch: x + proj(attn(LN1(x))) ----------------
  xn = layer_norm(x, g1_ref, be1_ref)
  qkv = jnp.dot(xn.astype(compute_dtype), wqkv_ref[...],
                preferred_element_type=jnp.float32) + bqkv_ref[...]   # (N, 3C) f32

  head_outs = []
  for h in range(num_heads):                     # static unroll over heads
    lo = h * head_dim
    qh = (qkv[:, lo:lo + head_dim] * scale).astype(compute_dtype)
    kh = qkv[:, c + lo:c + lo + head_dim].astype(compute_dtype)
    vh = qkv[:, 2 * c + lo:2 * c + lo + head_dim].astype(compute_dtype)
    # q @ k.T without an explicit transpose (contract last dims on the MXU).
    s = jax.lax.dot_general(qh, kh, (((1,), (1,)), ((), ())),
                            preferred_element_type=jnp.float32)       # (N, N)
    s = s - jnp.max(s, axis=-1, keepdims=True)
    p = jnp.exp(s)
    p = p / jnp.sum(p, axis=-1, keepdims=True)
    head_outs.append(jnp.dot(p.astype(compute_dtype), vh,
                             preferred_element_type=jnp.float32))     # (N, hd)
  attn_out = jnp.concatenate(head_outs, axis=-1)                      # (N, C)

  proj = jnp.dot(attn_out.astype(compute_dtype), wproj_ref[...],
                 preferred_element_type=jnp.float32) + bproj_ref[...]
  x = x + proj                                                        # residual 1

  # ---------------- FFN branch: x + fc2(GELU(fc1(LN2(x)))) ------------------
  yn = layer_norm(x, g2_ref, be2_ref)
  hpre = jnp.dot(yn.astype(compute_dtype), w1_ref[...],
                 preferred_element_type=jnp.float32) + b1_ref[...]    # (N, H) f32
  # TODO(synk): PyTorch nn.GELU() defaults to the exact erf form; tanh-approx
  # GELU is used here (EUP-friendly tanh), deviation ~1e-3.
  c0 = 0.7978845608028654  # sqrt(2/pi)
  hact = 0.5 * hpre * (1.0 + jnp.tanh(c0 * (hpre + 0.044715 * hpre * hpre * hpre)))
  ffn = jnp.dot(hact.astype(compute_dtype), w2_ref[...],
                preferred_element_type=jnp.float32) + b2_ref[...]

  o_ref[0] = (x + ffn).astype(o_ref.dtype)                            # residual 2


def transformer_block_pallas(x, params, *, num_heads, ln_eps=1e-5,
                             compute_dtype=jnp.bfloat16):
  """x: (B, N, C). params: pre-transposed (in, out) weights + 1D biases/LN params."""
  B, N, C = x.shape
  assert C % num_heads == 0, "dim must be divisible by num_heads"
  assert N % 8 == 0 and C % 128 == 0, (
      "keep N a multiple of 8 and C a multiple of 128 for sublane/lane-dense tiles")
  H = params["w_fc1"].shape[1]

  # Matmul weights go in as compute_dtype (bf16 halves HBM/VMEM traffic and hits
  # the bf16 MXU rate on v6e/v7x); biases / LN params stay f32 (post-accumulate).
  f32 = jnp.float32
  args = (
      x,
      params["ln1_g"].reshape(1, C).astype(f32),
      params["ln1_b"].reshape(1, C).astype(f32),
      params["w_qkv"].astype(compute_dtype),
      params["b_qkv"].reshape(1, 3 * C).astype(f32),
      params["w_proj"].astype(compute_dtype),
      params["b_proj"].reshape(1, C).astype(f32),
      params["ln2_g"].reshape(1, C).astype(f32),
      params["ln2_b"].reshape(1, C).astype(f32),
      params["w_fc1"].astype(compute_dtype),
      params["b_fc1"].reshape(1, H).astype(f32),
      params["w_fc2"].astype(compute_dtype),
      params["b_fc2"].reshape(1, C).astype(f32),
  )

  kernel = functools.partial(_transformer_block_kernel, num_heads=num_heads,
                             ln_eps=ln_eps, compute_dtype=compute_dtype)

  const = lambda b: (0, 0)   # resident weights/biases: same block at every step
  in_specs = [
      pl.BlockSpec((1, N, C), lambda b: (b, 0, 0)),    # x slab for batch b
      pl.BlockSpec((1, C), const),                     # ln1 gamma
      pl.BlockSpec((1, C), const),                     # ln1 beta
      pl.BlockSpec((C, 3 * C), const),                 # W_qkv
      pl.BlockSpec((1, 3 * C), const),                 # b_qkv
      pl.BlockSpec((C, C), const),                     # W_proj
      pl.BlockSpec((1, C), const),                     # b_proj
      pl.BlockSpec((1, C), const),                     # ln2 gamma
      pl.BlockSpec((1, C), const),                     # ln2 beta
      pl.BlockSpec((C, H), const),                     # W_fc1
      pl.BlockSpec((1, H), const),                     # b_fc1
      pl.BlockSpec((H, C), const),                     # W_fc2
      pl.BlockSpec((1, C), const),                     # b_fc2
  ]

  return pl.pallas_call(
      kernel,
      out_shape=jax.ShapeDtypeStruct((B, N, C), x.dtype),
      grid_spec=pltpu.PrefetchScalarGridSpec(
          num_scalar_prefetch=0,
          grid=(B,),
          in_specs=in_specs,
          out_specs=pl.BlockSpec((1, N, C), lambda b: (b, 0, 0)),
      ),
      compiler_params=pltpu.CompilerParams(
          dimension_semantics=("parallel",),
          vmem_limit_bytes=64 * 1024 * 1024),
  )(*args)


# ----------------------------- reference & init ------------------------------
def _torch_linear_init(key, in_features, out_features):
  """nn.Linear default init U(-1/sqrt(in), 1/sqrt(in)); weight pre-transposed (in, out)."""
  kw, kb = jax.random.split(key)
  bound = float(in_features) ** -0.5
  w_t = jax.random.uniform(kw, (in_features, out_features), minval=-bound,
                           maxval=bound, dtype=jnp.float32)
  b = jax.random.uniform(kb, (out_features,), minval=-bound, maxval=bound,
                         dtype=jnp.float32)
  return w_t, b


def _gelu_tanh(x):
  c0 = 0.7978845608028654
  return 0.5 * x * (1.0 + jnp.tanh(c0 * (x + 0.044715 * x * x * x)))


def transformer_block_ref(x, params, *, num_heads, ln_eps=1e-5):
  """Pure-JAX float32 reference mirroring the PyTorch forward."""
  B, N, C = x.shape
  hd = C // num_heads
  scale = float(hd) ** -0.5

  def ln(v, g, b):
    mu = jnp.mean(v, axis=-1, keepdims=True)
    var = jnp.mean((v - mu) ** 2, axis=-1, keepdims=True)
    return (v - mu) * jax.lax.rsqrt(var + ln_eps) * g + b

  xn = ln(x, params["ln1_g"], params["ln1_b"])
  qkv = xn @ params["w_qkv"] + params["b_qkv"]                    # (B, N, 3C)
  qkv = qkv.reshape(B, N, 3, num_heads, hd).transpose(2, 0, 3, 1, 4)
  q, k, v = qkv[0] * scale, qkv[1], qkv[2]                        # (B, H, N, hd)
  attn = jax.nn.softmax(q @ jnp.swapaxes(k, -1, -2), axis=-1)
  a = (attn @ v).transpose(0, 2, 1, 3).reshape(B, N, C)
  x = x + (a @ params["w_proj"] + params["b_proj"])

  yn = ln(x, params["ln2_g"], params["ln2_b"])
  h = _gelu_tanh(yn @ params["w_fc1"] + params["b_fc1"])
  return x + (h @ params["w_fc2"] + params["b_fc2"])


if __name__ == "__main__":
  key = jax.random.PRNGKey(0)
  ks = jax.random.split(key, 10)

  # Small but lane-dense shapes: batch=2, seq=128, dim=128 (4 heads), ffn x2.
  B, N, C = 2, 128, 128
  num_heads = 4
  ffn_expansion_factor = 2
  H = C * ffn_expansion_factor

  x = jax.random.normal(ks[0], (B, N, C), dtype=jnp.float32)
  w_qkv, b_qkv = _torch_linear_init(ks[1], C, 3 * C)
  w_proj, b_proj = _torch_linear_init(ks[2], C, C)
  w_fc1, b_fc1 = _torch_linear_init(ks[3], C, H)
  w_fc2, b_fc2 = _torch_linear_init(ks[4], H, C)
  params = dict(
      ln1_g=1.0 + 0.1 * jax.random.normal(ks[5], (C,), dtype=jnp.float32),
      ln1_b=0.1 * jax.random.normal(ks[6], (C,), dtype=jnp.float32),
      ln2_g=1.0 + 0.1 * jax.random.normal(ks[7], (C,), dtype=jnp.float32),
      ln2_b=0.1 * jax.random.normal(ks[8], (C,), dtype=jnp.float32),
      w_qkv=w_qkv, b_qkv=b_qkv, w_proj=w_proj, b_proj=b_proj,
      w_fc1=w_fc1, b_fc1=b_fc1, w_fc2=w_fc2, b_fc2=b_fc2,
  )

  ref = transformer_block_ref(x, params, num_heads=num_heads)

  # Float32-operand run: tight structural check against the pure-JAX reference.
  out_f32 = transformer_block_pallas(x, params, num_heads=num_heads,
                                     compute_dtype=jnp.float32)
  out_f32 = jax.block_until_ready(out_f32)
  assert out_f32.shape == x.shape and out_f32.dtype == x.dtype
  assert jnp.allclose(out_f32, ref, atol=2e-2, rtol=2e-2), "f32 mismatch vs reference"

  # bf16 matmul operands (recommended fast path on v6e/v7x): looser tolerance.
  out_bf16 = transformer_block_pallas(x, params, num_heads=num_heads,
                                      compute_dtype=jnp.bfloat16)
  out_bf16 = jax.block_until_ready(out_bf16)
  assert out_bf16.shape == x.shape and out_bf16.dtype == x.dtype
  assert jnp.allclose(out_bf16, ref, atol=1.5e-1, rtol=5e-2), "bf16 mismatch vs reference"

  print("KERNEL_OK")
</pallas_src>

<mosaic_0001>
module attributes {stable_mosaic.version = 11 : i64} {
  func.func @_transformer_block_kernel(%arg0: i32, %arg1: memref<1x128x128xf32, #tpu.memory_space<vmem>>, %arg2: memref<1x128xf32, #tpu.memory_space<vmem>>, %arg3: memref<1x128xf32, #tpu.memory_space<vmem>>, %arg4: memref<128x384xf32, #tpu.memory_space<vmem>>, %arg5: memref<1x384xf32, #tpu.memory_space<vmem>>, %arg6: memref<128x128xf32, #tpu.memory_space<vmem>>, %arg7: memref<1x128xf32, #tpu.memory_space<vmem>>, %arg8: memref<1x128xf32, #tpu.memory_space<vmem>>, %arg9: memref<1x128xf32, #tpu.memory_space<vmem>>, %arg10: memref<128x256xf32, #tpu.memory_space<vmem>>, %arg11: memref<1x256xf32, #tpu.memory_space<vmem>>, %arg12: memref<256x128xf32, #tpu.memory_space<vmem>>, %arg13: memref<1x128xf32, #tpu.memory_space<vmem>>, %arg14: memref<1x128x128xf32, #tpu.memory_space<vmem>>) attributes {dimension_semantics = [#tpu.dimension_semantics<parallel>], iteration_bounds = array<i64: 2>, scalar_prefetch = 0 : i64, scratch_operands = 0 : i64, tpu.core_type = #tpu.core_type<tc>, window_params = [{transform_indices = @transform_0, window_bounds = array<i64: 1, 128, 128>}, {pipeline_mode = #tpu.pipeline_mode<synchronous>, transform_indices = @transform_1, window_bounds = array<i64: 1, 128>}, {pipeline_mode = #tpu.pipeline_mode<synchronous>, transform_indices = @transform_2, window_bounds = array<i64: 1, 128>}, {pipeline_mode = #tpu.pipeline_mode<synchronous>, transform_indices = @transform_3, window_bounds = array<i64: 128, 384>}, {pipeline_mode = #tpu.pipeline_mode<synchronous>, transform_indices = @transform_4, window_bounds = array<i64: 1, 384>}, {pipeline_mode = #tpu.pipeline_mode<synchronous>, transform_indices = @transform_5, window_bounds = array<i64: 128, 128>}, {pipeline_mode = #tpu.pipeline_mode<synchronous>, transform_indices = @transform_6, window_bounds = array<i64: 1, 128>}, {pipeline_mode = #tpu.pipeline_mode<synchronous>, transform_indices = @transform_7, window_bounds = array<i64: 1, 128>}, {pipeline_mode = #tpu.pipeline_mode<synchronous>, transform_indices = @transform_8, window_bounds = array<i64: 1, 128>}, {pipeline_mode = #tpu.pipeline_mode<synchronous>, transform_indices = @transform_9, window_bounds = array<i64: 128, 256>}, {pipeline_mode = #tpu.pipeline_mode<synchronous>, transform_indices = @transform_10, window_bounds = array<i64: 1, 256>}, {pipeline_mode = #tpu.pipeline_mode<synchronous>, transform_indices = @transform_11, window_bounds = array<i64: 256, 128>}, {pipeline_mode = #tpu.pipeline_mode<synchronous>, transform_indices = @transform_12, window_bounds = array<i64: 1, 128>}, {transform_indices = @transform_13, window_bounds = array<i64: 1, 128, 128>}]} {
    %c0 = arith.constant 0 : index
    %c0_0 = arith.constant 0 : index
    %c0_1 = arith.constant 0 : index
    %0 = vector.load %arg1[%c0, %c0_0, %c0_1] : memref<1x128x128xf32, #tpu.memory_space<vmem>>, vector<1x128x128xf32>
    %1 = vector.shape_cast %0 : vector<1x128x128xf32> to vector<128x128xf32>
    %cst = arith.constant dense<0.000000e+00> : vector<128xf32>
    %2 = vector.multi_reduction <add>, %1, %cst [1] : vector<128x128xf32> to vector<128xf32>
    %3 = vector.shape_cast %2 : vector<128xf32> to vector<128x1xf32>
    %cst_2 = arith.constant 1.280000e+02 : f32
    %4 = vector.broadcast %cst_2 : f32 to vector<128x1xf32>
    %5 = arith.divf %3, %4 : vector<128x1xf32>
    %6 = vector.broadcast %5 : vector<128x1xf32> to vector<128x128xf32>
    %7 = arith.subf %1, %6 : vector<128x128xf32>
    %8 = arith.mulf %7, %7 : vector<128x128xf32>
    %cst_3 = arith.constant dense<0.000000e+00> : vector<128xf32>
    %9 = vector.multi_reduction <add>, %8, %cst_3 [1] : vector<128x128xf32> to vector<128xf32>
    %10 = vector.shape_cast %9 : vector<128xf32> to vector<128x1xf32>
    %cst_4 = arith.constant 1.280000e+02 : f32
    %11 = vector.broadcast %cst_4 : f32 to vector<128x1xf32>
    %12 = arith.divf %10, %11 : vector<128x1xf32>
    %cst_5 = arith.constant 9.99999974E-6 : f32
    %13 = vector.broadcast %cst_5 : f32 to vector<128x1xf32>
    %14 = arith.addf %12, %13 : vector<128x1xf32>
    %15 = math.rsqrt %14 : vector<128x1xf32>
    %16 = vector.broadcast %15 : vector<128x1xf32> to vector<128x128xf32>
    %17 = arith.mulf %7, %16 : vector<128x128xf32>
    %c0_6 = arith.constant 0 : index
    %c0_7 = arith.constant 0 : index
    %18 = vector.load %arg2[%c0_6, %c0_7] : memref<1x128xf32, #tpu.memory_space<vmem>>, vector<1x128xf32>
    %19 = vector.broadcast %18 : vector<1x128xf32> to vector<128x128xf32>
    %20 = arith.mulf %17, %19 : vector<128x128xf32>
    %c0_8 = arith.constant 0 : index
    %c0_9 = arith.constant 0 : index
    %21 = vector.load %arg3[%c0_8, %c0_9] : memref<1x128xf32, #tpu.memory_space<vmem>>, vector<1x128xf32>
    %22 = vector.broadcast %21 : vector<1x128xf32> to vector<128x128xf32>
    %23 = arith.addf %20, %22 : vector<128x128xf32>
    %c0_10 = arith.constant 0 : index
    %c0_11 = arith.constant 0 : index
    %24 = vector.load %arg4[%c0_10, %c0_11] : memref<128x384xf32, #tpu.memory_space<vmem>>, vector<128x384xf32>
    %cst_12 = arith.constant dense<0.000000e+00> : vector<128x384xf32>
    %25 = tpu.matmul %23, %24, %cst_12 {dimension_numbers = #tpu.dot_dimension_numbers<[1], [0], [0], [1], [0, 0, 1, 1], [], []>} : vector<128x128xf32>, vector<128x384xf32>, vector<128x384xf32> -> vector<128x384xf32>
    %c0_13 = arith.constant 0 : index
    %c0_14 = arith.constant 0 : index
    %26 = vector.load %arg5[%c0_13, %c0_14] : memref<1x384xf32, #tpu.memory_space<vmem>>, vector<1x384xf32>
    %27 = vector.broadcast %26 : vector<1x384xf32> to vector<128x384xf32>
    %28 = arith.addf %25, %27 : vector<128x384xf32>
    %29 = vector.extract_strided_slice %28 {offsets = [0, 0], sizes = [128, 32], strides = [1, 1]} : vector<128x384xf32> to vector<128x32xf32>
    %cst_15 = arith.constant 0.176776692 : f32
    %30 = vector.broadcast %cst_15 : f32 to vector<128x32xf32>
    %31 = arith.mulf %29, %30 : vector<128x32xf32>
    %32 = vector.extract_strided_slice %28 {offsets = [0, 128], sizes = [128, 32], strides = [1, 1]} : vector<128x384xf32> to vector<128x32xf32>
    %33 = vector.extract_strided_slice %28 {offsets = [0, 256], sizes = [128, 32], strides = [1, 1]} : vector<128x384xf32> to vector<128x32xf32>
    %cst_16 = arith.constant dense<0.000000e+00> : vector<128x128xf32>
    %34 = tpu.matmul %31, %32, %cst_16 {dimension_numbers = #tpu.dot_dimension_numbers<[1], [1], [0], [0], [0, 0, 1, 0], [], []>} : vector<128x32xf32>, vector<128x32xf32>, vector<128x128xf32> -> vector<128x128xf32>
    %cst_17 = arith.constant dense<0xFF800000> : vector<128xf32>
    %35 = vector.multi_reduction <maximumf>, %34, %cst_17 [1] : vector<128x128xf32> to vector<128xf32>
    %36 = vector.shape_cast %35 : vector<128xf32> to vector<128x1xf32>
    %37 = vector.broadcast %36 : vector<128x1xf32> to vector<128x128xf32>
    %38 = arith.subf %34, %37 : vector<128x128xf32>
    %39 = math.exp %38 : vector<128x128xf32>
    %cst_18 = arith.constant dense<0.000000e+00> : vector<128xf32>
    %40 = vector.multi_reduction <add>, %39, %cst_18 [1] : vector<128x128xf32> to vector<128xf32>
    %41 = vector.shape_cast %40 : vector<128xf32> to vector<128x1xf32>
    %42 = vector.broadcast %41 : vector<128x1xf32> to vector<128x128xf32>
    %43 = arith.divf %39, %42 : vector<128x128xf32>
    %cst_19 = arith.constant dense<0.000000e+00> : vector<128x32xf32>
    %44 = tpu.matmul %43, %33, %cst_19 {dimension_numbers = #tpu.dot_dimension_numbers<[1], [0], [0], [1], [0, 0, 1, 1], [], []>} : vector<128x128xf32>, vector<128x32xf32>, vector<128x32xf32> -> vector<128x32xf32>
    %45 = vector.extract_strided_slice %28 {offsets = [0, 32], sizes = [128, 32], strides = [1, 1]} : vector<128x384xf32> to vector<128x32xf32>
    %cst_20 = arith.constant 0.176776692 : f32
    %46 = vector.broadcast %cst_20 : f32 to vector<128x32xf32>
    %47 = arith.mulf %45, %46 : vector<128x32xf32>
    %48 = vector.extract_strided_slice %28 {offsets = [0, 160], sizes = [128, 32], strides = [1, 1]} : vector<128x384xf32> to vector<128x32xf32>
    %49 = vector.extract_strided_slice %28 {offsets = [0, 288], sizes = [128, 32], strides = [1, 1]} : vector<128x384xf32> to vector<128x32xf32>
    %cst_21 = arith.constant dense<0.000000e+00> : vector<128x128xf32>
    %50 = tpu.matmul %47, %48, %cst_21 {dimension_numbers = #tpu.dot_dimension_numbers<[1], [1], [0], [0], [0, 0, 1, 0], [], []>} : vector<128x32xf32>, vector<128x32xf32>, vector<128x128xf32> -> vector<128x128xf32>
    %cst_22 = arith.constant dense<0xFF800000> : vector<128xf32>
    %51 = vector.multi_reduction <maximumf>, %50, %cst_22 [1] : vector<128x128xf32> to vector<128xf32>
    %52 = vector.shape_cast %51 : vector<128xf32> to vector<128x1xf32>
    %53 = vector.broadcast %52 : vector<128x1xf32> to vector<128x128xf32>
    %54 = arith.subf %50, %53 : vector<128x128xf32>
    %55 = math.exp %54 : vector<128x128xf32>
    %cst_23 = arith.constant dense<0.000000e+00> : vector<128xf32>
    %56 = vector.multi_reduction <add>, %55, %cst_23 [1] : vector<128x128xf32> to vector<128xf32>
    %57 = vector.shape_cast %56 : vector<128xf32> to vector<128x1xf32>
    %58 = vector.broadcast %57 : vector<128x1xf32> to vector<128x128xf32>
    %59 = arith.divf %55, %58 : vector<128x128xf32>
    %cst_24 = arith.constant dense<0.000000e+00> : vector<128x32xf32>
    %60 = tpu.matmul %59, %49, %cst_24 {dimension_numbers = #tpu.dot_dimension_numbers<[1], [0], [0], [1], [0, 0, 1, 1], [], []>} : vector<128x128xf32>, vector<128x32xf32>, vector<128x32xf32> -> vector<128x32xf32>
    %61 = vector.extract_strided_slice %28 {offsets = [0, 64], sizes = [128, 32], strides = [1, 1]} : vector<128x384xf32> to vector<128x32xf32>
    %cst_25 = arith.constant 0.176776692 : f32
    %62 = vector.broadcast %cst_25 : f32 to vector<128x32xf32>
    %63 = arith.mulf %61, %62 : vector<128x32xf32>
    %64 = vector.extract_strided_slice %28 {offsets = [0, 192], sizes = [128, 32], strides = [1, 1]} : vector<128x384xf32> to vector<128x32xf32>
    %65 = vector.extract_strided_slice %28 {offsets = [0, 320], sizes = [128, 32], strides = [1, 1]} : vector<128x384xf32> to vector<128x32xf32>
    %cst_26 = arith.constant dense<0.000000e+00> : vector<128x128xf32>
    %66 = tpu.matmul %63, %64, %cst_26 {dimension_numbers = #tpu.dot_dimension_numbers<[1], [1], [0], [0], [0, 0, 1, 0], [], []>} : vector<128x32xf32>, vector<128x32xf32>, vector<128x128xf32> -> vector<128x128xf32>
    %cst_27 = arith.constant dense<0xFF800000> : vector<128xf32>
    %67 = vector.multi_reduction <maximumf>, %66, %cst_27 [1] : vector<128x128xf32> to vector<128xf32>
    %68 = vector.shape_cast %67 : vector<128xf32> to vector<128x1xf32>
    %69 = vector.broadcast %68 : vector<128x1xf32> to vector<128x128xf32>
    %70 = arith.subf %66, %69 : vector<128x128xf32>
    %71 = math.exp %70 : vector<128x128xf32>
    %cst_28 = arith.constant dense<0.000000e+00> : vector<128xf32>
    %72 = vector.multi_reduction <add>, %71, %cst_28 [1] : vector<128x128xf32> to vector<128xf32>
    %73 = vector.shape_cast %72 : vector<128xf32> to vector<128x1xf32>
    %74 = vector.broadcast %73 : vector<128x1xf32> to vector<128x128xf32>
    %75 = arith.divf %71, %74 : vector<128x128xf32>
    %cst_29 = arith.constant dense<0.000000e+00> : vector<128x32xf32>
    %76 = tpu.matmul %75, %65, %cst_29 {dimension_numbers = #tpu.dot_dimension_numbers<[1], [0], [0], [1], [0, 0, 1, 1], [], []>} : vector<128x128xf32>, vector<128x32xf32>, vector<128x32xf32> -> vector<128x32xf32>
    %77 = vector.extract_strided_slice %28 {offsets = [0, 96], sizes = [128, 32], strides = [1, 1]} : vector<128x384xf32> to vector<128x32xf32>
    %cst_30 = arith.constant 0.176776692 : f32
    %78 = vector.broadcast %cst_30 : f32 to vector<128x32xf32>
    %79 = arith.mulf %77, %78 : vector<128x32xf32>
    %80 = vector.extract_strided_slice %28 {offsets = [0, 224], sizes = [128, 32], strides = [1, 1]} : vector<128x384xf32> to vector<128x32xf32>
    %81 = vector.extract_strided_slice %28 {offsets = [0, 352], sizes = [128, 32], strides = [1, 1]} : vector<128x384xf32> to vector<128x32xf32>
    %cst_31 = arith.constant dense<0.000000e+00> : vector<128x128xf32>
    %82 = tpu.matmul %79, %80, %cst_31 {dimension_numbers = #tpu.dot_dimension_numbers<[1], [1], [0], [0], [0, 0, 1, 0], [], []>} : vector<128x32xf32>, vector<128x32xf32>, vector<128x128xf32> -> vector<128x128xf32>
    %cst_32 = arith.constant dense<0xFF800000> : vector<128xf32>
    %83 = vector.multi_reduction <maximumf>, %82, %cst_32 [1] : vector<128x128xf32> to vector<128xf32>
    %84 = vector.shape_cast %83 : vector<128xf32> to vector<128x1xf32>
    %85 = vector.broadcast %84 : vector<128x1xf32> to vector<128x128xf32>
    %86 = arith.subf %82, %85 : vector<128x128xf32>
    %87 = math.exp %86 : vector<128x128xf32>
    %cst_33 = arith.constant dense<0.000000e+00> : vector<128xf32>
    %88 = vector.multi_reduction <add>, %87, %cst_33 [1] : vector<128x128xf32> to vector<128xf32>
    %89 = vector.shape_cast %88 : vector<128xf32> to vector<128x1xf32>
    %90 = vector.broadcast %89 : vector<128x1xf32> to vector<128x128xf32>
    %91 = arith.divf %87, %90 : vector<128x128xf32>
    %cst_34 = arith.constant dense<0.000000e+00> : vector<128x32xf32>
    %92 = tpu.matmul %91, %81, %cst_34 {dimension_numbers = #tpu.dot_dimension_numbers<[1], [0], [0], [1], [0, 0, 1, 1], [], []>} : vector<128x128xf32>, vector<128x32xf32>, vector<128x32xf32> -> vector<128x32xf32>
    %93 = tpu.concatenate %44, %60, %76, %92 in 1 : vector<128x32xf32>, vector<128x32xf32>, vector<128x32xf32>, vector<128x32xf32> -> vector<128x128xf32>
    %c0_35 = arith.constant 0 : index
    %c0_36 = arith.constant 0 : index
    %94 = vector.load %arg6[%c0_35, %c0_36] : memref<128x128xf32, #tpu.memory_space<vmem>>, vector<128x128xf32>
    %cst_37 = arith.constant dense<0.000000e+00> : vector<128x128xf32>
    %95 = tpu.matmul %93, %94, %cst_37 {dimension_numbers = #tpu.dot_dimension_numbers<[1], [0], [0], [1], [0, 0, 1, 1], [], []>} : vector<128x128xf32>, vector<128x128xf32>, vector<128x128xf32> -> vector<128x128xf32>
    %c0_38 = arith.constant 0 : index
    %c0_39 = arith.constant 0 : index
    %96 = vector.load %arg7[%c0_38, %c0_39] : memref<1x128xf32, #tpu.memory_space<vmem>>, vector<1x128xf32>
    %97 = vector.broadcast %96 : vector<1x128xf32> to vector<128x128xf32>
    %98 = arith.addf %95, %97 : vector<128x128xf32>
    %99 = arith.addf %1, %98 : vector<128x128xf32>
    %cst_40 = arith.constant dense<0.000000e+00> : vector<128xf32>
    %100 = vector.multi_reduction <add>, %99, %cst_40 [1] : vector<128x128xf32> to vector<128xf32>
    %101 = vector.shape_cast %100 : vector<128xf32> to vector<128x1xf32>
    %cst_41 = arith.constant 1.280000e+02 : f32
    %102 = vector.broadcast %cst_41 : f32 to vector<128x1xf32>
    %103 = arith.divf %101, %102 : vector<128x1xf32>
    %104 = vector.broadcast %103 : vector<128x1xf32> to vector<128x128xf32>
    %105 = arith.subf %99, %104 : vector<128x128xf32>
    %106 = arith.mulf %105, %105 : vector<128x128xf32>
    %cst_42 = arith.constant dense<0.000000e+00> : vector<128xf32>
    %107 = vector.multi_reduction <add>, %106, %cst_42 [1] : vector<128x128xf32> to vector<128xf32>
    %108 = vector.shape_cast %107 : vector<128xf32> to vector<128x1xf32>
    %cst_43 = arith.constant 1.280000e+02 : f32
    %109 = vector.broadcast %cst_43 : f32 to vector<128x1xf32>
    %110 = arith.divf %108, %109 : vector<128x1xf32>
    %cst_44 = arith.constant 9.99999974E-6 : f32
    %111 = vector.broadcast %cst_44 : f32 to vector<128x1xf32>
    %112 = arith.addf %110, %111 : vector<128x1xf32>
    %113 = math.rsqrt %112 : vector<128x1xf32>
    %114 = vector.broadcast %113 : vector<128x1xf32> to vector<128x128xf32>
    %115 = arith.mulf %105, %114 : vector<128x128xf32>
    %c0_45 = arith.constant 0 : index
    %c0_46 = arith.constant 0 : index
    %116 = vector.load %arg8[%c0_45, %c0_46] : memref<1x128xf32, #tpu.memory_space<vmem>>, vector<1x128xf32>
    %117 = vector.broadcast %116 : vector<1x128xf32> to vector<128x128xf32>
    %118 = arith.mulf %115, %117 : vector<128x128xf32>
    %c0_47 = arith.constant 0 : index
    %c0_48 = arith.constant 0 : index
    %119 = vector.load %arg9[%c0_47, %c0_48] : memref<1x128xf32, #tpu.memory_space<vmem>>, vector<1x128xf32>
    %120 = vector.broadcast %119 : vector<1x128xf32> to vector<128x128xf32>
    %121 = arith.addf %118, %120 : vector<128x128xf32>
    %c0_49 = arith.constant 0 : index
    %c0_50 = arith.constant 0 : index
    %122 = vector.load %arg10[%c0_49, %c0_50] : memref<128x256xf32, #tpu.memory_space<vmem>>, vector<128x256xf32>
    %cst_51 = arith.constant dense<0.000000e+00> : vector<128x256xf32>
    %123 = tpu.matmul %121, %122, %cst_51 {dimension_numbers = #tpu.dot_dimension_numbers<[1], [0], [0], [1], [0, 0, 1, 1], [], []>} : vector<128x128xf32>, vector<128x256xf32>, vector<128x256xf32> -> vector<128x256xf32>
    %c0_52 = arith.constant 0 : index
    %c0_53 = arith.constant 0 : index
    %124 = vector.load %arg11[%c0_52, %c0_53] : memref<1x256xf32, #tpu.memory_space<vmem>>, vector<1x256xf32>
    %125 = vector.broadcast %124 : vector<1x256xf32> to vector<128x256xf32>
    %126 = arith.addf %123, %125 : vector<128x256xf32>
    %cst_54 = arith.constant 5.000000e-01 : f32
    %127 = vector.broadcast %cst_54 : f32 to vector<128x256xf32>
    %128 = arith.mulf %127, %126 : vector<128x256xf32>
    %cst_55 = arith.constant 4.471500e-02 : f32
    %129 = vector.broadcast %cst_55 : f32 to vector<128x256xf32>
    %130 = arith.mulf %129, %126 : vector<128x256xf32>
    %131 = arith.mulf %130, %126 : vector<128x256xf32>
    %132 = arith.mulf %131, %126 : vector<128x256xf32>
    %133 = arith.addf %126, %132 : vector<128x256xf32>
    %cst_56 = arith.constant 0.797884583 : f32
    %134 = vector.broadcast %cst_56 : f32 to vector<128x256xf32>
    %135 = arith.mulf %134, %133 : vector<128x256xf32>
    %136 = math.tanh %135 : vector<128x256xf32>
    %cst_57 = arith.constant 1.000000e+00 : f32
    %137 = vector.broadcast %cst_57 : f32 to vector<128x256xf32>
    %138 = arith.addf %137, %136 : vector<128x256xf32>
    %139 = arith.mulf %128, %138 : vector<128x256xf32>
    %c0_58 = arith.constant 0 : index
    %c0_59 = arith.constant 0 : index
    %140 = vector.load %arg12[%c0_58, %c0_59] : memref<256x128xf32, #tpu.memory_space<vmem>>, vector<256x128xf32>
    %cst_60 = arith.constant dense<0.000000e+00> : vector<128x128xf32>
    %141 = tpu.matmul %139, %140, %cst_60 {dimension_numbers = #tpu.dot_dimension_numbers<[1], [0], [0], [1], [0, 0, 1, 1], [], []>} : vector<128x256xf32>, vector<256x128xf32>, vector<128x128xf32> -> vector<128x128xf32>
    %c0_61 = arith.constant 0 : index
    %c0_62 = arith.constant 0 : index
    %142 = vector.load %arg13[%c0_61, %c0_62] : memref<1x128xf32, #tpu.memory_space<vmem>>, vector<1x128xf32>
    %143 = vector.broadcast %142 : vector<1x128xf32> to vector<128x128xf32>
    %144 = arith.addf %141, %143 : vector<128x128xf32>
    %145 = arith.addf %99, %144 : vector<128x128xf32>
    %c0_63 = arith.constant 0 : index
    %c0_64 = arith.constant 0 : index
    %c0_65 = arith.constant 0 : index
    %146 = vector.load %arg14[%c0_63, %c0_64, %c0_65] : memref<1x128x128xf32, #tpu.memory_space<vmem>>, vector<1x128x128xf32>
    %147 = vector.shape_cast %146 : vector<1x128x128xf32> to vector<128x128xf32>
    %148 = vector.shape_cast %145 : vector<128x128xf32> to vector<1x128x128xf32>
    tpu.vector_store %arg14[%c0_63, %c0_64, %c0_65], %148 {strides = array<i32>} : memref<1x128x128xf32, #tpu.memory_space<vmem>>, vector<1x128x128xf32>,
    return
  }
  func.func @transform_0(%arg0: i32) -> (i32, i32, i32) {
    %c0_i32 = arith.constant 0 : i32
    %c0_i32_0 = arith.constant 0 : i32
    %c0_i32_1 = arith.constant 0 : i32
    return %arg0, %c0_i32, %c0_i32_0 : i32, i32, i32
  }
  func.func @transform_1(%arg0: i32) -> (i32, i32) {
    %c0_i32 = arith.constant 0 : i32
    %c0_i32_0 = arith.constant 0 : i32
    %c0_i32_1 = arith.constant 0 : i32
    return %c0_i32, %c0_i32_0 : i32, i32
  }
  func.func @transform_2(%arg0: i32) -> (i32, i32) {
    %c0_i32 = arith.constant 0 : i32
    %c0_i32_0 = arith.constant 0 : i32
    %c0_i32_1 = arith.constant 0 : i32
    return %c0_i32, %c0_i32_0 : i32, i32
  }
  func.func @transform_3(%arg0: i32) -> (i32, i32) {
    %c0_i32 = arith.constant 0 : i32
    %c0_i32_0 = arith.constant 0 : i32
    %c0_i32_1 = arith.constant 0 : i32
    return %c0_i32, %c0_i32_0 : i32, i32
  }
  func.func @transform_4(%arg0: i32) -> (i32, i32) {
    %c0_i32 = arith.constant 0 : i32
    %c0_i32_0 = arith.constant 0 : i32
    %c0_i32_1 = arith.constant 0 : i32
    return %c0_i32, %c0_i32_0 : i32, i32
  }
  func.func @transform_5(%arg0: i32) -> (i32, i32) {
    %c0_i32 = arith.constant 0 : i32
    %c0_i32_0 = arith.constant 0 : i32
    %c0_i32_1 = arith.constant 0 : i32
    return %c0_i32, %c0_i32_0 : i32, i32
  }
  func.func @transform_6(%arg0: i32) -> (i32, i32) {
    %c0_i32 = arith.constant 0 : i32
    %c0_i32_0 = arith.constant 0 : i32
    %c0_i32_1 = arith.constant 0 : i32
    return %c0_i32, %c0_i32_0 : i32, i32
  }
  func.func @transform_7(%arg0: i32) -> (i32, i32) {
    %c0_i32 = arith.constant 0 : i32
    %c0_i32_0 = arith.constant 0 : i32
    %c0_i32_1 = arith.constant 0 : i32
    return %c0_i32, %c0_i32_0 : i32, i32
  }
  func.func @transform_8(%arg0: i32) -> (i32, i32) {
    %c0_i32 = arith.constant 0 : i32
    %c0_i32_0 = arith.constant 0 : i32
    %c0_i32_1 = arith.constant 0 : i32
    return %c0_i32, %c0_i32_0 : i32, i32
  }
  func.func @transform_9(%arg0: i32) -> (i32, i32) {
    %c0_i32 = arith.constant 0 : i32
    %c0_i32_0 = arith.constant 0 : i32
    %c0_i32_1 = arith.constant 0 : i32
    return %c0_i32, %c0_i32_0 : i32, i32
  }
  func.func @transform_10(%arg0: i32) -> (i32, i32) {
    %c0_i32 = arith.constant 0 : i32
    %c0_i32_0 = arith.constant 0 : i32
    %c0_i32_1 = arith.constant 0 : i32
    return %c0_i32, %c0_i32_0 : i32, i32
  }
  func.func @transform_11(%arg0: i32) -> (i32, i32) {
    %c0_i32 = arith.constant 0 : i32
    %c0_i32_0 = arith.constant 0 : i32
    %c0_i32_1 = arith.constant 0 : i32
    return %c0_i32, %c0_i32_0 : i32, i32
  }
  func.func @transform_12(%arg0: i32) -> (i32, i32) {
    %c0_i32 = arith.constant 0 : i32
    %c0_i32_0 = arith.constant 0 : i32
    %c0_i32_1 = arith.constant 0 : i32
    return %c0_i32, %c0_i32_0 : i32, i32
  }
  func.func @transform_13(%arg0: i32) -> (i32, i32, i32) {
    %c0_i32 = arith.constant 0 : i32
    %c0_i32_0 = arith.constant 0 : i32
    %c0_i32_1 = arith.constant 0 : i32
    return %arg0, %c0_i32, %c0_i32_0 : i32, i32, i32
  }
}

</mosaic_0001>

<bundles_post_ra>
// kernel: tpu_custom_call.1
= control target key start
LH: loop header
LB: loop body
LE: loop exit
PB: predicated region body
PF: predicated region fallthrough
CT: control target
= control target key end

     0   :  { %s10226_s0 = inlined_call_operand.hbm [shape: f32[2,128,128], index: 0, kind: input, shape index: {}]   ;;  %s10227_s1 = inlined_call_operand.hbm [shape: f32[1,128], index: 1, kind: input, shape index: {}]   ;;  %s10228_s2 = inlined_call_operand.hbm [shape: f32[1,128], index: 2, kind: input, shape index: {}]   ;;  %s10229_s3 = inlined_call_operand.hbm [shape: f32[128,384], index: 3, kind: input, shape index: {}]   ;;  %s10230_s4 = inlined_call_operand.vmem [shape: f32[1,384], index: 4, kind: input, shape index: {}]   ;;  %s10231_s5 = inlined_call_operand.hbm [shape: f32[128,128], index: 5, kind: input, shape index: {}]   ;;  %s10232_s6 = inlined_call_operand.hbm [shape: f32[1,128], index: 6, kind: input, shape index: {}]   ;;  %s10233_s7 = inlined_call_operand.vmem [shape: f32[1,128], index: 7, kind: input, shape index: {}]   ;;  %s10234_s8 = inlined_call_operand.vmem [shape: f32[1,128], index: 8, kind: input, shape index: {}]   ;;  %s10235_s9 = inlined_call_operand.hbm [shape: f32[128,256], index: 9, kind: input, shape index: {}]   ;;  %s10236_s10 = inlined_call_operand.vmem [shape: f32[1,256], index: 10, kind: input, shape index: {}]   ;;  %s10237_s11 = inlined_call_operand.hbm [shape: f32[256,128], index: 11, kind: input, shape index: {}]   ;;  %s10238_s12 = inlined_call_operand.vmem [shape: f32[1,128], index: 12, kind: input, shape index: {}]   ;;  %s10239_s13 = inlined_call_operand.hbm [shape: f32[2,128,128], index: 13, kind: output, shape index: {}]  }
   0x1   :  { %10254 = sst [smem:[#allocation60_spill]] %s10227_s1 }
   0x2   :  { %10255 = sst [smem:[#allocation61_spill]] %s10228_s2 }
   0x3   :  { %10256 = sst [smem:[#allocation62_spill]] %s10229_s3 }
   0x4   :  { %10257 = sst [smem:[#allocation63_spill]] %s10231_s5 }
   0x5   :  { %10258 = sst [smem:[#allocation64_spill]] %s10236_s10 }
   0x6   :  { %10259 = sst [smem:[#allocation65_spill]] %s10238_s12 }
   0x7   :  { %10260 = sst [smem:[#allocation66_spill]] %s10239_s13 }
   0x8   :  { %18 = vsyncpa [#allocation3], 0 }
   0x9   :  { %20 = vsyncpa [#allocation3 + $0x1], 0 }
   0xa   :  { %21 = vsyncpa [#allocation6], 0 }
   0xb   :  { %22 = vsyncpa [#allocation9], 0 }
   0xc   :  { %23 = vsyncpa [#allocation12], 0 }
   0xd   :  { %24 = vsyncpa [#allocation15], 0 }
   0xe   :  { %25 = vsyncpa [#allocation4], 0 }
   0xf   :  { %27 = vsyncpa [#allocation4 + $0x1], 0  ;;  %s6671_s25 = smov 0   ;;  %s6673_s26 = smov 0  }
  0x10   :  { %s6675_s27 = smov 0   ;;  %s6677_s28 = smov 0  }
  0x11 LB: > { %s10261_s1 = sld [smem:[#allocation60_spill]]  ;;  %s6695_s15 = sadd.s32 4294967295, %s6580_s28   ;;  %s6580_s28 = sphi %s6677_s28, %s10434_s28   ;;  %s6576_s27 = sphi %s6675_s27, %s10433_s27   ;;  %s6572_s26 = sphi %s6673_s26, %s10432_s26   ;;  %s6568_s25 = sphi %s6671_s25, %s10431_s25  }
  0x12   : > { %p5304_p0 = scmp.ge.s32.totalorder %s6580_s28, 1  ;;  %p54_p1 = scmp.eq.s32.totalorder %s6695_s15, 0 }
  0x13   : > { %p342_p2 = scmp.lt.s32.totalorder %s6580_s28, 3  ;;  %s6582_s17 = smov [#allocation5]  }
  0x14   : > { %s356_s18 = sshll.u32 %s6582_s17, 4  ;;  %s10263_s3 = sld [smem:[#allocation62_spill]]  ;;  %s357_s18 = int_to_ptr.vmem [resolvable:$true] %s356_s18 }
  0x15   : > { %p6700_p3 = pnand %p5304_p0, %p342_p2  ;;  %s6583_s23 = smov [#allocation8]  }
  0x16   : > { %s379_s24 = sshll.u32 %s6583_s23, 4  ;;  %s6584_s29 = smov 384   ;;  %s380_s24 = int_to_ptr.vmem [resolvable:$true] %s379_s24 }
  0x17   : > { %s354_s14 = sshll.u32 %s10261_s1, 4  ;;  %p5541_p5 = pneg %p6700_p3  ;;  %s355_s14 = int_to_ptr.hbm [resolvable:$true] %s354_s14 }
  0x18   : > { %s6585_s30 = smov 24   ;;  %s409_s20 = sshll.u32 %s10232_s6, 4  ;;  %s410_s20 = int_to_ptr.hbm [resolvable:$true] %s409_s20 }
  0x19   : > { %p6712_p6 = pnand %p5541_p5, %p54_p1  ;;  %s6586_s1 = smov [#allocation11]  }
  0x1a   : > { %s377_s21 = sshll.u32 %s10263_s3, 4  ;;  %s411_s3 = sshll.u32 %s6586_s1, 4  ;;  %s378_s21 = int_to_ptr.hbm [resolvable:$true] %s377_s21  ;;  %s412_s3 = int_to_ptr.vmem [resolvable:$true] %s411_s3 }
  0x1b   : > { %5544 = dma.hbm_to_vmem [thread:$0]  (!%p6712_p6), %s355_s14, 16, %s357_s18, [#allocation6]  }
  0x1c   : > { %5550 = dma.hbm_to_vmem [thread:$0]  (!%p6712_p6), %s378_s21, 6144, %s380_s24, [#allocation9], %s6584_s29, %s6584_s29, %s6585_s30  }
  0x1d   : > { %s10265_s2 = sld [smem:[#allocation61_spill]]  ;;  %s6587_s14 = smov [#allocation7]  }
  0x1e   : > { %5556 = dma.hbm_to_vmem [thread:$0]  (!%p6712_p6), %s410_s20, 16, %s412_s3, [#allocation12]  }
  0x1f   : > { %s368_s18 = sshll.u32 %s6587_s14, 4  ;;  %s10266_s5 = sld [smem:[#allocation63_spill]]  ;;  %s369_s18 = int_to_ptr.vmem [resolvable:$true] %s368_s18 }
  0x20   : > { %s6588_s1 = smov [#allocation10]   ;;  %s426_s30 = sshll.u32 %s10235_s9, 4  ;;  %s427_s30 = int_to_ptr.hbm [resolvable:$true] %s426_s30 }
  0x21   : > { %s396_s29 = sshll.u32 %s6588_s1, 4  ;;  %s10241_s3 = smov 128   ;;  %s397_s29 = int_to_ptr.vmem [resolvable:$true] %s396_s29 }
  0x22   : > { %s10242_s17 = smov 8   ;;  %s6591_s10 = smov [#allocation13]  }
  0x23   : > { %s366_s23 = sshll.u32 %s10265_s2, 4  ;;  %s428_s19 = sshll.u32 %s6591_s10, 4  ;;  %s367_s23 = int_to_ptr.hbm [resolvable:$true] %s366_s23  ;;  %s429_s19 = int_to_ptr.vmem [resolvable:$true] %s428_s19 }
  0x24   : > { %5547 = dma.hbm_to_vmem [thread:$0]  (!%p6712_p6), %s367_s23, 16, %s369_s18, [#allocation6]  }
  0x25   : > { %s394_s24 = sshll.u32 %s10266_s5, 4  ;;  %s6592_s20 = smov 256   ;;  %s395_s24 = int_to_ptr.hbm [resolvable:$true] %s394_s24 }
  0x26   : > { %5553 = dma.hbm_to_vmem [thread:$0]  (!%p6712_p6), %s395_s24, 2048, %s397_s29, [#allocation9], %s10241_s3, %s10241_s3, %s10242_s17  }
  0x27   : > { %s6593_s23 = smov 16   ;;  %s443_s21 = sshll.u32 %s10237_s11, 4  ;;  %s444_s21 = int_to_ptr.hbm [resolvable:$true] %s443_s21 }
  0x28   : > { %5559 = dma.hbm_to_vmem [thread:$0]  (!%p6712_p6), %s427_s30, 4096, %s429_s19, [#allocation12], %s6592_s20, %s6592_s20, %s6593_s23  }
  0x29   : > { %s6594_s24 = smov [#allocation14]   ;;  %s5303_s29 = sadd.s32 4294967294, %s6580_s28  }
  0x2a   : > { %s445_s1 = sshll.u32 %s6594_s24, 4  ;;  %s6753_s12 = sadd.s32 1, %s6580_s28   ;;  %s446_s1 = int_to_ptr.vmem [resolvable:$true] %s445_s1 }
  0x2b   : > { %5562 = dma.hbm_to_vmem [thread:$0]  (!%p6712_p6), %s444_s21, 4096, %s446_s1, [#allocation15], %s10241_s3, %s10241_s3, %s10242_s17  }
  0x2c   : > { %s40_s13 = sadd.s32 1, %s6576_s27  ;;  %s37_s30 = ssub.s32 %s6580_s28, %s6753_s12 }
  0x2d   : > { %p47_p7 = scmp.ne.s32.totalorder %s6576_s27, %s6572_s26  ;;  %p38_p8 = scmp.eq.s32.totalorder %s37_s30, 0 }
  0x2e   : > { %p48_p9 = scmp.eq.s32.totalorder %s6580_s28, 0  ;;  %p53_p10 = scmp.ne.s32.totalorder %s6572_s26, %s6568_s25 }
  0x2f   : > { %p329_p11 = scmp.eq.s32.totalorder %s6695_s15, 1  ;;  %p335_p0 = scmp.eq.s32.totalorder %s5303_s29, 1 }
  0x30   : > { %s6765_s10 = scalar_select %p38_p8, %s6576_s27, %s40_s13  }
  0x31   : > { %p6769_p12 = por %p54_p1, %p53_p10  ;;  %p6773_p13 = por %p329_p11, %p47_p7 }
  0x32   : > { %p49_p2 = por %p48_p9, %p47_p7  ;;  %s462_s20 = sand.u32 1, %s6576_s27  }
  0x33   : > { %p6778_p5 = por %p335_p0, %p53_p10  ;;  %p5578_p6 = scmp.lt.s32.totalorder %s6580_s28, 2 }
  0x34   : > { %s5313_s14 = sshll.u32 %s462_s20, 7  ;;  %s5459_s18 = sshll.u32 %s6580_s28, 7 }
  0x35   : > { %s471_s1 = scalar_lea.hbm %s10226_s0, %s5459_s18  ;;  %s466_s30 = scalar_lea.vmem [#allocation2], %s5313_s14 }
  0x36   : > { %s472_s13 = sshll.u32 %s471_s1, 4  ;;  %s474_s3 = sshll.u32 %s466_s30, 4  ;;  %s473_s13 = int_to_ptr.hbm [resolvable:$true] %s472_s13  ;;  %s475_s3 = int_to_ptr.vmem [resolvable:$true] %s474_s3 }
  0x37   : > { %p6787_p8 = pnand %p5578_p6, %p49_p2  ;;  %s463_s17 = scalar_lea.sflag [#allocation3], %s462_s20 }
  0x38   : > { %s6468_s2 = sshra.s32 %s473_s13, 4  ;;  %s6475_s14 = scalar_lea.hbm %s10226_s0, 256  ;;  %s6469_s2 = int_to_ptr.hbm [resolvable:$true] %s6468_s2 }
  0x39   : > { %s6470_s5 = scalar_lea.hbm %s6469_s2, 128  ;;  %p6472_p9 = pneg %p6787_p8 }
  0x3a   : > { %p6471_p7 = scmp.ne.s32.totalorder %s6469_s2, %s6470_s5  ;;  %p6476_p0 = scmp.lt.s32.totalorder %s6469_s2, %s10226_s0 }
  0x3b   : > { %p6477_p2 = scmp.lt.s32.totalorder %s6475_s14, %s6470_s5 }
  0x3c   : > { %p6473_p10 = pnand %p6472_p9, %p6471_p7 }
  0x3d   : > { %p6478_p6 = por %p6477_p2, %p6476_p0 }
  0x3e   : > { %p6474_p11 = pneg %p6473_p10 }
  0x40   : > { %p6479_p4 = pnand %p6478_p6, %p6474_p11 }
  0x42   : > { %6482 = shalt.err (!%p6479_p4)
}
  0x43   : > { %s10271_s20 = smov 8   ;;  %s10272_s30 = smov 128  }
  0x44   : > { %5566 = dma.hbm_to_vmem [thread:$0]  (!%p6787_p8), %s473_s13, 2048, %s475_s3, %s463_s17, %s10272_s30, %s10272_s30, %s10271_s20  }
  0x45   : > { %486 = sbr.rel (%p6700_p3) target bundleno = 2870 (0xb36), region = 72 }
  0x4a   : > { %s6807_s18 = sand.u32 1, %s6572_s26  }
  0x4b   : > { %s5317_s2 = sshll.u32 %s6807_s18, 7  ;;  %s489_s5 = scalar_lea.sflag [#allocation3], %s6807_s18 }
  0x4c   : > { %s6813_s21 = scalar_lea.vmem [#allocation2], %s5317_s2 }
  0x4d   : > { %6543 = dma.done.wait (%p6769_p12), %s489_s5, 2048  }
  0x4e   : > { %6545 = vsyncadd (%p6769_p12), %s489_s5, 4294965248 }
  0x4f   : > { %6547 = dma.done.wait (%p54_p1), [#allocation6], 32  }
  0x50   : > { %6549 = vsyncadd (%p54_p1), [#allocation6], 4294967264 }
  0x51   : > { %6551 = dma.done.wait (%p54_p1), [#allocation9], 8192  }
  0x52   : > { %6553 = vsyncadd (%p54_p1), [#allocation9], 4294959104 }
  0x53   : > { %6555 = dma.done.wait (%p54_p1), [#allocation12], 4112  }
  0x54   : > { %6557 = vsyncadd (%p54_p1), [#allocation12], 4294963184 }
  0x55   : > { %6559 = dma.done.wait (%p54_p1), [#allocation15], 4096  }
  0x56   : > { %6561 = vsyncadd (%p54_p1), [#allocation15], 4294963200  ;;  %v573_v0 = vld [vmem:[%s6813_s21 + $0x10] sm:$0xff]  ;;  %v571_v1 = vld [vmem:[%s6813_s21] sm:$0xff]  ;;  %v6595_v8 = vmov 128.0   ;;  %s6596_s17 = smov 96  }
  0x57   : > { %v575_v2 = vld [vmem:[%s6813_s21 + $0x20] sm:$0xff]  ;;  %591 = vadd.xlane.f32.xlu1 %v573_v0  ;;  %587 = vadd.xlane.f32.xlu0 %v571_v1  ;;  %v572_v3 = vld [vmem:[%s6813_s21 + $0x8] sm:$0xff]  ;;  %v574_v4 = vld [vmem:[%s6813_s21 + $0x18] sm:$0xff]  ;;  %5854 = vrcp.f32 %v6595_v8  ;;  %s6597_s22 = smov 64   ;;  %s6598_s13 = smov 32  }
  0x58   : > { %595 = vadd.xlane.f32.xlu2 %v575_v2  ;;  %v576_v5 = vld [vmem:[%s6813_s21 + $0x28] sm:$0xff]  ;;  %v6842_v6 = vld [vmem:[%s6813_s21 + $0x30] sm:$0xff]  ;;  %v6867_v31 = vld [vmem:[%s6813_s21 + $0x60] sm:$0xff]  ;;  %s10423_s5 = sld [smem:[#allocation64_spill]]  ;;  %s10126_s14 = scalar_lea.vmem [#allocation16], %s5317_s2 }
  0x59   : > { %v6846_v7 = vld [vmem:[%s6813_s21 + $0x48] sm:$0xff]  ;;  %v6870_v32 = vld [vmem:[%s6813_s21 + $0x38] sm:$0xff]  ;;  %v6886_v39 = vld [vmem:[%s6813_s21 + $0x40] sm:$0xff]  ;;  %s10428_s29 = sld [smem:[#allocation65_spill]]  ;;  %s5460_s2 = sshll.u32 %s6695_s15, 7 }
  0x5a   : > { %v999_v40 = vld [vmem:[#allocation8 + $0x168] sm:$0xff]  ;;  %v1000_v41 = vld [vmem:[#allocation8 + $0x170] sm:$0xff]  ;;  %v1001_v42 = vld [vmem:[#allocation8 + $0x178] sm:$0xff]  ;;  %s10429_s20 = sld [smem:[#allocation66_spill]]  ;;  %s5148_s15 = scalar_lea.sflag [#allocation4], %s6807_s18 }
  0x5b   : > { %1010 = vmatpush.msra.mxu0 %v999_v40  ;;  %v996_v45 = vld [vmem:[#allocation8 + $0x150] sm:$0xff]  ;;  %v997_v46 = vld [vmem:[#allocation8 + $0x158] sm:$0xff]  ;;  %v998_v47 = vld [vmem:[#allocation8 + $0x160] sm:$0xff]  ;;  %1075 = vmatpush.msra.mxu1 %v1000_v41 }
  0x5c   : > { %1140 = vmatpush.msra.mxu2 %v1001_v42  ;;  %v6893_v49 = vld [vmem:[%s6813_s21 + $0x50] sm:$0xff]  ;;  %v6898_v51 = vld [vmem:[%s6813_s21 + $0x78] sm:$0xff]  ;;  %v6913_v57 = vld [vmem:[%s6813_s21 + $0x68] sm:$0xff] }
  0x5d   : > { %v5855_v9 = vpop.eup %5854  ;;  %1011 = vmatpush.msra.mxu0 %v996_v45  ;;  %1076 = vmatpush.msra.mxu1 %v997_v46  ;;  %v6908_v54 = vld [vmem:[%s6813_s21 + $0x58] sm:$0xff]  ;;  %v994_v61 = vld [vmem:[#allocation8 + $0x140] sm:$0xff]  ;;  %v995_v62 = vld [vmem:[#allocation8 + $0x148] sm:$0xff] }
  0x5e   : > { %v620_v10 = vmul.f32 128.0, %v5855_v9  ;;  %vm624_vm0 = vweird.f32 %v5855_v9  ;;  %1141 = vmatpush.msra.mxu2 %v998_v47  ;;  %v993_v60 = vld [vmem:[#allocation8 + $0x138] sm:$0xff]  ;;  %v990_v63 = vld [vmem:[#allocation8 + $0x120] sm:$0xff]  ;;  %v955_v46 = vld [vmem:[#allocation8 + $0x8] sm:$0xff] }
  0x5f   : > { %589 = vadd.xlane.f32.xlu0 %v572_v3  ;;  %593 = vadd.xlane.f32.xlu1 %v574_v4  ;;  %v981_v8 = vld [vmem:[#allocation8 + $0xd8] sm:$0xff]  ;;  %v962_v40 = vld [vmem:[#allocation8 + $0x40] sm:$0xff]  ;;  %v956_v47 = vld [vmem:[#allocation8 + $0x10] sm:$0xff] }
  0x60   : > { %597 = vadd.xlane.f32.xlu2 %v576_v5  ;;  %v621_v11 = vsub.f32 1.0, %v620_v10  ;;  %1012 = vmatpush.msra.mxu0 %v993_v60  ;;  %v983_v10 = vld [vmem:[#allocation8 + $0xe8] sm:$0xff]  ;;  %v957_v41 = vld [vmem:[#allocation8 + $0x18] sm:$0xff]  ;;  %v958_v42 = vld [vmem:[#allocation8 + $0x20] sm:$0xff]  ;;  %s5159_s30 = scalar_lea.hbm %s10429_s20, %s5460_s2 }
  0x61   : > { %1077 = vmatpush.msra.mxu1 %v994_v61  ;;  %1142 = vmatpush.msra.mxu2 %v995_v62  ;;  %v954_v45 = vld [vmem:[#allocation8] sm:$0xff] }
  0x62   : > { %v622_v12 = vmul.f32 %v5855_v9, %v621_v11  ;;  %1013 = vmatpush.msra.mxu0 %v990_v63  ;;  %v978_v11 = vld [vmem:[#allocation8 + $0xc0] sm:$0xff] }
  0x64   : > { %v623_v13 = vadd.f32 %v5855_v9, %v622_v12  ;;  %v979_v12 = vld [vmem:[#allocation8 + $0xc8] sm:$0xff] }
  0x66   : > { %v6849_v14 = vsel %vm624_vm0, %v5855_v9, %v623_v13  ;;  %v982_v9 = vld [vmem:[#allocation8 + $0xe0] sm:$0xff]  ;;  %v980_v13 = vld [vmem:[#allocation8 + $0xd0] sm:$0xff] }
  0x67   : > { %599 = vadd.xlane.f32.xlu1 %v6842_v6  ;;  %10273 = vst [vmem:[#allocation23_spill] sm:$0xff] %v6849_v14 }
  0x6f   : > { %605 = vadd.xlane.f32.xlu1 %v6846_v7 }
  0xca   : > { %v592_v15 = vpop.xlane.xlu1 %591  ;;  %v588_v16 = vpop.xlane.xlu0 %587 }
  0xcb   : > { %v628_v17 = vmul.f32 %v6849_v14, %v592_v15  ;;  %v626_v18 = vmul.f32 %v6849_v14, %v588_v16  ;;  %v596_v19 = vpop.xlane.xlu2 %595  ;;  %v975_v15 = vld [vmem:[#allocation8 + $0xa8] sm:$0xff]  ;;  %v976_v16 = vld [vmem:[#allocation8 + $0xb0] sm:$0xff] }
  0xcc   : > { %v630_v38 = vmul.f32 %v6849_v14, %v596_v19  ;;  %v973_v19 = vld [vmem:[#allocation8 + $0x98] sm:$0xff] }
  0xcd   : > { %v6853_v20 = vsub.f32 %v573_v0, %v628_v17  ;;  %v6855_v21 = vsub.f32 %v571_v1, %v626_v18  ;;  %v991_v0 = vld [vmem:[#allocation8 + $0x128] sm:$0xff]  ;;  %v992_v1 = vld [vmem:[#allocation8 + $0x130] sm:$0xff]  ;;  %v977_v17 = vld [vmem:[#allocation8 + $0xb8] sm:$0xff] }
  0xce   : > { %v6889_v43 = vsub.f32 %v575_v2, %v630_v38  ;;  %1078 = vmatpush.msra.mxu1 %v991_v0  ;;  %1143 = vmatpush.msra.mxu2 %v992_v1  ;;  %v987_v2 = vld [vmem:[#allocation8 + $0x108] sm:$0xff]  ;;  %v972_v18 = vld [vmem:[#allocation8 + $0x90] sm:$0xff]  ;;  %v961_v38 = vld [vmem:[#allocation8 + $0x38] sm:$0xff] }
  0xcf   : > { %v660_v22 = vmul.f32 %v6853_v20, %v6853_v20  ;;  %v658_v23 = vmul.f32 %v6855_v21, %v6855_v21  ;;  %1014 = vmatpush.msra.mxu0 %v987_v2 }
  0xd0   : > { %v662_v50 = vmul.f32 %v6889_v43, %v6889_v43 }
  0xd1   : > { %678 = vadd.xlane.f32.xlu1 %v660_v22  ;;  %674 = vadd.xlane.f32.xlu0 %v658_v23  ;;  %v974_v22 = vld [vmem:[#allocation8 + $0xa0] sm:$0xff]  ;;  %v969_v23 = vld [vmem:[#allocation8 + $0x78] sm:$0xff] }
  0xd2   : > { %v590_v24 = vpop.xlane.xlu0 %589  ;;  %v594_v25 = vpop.xlane.xlu1 %593 }
  0xd3   : > { %v627_v26 = vmul.f32 %v6849_v14, %v590_v24  ;;  %v598_v27 = vpop.xlane.xlu2 %597  ;;  %v629_v30 = vmul.f32 %v6849_v14, %v594_v25  ;;  %v970_v24 = vld [vmem:[#allocation8 + $0x80] sm:$0xff]  ;;  %v971_v25 = vld [vmem:[#allocation8 + $0x88] sm:$0xff] }
  0xd4   : > { %v631_v29 = vmul.f32 %v6849_v14, %v598_v27  ;;  %v967_v27 = vld [vmem:[#allocation8 + $0x68] sm:$0xff] }
  0xd5   : > { %v6862_v28 = vsub.f32 %v572_v3, %v627_v26  ;;  %v6878_v35 = vsub.f32 %v574_v4, %v629_v30  ;;  %v988_v3 = vld [vmem:[#allocation8 + $0x110] sm:$0xff]  ;;  %v989_v4 = vld [vmem:[#allocation8 + $0x118] sm:$0xff]  ;;  %v966_v26 = vld [vmem:[#allocation8 + $0x60] sm:$0xff] }
  0xd6   : > { %v6876_v34 = vsub.f32 %v576_v5, %v631_v29  ;;  %1079 = vmatpush.msra.mxu1 %v988_v3  ;;  %1144 = vmatpush.msra.mxu2 %v989_v4  ;;  %v984_v5 = vld [vmem:[#allocation8 + $0xf0] sm:$0xff]  ;;  %v963_v30 = vld [vmem:[#allocation8 + $0x48] sm:$0xff] }
  0xd7   : > { %v659_v33 = vmul.f32 %v6862_v28, %v6862_v28  ;;  %v661_v37 = vmul.f32 %v6878_v35, %v6878_v35  ;;  %1015 = vmatpush.msra.mxu0 %v984_v5  ;;  %v968_v29 = vld [vmem:[#allocation8 + $0x70] sm:$0xff] }
  0xd8   : > { %v663_v36 = vmul.f32 %v6876_v34, %v6876_v34 }
  0xd9   : > { %611 = vadd.xlane.f32.xlu1 %v6867_v31  ;;  %601 = vadd.xlane.f32.xlu0 %v6870_v32 }
  0xda   : > { %676 = vadd.xlane.f32.xlu2 %v659_v33  ;;  %v600_v44 = vpop.xlane.xlu1 %599  ;;  %1016 = vmatpush.msra.mxu0 %v981_v8  ;;  %v964_v33 = vld [vmem:[#allocation8 + $0x50] sm:$0xff] }
  0xdb   : > { %v632_v48 = vmul.f32 %v6849_v14, %v600_v44  ;;  %v959_v44 = vld [vmem:[#allocation8 + $0x28] sm:$0xff] }
  0xdc   : > { %1017 = vmatpush.msra.mxu0 %v978_v11 }
  0xdd   : > { %v6903_v52 = vsub.f32 %v6842_v6, %v632_v48  ;;  %v985_v6 = vld [vmem:[#allocation8 + $0xf8] sm:$0xff] }
  0xde   : > { %1080 = vmatpush.msra.mxu1 %v985_v6  ;;  %1018 = vmatpush.msra.mxu0 %v975_v15 }
  0xdf   : > { %v664_v53 = vmul.f32 %v6903_v52, %v6903_v52 }
  0xe0   : > { %1081 = vmatpush.msra.mxu1 %v982_v9  ;;  %1019 = vmatpush.msra.mxu0 %v972_v18 }
  0xe1   : > { %684 = vadd.xlane.f32.xlu1 %v663_v36  ;;  %680 = vadd.xlane.f32.xlu0 %v661_v37  ;;  %v965_v36 = vld [vmem:[#allocation8 + $0x58] sm:$0xff]  ;;  %v960_v37 = vld [vmem:[#allocation8 + $0x30] sm:$0xff] }
  0xe2   : > { %603 = vadd.xlane.f32.xlu2 %v6886_v39  ;;  %v606_v55 = vpop.xlane.xlu1 %605  ;;  %1082 = vmatpush.msra.mxu1 %v979_v12 }
  0xe3   : > { %v635_v56 = vmul.f32 %v6849_v14, %v606_v55  ;;  %1020 = vmatpush.msra.mxu0 %v969_v23 }
  0xe4   : > { %1083 = vmatpush.msra.mxu1 %v976_v16 }
  0xe5   : > { %v6917_v58 = vsub.f32 %v6846_v7, %v635_v56  ;;  %v986_v7 = vld [vmem:[#allocation8 + $0x100] sm:$0xff]  ;;  %1021 = vmatpush.msra.mxu0 %v966_v26 }
  0xe6   : > { %1145 = vmatpush.msra.mxu2 %v986_v7  ;;  %1084 = vmatpush.msra.mxu1 %v973_v19 }
  0xe7   : > { %v667_v59 = vmul.f32 %v6917_v58, %v6917_v58  ;;  %1022 = vmatpush.msra.mxu0 %v963_v30  ;;  %v6953_v30 = vld [vmem:[#allocation5] ss:$0 sm:$0xff] }
  0xe8   : > { %1146 = vmatpush.msra.mxu2 %v983_v10  ;;  %1085 = vmatpush.msra.mxu1 %v970_v24  ;;  %v6948_v24 = vld [vmem:[%s6813_s21 + $0x70] sm:$0xff] }
  0xe9   : > { %607 = vadd.xlane.f32.xlu0 %v6893_v49  ;;  %617 = vadd.xlane.f32.xlu1 %v6898_v51 }
  0xea   : > { %682 = vadd.xlane.f32.xlu2 %v662_v50  ;;  %1147 = vmatpush.msra.mxu2 %v980_v13 }
  0xeb   : > { %1086 = vmatpush.msra.mxu1 %v967_v27  ;;  %1023 = vmatpush.msra.mxu0 %v960_v37 }
  0xec   : > { %1148 = vmatpush.msra.mxu2 %v977_v17 }
  0xed   : > { %1087 = vmatpush.msra.mxu1 %v964_v33  ;;  %1024 = vmatpush.msra.mxu0 %v957_v41  ;;  %v6962_v41 = vld [vmem:[#allocation7] ss:$0 sm:$0xff] }
  0xee   : > { %1149 = vmatpush.msra.mxu2 %v974_v22 }
  0xef   : > { %1088 = vmatpush.msra.mxu1 %v961_v38  ;;  %1025 = vmatpush.msra.mxu0 %v954_v45 }
  0xf0   : > { %1150 = vmatpush.msra.mxu2 %v971_v25 }
  0xf1   : > { %686 = vadd.xlane.f32.xlu0 %v664_v53  ;;  %1089 = vmatpush.msra.mxu1 %v958_v42 }
  0xf2   : > { %609 = vadd.xlane.f32.xlu2 %v6908_v54  ;;  %1151 = vmatpush.msra.mxu2 %v968_v29 }
  0xf3   : > { %1090 = vmatpush.msra.mxu1 %v955_v46 }
  0xf4   : > { %1152 = vmatpush.msra.mxu2 %v965_v36 }
  0xf6   : > { %1153 = vmatpush.msra.mxu2 %v962_v40 }
  0xf8   : > { %1154 = vmatpush.msra.mxu2 %v959_v44 }
  0xf9   : > { %613 = vadd.xlane.f32.xlu0 %v6913_v57 }
  0xfa   : > { %1155 = vmatpush.msra.mxu2 %v956_v47 }
 0x101   : > { %692 = vadd.xlane.f32.xlu0 %v667_v59 }
 0x144   : > { %v679_v48 = vpop.xlane.xlu1 %678  ;;  %v675_v50 = vpop.xlane.xlu0 %674 }
 0x145   : > { %v708_v53 = vmul.f32 %v679_v48, %v6849_v14  ;;  %v706_v55 = vmul.f32 %v675_v50, %v6849_v14 }
 0x147   : > { %v6923_v56 = vadd.f32 1e-05, %v708_v53  ;;  %v722_v59 = vadd.f32 1e-05, %v706_v55 }
 0x149   : > { %5856 = vrsqrt.f32 %v6923_v56  ;;  %vm744_vm2 = vweird.f32 %v722_v59  ;;  %vm764_vm6 = vweird.f32 %v6923_v56 }
 0x14a   : > { %5858 = vrsqrt.f32 %v722_v59 }
 0x14c   : > { %v612_v60 = vpop.xlane.xlu1 %611  ;;  %v602_v61 = vpop.xlane.xlu0 %601 }
 0x14d   : > { %v677_v62 = vpop.xlane.xlu2 %676  ;;  %v633_v63 = vmul.f32 %v6849_v14, %v602_v61  ;;  %v638_v17 = vmul.f32 %v6849_v14, %v612_v60 }
 0x14e   : > { %v707_v0 = vmul.f32 %v677_v62, %v6849_v14 }
 0x14f   : > { %v6928_v1 = vpop.eup %5856  ;;  %v6931_v2 = vsub.f32 %v6870_v32, %v633_v63 }
 0x150   : > { %v5859_v3 = vpop.eup %5858  ;;  %v723_v4 = vadd.f32 1e-05, %v707_v0  ;;  %v759_v5 = vmul.f32 %v6928_v1, %v6923_v56  ;;  %vm765_vm7 = vweird.f32 %v6928_v1 }
 0x151   : > { %v739_v6 = vmul.f32 %v5859_v3, %v722_v59  ;;  %v665_v7 = vmul.f32 %v6931_v2, %v6931_v2  ;;  %vm745_vm1 = vweird.f32 %v5859_v3  ;;  %vm6993_vm9 = vmor %vm764_vm6, %vm765_vm7 }
 0x152   : > { %5860 = vrsqrt.f32 %v723_v4  ;;  %v760_v10 = vmul.f32 %v6928_v1, %v759_v5  ;;  %vm746_vm3 = vmor %vm744_vm2, %vm745_vm1  ;;  %vm754_vm4 = vweird.f32 %v723_v4 }
 0x153   : > { %v740_v8 = vmul.f32 %v5859_v3, %v739_v6  ;;  %688 = vadd.xlane.f32.xlu2 %v665_v7 }
 0x154   : > { %v681_v9 = vpop.xlane.xlu0 %680  ;;  %v685_v12 = vpop.xlane.xlu1 %684  ;;  %v761_v25 = vmul.f32 0.5, %v760_v10 }
 0x155   : > { %v741_v11 = vmul.f32 0.5, %v740_v8  ;;  %v604_v32 = vpop.xlane.xlu2 %603  ;;  %v709_v13 = vmul.f32 %v681_v9, %v6849_v14  ;;  %v711_v22 = vmul.f32 %v685_v12, %v6849_v14 }
 0x156   : > { %v634_v15 = vmul.f32 %v6849_v14, %v604_v32  ;;  %v762_v42 = vsub.f32 1.5, %v761_v25 }
 0x157   : > { %v742_v16 = vsub.f32 1.5, %v741_v11  ;;  %v6941_v18 = vadd.f32 1e-05, %v709_v13  ;;  %v6959_v37 = vadd.f32 1e-05, %v711_v22 }
 0x158   : > { %v5861_v19 = vpop.eup %5860  ;;  %v6945_v23 = vsub.f32 %v6886_v39, %v634_v15  ;;  %v6957_v39 = vsub.f32 %v6867_v31, %v638_v17  ;;  %v763_v63 = vmul.f32 %v6928_v1, %v762_v42 }
 0x159   : > { %v743_v26 = vmul.f32 %v5859_v3, %v742_v16  ;;  %v749_v27 = vmul.f32 %v5861_v19, %v723_v4  ;;  %5862 = vrsqrt.f32 %v6941_v18  ;;  %vm755_vm5 = vweird.f32 %v5861_v19 }
 0x15a   : > { %v666_v29 = vmul.f32 %v6945_v23, %v6945_v23  ;;  %vm6977_vm8 = vmor %vm754_vm4, %vm755_vm5  ;;  %5864 = vrsqrt.f32 %v6959_v37  ;;  %v767_v12 = vsel %vm6993_vm9, %v6928_v1, %v763_v63  ;;  %vm774_vm10 = vweird.f32 %v6941_v18 }
 0x15b   : > { %v750_v33 = vmul.f32 %v5861_v19, %v749_v27  ;;  %615 = vadd.xlane.f32.xlu2 %v6948_v24  ;;  %v747_v36 = vsel %vm746_vm3, %v5859_v3, %v743_v26  ;;  %v900_v22 = vmul.f32 %v767_v12, %v6853_v20  ;;  %vm794_vm0 = vweird.f32 %v6959_v37 }
 0x15c   : > { %690 = vadd.xlane.f32.xlu1 %v666_v29  ;;  %v608_v38 = vpop.xlane.xlu0 %607  ;;  %v898_v40 = vmul.f32 %v747_v36, %v6855_v21  ;;  %v618_v47 = vpop.xlane.xlu1 %617  ;;  %v670_v21 = vmul.f32 %v6957_v39, %v6957_v39 }
 0x15d   : > { %v751_v44 = vmul.f32 0.5, %v750_v33  ;;  %v683_v45 = vpop.xlane.xlu2 %682  ;;  %v636_v46 = vmul.f32 %v6849_v14, %v608_v38  ;;  %v641_v62 = vmul.f32 %v6849_v14, %v618_v47  ;;  %v920_v33 = vmul.f32 %v6953_v30, %v900_v22 }
 0x15e   : > { %v710_v31 = vmul.f32 %v683_v45, %v6849_v14  ;;  %v918_v48 = vmul.f32 %v6953_v30, %v898_v40 }
 0x15f   : > { %v752_v50 = vsub.f32 1.5, %v751_v44  ;;  %v6972_v53 = vsub.f32 %v6893_v49, %v636_v46  ;;  %v6974_v55 = vpop.eup %5862  ;;  %v7003_v56 = vsub.f32 %v6898_v51, %v641_v62  ;;  %v940_v47 = vadd.f32 %v6962_v41, %v920_v33 }
 0x160   : > { %v6982_v60 = vadd.f32 1e-05, %v710_v31  ;;  %v938_v61 = vadd.f32 %v6962_v41, %v918_v48  ;;  %v769_v49 = vmul.f32 %v6974_v55, %v6941_v18  ;;  %v7009_v32 = vpop.eup %5864  ;;  %vm775_vm11 = vweird.f32 %v6974_v55 }
 0x161   : > { %v753_v0 = vmul.f32 %v5861_v19, %v752_v50  ;;  %v668_v3 = vmul.f32 %v6972_v53, %v6972_v53  ;;  %v789_v25 = vmul.f32 %v7009_v32, %v6959_v37  ;;  %vm7026_vm12 = vmor %vm774_vm10, %vm775_vm11  ;;  %vm795_vm1 = vweird.f32 %v7009_v32 }
 0x162   : > { %5866 = vrsqrt.f32 %v6982_v60  ;;  %1026 = vmatmul.f32.vlgmr.msra.gmra.mxu0 %v938_v61  ;;  %1091 = vmatmul.f32.vlgmr.msra.gmra.mxu1 %v938_v61  ;;  %v770_v5 = vmul.f32 %v6974_v55, %v769_v49  ;;  %vm784_vm13 = vweird.f32 %v6982_v60  ;;  %vm796_vm2 = vmor %vm794_vm0, %vm795_vm1 }
 0x163   : > { %1156 = vmatmul.f32.vlgmr.msra.gmra.mxu2 %v938_v61  ;;  %694 = vadd.xlane.f32.xlu2 %v668_v3  ;;  %v757_v6 = vsel %vm6977_vm8, %v5861_v19, %v753_v0  ;;  %v673_v19 = vmul.f32 %v7003_v56, %v7003_v56  ;;  %v790_v36 = vmul.f32 %v7009_v32, %v789_v25 }
 0x164   : > { %698 = vadd.xlane.f32.xlu1 %v670_v21  ;;  %v687_v7 = vpop.xlane.xlu0 %686  ;;  %v899_v8 = vmul.f32 %v757_v6, %v6862_v28  ;;  %v771_v9 = vmul.f32 0.5, %v770_v5 }
 0x165   : > { %v610_v10 = vpop.xlane.xlu2 %609  ;;  %v712_v11 = vmul.f32 %v687_v7, %v6849_v14  ;;  %v791_v48 = vmul.f32 0.5, %v790_v36 }
 0x166   : > { %v637_v13 = vmul.f32 %v6849_v14, %v610_v10  ;;  %v919_v15 = vmul.f32 %v6953_v30, %v899_v8  ;;  %v772_v16 = vsub.f32 1.5, %v771_v9 }
 0x167   : > { %v728_v28 = vadd.f32 1e-05, %v712_v11 }
 0x168   : > { %v5867_v51 = vpop.eup %5866  ;;  %v939_v17 = vadd.f32 %v6962_v41, %v919_v15  ;;  %v7019_v1 = vsub.f32 %v6908_v54, %v637_v13  ;;  %v773_v26 = vmul.f32 %v6974_v55, %v772_v16 }
 0x169   : > { %v779_v18 = vmul.f32 %v5867_v51, %v6982_v60  ;;  %5868 = vrsqrt.f32 %v728_v28  ;;  %vm785_vm14 = vweird.f32 %v5867_v51  ;;  %v792_v60 = vsub.f32 1.5, %v791_v48  ;;  %v7085_v48 = vld [vmem:[%s10230_s4] sm:$0x7] }
 0x16a   : > { %1029 = vmatmul.f32.gmra.mxu0 %v939_v17  ;;  %1094 = vmatmul.f32.gmra.mxu1 %v939_v17  ;;  %v669_v54 = vmul.f32 %v7019_v1, %v7019_v1  ;;  %v777_v42 = vsel %vm7026_vm12, %v6974_v55, %v773_v26  ;;  %vm786_vm15 = vmor %vm784_vm13, %vm785_vm14  ;;  %vm804_vm3 = vweird.f32 %v728_v28 }
 0x16b   : > { %v780_v29 = vmul.f32 %v5867_v51, %v779_v18  ;;  %1159 = vmatmul.f32.gmra.mxu2 %v939_v17  ;;  %v901_v31 = vmul.f32 %v777_v42, %v6878_v35  ;;  %v793_v63 = vmul.f32 %v7009_v32, %v792_v60 }
 0x16c   : > { %704 = vadd.xlane.f32.xlu1 %v673_v19  ;;  %696 = vadd.xlane.f32.xlu0 %v669_v54  ;;  %v614_v20 = vpop.xlane.xlu0 %613 }
 0x16d   : > { %v781_v38 = vmul.f32 0.5, %v780_v29  ;;  %v639_v40 = vmul.f32 %v6849_v14, %v614_v20  ;;  %v921_v55 = vmul.f32 %v6953_v30, %v901_v31  ;;  %v797_v4 = vsel %vm796_vm2, %v7009_v32, %v793_v63 }
 0x16e   : > { %v903_v5 = vmul.f32 %v797_v4, %v6876_v34 }
 0x16f   : > { %v5869_v44 = vpop.eup %5868  ;;  %v782_v45 = vsub.f32 1.5, %v781_v38  ;;  %v7040_v46 = vsub.f32 %v6913_v57, %v639_v40  ;;  %v941_v35 = vadd.f32 %v6962_v41, %v921_v55  ;;  %v7089_v55 = vperm.slane %v7085_v48, 1 }
 0x170   : > { %v799_v21 = vmul.f32 %v5869_v44, %v728_v28  ;;  %vm805_vm4 = vweird.f32 %v5869_v44 }
 0x171   : > { %v783_v50 = vmul.f32 %v5867_v51, %v782_v45  ;;  %v671_v59 = vmul.f32 %v7040_v46, %v7040_v46  ;;  %vm806_vm5 = vmor %vm804_vm3, %vm805_vm4 }
 0x172   : > { %1032 = vmatmul.f32.gmra.mxu0 %v940_v47  ;;  %1097 = vmatmul.f32.gmra.mxu1 %v940_v47  ;;  %v800_v57 = vmul.f32 %v5869_v44, %v799_v21 }
 0x173   : > { %1162 = vmatmul.f32.gmra.mxu2 %v940_v47  ;;  %700 = vadd.xlane.f32.xlu2 %v671_v59  ;;  %v787_v61 = vsel %vm786_vm15, %v5867_v51, %v783_v50 }
 0x174   : > { %v902_v62 = vmul.f32 %v787_v61, %v6889_v43  ;;  %v801_v0 = vmul.f32 0.5, %v800_v57  ;;  %v923_v43 = vmul.f32 %v6953_v30, %v903_v5  ;;  %v693_v34 = vpop.xlane.xlu0 %692 }
 0x175   : > { %v715_v12 = vmul.f32 %v693_v34, %v6849_v14 }
 0x176   : > { %v922_v49 = vmul.f32 %v6953_v30, %v902_v62  ;;  %v802_v3 = vsub.f32 1.5, %v801_v0  ;;  %v943_v8 = vadd.f32 %v6962_v41, %v923_v43 }
 0x177   : > { %v7062_v32 = vadd.f32 1e-05, %v715_v12 }
 0x178   : > { %v942_v37 = vadd.f32 %v6962_v41, %v922_v49  ;;  %v803_v6 = vmul.f32 %v5869_v44, %v802_v3 }
 0x179   : > { %5870 = vrsqrt.f32 %v7062_v32  ;;  %vm834_vm11 = vweird.f32 %v7062_v32 }
 0x17a   : > { %1035 = vmatmul.f32.gmra.mxu0 %v941_v35  ;;  %1100 = vmatmul.f32.gmra.mxu1 %v941_v35  ;;  %v807_v7 = vsel %vm806_vm5, %v5869_v44, %v803_v6 }
 0x17b   : > { %1165 = vmatmul.f32.gmra.mxu2 %v941_v35  ;;  %v904_v9 = vmul.f32 %v807_v7, %v6903_v52  ;;  %v7095_v35 = vperm.slane %v7085_v48, 0 }
 0x17d   : > { %v924_v10 = vmul.f32 %v6953_v30, %v904_v9 }
 0x17f   : > { %v944_v11 = vadd.f32 %v6962_v41, %v924_v10  ;;  %v7066_v28 = vpop.eup %5870 }
 0x180   : > { %v829_v26 = vmul.f32 %v7066_v28, %v7062_v32  ;;  %vm835_vm12 = vweird.f32 %v7066_v28 }
 0x181   : > { %vm7124_vm14 = vmor %vm834_vm11, %vm835_vm12 }
 0x182   : > { %1038 = vmatmul.f32.gmra.mxu0 %v942_v37  ;;  %1103 = vmatmul.f32.gmra.mxu1 %v942_v37  ;;  %v830_v20 = vmul.f32 %v7066_v28, %v829_v26 }
 0x183   : > { %1168 = vmatmul.f32.gmra.mxu2 %v942_v37 }
 0x184   : > { %v831_v45 = vmul.f32 0.5, %v830_v20 }
 0x186   : > { %v832_v57 = vsub.f32 1.5, %v831_v45 }
 0x18a   : > { %1041 = vmatmul.f32.gmra.mxu0 %v943_v8  ;;  %1106 = vmatmul.f32.gmra.mxu1 %v943_v8 }
 0x18b   : > { %1171 = vmatmul.f32.gmra.mxu2 %v943_v8  ;;  %v833_v8 = vmul.f32 %v7066_v28, %v832_v57 }
 0x192   : > { %1044 = vmatmul.f32.gmra.mxu0 %v944_v11  ;;  %1109 = vmatmul.f32.gmra.mxu1 %v944_v11 }
 0x193   : > { %1174 = vmatmul.f32.gmra.mxu2 %v944_v11 }
 0x1c6   : > { %v689_v13 = vpop.xlane.xlu2 %688 }
 0x1c7   : > { %v713_v15 = vmul.f32 %v689_v13, %v6849_v14 }
 0x1c9   : > { %v729_v52 = vadd.f32 1e-05, %v713_v15 }
 0x1cb   : > { %5872 = vrsqrt.f32 %v729_v52  ;;  %vm814_vm7 = vweird.f32 %v729_v52 }
 0x1ce   : > { %v616_v16 = vpop.xlane.xlu2 %615 }
 0x1cf   : > { %v691_v51 = vpop.xlane.xlu1 %690  ;;  %v640_v17 = vmul.f32 %v6849_v14, %v616_v16 }
 0x1d0   : > { %v714_v19 = vmul.f32 %v691_v51, %v6849_v14 }
 0x1d1   : > { %v5873_v22 = vpop.eup %5872  ;;  %v7071_v25 = vsub.f32 %v6948_v24, %v640_v17  ;;  %v837_v17 = vsel %vm7124_vm14, %v7066_v28, %v833_v8 }
 0x1d2   : > { %v809_v18 = vmul.f32 %v5873_v22, %v729_v52  ;;  %v730_v27 = vadd.f32 1e-05, %v714_v19  ;;  %vm815_vm6 = vweird.f32 %v5873_v22 }
 0x1d3   : > { %v672_v54 = vmul.f32 %v7071_v25, %v7071_v25  ;;  %vm816_vm8 = vmor %vm814_vm7, %vm815_vm6 }
 0x1d4   : > { %v810_v29 = vmul.f32 %v5873_v22, %v809_v18  ;;  %5874 = vrsqrt.f32 %v730_v27  ;;  %vm824_vm9 = vweird.f32 %v730_v27 }
 0x1d5   : > { %702 = vadd.xlane.f32.xlu0 %v672_v54 }
 0x1d6   : > { %v811_v33 = vmul.f32 0.5, %v810_v29  ;;  %v695_v36 = vpop.xlane.xlu2 %694 }
 0x1d7   : > { %v699_v38 = vpop.xlane.xlu1 %698  ;;  %v716_v40 = vmul.f32 %v695_v36, %v6849_v14 }
 0x1d8   : > { %v812_v24 = vsub.f32 1.5, %v811_v33  ;;  %v718_v31 = vmul.f32 %v699_v38, %v6849_v14 }
 0x1d9   : > { %v7079_v42 = vadd.f32 1e-05, %v716_v40 }
 0x1da   : > { %v5875_v44 = vpop.eup %5874  ;;  %v813_v47 = vmul.f32 %v5873_v22, %v812_v24  ;;  %v7092_v61 = vadd.f32 1e-05, %v718_v31 }
 0x1db   : > { %v819_v50 = vmul.f32 %v5875_v44, %v730_v27  ;;  %5876 = vrsqrt.f32 %v7079_v42  ;;  %vm825_vm10 = vweird.f32 %v5875_v44  ;;  %vm844_vm15 = vweird.f32 %v7079_v42 }
 0x1dc   : > { %v817_v21 = vsel %vm816_vm8, %v5873_v22, %v813_v47  ;;  %vm7107_vm13 = vmor %vm824_vm9, %vm825_vm10  ;;  %5878 = vrsqrt.f32 %v7092_v61  ;;  %v907_v27 = vmul.f32 %v837_v17, %v6917_v58  ;;  %vm864_vm5 = vweird.f32 %v7092_v61 }
 0x1dd   : > { %v820_v59 = vmul.f32 %v5875_v44, %v819_v50  ;;  %v905_v60 = vmul.f32 %v817_v21, %v6931_v2 }
 0x1de   : > { %v927_v38 = vmul.f32 %v6953_v30, %v907_v27 }
 0x1df   : > { %v821_v62 = vmul.f32 0.5, %v820_v59  ;;  %v1027_v63 = vpop.f32.mrf.mxu0  ;;  %v925_v0 = vmul.f32 %v6953_v30, %v905_v60  ;;  %v1092_v49 = vpop.f32.mrf.mxu1 }
 0x1e0   : > { %v697_v3 = vpop.xlane.xlu0 %696  ;;  %v7103_v37 = vadd.f32 %v1092_v49, %v7089_v55  ;;  %v1028_v10 = vadd.f32 %v1027_v63, %v7095_v35  ;;  %v947_v50 = vadd.f32 %v6962_v41, %v927_v38 }
 0x1e1   : > { %v7100_v4 = vpop.eup %5876  ;;  %v822_v2 = vsub.f32 1.5, %v821_v62  ;;  %v717_v5 = vmul.f32 %v697_v3, %v6849_v14  ;;  %v945_v6 = vadd.f32 %v6962_v41, %v925_v0 }
 0x1e2   : > { %v839_v7 = vmul.f32 %v7100_v4, %v7079_v42  ;;  %1832 = vrot.lane.b32.xlu1 %v7103_v37, %s6596_s17  ;;  %2506 = vrot.lane.b32.xlu2 %v7103_v37, %s6597_s22  ;;  %v7132_v51 = vmul.f32 0.17677669, %v1028_v10  ;;  %v7138_v19 = vpop.eup %5878  ;;  %vm845_vm0 = vweird.f32 %v7100_v4 }
 0x1e3   : > { %v823_v9 = vmul.f32 %v5875_v44, %v822_v2  ;;  %v733_v11 = vadd.f32 1e-05, %v717_v5  ;;  %1047 = vmatmul.f32.gmra.mxu0 %v945_v6  ;;  %1112 = vmatmul.f32.gmra.mxu1 %v945_v6  ;;  %v859_v28 = vmul.f32 %v7138_v19, %v7092_v61  ;;  %vm7157_vm1 = vmor %vm844_vm15, %vm845_vm0  ;;  %vm865_vm6 = vweird.f32 %v7138_v19 }
 0x1e4   : > { %v840_v12 = vmul.f32 %v7100_v4, %v839_v7  ;;  %1177 = vmatmul.f32.gmra.mxu2 %v945_v6  ;;  %vm866_vm7 = vmor %vm864_vm5, %vm865_vm6 }
 0x1e5   : > { %5880 = vrsqrt.f32 %v733_v11  ;;  %v827_v13 = vsel %vm7107_vm13, %v5875_v44, %v823_v9  ;;  %v860_v40 = vmul.f32 %v7138_v19, %v859_v28  ;;  %vm854_vm2 = vweird.f32 %v733_v11 }
 0x1e6   : > { %v841_v15 = vmul.f32 0.5, %v840_v12  ;;  %v701_v52 = vpop.xlane.xlu2 %700  ;;  %v906_v16 = vmul.f32 %v827_v13, %v6945_v23 }
 0x1e7   : > { %v719_v32 = vmul.f32 %v701_v52, %v6849_v14  ;;  %v1095_v36 = vpop.f32.mrf.mxu1  ;;  %v1030_v44 = vpop.f32.mrf.mxu0  ;;  %v861_v59 = vmul.f32 0.5, %v860_v40 }
 0x1e8   : > { %v842_v22 = vsub.f32 1.5, %v841_v15  ;;  %v926_v26 = vmul.f32 %v6953_v30, %v906_v16  ;;  %v7169_v47 = vadd.f32 %v1095_v36, %v7089_v55  ;;  %v1031_v62 = vadd.f32 %v1030_v44, %v7095_v35 }
 0x1e9   : > { %v7143_v18 = vadd.f32 1e-05, %v719_v32  ;;  %1800 = vrot.lane.b32.xlu0 %v7132_v51, %s6596_s17 }
 0x1ea   : > { %v946_v23 = vadd.f32 %v6962_v41, %v926_v26  ;;  %v843_v29 = vmul.f32 %v7100_v4, %v842_v22  ;;  %3164 = vrot.lane.b32.xlu1 %v7103_v37, %s6598_s13  ;;  %3132 = vrot.lane.b32.xlu2 %v7132_v51, %s6598_s13  ;;  %v7186_v3 = vmul.f32 0.17677669, %v1031_v62 }
 0x1eb   : > { %v5881_v54 = vpop.eup %5880  ;;  %5882 = vrsqrt.f32 %v7143_v18  ;;  %vm874_vm8 = vweird.f32 %v7143_v18 }
 0x1ec   : > { %v849_v58 = vmul.f32 %v5881_v54, %v733_v11  ;;  %1050 = vmatmul.f32.gmra.mxu0 %v946_v23  ;;  %1115 = vmatmul.f32.gmra.mxu1 %v946_v23  ;;  %v847_v24 = vsel %vm7157_vm1, %v7100_v4, %v843_v29  ;;  %vm855_vm3 = vweird.f32 %v5881_v54  ;;  %vm1221_vm1 = vcmask 261120  }
 0x1ed   : > { %1180 = vmatmul.f32.gmra.mxu2 %v946_v23  ;;  %v908_v21 = vmul.f32 %v847_v24, %v6972_v53  ;;  %vm856_vm4 = vmor %vm854_vm2, %vm855_vm3  ;;  %v862_v53 = vsub.f32 1.5, %v861_v59  ;;  %v705_v24 = vpop.xlane.xlu1 %704 }
 0x1ee   : > { %v850_v33 = vmul.f32 %v5881_v54, %v849_v58 }
 0x1ef   : > { %v928_v63 = vmul.f32 %v6953_v30, %v908_v21  ;;  %v1033_v4 = vpop.f32.mrf.mxu0  ;;  %v863_v6 = vmul.f32 %v7138_v19, %v862_v53  ;;  %v1098_v61 = vpop.f32.mrf.mxu1 }
 0x1f0   : > { %v851_v42 = vmul.f32 0.5, %v850_v33  ;;  %v1034_v7 = vadd.f32 %v1033_v4, %v7095_v35  ;;  %v7205_v11 = vadd.f32 %v1098_v61, %v7089_v55 }
 0x1f1   : > { %v7166_v45 = vpop.eup %5882  ;;  %2474 = vrot.lane.b32.xlu0 %v7132_v51, %s6597_s22  ;;  %v948_v2 = vadd.f32 %v6962_v41, %v928_v63 }
 0x1f2   : > { %v852_v31 = vsub.f32 1.5, %v851_v42  ;;  %v869_v60 = vmul.f32 %v7166_v45, %v7143_v18  ;;  %2508 = vrot.lane.b32.xlu1 %v7169_v47, %s6597_s22  ;;  %1834 = vrot.lane.b32.xlu2 %v7169_v47, %s6596_s17  ;;  %vm875_vm9 = vweird.f32 %v7166_v45  ;;  %v7202_v10 = vmul.f32 0.17677669, %v1034_v7 }
 0x1f3   : > { %vm876_vm10 = vmor %vm874_vm8, %vm875_vm9 }
 0x1f4   : > { %v853_v57 = vmul.f32 %v5881_v54, %v852_v31  ;;  %1053 = vmatmul.f32.gmra.mxu0 %v947_v50  ;;  %1118 = vmatmul.f32.gmra.mxu1 %v947_v50  ;;  %v870_v0 = vmul.f32 %v7166_v45, %v869_v60 }
 0x1f5   : > { %1183 = vmatmul.f32.gmra.mxu2 %v947_v50 }
 0x1f6   : > { %v857_v49 = vsel %vm856_vm4, %v5881_v54, %v853_v57  ;;  %v871_v43 = vmul.f32 0.5, %v870_v0 }
 0x1f7   : > { %v909_v5 = vmul.f32 %v857_v49, %v7019_v1  ;;  %v867_v1 = vsel %vm866_vm7, %v7138_v19, %v863_v6  ;;  %v1101_v15 = vpop.f32.mrf.mxu1 }
 0x1f8   : > { %v872_v9 = vsub.f32 1.5, %v871_v43  ;;  %v910_v12 = vmul.f32 %v867_v1, %v6957_v39  ;;  %v7219_v32 = vadd.f32 %v1101_v15, %v7089_v55  ;;  %v1036_v39 = vpop.f32.mrf.mxu0 }
 0x1f9   : > { %3166 = vrot.lane.b32.xlu0 %v7169_v47, %s6598_s13  ;;  %v929_v8 = vmul.f32 %v6953_v30, %v909_v5  ;;  %v1037_v22 = vadd.f32 %v1036_v39, %v7095_v35 }
 0x1fa   : > { %2476 = vrot.lane.b32.xlu1 %v7186_v3, %s6597_s22  ;;  %1802 = vrot.lane.b32.xlu2 %v7186_v3, %s6596_s17  ;;  %v873_v13 = vmul.f32 %v7166_v45, %v872_v9  ;;  %v930_v52 = vmul.f32 %v6953_v30, %v910_v12  ;;  %v7309_v12 = vpop.f32.mrf.mxu2 }
 0x1fb   : > { %v949_v34 = vadd.f32 %v6962_v41, %v929_v8  ;;  %v7231_v18 = vmul.f32 0.17677669, %v1037_v22 }
 0x1fc   : > { %1056 = vmatmul.f32.gmra.mxu0 %v948_v2  ;;  %1121 = vmatmul.f32.gmra.mxu1 %v948_v2  ;;  %v877_v16 = vsel %vm876_vm10, %v7166_v45, %v873_v13  ;;  %v950_v17 = vadd.f32 %v6962_v41, %v930_v52  ;;  %v721_v45 = vmul.f32 %v705_v24, %v6849_v14 }
 0x1fd   : > { %1186 = vmatmul.f32.gmra.mxu2 %v948_v2  ;;  %v911_v19 = vmul.f32 %v877_v16, %v7040_v46 }
 0x1fe   : > { %v737_v50 = vadd.f32 1e-05, %v721_v45 }
 0x1ff   : > { %v931_v26 = vmul.f32 %v6953_v30, %v911_v19  ;;  %v1104_v23 = vpop.f32.mrf.mxu1 }
 0x200   : > { %v7241_v27 = vadd.f32 %v1104_v23, %v7089_v55  ;;  %v1039_v54 = vpop.f32.mrf.mxu0  ;;  %5884 = vrsqrt.f32 %v737_v50  ;;  %vm894_vm11 = vweird.f32 %v737_v50 }
 0x201   : > { %3134 = vrot.lane.b32.xlu0 %v7186_v3, %s6598_s13  ;;  %v951_v46 = vadd.f32 %v6962_v41, %v931_v26  ;;  %v1040_v28 = vadd.f32 %v1039_v54, %v7095_v35 }
 0x202   : > { %2510 = vrot.lane.b32.xlu1 %v7205_v11, %s6597_s22  ;;  %2478 = vrot.lane.b32.xlu2 %v7202_v10, %s6597_s22 }
 0x203   : > { %v7250_v29 = vmul.f32 0.17677669, %v1040_v28  ;;  %v7334_v28 = vpop.f32.mrf.mxu2 }
 0x204   : > { %1059 = vmatmul.f32.gmra.mxu0 %v949_v34  ;;  %1124 = vmatmul.f32.gmra.mxu1 %v949_v34 }
 0x205   : > { %1189 = vmatmul.f32.gmra.mxu2 %v949_v34 }
 0x206   : > { %v5885_v60 = vpop.eup %5884 }
 0x207   : > { %v1107_v20 = vpop.f32.mrf.mxu1  ;;  %v889_v63 = vmul.f32 %v5885_v60, %v737_v50  ;;  %vm895_vm12 = vweird.f32 %v5885_v60 }
 0x208   : > { %v7259_v58 = vadd.f32 %v1107_v20, %v7089_v55  ;;  %v1042_v33 = vpop.f32.mrf.mxu0  ;;  %vm896_vm14 = vmor %vm894_vm11, %vm895_vm12 }
 0x209   : > { %1836 = vrot.lane.b32.xlu0 %v7205_v11, %s6596_s17  ;;  %v1043_v36 = vadd.f32 %v1042_v33, %v7095_v35  ;;  %v890_v53 = vmul.f32 %v5885_v60, %v889_v63 }
 0x20a   : > { %1804 = vrot.lane.b32.xlu1 %v7202_v10, %s6596_s17  ;;  %3170 = vrot.lane.b32.xlu2 %v7219_v32, %s6598_s13 }
 0x20b   : > { %v7268_v38 = vmul.f32 0.17677669, %v1043_v36  ;;  %v891_v49 = vmul.f32 0.5, %v890_v53 }
 0x20c   : > { %1062 = vmatmul.f32.gmra.mxu0 %v950_v17  ;;  %1127 = vmatmul.f32.gmra.mxu1 %v950_v17 }
 0x20d   : > { %1192 = vmatmul.f32.gmra.mxu2 %v950_v17  ;;  %v892_v5 = vsub.f32 1.5, %v891_v49 }
 0x20f   : > { %v1110_v40 = vpop.f32.mrf.mxu1  ;;  %v893_v7 = vmul.f32 %v5885_v60, %v892_v5 }
 0x210   : > { %v7277_v42 = vadd.f32 %v1110_v40, %v7089_v55  ;;  %v1045_v44 = vpop.f32.mrf.mxu0 }
 0x211   : > { %3168 = vrot.lane.b32.xlu0 %v7205_v11, %s6598_s13  ;;  %v1046_v31 = vadd.f32 %v1045_v44, %v7095_v35  ;;  %v897_v13 = vsel %vm896_vm14, %v5885_v60, %v893_v7  ;;  %v7354_v44 = vpop.f32.mrf.mxu2 }
 0x212   : > { %3136 = vrot.lane.b32.xlu1 %v7202_v10, %s6598_s13  ;;  %3138 = vrot.lane.b32.xlu2 %v7231_v18, %s6598_s13  ;;  %v913_v22 = vmul.f32 %v897_v13, %v7003_v56 }
 0x213   : > { %v7287_v21 = vmul.f32 0.17677669, %v1046_v31 }
 0x214   : > { %1065 = vmatmul.f32.gmra.mxu0 %v951_v46  ;;  %1130 = vmatmul.f32.gmra.mxu1 %v951_v46 }
 0x215   : > { %1195 = vmatmul.f32.gmra.mxu2 %v951_v46  ;;  %v933_v46 = vmul.f32 %v6953_v30, %v913_v22 }
 0x217   : > { %v953_v33 = vadd.f32 %v6962_v41, %v933_v46 }
 0x219   : > { %2512 = vrot.lane.b32.xlu0 %v7219_v32, %s6597_s22  ;;  %v7374_v63 = vpop.f32.mrf.mxu2 }
 0x21a   : > { %1838 = vrot.lane.b32.xlu1 %v7219_v32, %s6596_s17  ;;  %1840 = vrot.lane.b32.xlu2 %v7241_v27, %s6596_s17 }
 0x221   : > { %1806 = vrot.lane.b32.xlu0 %v7231_v18, %s6596_s17 }
 0x222   : > { %2482 = vrot.lane.b32.xlu1 %v7250_v29, %s6597_s22  ;;  %3172 = vrot.lane.b32.xlu2 %v7241_v27, %s6598_s13 }
 0x229   : > { %2480 = vrot.lane.b32.xlu0 %v7231_v18, %s6597_s22 }
 0x22a   : > { %3174 = vrot.lane.b32.xlu1 %v7259_v58, %s6598_s13  ;;  %1808 = vrot.lane.b32.xlu2 %v7250_v29, %s6596_s17 }
 0x231   : > { %2514 = vrot.lane.b32.xlu0 %v7241_v27, %s6597_s22 }
 0x232   : > { %1810 = vrot.lane.b32.xlu1 %v7268_v38, %s6596_s17  ;;  %2516 = vrot.lane.b32.xlu2 %v7259_v58, %s6597_s22 }
 0x239   : > { %3140 = vrot.lane.b32.xlu0 %v7250_v29, %s6598_s13 }
 0x23a   : > { %2484 = vrot.lane.b32.xlu1 %v7268_v38, %s6597_s22  ;;  %2518 = vrot.lane.b32.xlu2 %v7277_v42, %s6597_s22 }
 0x23c   : > { %v7306_v8 = vpop.permute.xlu2 %2506 }
 0x23d   : > { %10287 = vst [vmem:[#allocation25_spill] sm:$0xff] %v7306_v8 }
 0x241   : > { %1842 = vrot.lane.b32.xlu0 %v7259_v58, %s6596_s17 }
 0x242   : > { %1844 = vrot.lane.b32.xlu1 %v7277_v42, %s6596_s17  ;;  %2486 = vrot.lane.b32.xlu2 %v7287_v21, %s6597_s22 }
 0x248   : > { %v703_v59 = vpop.xlane.xlu0 %702 }
 0x249   : > { %v720_v57 = vmul.f32 %v703_v59, %v6849_v14  ;;  %3142 = vrot.lane.b32.xlu0 %v7268_v38, %s6598_s13 }
 0x24a   : > { %3176 = vrot.lane.b32.xlu1 %v7277_v42, %s6598_s13 }
 0x24b   : > { %v736_v62 = vadd.f32 1e-05, %v720_v57 }
 0x24d   : > { %5886 = vrsqrt.f32 %v736_v62  ;;  %vm884_vm15 = vweird.f32 %v736_v62 }
 0x251   : > { %1812 = vrot.lane.b32.xlu0 %v7287_v21, %s6596_s17 }
 0x252   : > { %3144 = vrot.lane.b32.xlu1 %v7287_v21, %s6598_s13 }
 0x253   : > { %v5887_v0 = vpop.eup %5886 }
 0x254   : > { %v879_v4 = vmul.f32 %v5887_v0, %v736_v62  ;;  %vm885_vm13 = vweird.f32 %v5887_v0  ;;  %v7360_v50 = vpop.permute.xlu1 %1832 }
 0x255   : > { %vm886_vm0 = vmor %vm884_vm15, %vm885_vm13 }
 0x256   : > { %v880_v2 = vmul.f32 %v5887_v0, %v879_v4 }
 0x258   : > { %v881_v6 = vmul.f32 0.5, %v880_v2 }
 0x25a   : > { %v882_v43 = vsub.f32 1.5, %v881_v6  ;;  %v7390_v6 = vpop.f32.mrf.mxu2 }
 0x25b   : > { %v7304_v61 = vpop.permute.xlu0 %1800 }
 0x25c   : > { %10286 = vst [vmem:[#allocation24_spill] sm:$0xff] %v7304_v61  ;;  %v883_v9 = vmul.f32 %v5887_v0, %v882_v43  ;;  %v7380_v4 = vpop.permute.xlu1 %3164 }
 0x25d   : > { %10293 = vst [vmem:[#allocation31_spill] sm:$0xff] %v7380_v4 }
 0x25e   : > { %v887_v1 = vsel %vm886_vm0, %v5887_v0, %v883_v9 }
 0x25f   : > { %v912_v34 = vmul.f32 %v887_v1, %v7071_v25  ;;  %v7325_v25 = vpop.permute.xlu2 %3132 }
 0x260   : > { %v1048_v15 = vpop.f32.mrf.mxu0  ;;  %v1113_v52 = vpop.f32.mrf.mxu1  ;;  %10289 = vst [vmem:[#allocation27_spill] sm:$0xff] %v7325_v25 }
 0x261   : > { %v932_v16 = vmul.f32 %v6953_v30, %v912_v34  ;;  %v7313_v39 = vadd.f32 %v1113_v52, %v7089_v55  ;;  %v1049_v26 = vadd.f32 %v1048_v15, %v7095_v35 }
 0x263   : > { %v7315_v17 = vpop.permute.xlu0 %2474  ;;  %v952_v19 = vadd.f32 %v6962_v41, %v932_v16  ;;  %2520 = vrot.lane.b32.xlu1 %v7313_v39, %s6597_s22  ;;  %3178 = vrot.lane.b32.xlu0 %v7313_v39, %s6598_s13  ;;  %v7329_v56 = vmul.f32 0.17677669, %v1049_v26  ;;  %v7413_v16 = vpop.f32.mrf.mxu2 }
 0x264   : > { %10288 = vst [vmem:[#allocation26_spill] sm:$0xff] %v7315_v17  ;;  %1846 = vrot.lane.b32.xlu2 %v7313_v39, %s6596_s17  ;;  %v7404_v34 = vpop.permute.xlu1 %2508 }
 0x265   : > { %1068 = vmatmul.f32.gmra.mxu0 %v952_v19  ;;  %1133 = vmatmul.f32.gmra.mxu1 %v952_v19  ;;  %10296 = vst [vmem:[#allocation34_spill] sm:$0xff] %v7404_v34 }
 0x266   : > { %1198 = vmatmul.f32.gmra.mxu2 %v952_v19 }
 0x267   : > { %v7346_v40 = vpop.permute.xlu2 %1834 }
 0x269   : > { %v1116_v23 = vpop.f32.mrf.mxu1  ;;  %v1051_v20 = vpop.f32.mrf.mxu0 }
 0x26a   : > { %v7332_v54 = vadd.f32 %v1116_v23, %v7089_v55  ;;  %v1052_v36 = vadd.f32 %v1051_v20, %v7095_v35 }
 0x26b   : > { %3146 = vrot.lane.b32.xlu0 %v7329_v56, %s6598_s13  ;;  %v7343_v30 = vpop.permute.xlu0 %3166  ;;  %v7434_v20 = vpop.f32.mrf.mxu2 }
 0x26c   : > { %2522 = vrot.lane.b32.xlu1 %v7332_v54, %s6597_s22  ;;  %1814 = vrot.lane.b32.xlu2 %v7329_v56, %s6596_s17  ;;  %10290 = vst [vmem:[#allocation28_spill] sm:$0xff] %v7343_v30  ;;  %v7348_v24 = vmul.f32 0.17677669, %v1052_v36  ;;  %v7423_v26 = vpop.permute.xlu1 %2476 }
 0x26d   : > { %1071 = vmatmul.f32.gmra.mxu0 %v953_v33  ;;  %1136 = vmatmul.f32.gmra.mxu1 %v953_v33  ;;  %10299 = vst [vmem:[#allocation37_spill] sm:$0xff] %v7423_v26 }
 0x26e   : > { %1201 = vmatmul.f32.gmra.mxu2 %v953_v33 }
 0x26f   : > { %v7362_v59 = vpop.permute.xlu2 %1802 }
 0x270   : > { %10292 = vst [vmem:[#allocation30_spill] sm:$0xff] %v7362_v59 }
 0x271   : > { %v1119_v41 = vpop.f32.mrf.mxu1  ;;  %v1054_v45 = vpop.f32.mrf.mxu0 }
 0x272   : > { %v7365_v60 = vadd.f32 %v1119_v41, %v7089_v55  ;;  %v1055_v62 = vadd.f32 %v1054_v45, %v7095_v35 }
 0x273   : > { %1848 = vrot.lane.b32.xlu0 %v7332_v54, %s6596_s17  ;;  %v7358_v31 = vpop.permute.xlu0 %3134 }
 0x274   : > { %1816 = vrot.lane.b32.xlu1 %v7348_v24, %s6596_s17  ;;  %2488 = vrot.lane.b32.xlu2 %v7329_v56, %s6597_s22  ;;  %10291 = vst [vmem:[#allocation29_spill] sm:$0xff] %v7358_v31  ;;  %v7378_v49 = vmul.f32 0.17677669, %v1055_v62  ;;  %v7441_v45 = vpop.permute.xlu1 %2510 }
 0x275   : > { %10302 = vst [vmem:[#allocation40_spill] sm:$0xff] %v7441_v45 }
 0x277   : > { %v7382_v2 = vpop.permute.xlu2 %2478 }
 0x278   : > { %10294 = vst [vmem:[#allocation32_spill] sm:$0xff] %v7382_v2 }
 0x279   : > { %v1122_v57 = vpop.f32.mrf.mxu1  ;;  %v1057_v53 = vpop.f32.mrf.mxu0 }
 0x27a   : > { %v7396_v7 = vadd.f32 %v1122_v57, %v7089_v55  ;;  %v1058_v33 = vadd.f32 %v1057_v53, %v7095_v35 }
 0x27b   : > { %3180 = vrot.lane.b32.xlu0 %v7332_v54, %s6598_s13  ;;  %v7376_v0 = vpop.permute.xlu0 %1836 }
 0x27c   : > { %1850 = vrot.lane.b32.xlu1 %v7365_v60, %s6596_s17  ;;  %3182 = vrot.lane.b32.xlu2 %v7365_v60, %s6598_s13  ;;  %v7445_v62 = vmul.f32 0.17677669, %v1058_v33 }
 0x27f   : > { %v7408_v13 = vpop.permute.xlu2 %3170 }
 0x280   : > { %10297 = vst [vmem:[#allocation35_spill] sm:$0xff] %v7408_v13 }
 0x281   : > { %v1125_v5 = vpop.f32.mrf.mxu1  ;;  %v1060_v9 = vpop.f32.mrf.mxu0 }
 0x282   : > { %v7393_v43 = vadd.f32 %v1125_v5, %v7089_v55  ;;  %v1061_v15 = vadd.f32 %v1060_v9, %v7095_v35  ;;  %v7454_v9 = vpop.f32.mrf.mxu2 }
 0x283   : > { %2490 = vrot.lane.b32.xlu0 %v7348_v24, %s6597_s22  ;;  %v7398_v1 = vpop.permute.xlu0 %3168 }
 0x284   : > { %2492 = vrot.lane.b32.xlu1 %v7378_v49, %s6597_s22  ;;  %1818 = vrot.lane.b32.xlu2 %v7378_v49, %s6596_s17  ;;  %10295 = vst [vmem:[#allocation33_spill] sm:$0xff] %v7398_v1  ;;  %v7411_v52 = vmul.f32 0.17677669, %v1061_v15 }
 0x287   : > { %v7425_v46 = vpop.permute.xlu2 %3138 }
 0x288   : > { %10300 = vst [vmem:[#allocation38_spill] sm:$0xff] %v7425_v46 }
 0x289   : > { %v1128_v19 = vpop.f32.mrf.mxu1  ;;  %v1063_v53 = vpop.f32.mrf.mxu0 }
 0x28a   : > { %v7428_v23 = vadd.f32 %v1128_v19, %v7089_v55  ;;  %v7460_v19 = vpop.permute.xlu1 %1804  ;;  %v1064_v14 = vadd.f32 %v1063_v53, %v7095_v35 }
 0x28b   : > { %3148 = vrot.lane.b32.xlu0 %v7348_v24, %s6598_s13  ;;  %v7419_v22 = vpop.permute.xlu0 %2512  ;;  %10304 = vst [vmem:[#allocation42_spill] sm:$0xff] %v7460_v19 }
 0x28c   : > { %3186 = vrot.lane.b32.xlu1 %v7393_v43, %s6598_s13  ;;  %1852 = vrot.lane.b32.xlu2 %v7396_v7, %s6596_s17  ;;  %10298 = vst [vmem:[#allocation36_spill] sm:$0xff] %v7419_v22  ;;  %v7473_v46 = vmul.f32 0.17677669, %v1064_v14 }
 0x28f   : > { %v7443_v57 = vpop.permute.xlu2 %1840 }
 0x291   : > { %v1131_v36 = vpop.f32.mrf.mxu1 }
 0x292   : > { %v7448_v5 = vadd.f32 %v1131_v36, %v7089_v55  ;;  %v7470_v36 = vpop.f32.mrf.mxu2  ;;  %v7479_v31 = vpop.permute.xlu1 %3136 }
 0x293   : > { %2524 = vrot.lane.b32.xlu0 %v7365_v60, %s6597_s22  ;;  %v7439_v41 = vpop.permute.xlu0 %1806  ;;  %10307 = vst [vmem:[#allocation45_spill] sm:$0xff] %v7479_v31 }
 0x294   : > { %1822 = vrot.lane.b32.xlu1 %v7411_v52, %s6596_s17  ;;  %3184 = vrot.lane.b32.xlu2 %v7396_v7, %s6598_s13  ;;  %10301 = vst [vmem:[#allocation39_spill] sm:$0xff] %v7439_v41 }
 0x297   : > { %v7462_v33 = vpop.permute.xlu2 %3172 }
 0x298   : > { %10305 = vst [vmem:[#allocation43_spill] sm:$0xff] %v7462_v33 }
 0x29a   : > { %v1184_v17 = vpop.f32.mrf.mxu2  ;;  %v7492_v53 = vpop.permute.xlu1 %1838 }
 0x29b   : > { %2526 = vrot.lane.b32.xlu0 %v7396_v7, %s6597_s22  ;;  %v7458_v15 = vpop.permute.xlu0 %2480 }
 0x29c   : > { %3188 = vrot.lane.b32.xlu1 %v7428_v23, %s6598_s13  ;;  %2528 = vrot.lane.b32.xlu2 %v7393_v43, %s6597_s22  ;;  %10303 = vst [vmem:[#allocation41_spill] sm:$0xff] %v7458_v15  ;;  %v1066_v15 = vpop.f32.mrf.mxu0 }
 0x29d   : > { %v1067_v25 = vadd.f32 %v1066_v15, %v7095_v35 }
 0x29f   : > { %v7483_v26 = vpop.permute.xlu2 %1808  ;;  %v7486_v8 = vmul.f32 0.17677669, %v1067_v25 }
 0x2a0   : > { %10308 = vst [vmem:[#allocation46_spill] sm:$0xff] %v7483_v26 }
 0x2a2   : > { %v1187_v31 = vpop.f32.mrf.mxu2  ;;  %v7498_v22 = vpop.permute.xlu1 %2482 }
 0x2a3   : > { %1820 = vrot.lane.b32.xlu0 %v7445_v62, %s6596_s17  ;;  %v7475_v2 = vpop.permute.xlu0 %2514  ;;  %10311 = vst [vmem:[#allocation49_spill] sm:$0xff] %v7498_v22 }
 0x2a4   : > { %1858 = vrot.lane.b32.xlu1 %v7448_v5, %s6596_s17  ;;  %1856 = vrot.lane.b32.xlu2 %v7428_v23, %s6596_s17  ;;  %10306 = vst [vmem:[#allocation44_spill] sm:$0xff] %v7475_v2 }
 0x2a7   : > { %v7494_v34 = vpop.permute.xlu2 %2516 }
 0x2a8   : > { %10310 = vst [vmem:[#allocation48_spill] sm:$0xff] %v7494_v34 }
 0x2aa   : > { %v1190_v15 = vpop.f32.mrf.mxu2  ;;  %v7504_v25 = vpop.permute.xlu1 %3174 }
 0x2ab   : > { %1854 = vrot.lane.b32.xlu0 %v7393_v43, %s6596_s17  ;;  %v7490_v14 = vpop.permute.xlu0 %3140  ;;  %10314 = vst [vmem:[#allocation52_spill] sm:$0xff] %v7504_v25 }
 0x2ac   : > { %2532 = vrot.lane.b32.xlu1 %v7448_v5, %s6597_s22  ;;  %2530 = vrot.lane.b32.xlu2 %v7428_v23, %s6597_s22  ;;  %10309 = vst [vmem:[#allocation47_spill] sm:$0xff] %v7490_v14 }
 0x2af   : > { %v7500_v2 = vpop.permute.xlu2 %2518 }
 0x2b0   : > { %10312 = vst [vmem:[#allocation50_spill] sm:$0xff] %v7500_v2 }
 0x2b2   : > { %v1193_v1 = vpop.f32.mrf.mxu2  ;;  %v7512_v34 = vpop.permute.xlu1 %1810 }
 0x2b3   : > { %3190 = vrot.lane.b32.xlu0 %v7448_v5, %s6598_s13  ;;  %v7496_v45 = vpop.permute.xlu0 %1842  ;;  %10317 = vst [vmem:[#allocation55_spill] sm:$0xff] %v7512_v34 }
 0x2b4   : > { %1824 = vrot.lane.b32.xlu2 %v7473_v46, %s6596_s17 }
 0x2b7   : > { %v7506_v30 = vpop.permute.xlu2 %2486 }
 0x2b8   : > { %10315 = vst [vmem:[#allocation53_spill] sm:$0xff] %v7506_v30 }
 0x2ba   : > { %v1196_v33 = vpop.f32.mrf.mxu2  ;;  %v7521_v30 = vpop.permute.xlu1 %2484 }
 0x2bb   : > { %1826 = vrot.lane.b32.xlu0 %v7486_v8, %s6596_s17  ;;  %v7502_v4 = vpop.permute.xlu0 %3142  ;;  %10320 = vst [vmem:[#allocation58_spill] sm:$0xff] %v7521_v30 }
 0x2bc   : > { %10313 = vst [vmem:[#allocation51_spill] sm:$0xff] %v7502_v4 }
 0x2bf   : > { %v7510_v13 = vpop.permute.xlu2 %1846 }
 0x2c3   : > { %v7508_v14 = vpop.permute.xlu0 %1812 }
 0x2c4   : > { %10316 = vst [vmem:[#allocation54_spill] sm:$0xff] %v7508_v14 }
 0x2c7   : > { %v7517_v41 = vpop.permute.xlu2 %1814 }
 0x2c8   : > { %10319 = vst [vmem:[#allocation57_spill] sm:$0xff] %v7517_v41 }
 0x2cf   : > { %v7539_v30 = vpop.permute.xlu2 %2488 }
 0x2d5   : > { %v7514_v26 = vpop.permute.xlu0 %3178 }
 0x2d6   : > { %10318 = vst [vmem:[#allocation56_spill] sm:$0xff] %v7514_v26 }
 0x2dd   : > { %v7527_v26 = vpop.permute.xlu0 %3146 }
 0x2de   : > { %10321 = vst [vmem:[#allocation59_spill] sm:$0xff] %v7527_v26 }
 0x2e2   : > { %v1134_v22 = vpop.f32.mrf.mxu1  ;;  %v1069_v4 = vpop.f32.mrf.mxu0 }
 0x2e3   : > { %v1135_v2 = vadd.f32 %v1134_v22, %v7089_v55  ;;  %v1070_v14 = vadd.f32 %v1069_v4, %v7095_v35  ;;  %v1006_v4 = vperm.slane %v7085_v48, 2 }
 0x2e5   : > { %2534 = vrot.lane.b32.xlu1 %v1135_v2, %s6597_s22  ;;  %1860 = vrot.lane.b32.xlu0 %v1135_v2, %s6596_s17  ;;  %v7529_v22 = vmul.f32 0.17677669, %v1070_v14  ;;  %v1197_v59 = vadd.f32 %v1196_v33, %v1006_v4  ;;  %v7548_v61 = vpop.permute.xlu0 %1848  ;;  %v1185_v48 = vadd.f32 %v1184_v17, %v1006_v4  ;;  %v7557_v33 = vpop.permute.xlu2 %3182  ;;  %v1173_v17 = vadd.f32 %v7413_v16, %v1006_v4 }
 0x2e9   : > { %v1199_v25 = vpop.f32.mrf.mxu2 }
 0x2ea   : > { %v1137_v19 = vpop.f32.mrf.mxu1  ;;  %v1200_v14 = vadd.f32 %v1199_v25, %v1006_v4  ;;  %v1194_v25 = vadd.f32 %v1193_v1, %v1006_v4  ;;  %v1170_v1 = vadd.f32 %v7390_v6, %v1006_v4  ;;  %v1161_v6 = vadd.f32 %v7334_v28, %v1006_v4 }
 0x2eb   : > { %v7525_v34 = vadd.f32 %v1137_v19, %v7089_v55  ;;  %v7541_v55 = vpop.permute.xlu1 %1844 }
 0x2ed   : > { %1862 = vrot.lane.b32.xlu2 %v7525_v34, %s6596_s17  ;;  %5326 = vmatpush.xpose.msk.msra.mxu3 %vm1221_vm1, %v7525_v34 }
 0x2ee   : > { %3192 = vrot.lane.b32.xlu0 %v1135_v2, %s6598_s13  ;;  %1828 = vrot.lane.b32.xlu1 %v7529_v22, %s6596_s17 }
 0x2f1   : > { %v1202_v19 = vpop.f32.mrf.mxu2  ;;  %5327 = vmatpush.xpose.msk.msra.mxu3 %vm1221_vm1, %v1135_v2  ;;  %v1182_v2 = vadd.f32 %v7470_v36, %v1006_v4  ;;  %v1176_v36 = vadd.f32 %v7434_v20, %v1006_v4  ;;  %v1158_v20 = vadd.f32 %v7309_v12, %v1006_v4 }
 0x2f2   : > { %v1203_v26 = vadd.f32 %v1202_v19, %v1006_v4 }
 0x2f3   : > { %v7559_v19 = vpop.permute.xlu1 %3176  ;;  %v7611_v28 = vpack.i.bf16 %v1158_v20, %v1161_v6 }
 0x2f4   : > { %1735 = vmatpush.msrb.mxu0 %v1203_v26  ;;  %v7544_v41 = vpack.i.bf16 %v1200_v14, %v1203_v26  ;;  %v1191_v26 = vadd.f32 %v1190_v15, %v1006_v4  ;;  %v7581_v15 = vpop.permute.xlu2 %1818 }
 0x2f5   : > { %3150 = vrot.lane.b32.xlu2 %v7378_v49, %s6598_s13  ;;  %5328 = vmatpush.xpose.msk.msra.mxu3 %vm1221_vm1, %v7448_v5  ;;  %v7563_v5 = vpack.i.bf16 %v1182_v2, %v1185_v48 }
 0x2f6   : > { %1736 = vmatpush.msrb.mxu0 %v1200_v14  ;;  %2494 = vrot.lane.b32.xlu0 %v7445_v62, %s6597_s22  ;;  %v1188_v14 = vadd.f32 %v1187_v31, %v1006_v4  ;;  %v7574_v31 = vpop.permute.xlu0 %3180 }
 0x2f7   : > { %2496 = vrot.lane.b32.xlu1 %v7411_v52, %s6597_s22 }
 0x2f8   : > { %1737 = vmatpush.msrb.mxu0 %v1197_v59 }
 0x2f9   : > { %5329 = vmatpush.xpose.msk.msra.mxu3 %vm1221_vm1, %v7428_v23  ;;  %v1179_v23 = vadd.f32 %v7454_v9, %v1006_v4  ;;  %v1164_v9 = vadd.f32 %v7354_v44, %v1006_v4 }
 0x2fa   : > { %1738 = vmatpush.msrb.mxu0 %v1194_v25 }
 0x2fb   : > { %v7585_v16 = vpop.permute.xlu1 %3144 }
 0x2fc   : > { %1739 = vmatpush.msrb.mxu0 %v1191_v26 }
 0x2fd   : > { %5649 = vrot.lane.b32.xlu2 %v7563_v5, %s6596_s17  ;;  %5330 = vmatpush.xpose.msk.msra.mxu3 %vm1221_vm1, %v7393_v43  ;;  %v7583_v43 = vpack.i.bf16 %v1170_v1, %v1173_v17 }
 0x2fe   : > { %1740 = vmatpush.msrb.mxu0 %v1188_v14  ;;  %3152 = vrot.lane.b32.xlu0 %v7445_v62, %s6598_s13 }
 0x2ff   : > { %2498 = vrot.lane.b32.xlu1 %v7473_v46, %s6597_s22 }
 0x300   : > { %1741 = vmatpush.msrb.mxu0 %v1185_v48  ;;  %v7587_v48 = vpack.i.bf16 %v1194_v25, %v1197_v59  ;;  %v7599_v59 = vpop.permute.xlu0 %2490  ;;  %v5643_v25 = vpack.i.bf16 %v1188_v14, %v1191_v26 }
 0x301   : > { %5331 = vmatpush.xpose.msk.msra.mxu3 %vm1221_vm1, %v7396_v7  ;;  %v1167_v7 = vadd.f32 %v7374_v63, %v1006_v4 }
 0x302   : > { %1742 = vmatpush.msrb.mxu0 %v1182_v2  ;;  %v7607_v2 = vpop.permute.xlu2 %1852 }
 0x304   : > { %1743 = vmatpush.msrb.mxu0 %v1179_v23 }
 0x305   : > { %5659 = vrot.lane.b32.xlu2 %v7583_v43, %s6596_s17  ;;  %5332 = vmatpush.xpose.msk.msra.mxu3 %vm1221_vm1, %v7365_v60  ;;  %v7605_v60 = vpop.permute.xlu1 %2520 }
 0x306   : > { %1744 = vmatpush.msrb.mxu0 %v1176_v36  ;;  %5639 = vrot.lane.b32.xlu0 %v7587_v48, %s6596_s17 }
 0x307   : > { %2500 = vrot.lane.b32.xlu1 %v7486_v8, %s6597_s22 }
 0x308   : > { %1745 = vmatpush.msrb.mxu0 %v1173_v17  ;;  %v7620_v12 = vpop.permute.xlu0 %3148  ;;  %v7668_v17 = vpack.i.bf16 %v1164_v9, %v1167_v7 }
 0x309   : > { %5333 = vmatpush.xpose.msk.msra.mxu3 %vm1221_vm1, %v7332_v54 }
 0x30a   : > { %1746 = vmatpush.msrb.mxu0 %v1170_v1 }
 0x30c   : > { %1747 = vmatpush.msrb.mxu0 %v1167_v7 }
 0x30d   : > { %3158 = vrot.lane.b32.xlu2 %v7486_v8, %s6598_s13  ;;  %5334 = vmatpush.xpose.msk.msra.mxu3 %vm1221_vm1, %v7313_v39  ;;  %v7624_v54 = vpop.permute.xlu1 %2522  ;;  %v7630_v39 = vpop.permute.xlu2 %3184 }
 0x30e   : > { %1748 = vmatpush.msrb.mxu0 %v1164_v9  ;;  %5644 = vrot.lane.b32.xlu0 %v5643_v25, %s6596_s17 }
 0x30f   : > { %5669 = vrot.lane.b32.xlu1 %v7611_v28, %s6596_s17 }
 0x310   : > { %1749 = vmatpush.msrb.mxu0 %v1161_v6  ;;  %v7640_v44 = vpop.permute.xlu0 %2524 }
 0x311   : > { %5335 = vmatpush.xpose.msk.msra.mxu3 %vm1221_vm1, %v7277_v42  ;;  %v7636_v42 = vpack.i.bf16 %v1176_v36, %v1179_v23 }
 0x312   : > { %1750 = vmatpush.msrb.mxu0 %v1158_v20 }
 0x315   : > { %3160 = vrot.lane.b32.xlu2 %v7529_v22, %s6598_s13  ;;  %5336 = vmatpush.xpose.msk.msra.mxu3 %vm1221_vm1, %v7259_v58  ;;  %v7647_v58 = vpop.permute.xlu1 %1816  ;;  %v7649_v63 = vpop.permute.xlu2 %2528 }
 0x316   : > { %3154 = vrot.lane.b32.xlu0 %v7411_v52, %s6598_s13 }
 0x317   : > { %5674 = vrot.lane.b32.xlu1 %v7587_v48, %s6598_s13 }
 0x318   : > { %v7662_v4 = vpop.permute.xlu0 %2526 }
 0x319   : > { %5337 = vmatpush.xpose.msk.msra.mxu3 %vm1221_vm1, %v7241_v27  ;;  %v1072_v27 = vpop.f32.mrf.mxu0 }
 0x31d   : > { %5689 = vrot.lane.b32.xlu2 %v7563_v5, %s6598_s13  ;;  %5338 = vmatpush.xpose.msk.msra.mxu3 %vm1221_vm1, %v7219_v32  ;;  %v1073_v32 = vadd.f32 %v1072_v27, %v7095_v35  ;;  %v1851_v26 = vpop.permute.xlu1 %1850  ;;  %v1857_v14 = vpop.permute.xlu2 %1856 }
 0x31e   : > { %5654 = vrot.lane.b32.xlu0 %v7636_v42, %s6596_s17 }
 0x31f   : > { %5694 = vrot.lane.b32.xlu1 %v5643_v25, %s6597_s22 }
 0x320   : > { %v7678_v35 = vpop.permute.xlu0 %1820 }
 0x321   : > { %5339 = vmatpush.xpose.msk.msra.mxu3 %vm1221_vm1, %v7205_v11  ;;  %v7666_v11 = vmul.f32 0.17677669, %v1073_v32  ;;  %v10328_v32 = vld [vmem:[#allocation52_spill] sm:$0xff] }
 0x325   : > { %3194 = vrot.lane.b32.xlu2 %v7525_v34, %s6598_s13  ;;  %5340 = vmatpush.xpose.msk.msra.mxu3 %vm1221_vm1, %v7169_v47  ;;  %v7682_v47 = vpop.permute.xlu2 %2530 }
 0x326   : > { %3156 = vrot.lane.b32.xlu0 %v7473_v46, %s6598_s13 }
 0x327   : > { %5699 = vrot.lane.b32.xlu1 %v7636_v42, %s6598_s13 }
 0x329   : > { %5341 = vmatpush.xpose.msk.msra.mxu3 %vm1221_vm1, %v7103_v37  ;;  %v7680_v37 = vpop.permute.xlu1 %2492 }
 0x32c   : > { %5342 = vmatmul.msk.f32.vlgmr.msra.gmra.mxu3 %vm1221_vm1, %v7132_v51  ;;  %v1855_v51 = vpop.permute.xlu0 %1854 }
 0x32d   : > { %1830 = vrot.lane.b32.xlu2 %v7666_v11, %s6596_s17  ;;  %v7697_v23 = vpop.permute.xlu2 %1824 }
 0x32e   : > { %5664 = vrot.lane.b32.xlu0 %v7668_v17, %s6596_s17 }
 0x32f   : > { %2504 = vrot.lane.b32.xlu1 %v7666_v11, %s6597_s22 }
 0x331   : > { %v7694_v1 = vpop.permute.xlu1 %3186 }
 0x334   : > { %5343 = vmatmul.msk.f32.gmra.mxu3 %vm1221_vm1, %v7186_v3  ;;  %v3191_v3 = vpop.permute.xlu0 %3190 }
 0x335   : > { %5719 = vrot.lane.b32.xlu2 %v7544_v41, %s6598_s13 }
 0x336   : > { %2502 = vrot.lane.b32.xlu0 %v7529_v22, %s6597_s22 }
 0x337   : > { %3162 = vrot.lane.b32.xlu1 %v7666_v11, %s6598_s13 }
 0x339   : > { %v7703_v6 = vpop.permute.xlu1 %1822 }
 0x33c   : > { %5344 = vmatmul.msk.f32.gmra.mxu3 %vm1221_vm1, %v7202_v10  ;;  %v7710_v10 = vpop.permute.xlu0 %1826 }
 0x33e   : > { %5679 = vrot.lane.b32.xlu0 %v5643_v25, %s6598_s13 }
 0x341   : > { %v3189_v7 = vpop.permute.xlu1 %3188 }
 0x344   : > { %5345 = vmatmul.msk.f32.gmra.mxu3 %vm1221_vm1, %v7231_v18 }
 0x346   : > { %5684 = vrot.lane.b32.xlu0 %v7587_v48, %s6597_s22 }
 0x347   : > { %v1863_v36 = vpop.permute.xlu2 %1862 }
 0x348   : > { %5358 = vmatpush.xpose.msk.msrb.mxu1 %vm1221_vm1, %v1863_v36  ;;  %v10333_v36 = vld [vmem:[#allocation33_spill] sm:$0xff] }
 0x349   : > { %v1859_v48 = vpop.permute.xlu1 %1858 }
 0x34c   : > { %5346 = vmatmul.msk.f32.gmra.mxu3 %vm1221_vm1, %v7250_v29 }
 0x34e   : > { %5704 = vrot.lane.b32.xlu0 %v7563_v5, %s6597_s22 }
 0x34f   : > { %v7712_v20 = vpop.permute.xlu2 %3150 }
 0x354   : > { %5347 = vmatmul.msk.f32.gmra.mxu3 %vm1221_vm1, %v7268_v38 }
 0x356   : > { %5709 = vrot.lane.b32.xlu0 %v7583_v43, %s6598_s13 }
 0x357   : > { %v1861_v18 = vpop.permute.xlu0 %1860  ;;  %v7724_v29 = vpop.permute.xlu2 %5649 }
 0x358   : > { %5359 = vmatpush.xpose.msk.msrb.mxu1 %vm1221_vm1, %v1861_v18 }
 0x35c   : > { %5348 = vmatmul.msk.f32.gmra.mxu3 %vm1221_vm1, %v7287_v21  ;;  %5360 = vmatpush.xpose.msk.msrb.mxu1 %vm1221_vm1, %v1859_v48 }
 0x35e   : > { %2536 = vrot.lane.b32.xlu0 %v7525_v34, %s6597_s22 }
 0x35f   : > { %v7734_v21 = vpop.permute.xlu2 %5659 }
 0x360   : > { %v3193_v5 = vpop.permute.xlu0 %3192  ;;  %5361 = vmatpush.xpose.msk.msrb.mxu1 %vm1221_vm1, %v1857_v14 }
 0x364   : > { %5349 = vmatmul.msk.f32.gmra.mxu3 %vm1221_vm1, %v7329_v56  ;;  %5362 = vmatpush.xpose.msk.msrb.mxu1 %vm1221_vm1, %v1855_v51 }
 0x366   : > { %5714 = vrot.lane.b32.xlu0 %v7544_v41, %s6596_s17 }
 0x367   : > { %v7747_v34 = vpop.permute.xlu2 %3158 }
 0x368   : > { %v7732_v38 = vpop.permute.xlu0 %2494  ;;  %5363 = vmatpush.xpose.msk.msrb.mxu1 %vm1221_vm1, %v7607_v2  ;;  %v10326_v2 = vld [vmem:[#allocation56_spill] sm:$0xff] }
 0x36c   : > { %5350 = vmatmul.msk.f32.gmra.mxu3 %vm1221_vm1, %v7348_v24  ;;  %5364 = vmatpush.xpose.msk.msrb.mxu1 %vm1221_vm1, %v1851_v26  ;;  %v10329_v26 = vld [vmem:[#allocation55_spill] sm:$0xff] }
 0x36e   : > { %5724 = vrot.lane.b32.xlu0 %v7544_v41, %s6597_s22 }
 0x36f   : > { %v7757_v24 = vpop.permute.xlu2 %3160 }
 0x370   : > { %v7743_v56 = vpop.permute.xlu0 %3152  ;;  %5365 = vmatpush.xpose.msk.msrb.mxu1 %vm1221_vm1, %v7548_v61 }
 0x374   : > { %5351 = vmatmul.msk.f32.gmra.mxu3 %vm1221_vm1, %v7378_v49  ;;  %5366 = vmatpush.xpose.msk.msrb.mxu1 %vm1221_vm1, %v7510_v13 }
 0x377   : > { %v7771_v49 = vpop.permute.xlu2 %5689 }
 0x378   : > { %v7753_v9 = vpop.permute.xlu0 %5639  ;;  %5367 = vmatpush.xpose.msk.msrb.mxu1 %vm1221_vm1, %v7541_v55 }
 0x37c   : > { %5352 = vmatmul.msk.f32.gmra.mxu3 %vm1221_vm1, %v7445_v62  ;;  %5368 = vmatpush.xpose.msk.msrb.mxu1 %vm1221_vm1, %v7496_v45 }
 0x37f   : > { %v3195_v45 = vpop.permute.xlu2 %3194 }
 0x380   : > { %v7763_v61 = vpop.permute.xlu0 %5644  ;;  %5369 = vmatpush.xpose.msk.msrb.mxu1 %vm1221_vm1, %v7443_v57 }
 0x384   : > { %5353 = vmatmul.msk.f32.gmra.mxu3 %vm1221_vm1, %v7411_v52  ;;  %5370 = vmatpush.xpose.msk.msrb.mxu1 %vm1221_vm1, %v7492_v53  ;;  %v10322_v52 = vld [vmem:[#allocation24_spill] sm:$0xff] }
 0x388   : > { %v7773_v13 = vpop.permute.xlu0 %3154  ;;  %5371 = vmatpush.xpose.msk.msrb.mxu1 %vm1221_vm1, %v7376_v0 }
 0x38c   : > { %5354 = vmatmul.msk.f32.gmra.mxu3 %vm1221_vm1, %v7473_v46  ;;  %5372 = vmatpush.xpose.msk.msrb.mxu1 %vm1221_vm1, %v7346_v40  ;;  %v2533_v46 = vpop.permute.xlu1 %2532  ;;  %v10323_v40 = vld [vmem:[#allocation30_spill] sm:$0xff] }
 0x390   : > { %v7781_v41 = vpop.permute.xlu0 %5654  ;;  %5373 = vmatpush.xpose.msk.msrb.mxu1 %vm1221_vm1, %v7360_v50 }
 0x393   : > { %5374 = vmatmul.msk.f32.vlgmr.msrb.gmra.mxu1 %vm1221_vm1, %v10322_v52  ;;  %v10336_v52 = vld [vmem:[#allocation31_spill] sm:$0xff] }
 0x394   : > { %5422 = vmatpush.xpose.msk.msra.mxu1 %vm1221_vm1, %v3195_v45  ;;  %5355 = vmatmul.msk.f32.gmra.mxu3 %vm1221_vm1, %v7486_v8  ;;  %v2535_v57 = vpop.permute.xlu1 %2534  ;;  %v10324_v8 = vld [vmem:[#allocation42_spill] sm:$0xff]  ;;  %v10335_v45 = vld [vmem:[#allocation57_spill] sm:$0xff] }
 0x398   : > { %5423 = vmatpush.xpose.msk.msra.mxu1 %vm1221_vm1, %v3193_v5  ;;  %v7791_v0 = vpop.permute.xlu0 %3156  ;;  %v10334_v5 = vld [vmem:[#allocation28_spill] sm:$0xff] }
 0x39b   : > { %5375 = vmatmul.msk.f32.gmra.mxu1 %vm1221_vm1, %v10323_v40 }
 0x39c   : > { %5424 = vmatpush.xpose.msk.msra.mxu1 %vm1221_vm1, %v3191_v3  ;;  %5356 = vmatmul.msk.f32.gmra.mxu3 %vm1221_vm1, %v7529_v22  ;;  %v7813_v53 = vpop.permute.xlu1 %1828  ;;  %v10325_v22 = vld [vmem:[#allocation39_spill] sm:$0xff]  ;;  %v10332_v3 = vld [vmem:[#allocation54_spill] sm:$0xff] }
 0x3a0   : > { %5425 = vmatpush.xpose.msk.msra.mxu1 %vm1221_vm1, %v3189_v7  ;;  %v7799_v50 = vpop.permute.xlu0 %5664 }
 0x3a3   : > { %5376 = vmatmul.msk.f32.gmra.mxu1 %vm1221_vm1, %v10324_v8 }
 0x3a4   : > { %5426 = vmatpush.xpose.msk.msra.mxu1 %vm1221_vm1, %v7694_v1  ;;  %5357 = vmatmul.msk.f32.gmra.mxu3 %vm1221_vm1, %v7666_v11  ;;  %v10330_v11 = vld [vmem:[#allocation43_spill] sm:$0xff] }
 0x3a5   : > { %v10331_v1 = vld [vmem:[#allocation35_spill] sm:$0xff] }
 0x3a8   : > { %5427 = vmatpush.xpose.msk.msra.mxu1 %vm1221_vm1, %v7630_v39  ;;  %v7809_v62 = vpop.permute.xlu0 %2502  ;;  %v10327_v39 = vld [vmem:[#allocation46_spill] sm:$0xff] }
 0x3ab   : > { %5377 = vmatmul.msk.f32.gmra.mxu1 %vm1221_vm1, %v10325_v22 }
 0x3ac   : > { %5428 = vmatpush.xpose.msk.msra.mxu1 %vm1221_vm1, %v7557_v33  ;;  %v7828_v33 = vpop.permute.xlu1 %2496 }
 0x3af   : > { %v7819_v55 = vpop.f32.mrf.mxu3 }
 0x3b0   : > { %5429 = vmatpush.xpose.msk.msra.mxu1 %vm1221_vm1, %v7574_v31  ;;  %v7821_v25 = vpop.permute.xlu0 %5679  ;;  %1383 = vmax.xlane.f32.xlu1 %v7819_v55 }
 0x3b3   : > { %5378 = vmatmul.msk.f32.gmra.mxu1 %vm1221_vm1, %v10327_v39 }
 0x3b4   : > { %5430 = vmatpush.xpose.msk.msra.mxu1 %vm1221_vm1, %v10326_v2  ;;  %v7843_v14 = vpop.permute.xlu1 %2498 }
 0x3b7   : > { %v7832_v27 = vpop.f32.mrf.mxu3 }
 0x3b8   : > { %5431 = vmatpush.xpose.msk.msra.mxu1 %vm1221_vm1, %v7559_v19  ;;  %v7834_v31 = vpop.permute.xlu0 %5684  ;;  %1385 = vmax.xlane.f32.xlu0 %v7832_v27 }
 0x3bb   : > { %5379 = vmatmul.msk.f32.gmra.mxu1 %vm1221_vm1, %v10329_v26 }
 0x3bc   : > { %5432 = vmatpush.xpose.msk.msra.mxu1 %vm1221_vm1, %v10328_v32  ;;  %v7860_v48 = vpop.permute.xlu1 %2500 }
 0x3bf   : > { %v7845_v51 = vpop.f32.mrf.mxu3 }
 0x3c0   : > { %5433 = vmatpush.xpose.msk.msra.mxu1 %vm1221_vm1, %v10330_v11  ;;  %v7847_v19 = vpop.permute.xlu0 %5704  ;;  %1387 = vmax.xlane.f32.xlu2 %v7845_v51 }
 0x3c3   : > { %5380 = vmatmul.msk.f32.gmra.mxu1 %vm1221_vm1, %v10332_v3 }
 0x3c4   : > { %5434 = vmatpush.xpose.msk.msra.mxu1 %vm1221_vm1, %v10331_v1  ;;  %v7873_v22 = vpop.permute.xlu1 %5669 }
 0x3c7   : > { %v7856_v7 = vpop.f32.mrf.mxu3 }
 0x3c8   : > { %5435 = vmatpush.xpose.msk.msra.mxu1 %vm1221_vm1, %v10333_v36  ;;  %v7858_v18 = vpop.permute.xlu0 %5709  ;;  %1389 = vmax.xlane.f32.xlu0 %v7856_v7 }
 0x3cb   : > { %5381 = vmatmul.msk.f32.gmra.mxu1 %vm1221_vm1, %v10335_v45 }
 0x3cc   : > { %5436 = vmatpush.xpose.msk.msra.mxu1 %vm1221_vm1, %v10334_v5  ;;  %v7884_v11 = vpop.permute.xlu1 %5674  ;;  %v5651_v5 = vunpack.i.l.bf16 %v7724_v29 }
 0x3cf   : > { %v7869_v40 = vpop.f32.mrf.mxu3 }
 0x3d0   : > { %5437 = vmatpush.xpose.msk.msra.mxu1 %vm1221_vm1, %v10336_v52  ;;  %v2537_v8 = vpop.permute.xlu0 %2536  ;;  %1391 = vmax.xlane.f32.xlu1 %v7869_v40  ;;  %v5687_v52 = vunpack.i.h.bf16 %v7834_v31 }
 0x3d1   : > { %5390 = vmatpush.xpose.msk.msrb.mxu3 %vm1221_vm1, %v2537_v8 }
 0x3d3   : > { %5382 = vmatmul.msk.f32.gmra.mxu1 %vm1221_vm1, %v7647_v58  ;;  %v5641_v58 = vunpack.i.l.bf16 %v7753_v9 }
 0x3d4   : > { %v5695_v45 = vpop.permute.xlu1 %5694 }
 0x3d5   : > { %5391 = vmatpush.xpose.msk.msrb.mxu3 %vm1221_vm1, %v2535_v57  ;;  %v5642_v57 = vunpack.i.h.bf16 %v7753_v9  ;;  %v5686_v9 = vunpack.i.l.bf16 %v7834_v31  ;;  %v5696_v8 = vunpack.i.l.bf16 %v5695_v45  ;;  %v5661_v31 = vunpack.i.l.bf16 %v7734_v21 }
 0x3d7   : > { %v7878_v2 = vpop.f32.mrf.mxu3 }
 0x3d8   : > { %v5715_v39 = vpop.permute.xlu0 %5714  ;;  %1393 = vmax.xlane.f32.xlu1 %v7878_v2 }
 0x3d9   : > { %5392 = vmatpush.xpose.msk.msrb.mxu3 %vm1221_vm1, %v2533_v46  ;;  %v5716_v32 = vunpack.i.l.bf16 %v5715_v39  ;;  %v5717_v26 = vunpack.i.h.bf16 %v5715_v39  ;;  %v5657_v39 = vunpack.i.h.bf16 %v7781_v41 }
 0x3db   : > { %2409 = vmatpush.msrb.mxu2 %v5716_v32  ;;  %5383 = vmatmul.msk.f32.gmra.mxu1 %vm1221_vm1, %v7581_v15  ;;  %v5646_v15 = vunpack.i.l.bf16 %v7763_v61  ;;  %v5706_v32 = vunpack.i.l.bf16 %v7847_v19 }
 0x3dd   : > { %2410 = vmatpush.msrb.mxu2 %v5717_v26  ;;  %5393 = vmatpush.xpose.msk.msrb.mxu3 %vm1221_vm1, %v7682_v47  ;;  %v5647_v47 = vunpack.i.h.bf16 %v7763_v61  ;;  %v5707_v26 = vunpack.i.h.bf16 %v7847_v19  ;;  %v5671_v19 = vunpack.i.l.bf16 %v7873_v22 }
 0x3df   : > { %2411 = vmatpush.msrb.mxu2 %v5641_v58  ;;  %v7890_v1 = vpop.f32.mrf.mxu3  ;;  %v10337_v58 = vld [vmem:[#allocation50_spill] sm:$0xff] }
 0x3e0   : > { %v5725_v46 = vpop.permute.xlu0 %5724  ;;  %1395 = vmax.xlane.f32.xlu0 %v7890_v1 }
 0x3e1   : > { %v5726_v3 = vunpack.i.l.bf16 %v5725_v46  ;;  %2412 = vmatpush.msrb.mxu2 %v5642_v57  ;;  %5394 = vmatpush.xpose.msk.msrb.mxu3 %vm1221_vm1, %v7649_v63  ;;  %v5727_v36 = vunpack.i.h.bf16 %v5725_v46  ;;  %v5652_v63 = vunpack.i.h.bf16 %v7724_v29  ;;  %v5697_v29 = vunpack.i.h.bf16 %v5695_v45 }
 0x3e2   : > { %v5672_v57 = vunpack.i.h.bf16 %v7873_v22  ;;  %v10339_v22 = vld [vmem:[#allocation44_spill] sm:$0xff]  ;;  %v5692_v45 = vunpack.i.h.bf16 %v7771_v49 }
 0x3e3   : > { %2413 = vmatpush.msrb.mxu2 %v5646_v15  ;;  %3067 = vmatpush.msra.mxu0 %v5726_v3  ;;  %v5677_v15 = vunpack.i.h.bf16 %v7884_v11 }
 0x3e4   : > { %5384 = vmatmul.msk.f32.gmra.mxu1 %vm1221_vm1, %v7678_v35  ;;  %v5656_v35 = vunpack.i.l.bf16 %v7781_v41 }
 0x3e5   : > { %2414 = vmatpush.msrb.mxu2 %v5647_v47  ;;  %3068 = vmatpush.msra.mxu0 %v5727_v36  ;;  %v5681_v36 = vunpack.i.l.bf16 %v7821_v25 }
 0x3e6   : > { %5395 = vmatpush.xpose.msk.msrb.mxu3 %vm1221_vm1, %v7662_v4  ;;  %v7911_v4 = vpop.permute.xlu2 %1830 }
 0x3e7   : > { %2415 = vmatpush.msrb.mxu2 %v5651_v5  ;;  %3069 = vmatpush.msra.mxu0 %v5686_v9  ;;  %v7905_v61 = vpop.f32.mrf.mxu3  ;;  %v5682_v9 = vunpack.i.h.bf16 %v7821_v25  ;;  %v10340_v5 = vld [vmem:[#allocation36_spill] sm:$0xff] }
 0x3e8   : > { %1397 = vmax.xlane.f32.xlu0 %v7905_v61 }
 0x3e9   : > { %2416 = vmatpush.msrb.mxu2 %v5652_v63  ;;  %3070 = vmatpush.msra.mxu0 %v5687_v52  ;;  %v10341_v63 = vld [vmem:[#allocation40_spill] sm:$0xff] }
 0x3ea   : > { %5396 = vmatpush.xpose.msk.msrb.mxu3 %vm1221_vm1, %v7640_v44  ;;  %v5662_v44 = vunpack.i.h.bf16 %v7734_v21 }
 0x3eb   : > { %2417 = vmatpush.msrb.mxu2 %v5656_v35  ;;  %3071 = vmatpush.msra.mxu0 %v5696_v8  ;;  %v10342_v8 = vld [vmem:[#allocation34_spill] sm:$0xff] }
 0x3ec   : > { %5385 = vmatmul.msk.f32.gmra.mxu1 %vm1221_vm1, %v7703_v6  ;;  %v5666_v6 = vunpack.i.l.bf16 %v7799_v50 }
 0x3ed   : > { %2418 = vmatpush.msrb.mxu2 %v5657_v39  ;;  %3072 = vmatpush.msra.mxu0 %v5697_v29  ;;  %v10343_v39 = vld [vmem:[#allocation25_spill] sm:$0xff] }
 0x3ee   : > { %5397 = vmatpush.xpose.msk.msrb.mxu3 %vm1221_vm1, %v7624_v54  ;;  %v5667_v54 = vunpack.i.h.bf16 %v7799_v50  ;;  %v5720_v21 = vpop.permute.xlu2 %5719  ;;  %v10338_v50 = vld [vmem:[#allocation48_spill] sm:$0xff] }
 0x3ef   : > { %2419 = vmatpush.msrb.mxu2 %v5661_v31  ;;  %3073 = vmatpush.msra.mxu0 %v5706_v32  ;;  %v7922_v41 = vpop.f32.mrf.mxu3  ;;  %v5721_v46 = vunpack.i.l.bf16 %v5720_v21  ;;  %v10344_v31 = vld [vmem:[#allocation26_spill] sm:$0xff] }
 0x3f0   : > { %1399 = vmax.xlane.f32.xlu1 %v7922_v41 }
 0x3f1   : > { %2420 = vmatpush.msrb.mxu2 %v5662_v44  ;;  %3074 = vmatpush.msra.mxu0 %v5707_v26  ;;  %v10345_v26 = vld [vmem:[#allocation27_spill] sm:$0xff] }
 0x3f2   : > { %5398 = vmatpush.xpose.msk.msrb.mxu3 %vm1221_vm1, %v7605_v60  ;;  %v5722_v60 = vunpack.i.h.bf16 %v5720_v21  ;;  %v10347_v21 = vld [vmem:[#allocation29_spill] sm:$0xff] }
 0x3f3   : > { %2421 = vmatpush.msrb.mxu2 %v5666_v6 }
 0x3f4   : > { %5386 = vmatmul.msk.f32.gmra.mxu1 %vm1221_vm1, %v7697_v23  ;;  %v5676_v23 = vunpack.i.l.bf16 %v7884_v11  ;;  %v5700_v11 = vpop.permute.xlu1 %5699 }
 0x3f5   : > { %2422 = vmatpush.msrb.mxu2 %v5667_v54  ;;  %v5701_v52 = vunpack.i.l.bf16 %v5700_v11  ;;  %v5702_v25 = vunpack.i.h.bf16 %v5700_v11  ;;  %v10355_v11 = vld [vmem:[#allocation51_spill] sm:$0xff] }
 0x3f6   : > { %5399 = vmatpush.xpose.msk.msrb.mxu3 %vm1221_vm1, %v10337_v58  ;;  %v10348_v58 = vld [vmem:[#allocation32_spill] sm:$0xff] }
 0x3f7   : > { %2423 = vmatpush.msrb.mxu2 %v5671_v19  ;;  %v7935_v3 = vpop.f32.mrf.mxu3 }
 0x3f8   : > { %1401 = vmax.xlane.f32.xlu0 %v7935_v3 }
 0x3f9   : > { %2424 = vmatpush.msrb.mxu2 %v5672_v57 }
 0x3fa   : > { %5400 = vmatpush.xpose.msk.msrb.mxu3 %vm1221_vm1, %v10338_v50 }
 0x3fb   : > { %3725 = vmatpush.msra.mxu2 %v5721_v46  ;;  %v10349_v46 = vld [vmem:[#allocation45_spill] sm:$0xff] }
 0x3fc   : > { %5387 = vmatmul.msk.f32.gmra.mxu1 %vm1221_vm1, %v7710_v10  ;;  %v5691_v10 = vunpack.i.l.bf16 %v7771_v49  ;;  %v5712_v49 = vunpack.i.h.bf16 %v7858_v18  ;;  %v2505_v44 = vpop.permute.xlu1 %2504 }
 0x3fd   : > { %3726 = vmatpush.msra.mxu2 %v5722_v60 }
 0x3fe   : > { %5401 = vmatpush.xpose.msk.msrb.mxu3 %vm1221_vm1, %v10339_v22  ;;  %v10351_v22 = vld [vmem:[#allocation38_spill] sm:$0xff] }
 0x3ff   : > { %3727 = vmatpush.msra.mxu2 %v5676_v23  ;;  %v7947_v47 = vpop.f32.mrf.mxu3 }
 0x400   : > { %1403 = vmax.xlane.f32.xlu0 %v7947_v47 }
 0x401   : > { %3728 = vmatpush.msra.mxu2 %v5677_v15  ;;  %v10350_v15 = vld [vmem:[#allocation41_spill] sm:$0xff] }
 0x402   : > { %5402 = vmatpush.xpose.msk.msrb.mxu3 %vm1221_vm1, %v10340_v5  ;;  %v10352_v5 = vld [vmem:[#allocation49_spill] sm:$0xff] }
 0x403   : > { %3729 = vmatpush.msra.mxu2 %v5681_v36 }
 0x404   : > { %5388 = vmatmul.msk.f32.gmra.mxu1 %vm1221_vm1, %v7813_v53  ;;  %v5711_v53 = vunpack.i.l.bf16 %v7858_v18  ;;  %v10346_v18 = vld [vmem:[#allocation37_spill] sm:$0xff]  ;;  %v3163_v54 = vpop.permute.xlu1 %3162 }
 0x405   : > { %3730 = vmatpush.msra.mxu2 %v5682_v9 }
 0x406   : > { %5403 = vmatpush.xpose.msk.msrb.mxu3 %vm1221_vm1, %v10341_v63  ;;  %v10357_v63 = vld [vmem:[#allocation59_spill] sm:$0xff] }
 0x407   : > { %3731 = vmatpush.msra.mxu2 %v5691_v10  ;;  %v7959_v35 = vpop.f32.mrf.mxu3  ;;  %v10354_v10 = vld [vmem:[#allocation58_spill] sm:$0xff] }
 0x408   : > { %1405 = vmax.xlane.f32.xlu2 %v7959_v35 }
 0x409   : > { %3732 = vmatpush.msra.mxu2 %v5692_v45  ;;  %v10356_v45 = vld [vmem:[#allocation53_spill] sm:$0xff] }
 0x40a   : > { %5404 = vmatpush.xpose.msk.msrb.mxu3 %vm1221_vm1, %v10342_v8 }
 0x40b   : > { %3733 = vmatpush.msra.mxu2 %v5701_v52 }
 0x40c   : > { %5389 = vmatmul.msk.f32.gmra.mxu1 %vm1221_vm1, %v7911_v4 }
 0x40d   : > { %3734 = vmatpush.msra.mxu2 %v5702_v25 }
 0x40e   : > { %5405 = vmatpush.xpose.msk.msrb.mxu3 %vm1221_vm1, %v10343_v39 }
 0x40f   : > { %3735 = vmatpush.msra.mxu2 %v5711_v53  ;;  %v7970_v29 = vpop.f32.mrf.mxu3 }
 0x410   : > { %1407 = vmax.xlane.f32.xlu2 %v7970_v29  ;;  %v7975_v32 = vpop.f32.mrf.mxu1 }
 0x411   : > { %3736 = vmatpush.msra.mxu2 %v5712_v49  ;;  %5406 = vmatmul.msk.f32.vlgmr.msrb.gmra.mxu3 %vm1221_vm1, %v10344_v31 }
 0x414   : > { %5438 = vmatmul.msk.f32.vlgmr.msra.gmra.mxu1 %vm1221_vm1, %v10345_v26 }
 0x417   : > { %v7979_v4 = vpop.f32.mrf.mxu3 }
 0x418   : > { %1409 = vmax.xlane.f32.xlu1 %v7979_v4  ;;  %v7984_v6 = vpop.f32.mrf.mxu1  ;;  %1993 = vmax.xlane.f32.xlu2 %v7975_v32 }
 0x419   : > { %5407 = vmatmul.msk.f32.gmra.mxu3 %vm1221_vm1, %v10346_v18  ;;  %1995 = vmax.xlane.f32.xlu0 %v7984_v6 }
 0x41c   : > { %5439 = vmatmul.msk.f32.gmra.mxu1 %vm1221_vm1, %v10347_v21 }
 0x41f   : > { %v7990_v19 = vpop.f32.mrf.mxu3 }
 0x420   : > { %1411 = vmax.xlane.f32.xlu2 %v7990_v19  ;;  %v8007_v9 = vpop.f32.mrf.mxu1 }
 0x421   : > { %5408 = vmatmul.msk.f32.gmra.mxu3 %vm1221_vm1, %v10348_v58 }
 0x423   : > { %v1384_v57 = vpop.xlane.xlu1 %1383 }
 0x424   : > { %5440 = vmatmul.msk.f32.gmra.mxu1 %vm1221_vm1, %v10349_v46  ;;  %v1415_v60 = vsub.f32 %v7819_v55, %v1384_v57  ;;  %v10353_v55 = vld [vmem:[#allocation47_spill] sm:$0xff] }
 0x426   : > { %v1431_v50 = vmul.f32 1.442695, %v1415_v60 }
 0x427   : > { %v7998_v23 = vpop.f32.mrf.mxu3 }
 0x428   : > { %5888 = vpow2.f32 %v1431_v50  ;;  %1413 = vmax.xlane.f32.xlu0 %v7998_v23  ;;  %v8031_v52 = vpop.f32.mrf.mxu1 }
 0x429   : > { %5409 = vmatmul.msk.f32.gmra.mxu3 %vm1221_vm1, %v10350_v15 }
 0x42c   : > { %5441 = vmatmul.msk.f32.gmra.mxu1 %vm1221_vm1, %v10351_v22 }
 0x42e   : > { %v8005_v36 = vpop.eup %5888 }
 0x42f   : > { %1463 = vadd.xlane.f32.xlu1 %v8005_v36 }
 0x430   : > { %1997 = vmax.xlane.f32.xlu0 %v8007_v9 }
 0x431   : > { %5410 = vmatmul.msk.f32.gmra.mxu3 %vm1221_vm1, %v10352_v5 }
 0x434   : > { %5442 = vmatmul.msk.f32.gmra.mxu1 %vm1221_vm1, %v10353_v55 }
 0x439   : > { %5411 = vmatmul.msk.f32.gmra.mxu3 %vm1221_vm1, %v10354_v10 }
 0x43c   : > { %5443 = vmatmul.msk.f32.gmra.mxu1 %vm1221_vm1, %v10355_v11 }
 0x441   : > { %5412 = vmatmul.msk.f32.gmra.mxu3 %vm1221_vm1, %v10356_v45 }
 0x444   : > { %5444 = vmatmul.msk.f32.gmra.mxu1 %vm1221_vm1, %v7585_v16  ;;  %v8037_v16 = vpop.f32.mrf.mxu1 }
 0x449   : > { %5413 = vmatmul.msk.f32.gmra.mxu3 %vm1221_vm1, %v7539_v30 }
 0x44c   : > { %5445 = vmatmul.msk.f32.gmra.mxu1 %vm1221_vm1, %v10357_v63  ;;  %v8045_v30 = vpop.f32.mrf.mxu1 }
 0x451   : > { %5414 = vmatmul.msk.f32.gmra.mxu3 %vm1221_vm1, %v7599_v59 }
 0x454   : > { %5446 = vmatmul.msk.f32.gmra.mxu1 %vm1221_vm1, %v7620_v12  ;;  %v8053_v59 = vpop.f32.mrf.mxu1 }
 0x459   : > { %5415 = vmatmul.msk.f32.gmra.mxu3 %vm1221_vm1, %v7680_v37  ;;  %v1392_v37 = vpop.xlane.xlu1 %1391 }
 0x45a   : > { %v1419_v15 = vsub.f32 %v7869_v40, %v1392_v37 }
 0x45c   : > { %5447 = vmatmul.msk.f32.gmra.mxu1 %vm1221_vm1, %v7712_v20  ;;  %v8059_v12 = vpop.f32.mrf.mxu1  ;;  %v1439_v63 = vmul.f32 1.442695, %v1419_v15 }
 0x461   : > { %5416 = vmatmul.msk.f32.gmra.mxu3 %vm1221_vm1, %v7732_v38  ;;  %v1394_v38 = vpop.xlane.xlu1 %1393 }
 0x462   : > { %v1420_v49 = vsub.f32 %v7878_v2, %v1394_v38 }
 0x464   : > { %5448 = vmatmul.msk.f32.gmra.mxu1 %vm1221_vm1, %v7743_v56  ;;  %v8065_v20 = vpop.f32.mrf.mxu1  ;;  %v1441_v31 = vmul.f32 1.442695, %v1420_v49 }
 0x469   : > { %5417 = vmatmul.msk.f32.gmra.mxu3 %vm1221_vm1, %v7828_v33  ;;  %v1388_v33 = vpop.xlane.xlu2 %1387 }
 0x46a   : > { %v1417_v8 = vsub.f32 %v7845_v51, %v1388_v33 }
 0x46c   : > { %5449 = vmatmul.msk.f32.gmra.mxu1 %vm1221_vm1, %v7773_v13  ;;  %v8069_v56 = vpop.f32.mrf.mxu1  ;;  %v8071_v13 = vpop.xlane.xlu1 %1399  ;;  %v1435_v39 = vmul.f32 1.442695, %v1417_v8 }
 0x471   : > { %5418 = vmatmul.msk.f32.gmra.mxu3 %vm1221_vm1, %v7843_v14 }
 0x474   : > { %5450 = vmatmul.msk.f32.gmra.mxu1 %vm1221_vm1, %v7791_v0  ;;  %v8082_v53 = vpop.f32.mrf.mxu1 }
 0x479   : > { %5419 = vmatmul.msk.f32.gmra.mxu3 %vm1221_vm1, %v7860_v48 }
 0x47c   : > { %5451 = vmatmul.msk.f32.gmra.mxu1 %vm1221_vm1, %v7747_v34  ;;  %v1386_v34 = vpop.xlane.xlu0 %1385  ;;  %v8095_v51 = vpop.f32.mrf.mxu1 }
 0x481   : > { %5420 = vmatmul.msk.f32.gmra.mxu3 %vm1221_vm1, %v7809_v62  ;;  %v1416_v62 = vsub.f32 %v7832_v27, %v1386_v34 }
 0x484   : > { %5452 = vmatmul.msk.f32.gmra.mxu1 %vm1221_vm1, %v7757_v24  ;;  %v1433_v24 = vmul.f32 1.442695, %v1416_v62  ;;  %v1390_v48 = vpop.xlane.xlu0 %1389  ;;  %v8109_v55 = vpop.f32.mrf.mxu1 }
 0x485   : > { %v1418_v27 = vsub.f32 %v7856_v7, %v1390_v48 }
 0x486   : > { %5890 = vpow2.f32 %v1433_v24 }
 0x489   : > { %5421 = vmatmul.msk.f32.gmra.mxu3 %vm1221_vm1, %v2505_v44  ;;  %v1437_v44 = vmul.f32 1.442695, %v1418_v27 }
 0x48b   : > { %v8077_v14 = vpop.xlane.xlu1 %1409 }
 0x48c   : > { %5453 = vmatmul.msk.f32.gmra.mxu1 %vm1221_vm1, %v3163_v54  ;;  %v8090_v54 = vpop.eup %5890  ;;  %v1396_v11 = vpop.xlane.xlu0 %1395 }
 0x48d   : > { %v1421_v37 = vsub.f32 %v7890_v1, %v1396_v11  ;;  %v8117_v24 = vpop.f32.mrf.mxu1  ;;  %v1406_v1 = vpop.xlane.xlu2 %1405 }
 0x48f   : > { %v1443_v33 = vmul.f32 1.442695, %v1421_v37 }
 0x494   : > { %v8073_v0 = vpop.f32.mrf.mxu3  ;;  %v1398_v48 = vpop.xlane.xlu0 %1397 }
 0x495   : > { %2667 = vmax.xlane.f32.xlu1 %v8073_v0 }
 0x49c   : > { %v8079_v25 = vpop.f32.mrf.mxu3  ;;  %v1402_v27 = vpop.xlane.xlu0 %1401 }
 0x49d   : > { %1999 = vmax.xlane.f32.xlu1 %v8031_v52  ;;  %2669 = vmax.xlane.f32.xlu2 %v8079_v25 }
 0x4a2   : > { %v1464_v26 = vpop.xlane.xlu1 %1463 }
 0x4a3   : > { %5892 = vrcp.f32 %v1464_v26  ;;  %v1506_v50 = vand.u32 2147483648, %v1464_v26  ;;  %v1504_v5 = vand.u32 2147483647, %v1464_v26  ;;  %vm1500_vm3 = vweird.f32 %v1464_v26 }
 0x4a4   : > { %v8088_v18 = vpop.f32.mrf.mxu3  ;;  %5894 = vpow2.f32 %v1435_v39 }
 0x4a5   : > { %2001 = vmax.xlane.f32.xlu2 %v8037_v16  ;;  %2671 = vmax.xlane.f32.xlu0 %v8088_v18  ;;  %5896 = vpow2.f32 %v1441_v31  ;;  %v1507_v45 = vor.u32 1.1754944e-38, %v1506_v50  ;;  %vm1505_vm5 = vcmp.eq.f32.partialorder %v1504_v5, 8.507059e+37  ;;  %v8130_v31 = vpop.f32.mrf.mxu1  ;;  %v1422_v50 = vsub.f32 %v7905_v61, %v1398_v48 }
 0x4a6   : > { %1465 = vadd.xlane.f32.xlu1 %v8090_v54  ;;  %5898 = vpow2.f32 %v1437_v44  ;;  %v1423_v44 = vsub.f32 %v7922_v41, %v8071_v13  ;;  %v1426_v61 = vsub.f32 %v7959_v35, %v1406_v1 }
 0x4a7   : > { %5900 = vpow2.f32 %v1439_v63  ;;  %v1445_v13 = vmul.f32 1.442695, %v1422_v50 }
 0x4a8   : > { %5902 = vpow2.f32 %v1443_v33 }
 0x4a9   : > { %v5893_v7 = vpop.eup %5892 }
 0x4aa   : > { %v8097_v2 = vpop.eup %5894  ;;  %v1496_v21 = vmul.f32 %v5893_v7, %v1464_v26  ;;  %vm1501_vm2 = vweird.f32 %v5893_v7  ;;  %v1424_v26 = vsub.f32 %v7935_v3, %v1402_v27 }
 0x4ab   : > { %v8099_v58 = vpop.eup %5896  ;;  %vm1502_vm4 = vmor %vm1500_vm3, %vm1501_vm2 }
 0x4ac   : > { %v8101_v57 = vpop.f32.mrf.mxu3  ;;  %v8103_v46 = vpop.eup %5898  ;;  %v1497_v60 = vsub.f32 1.0, %v1496_v21  ;;  %v1449_v21 = vmul.f32 1.442695, %v1424_v26 }
 0x4ad   : > { %10358 = vst [vmem:[#allocation24_spill] sm:$0xff] %v8101_v57  ;;  %1467 = vadd.xlane.f32.xlu2 %v8097_v2  ;;  %1473 = vadd.xlane.f32.xlu0 %v8099_v58  ;;  %v8121_v49 = vpop.eup %5900  ;;  %v8143_v41 = vpop.f32.mrf.mxu1 }
 0x4ae   : > { %1469 = vadd.xlane.f32.xlu1 %v8103_v46  ;;  %v1498_v22 = vmul.f32 %v5893_v7, %v1497_v60  ;;  %v1408_v60 = vpop.xlane.xlu2 %1407 }
 0x4af   : > { %v1427_v15 = vsub.f32 %v7970_v29, %v1408_v60 }
 0x4b0   : > { %v1499_v10 = vadd.f32 %v5893_v7, %v1498_v22 }
 0x4b1   : > { %v1455_v22 = vmul.f32 1.442695, %v1427_v15 }
 0x4b2   : > { %v1503_v38 = vsel %vm1502_vm4, %v5893_v7, %v1499_v10  ;;  %v1447_v7 = vmul.f32 1.442695, %v1423_v44  ;;  %v1404_v10 = vpop.xlane.xlu0 %1403 }
 0x4b3   : > { %v1508_v62 = vsel %vm1505_vm5, %v1507_v45, %v1503_v38  ;;  %v1453_v45 = vmul.f32 1.442695, %v1426_v61 }
 0x4b4   : > { %v8111_v34 = vpop.f32.mrf.mxu3  ;;  %v1509_v40 = vmul.f32 %v8005_v36, %v1508_v62  ;;  %v8126_v36 = vpop.eup %5902  ;;  %5904 = vpow2.f32 %v1447_v7  ;;  %v1425_v62 = vsub.f32 %v7947_v47, %v1404_v10  ;;  %v1428_v7 = vsub.f32 %v7979_v4, %v8077_v14 }
 0x4b5   : > { %10359 = vst [vmem:[#allocation30_spill] sm:$0xff] %v8111_v34  ;;  %2003 = vmax.xlane.f32.xlu2 %v8045_v30  ;;  %5906 = vpow2.f32 %v1449_v21  ;;  %v8153_v11 = vpop.f32.mrf.mxu1 }
 0x4b6   : > { %2673 = vmax.xlane.f32.xlu1 %v8101_v57  ;;  %1751 = vmatmul.f32.vlgmr.msrb.gmra.mxu0 %v1509_v40  ;;  %5908 = vpow2.f32 %v1445_v13  ;;  %v1994_v29 = vpop.xlane.xlu2 %1993  ;;  %v1451_v40 = vmul.f32 1.442695, %v1425_v62  ;;  %v1457_v21 = vmul.f32 1.442695, %v1428_v7 }
 0x4b7   : > { %5910 = vpow2.f32 %v1455_v22  ;;  %v2025_v50 = vsub.f32 %v7975_v32, %v1994_v29 }
 0x4b8   : > { %5912 = vpow2.f32 %v1453_v45 }
 0x4b9   : > { %5914 = vpow2.f32 %v1451_v40  ;;  %v2041_v13 = vmul.f32 1.442695, %v2025_v50 }
 0x4ba   : > { %v8145_v3 = vpop.eup %5904  ;;  %v1996_v35 = vpop.xlane.xlu0 %1995 }
 0x4bb   : > { %v8147_v5 = vpop.eup %5906 }
 0x4bc   : > { %v8119_v8 = vpop.f32.mrf.mxu3  ;;  %v8155_v63 = vpop.eup %5908 }
 0x4bd   : > { %10360 = vst [vmem:[#allocation42_spill] sm:$0xff] %v8119_v8  ;;  %2005 = vmax.xlane.f32.xlu2 %v8053_v59  ;;  %2677 = vmax.xlane.f32.xlu0 %v8119_v8  ;;  %v8157_v38 = vpop.eup %5910  ;;  %v8163_v33 = vpop.f32.mrf.mxu1 }
 0x4be   : > { %1471 = vadd.xlane.f32.xlu1 %v8121_v49  ;;  %v1412_v37 = vpop.xlane.xlu2 %1411  ;;  %10362 = vst [vmem:[#allocation56_spill] sm:$0xff] %v8163_v33  ;;  %v8165_v48 = vpop.eup %5912 }
 0x4bf   : > { %v1429_v1 = vsub.f32 %v7990_v19, %v1412_v37  ;;  %v8171_v44 = vpop.eup %5914 }
 0x4c1   : > { %v1459_v27 = vmul.f32 1.442695, %v1429_v1 }
 0x4c2   : > { %v1414_v47 = vpop.xlane.xlu0 %1413 }
 0x4c3   : > { %5916 = vpow2.f32 %v1459_v27  ;;  %v1430_v45 = vsub.f32 %v7998_v23, %v1414_v47 }
 0x4c4   : > { %v8128_v39 = vpop.f32.mrf.mxu3  ;;  %5918 = vpow2.f32 %v1457_v21 }
 0x4c5   : > { %10361 = vst [vmem:[#allocation39_spill] sm:$0xff] %v8128_v39  ;;  %2675 = vmax.xlane.f32.xlu2 %v8111_v34  ;;  %1475 = vadd.xlane.f32.xlu0 %v8126_v36  ;;  %v8173_v26 = vpop.f32.mrf.mxu1  ;;  %5920 = vpow2.f32 %v2041_v13  ;;  %v1461_v1 = vmul.f32 1.442695, %v1430_v45 }
 0x4c6   : > { %2679 = vmax.xlane.f32.xlu1 %v8128_v39 }
 0x4c9   : > { %v8180_v60 = vpop.eup %5916 }
 0x4ca   : > { %v1998_v19 = vpop.xlane.xlu0 %1997  ;;  %v8186_v61 = vpop.eup %5918 }
 0x4cb   : > { %v2027_v15 = vsub.f32 %v8007_v9, %v1998_v19  ;;  %v8190_v4 = vpop.eup %5920  ;;  %v2026_v9 = vsub.f32 %v7984_v6, %v1996_v35 }
 0x4cd   : > { %2007 = vmax.xlane.f32.xlu2 %v8059_v12  ;;  %2011 = vmax.xlane.f32.xlu0 %v8069_v56  ;;  %v2045_v22 = vmul.f32 1.442695, %v2027_v15  ;;  %v2043_v10 = vmul.f32 1.442695, %v2026_v9  ;;  %v8197_v29 = vpop.f32.mrf.mxu1 }
 0x4ce   : > { %2013 = vmax.xlane.f32.xlu1 %v8082_v53 }
 0x4cf   : > { %5922 = vpow2.f32 %v2045_v22 }
 0x4d0   : > { %5924 = vpow2.f32 %v2043_v10 }
 0x4d5   : > { %2009 = vmax.xlane.f32.xlu2 %v8065_v20  ;;  %1479 = vadd.xlane.f32.xlu0 %v8145_v3  ;;  %v8192_v32 = vpop.eup %5922  ;;  %v8208_v35 = vpop.f32.mrf.mxu1 }
 0x4d6   : > { %1481 = vadd.xlane.f32.xlu1 %v8147_v5  ;;  %v8204_v7 = vpop.eup %5924 }
 0x4dd   : > { %2015 = vmax.xlane.f32.xlu0 %v8095_v51  ;;  %1477 = vadd.xlane.f32.xlu2 %v8155_v63  ;;  %v8220_v13 = vpop.f32.mrf.mxu1 }
 0x4de   : > { %1487 = vadd.xlane.f32.xlu1 %v8157_v38  ;;  %10364 = vst [vmem:[#allocation52_spill] sm:$0xff] %v8220_v13 }
 0x4e5   : > { %1485 = vadd.xlane.f32.xlu0 %v8165_v48  ;;  %2017 = vmax.xlane.f32.xlu2 %v8109_v55 }
 0x4e6   : > { %2023 = vmax.xlane.f32.xlu1 %v8143_v41 }
 0x4ed   : > { %2021 = vmax.xlane.f32.xlu0 %v8130_v31  ;;  %1483 = vadd.xlane.f32.xlu2 %v8171_v44 }
 0x4ee   : > { %3329 = vmax.xlane.f32.xlu1 %v8173_v26 }
 0x4f5   : > { %1491 = vadd.xlane.f32.xlu0 %v8180_v60  ;;  %2019 = vmax.xlane.f32.xlu2 %v8117_v24 }
 0x4fd   : > { %3327 = vmax.xlane.f32.xlu0 %v8163_v33  ;;  %1489 = vadd.xlane.f32.xlu2 %v8186_v61 }
 0x505   : > { %2073 = vadd.xlane.f32.xlu2 %v8190_v4  ;;  %2077 = vadd.xlane.f32.xlu0 %v8192_v32 }
 0x508   : > { %v2668_v14 = vpop.xlane.xlu1 %2667 }
 0x509   : > { %v2699_v6 = vsub.f32 %v8073_v0, %v2668_v14 }
 0x50b   : > { %v2715_v23 = vmul.f32 1.442695, %v2699_v6 }
 0x50d   : > { %3325 = vmax.xlane.f32.xlu2 %v8153_v11 }
 0x510   : > { %v2000_v62 = vpop.xlane.xlu1 %1999  ;;  %v8201_v40 = vpop.xlane.xlu2 %2669 }
 0x511   : > { %v2028_v37 = vsub.f32 %v8031_v52, %v2000_v62 }
 0x513   : > { %v2047_v27 = vmul.f32 1.442695, %v2028_v37 }
 0x515   : > { %5926 = vpow2.f32 %v2047_v27  ;;  %2075 = vadd.xlane.f32.xlu2 %v8204_v7 }
 0x516   : > { %5928 = vpow2.f32 %v1461_v1 }
 0x518   : > { %v2002_v21 = vpop.xlane.xlu2 %2001  ;;  %v8218_v50 = vpop.xlane.xlu0 %2671 }
 0x519   : > { %v1466_v19 = vpop.xlane.xlu1 %1465  ;;  %5729 = vrot.lane.b32.xlu0 %v7636_v42, %s6597_s22  ;;  %v2029_v37 = vsub.f32 %v8037_v16, %v2002_v21  ;;  %v8237_v21 = vpop.f32.mrf.mxu1 }
 0x51a   : > { %5930 = vrcp.f32 %v1466_v19  ;;  %v1521_v10 = vand.u32 2147483648, %v1466_v19  ;;  %v1519_v62 = vand.u32 2147483647, %v1466_v19  ;;  %vm1515_vm7 = vweird.f32 %v1466_v19 }
 0x51b   : > { %v8212_v52 = vpop.eup %5926  ;;  %5932 = vpow2.f32 %v2715_v23 }
 0x51c   : > { %10363 = vst [vmem:[#allocation46_spill] sm:$0xff] %v8212_v52  ;;  %v8214_v47 = vpop.eup %5928  ;;  %2079 = vadd.xlane.f32.xlu1 %v8212_v52  ;;  %v1522_v39 = vor.u32 1.1754944e-38, %v1521_v10  ;;  %vm1520_vm9 = vcmp.eq.f32.partialorder %v1519_v62, 8.507059e+37 }
 0x51d   : > { %1493 = vadd.xlane.f32.xlu2 %v8214_v47 }
 0x520   : > { %v5931_v0 = vpop.eup %5930  ;;  %v1468_v15 = vpop.xlane.xlu2 %1467 }
 0x521   : > { %v1511_v22 = vmul.f32 %v5931_v0, %v1466_v19  ;;  %5934 = vrcp.f32 %v1468_v15  ;;  %v8222_v42 = vpop.xlane.xlu1 %1469  ;;  %v8225_v14 = vpop.eup %5932  ;;  %vm1516_vm6 = vweird.f32 %v5931_v0  ;;  %v1536_v34 = vand.u32 2147483648, %v1468_v15 }
 0x522   : > { %5936 = vrcp.f32 %v8222_v42  ;;  %10365 = vst [vmem:[#allocation55_spill] sm:$0xff] %v8225_v14  ;;  %v8230_v33 = vpop.xlane.xlu0 %1473  ;;  %vm1517_vm8 = vmor %vm1515_vm7, %vm1516_vm6  ;;  %v1534_v52 = vand.u32 2147483647, %v1468_v15  ;;  %vm1530_vm11 = vweird.f32 %v1468_v15  ;;  %vm1545_vm15 = vweird.f32 %v8222_v42 }
 0x523   : > { %v1512_v9 = vsub.f32 1.0, %v1511_v22  ;;  %5938 = vrcp.f32 %v8230_v33 }
 0x524   : > { %3335 = vmax.xlane.f32.xlu1 %v8220_v13  ;;  %vm1535_vm13 = vcmp.eq.f32.partialorder %v1534_v52, 8.507059e+37 }
 0x525   : > { %2747 = vadd.xlane.f32.xlu2 %v8225_v14  ;;  %v1513_v45 = vmul.f32 %v5931_v0, %v1512_v9  ;;  %v2049_v14 = vmul.f32 1.442695, %v2029_v37 }
 0x527   : > { %v5935_v1 = vpop.eup %5934  ;;  %v1514_v27 = vadd.f32 %v5931_v0, %v1513_v45  ;;  %5940 = vpow2.f32 %v2049_v14  ;;  %v1551_v14 = vand.u32 2147483648, %v8222_v42 }
 0x528   : > { %v5937_v6 = vpop.eup %5936  ;;  %v1526_v23 = vmul.f32 %v5935_v1, %v1468_v15  ;;  %v8232_v22 = vpop.xlane.xlu2 %2003  ;;  %vm1531_vm10 = vweird.f32 %v5935_v1 }
 0x529   : > { %v1541_v8 = vmul.f32 %v5937_v6, %v8222_v42  ;;  %v8235_v57 = vpop.xlane.xlu1 %2673  ;;  %v1518_v9 = vsel %vm1517_vm8, %v5931_v0, %v1514_v27  ;;  %vm1532_vm12 = vmor %vm1530_vm11, %vm1531_vm10  ;;  %v8247_v27 = vpop.eup %5938  ;;  %vm1546_vm14 = vweird.f32 %v5937_v6  ;;  %vm1575_vm8 = vweird.f32 %v8230_v33 }
 0x52a   : > { %v1527_v13 = vsub.f32 1.0, %v1526_v23  ;;  %v1523_v16 = vsel %vm1520_vm9, %v1522_v39, %v1518_v9  ;;  %v1537_v39 = vor.u32 1.1754944e-38, %v1536_v34  ;;  %v1549_v34 = vand.u32 2147483647, %v8222_v42  ;;  %vm1547_vm0 = vmor %vm1545_vm15, %vm1546_vm14 }
 0x52b   : > { %v1542_v19 = vsub.f32 1.0, %v1541_v8  ;;  %v1524_v45 = vmul.f32 %v8090_v54, %v1523_v16  ;;  %v1571_v52 = vmul.f32 %v8247_v27, %v8230_v33  ;;  %vm1576_vm6 = vweird.f32 %v8247_v27 }
 0x52c   : > { %3337 = vmax.xlane.f32.xlu1 %v8237_v21  ;;  %v1528_v10 = vmul.f32 %v5935_v1, %v1527_v13  ;;  %vm1550_vm2 = vcmp.eq.f32.partialorder %v1549_v34, 8.507059e+37  ;;  %vm1577_vm9 = vmor %vm1575_vm8, %vm1576_vm6 }
 0x52d   : > { %1754 = vmatmul.f32.gmra.mxu0 %v1524_v45  ;;  %3331 = vmax.xlane.f32.xlu2 %v8197_v29  ;;  %v1543_v0 = vmul.f32 %v5937_v6, %v1542_v19  ;;  %v8253_v15 = vpop.eup %5940  ;;  %v2700_v19 = vsub.f32 %v8079_v25, %v8201_v40  ;;  %v8270_v40 = vpop.f32.mrf.mxu3 }
 0x52e   : > { %v1529_v62 = vadd.f32 %v5935_v1, %v1528_v10  ;;  %v1572_v10 = vsub.f32 1.0, %v1571_v52 }
 0x52f   : > { %v1544_v9 = vadd.f32 %v5937_v6, %v1543_v0 }
 0x530   : > { %v8243_v8 = vpop.xlane.xlu2 %2005  ;;  %v8245_v37 = vpop.xlane.xlu0 %2677  ;;  %v1533_v54 = vsel %vm1532_vm12, %v5935_v1, %v1529_v62 }
 0x531   : > { %v1472_v13 = vpop.xlane.xlu1 %1471  ;;  %v1538_v23 = vsel %vm1535_vm13, %v1537_v39, %v1533_v54  ;;  %v1548_v1 = vsel %vm1547_vm0, %v5937_v6, %v1544_v9  ;;  %v2717_v54 = vmul.f32 1.442695, %v2700_v19 }
 0x532   : > { %5942 = vrcp.f32 %v1472_v13  ;;  %v1539_v16 = vmul.f32 %v8097_v2, %v1538_v23  ;;  %v1552_v2 = vor.u32 1.1754944e-38, %v1551_v14  ;;  %v2030_v23 = vsub.f32 %v8045_v30, %v8232_v22 }
 0x533   : > { %v1573_v14 = vmul.f32 %v8247_v27, %v1572_v10  ;;  %v1564_v52 = vand.u32 2147483647, %v1472_v13  ;;  %vm1560_vm4 = vweird.f32 %v1472_v13 }
 0x534   : > { %v1553_v62 = vsel %vm1550_vm2, %v1552_v2, %v1548_v1  ;;  %v2051_v30 = vmul.f32 1.442695, %v2030_v23 }
 0x535   : > { %1757 = vmatmul.f32.gmra.mxu0 %v1539_v16  ;;  %2081 = vadd.xlane.f32.xlu2 %v8253_v15  ;;  %v1554_v25 = vmul.f32 %v8103_v46, %v1553_v62  ;;  %v1566_v16 = vand.u32 2147483648, %v1472_v13  ;;  %v1574_v10 = vadd.f32 %v8247_v27, %v1573_v14  ;;  %vm1565_vm7 = vcmp.eq.f32.partialorder %v1564_v52, 8.507059e+37 }
 0x537   : > { %v1567_v62 = vor.u32 1.1754944e-38, %v1566_v16 }
 0x538   : > { %v5943_v45 = vpop.eup %5942  ;;  %v8260_v0 = vpop.xlane.xlu2 %2675 }
 0x539   : > { %v8262_v42 = vpop.xlane.xlu0 %1475  ;;  %v1556_v39 = vmul.f32 %v5943_v45, %v1472_v13  ;;  %v8267_v9 = vpop.xlane.xlu1 %2679  ;;  %vm1561_vm3 = vweird.f32 %v5943_v45  ;;  %v1579_v13 = vand.u32 2147483647, %v8230_v33 }
 0x53a   : > { %5944 = vrcp.f32 %v8262_v42  ;;  %vm1562_vm5 = vmor %vm1560_vm4, %vm1561_vm3  ;;  %vm1590_vm12 = vweird.f32 %v8262_v42 }
 0x53b   : > { %v1557_v6 = vsub.f32 1.0, %v1556_v39  ;;  %5946 = vpow2.f32 %v2717_v54  ;;  %v1581_v54 = vand.u32 2147483648, %v8230_v33  ;;  %vm1580_vm10 = vcmp.eq.f32.partialorder %v1579_v13, 8.507059e+37 }
 0x53c   : > { %5948 = vpow2.f32 %v2051_v30 }
 0x53d   : > { %1760 = vmatmul.f32.gmra.mxu0 %v1554_v25  ;;  %2681 = vmax.xlane.f32.xlu2 %v8270_v40  ;;  %v1558_v34 = vmul.f32 %v5943_v45, %v1557_v6  ;;  %v1582_v33 = vor.u32 1.1754944e-38, %v1581_v54 }
 0x53f   : > { %v1559_v22 = vadd.f32 %v5943_v45, %v1558_v34 }
 0x540   : > { %v8274_v1 = vpop.eup %5944  ;;  %v2008_v19 = vpop.xlane.xlu2 %2007 }
 0x541   : > { %v1586_v46 = vmul.f32 %v8274_v1, %v8262_v42  ;;  %v2012_v2 = vpop.xlane.xlu0 %2011  ;;  %v1563_v6 = vsel %vm1562_vm5, %v5943_v45, %v1559_v22  ;;  %v8286_v14 = vpop.eup %5946  ;;  %v1578_v45 = vsel %vm1577_vm9, %v8247_v27, %v1574_v10  ;;  %vm1591_vm11 = vweird.f32 %v8274_v1 }
 0x542   : > { %v2034_v39 = vsub.f32 %v8069_v56, %v2012_v2  ;;  %v1568_v25 = vsel %vm1565_vm7, %v1567_v62, %v1563_v6  ;;  %10366 = vst [vmem:[#allocation43_spill] sm:$0xff] %v8286_v14  ;;  %v2031_v56 = vsub.f32 %v8053_v59, %v8243_v8  ;;  %v8291_v52 = vpop.xlane.xlu1 %2013  ;;  %v8300_v8 = vpop.eup %5948  ;;  %v1596_v10 = vand.u32 2147483648, %v8262_v42  ;;  %vm1592_vm13 = vmor %vm1590_vm12, %vm1591_vm11 }
 0x543   : > { %v1587_v23 = vsub.f32 1.0, %v1586_v46  ;;  %3333 = vmax.xlane.f32.xlu0 %v8208_v35  ;;  %v1569_v16 = vmul.f32 %v8121_v49, %v1568_v25  ;;  %v1583_v49 = vsel %vm1580_vm10, %v1582_v33, %v1578_v45  ;;  %v1594_v6 = vand.u32 2147483647, %v8262_v42 }
 0x544   : > { %v2059_v34 = vmul.f32 1.442695, %v2034_v39  ;;  %v2053_v46 = vmul.f32 1.442695, %v2031_v56  ;;  %v1584_v27 = vmul.f32 %v8099_v58, %v1583_v49 }
 0x545   : > { %1763 = vmatmul.f32.gmra.mxu0 %v1569_v16  ;;  %2749 = vadd.xlane.f32.xlu2 %v8286_v14  ;;  %v1588_v22 = vmul.f32 %v8274_v1, %v1587_v23  ;;  %v1597_v23 = vor.u32 1.1754944e-38, %v1596_v10  ;;  %vm1595_vm14 = vcmp.eq.f32.partialorder %v1594_v6, 8.507059e+37 }
 0x546   : > { %5950 = vpow2.f32 %v2059_v34 }
 0x547   : > { %v1589_v59 = vadd.f32 %v8274_v1, %v1588_v22 }
 0x548   : > { %v2010_v2 = vpop.xlane.xlu2 %2009 }
 0x549   : > { %v8295_v62 = vpop.xlane.xlu0 %1479  ;;  %v2033_v30 = vsub.f32 %v8065_v20, %v2010_v2  ;;  %v2032_v20 = vsub.f32 %v8059_v12, %v2008_v19  ;;  %v1593_v58 = vsel %vm1592_vm13, %v8274_v1, %v1589_v59 }
 0x54a   : > { %5952 = vrcp.f32 %v8295_v62  ;;  %v8313_v25 = vpop.xlane.xlu1 %1481  ;;  %v1598_v42 = vsel %vm1595_vm14, %v1597_v23, %v1593_v58  ;;  %vm1620_vm5 = vweird.f32 %v8295_v62 }
 0x54b   : > { %v2057_v39 = vmul.f32 1.442695, %v2033_v30  ;;  %2083 = vadd.xlane.f32.xlu0 %v8300_v8  ;;  %5954 = vpow2.f32 %v2053_v46  ;;  %v2055_v13 = vmul.f32 1.442695, %v2032_v20  ;;  %v1599_v33 = vmul.f32 %v8126_v36, %v1598_v42 }
 0x54c   : > { %v8309_v54 = vpop.eup %5950  ;;  %vm1635_vm9 = vweird.f32 %v8313_v25 }
 0x54d   : > { %5956 = vpow2.f32 %v2057_v39  ;;  %1766 = vmatmul.f32.gmra.mxu0 %v1584_v27  ;;  %2091 = vadd.xlane.f32.xlu2 %v8309_v54 }
 0x550   : > { %v1478_v34 = vpop.xlane.xlu2 %1477  ;;  %v8315_v56 = vpop.eup %5952 }
 0x551   : > { %v2016_v16 = vpop.xlane.xlu0 %2015  ;;  %5958 = vrcp.f32 %v1478_v34  ;;  %v8318_v19 = vpop.eup %5954  ;;  %v1616_v22 = vmul.f32 %v8315_v56, %v8295_v62  ;;  %v1611_v58 = vand.u32 2147483648, %v1478_v34  ;;  %vm1605_vm0 = vweird.f32 %v1478_v34 }
 0x552   : > { %v2036_v12 = vsub.f32 %v8095_v51, %v2016_v16  ;;  %5960 = vrcp.f32 %v8313_v25  ;;  %vm1621_vm3 = vweird.f32 %v8315_v56 }
 0x553   : > { %v8321_v1 = vpop.eup %5956  ;;  %2085 = vadd.xlane.f32.xlu0 %v8318_v19  ;;  %5962 = vpow2.f32 %v2055_v13  ;;  %v1617_v46 = vsub.f32 1.0, %v1616_v22  ;;  %v1609_v13 = vand.u32 2147483647, %v1478_v34  ;;  %v1612_v42 = vor.u32 1.1754944e-38, %v1611_v58  ;;  %vm1622_vm6 = vmor %vm1620_vm5, %vm1621_vm3 }
 0x554   : > { %v2063_v45 = vmul.f32 1.442695, %v2036_v12  ;;  %2089 = vadd.xlane.f32.xlu1 %v8321_v1  ;;  %v8343_v12 = vpop.f32.mrf.mxu1 }
 0x555   : > { %1769 = vmatmul.f32.gmra.mxu0 %v1599_v33  ;;  %vm1610_vm4 = vcmp.eq.f32.partialorder %v1609_v13, 8.507059e+37 }
 0x556   : > { %5964 = vpow2.f32 %v2063_v45 }
 0x557   : > { %v5959_v51 = vpop.eup %5958 }
 0x558   : > { %v8328_v49 = vpop.eup %5960  ;;  %v1601_v2 = vmul.f32 %v5959_v51, %v1478_v34  ;;  %v2018_v30 = vpop.xlane.xlu2 %2017  ;;  %vm1606_vm15 = vweird.f32 %v5959_v51 }
 0x559   : > { %v2037_v59 = vsub.f32 %v8109_v55, %v2018_v30  ;;  %v8331_v27 = vpop.xlane.xlu0 %1485  ;;  %v8333_v10 = vpop.eup %5962  ;;  %v1631_v6 = vmul.f32 %v8328_v49, %v8313_v25  ;;  %v1618_v55 = vmul.f32 %v8315_v56, %v1617_v46  ;;  %vm1607_vm2 = vmor %vm1605_vm0, %vm1606_vm15  ;;  %v1626_v46 = vand.u32 2147483648, %v8295_v62 }
 0x55a   : > { %v1602_v36 = vsub.f32 1.0, %v1601_v2  ;;  %vm1636_vm8 = vweird.f32 %v8328_v49 }
 0x55b   : > { %v2065_v20 = vmul.f32 1.442695, %v2037_v59  ;;  %2087 = vadd.xlane.f32.xlu0 %v8333_v10  ;;  %v1632_v45 = vsub.f32 1.0, %v1631_v6  ;;  %v1619_v2 = vadd.f32 %v8315_v56, %v1618_v55  ;;  %v1624_v59 = vand.u32 2147483647, %v8295_v62  ;;  %vm1637_vm10 = vmor %vm1635_vm9, %vm1636_vm8 }
 0x55c   : > { %v8335_v39 = vpop.eup %5964  ;;  %v1603_v23 = vmul.f32 %v5959_v51, %v1602_v36 }
 0x55d   : > { %2095 = vadd.xlane.f32.xlu1 %v8335_v39  ;;  %5966 = vpow2.f32 %v2065_v20  ;;  %v1623_v62 = vsel %vm1622_vm6, %v8315_v56, %v1619_v2  ;;  %v1627_v20 = vor.u32 1.1754944e-38, %v1626_v46  ;;  %vm1625_vm7 = vcmp.eq.f32.partialorder %v1624_v59, 8.507059e+37  ;;  %v8375_v56 = vpop.f32.mrf.mxu1 }
 0x55e   : > { %v1604_v16 = vadd.f32 %v5959_v51, %v1603_v23  ;;  %v8366_v23 = vpop.xlane.xlu1 %1487 }
 0x55f   : > { %v1628_v13 = vsel %vm1625_vm7, %v1627_v20, %v1623_v62  ;;  %vm1680_vm6 = vweird.f32 %v8366_v23 }
 0x560   : > { %v8345_v33 = vpop.xlane.xlu2 %1483  ;;  %v1608_v22 = vsel %vm1607_vm2, %v5959_v51, %v1604_v16  ;;  %v2035_v51 = vsub.f32 %v8082_v53, %v8291_v52  ;;  %v1641_v52 = vand.u32 2147483648, %v8313_v25  ;;  %v1629_v2 = vmul.f32 %v8145_v3, %v1628_v13 }
 0x561   : > { %5968 = vrcp.f32 %v8345_v33  ;;  %v1613_v30 = vsel %vm1610_vm4, %v1612_v42, %v1608_v22  ;;  %v8356_v6 = vpop.xlane.xlu0 %2021  ;;  %vm1650_vm13 = vweird.f32 %v8345_v33  ;;  %vm1665_vm2 = vweird.f32 %v8331_v27 }
 0x562   : > { %v1614_v34 = vmul.f32 %v8155_v63, %v1613_v30  ;;  %5970 = vrcp.f32 %v8331_v27  ;;  %v1633_v63 = vmul.f32 %v8328_v49, %v1632_v45  ;;  %v2061_v55 = vmul.f32 1.442695, %v2035_v51 }
 0x563   : > { %v8353_v36 = vpop.eup %5966  ;;  %3339 = vmax.xlane.f32.xlu0 %v8343_v12  ;;  %5972 = vrcp.f32 %v8366_v23  ;;  %v1639_v30 = vand.u32 2147483647, %v8313_v25  ;;  %v1642_v51 = vor.u32 1.1754944e-38, %v1641_v52 }
 0x564   : > { %1772 = vmatmul.f32.gmra.mxu0 %v1614_v34  ;;  %2097 = vadd.xlane.f32.xlu2 %v8353_v36  ;;  %v1634_v22 = vadd.f32 %v8328_v49, %v1633_v63  ;;  %5974 = vpow2.f32 %v2061_v55  ;;  %v1656_v55 = vand.u32 2147483648, %v8345_v33 }
 0x565   : > { %vm1640_vm11 = vcmp.eq.f32.partialorder %v1639_v30, 8.507059e+37 }
 0x566   : > { %v1638_v34 = vsel %vm1637_vm10, %v8328_v49, %v1634_v22  ;;  %v1654_v49 = vand.u32 2147483647, %v8345_v33 }
 0x567   : > { %v5969_v58 = vpop.eup %5968  ;;  %v1643_v62 = vsel %vm1640_vm11, %v1642_v51, %v1638_v34 }
 0x568   : > { %v1646_v16 = vmul.f32 %v5969_v58, %v8345_v33  ;;  %v2020_v42 = vpop.xlane.xlu2 %2019  ;;  %v8371_v53 = vpop.eup %5970  ;;  %vm1651_vm12 = vweird.f32 %v5969_v58  ;;  %vm1655_vm15 = vcmp.eq.f32.partialorder %v1654_v49, 8.507059e+37 }
 0x569   : > { %v1661_v46 = vmul.f32 %v8371_v53, %v8331_v27  ;;  %v8384_v63 = vpop.xlane.xlu0 %1491  ;;  %v8386_v20 = vpop.eup %5972  ;;  %vm1652_vm14 = vmor %vm1650_vm13, %vm1651_vm12  ;;  %v2038_v52 = vsub.f32 %v8117_v24, %v2020_v42  ;;  %vm1666_vm0 = vweird.f32 %v8371_v53 }
 0x56a   : > { %v1647_v45 = vsub.f32 1.0, %v1646_v16  ;;  %v8391_v16 = vpop.eup %5974  ;;  %v1676_v22 = vmul.f32 %v8386_v20, %v8366_v23  ;;  %v8416_v42 = vpop.f32.mrf.mxu3  ;;  %vm1667_vm3 = vmor %vm1665_vm2, %vm1666_vm0  ;;  %vm1681_vm5 = vweird.f32 %v8386_v20 }
 0x56b   : > { %3341 = vmax.xlane.f32.xlu0 %v8375_v56  ;;  %v1662_v3 = vsub.f32 1.0, %v1661_v46  ;;  %vm8446_vm7 = vmor %vm1680_vm6, %vm1681_vm5 }
 0x56c   : > { %1775 = vmatmul.f32.gmra.mxu0 %v1629_v2  ;;  %v1648_v59 = vmul.f32 %v5969_v58, %v1647_v45  ;;  %v1644_v2 = vmul.f32 %v8147_v5, %v1643_v62  ;;  %v1657_v5 = vor.u32 1.1754944e-38, %v1656_v55  ;;  %v1677_v33 = vsub.f32 1.0, %v1676_v22 }
 0x56d   : > { %v1663_v30 = vmul.f32 %v8371_v53, %v1662_v3 }
 0x56e   : > { %v1649_v13 = vadd.f32 %v5969_v58, %v1648_v59  ;;  %v2067_v59 = vmul.f32 1.442695, %v2038_v52  ;;  %v1678_v55 = vmul.f32 %v8386_v20, %v1677_v33 }
 0x56f   : > { %v1664_v62 = vadd.f32 %v8371_v53, %v1663_v30 }
 0x570   : > { %v8388_v25 = vpop.xlane.xlu2 %1489  ;;  %v1653_v45 = vsel %vm1652_vm14, %v5969_v58, %v1649_v13  ;;  %v2701_v58 = vsub.f32 %v8088_v18, %v8218_v50  ;;  %v1669_v13 = vand.u32 2147483647, %v8331_v27  ;;  %v1679_v52 = vadd.f32 %v8386_v20, %v1678_v55 }
 0x571   : > { %5976 = vrcp.f32 %v8388_v25  ;;  %v8404_v46 = vpop.xlane.xlu0 %3327  ;;  %v1658_v34 = vsel %vm1655_vm15, %v1657_v5, %v1653_v45  ;;  %v1668_v50 = vsel %vm1667_vm3, %v8371_v53, %v1664_v62  ;;  %v1686_v53 = vand.u32 2147483648, %v8366_v23 }
 0x572   : > { %v1659_v3 = vmul.f32 %v8171_v44, %v1658_v34  ;;  %v2719_v44 = vmul.f32 1.442695, %v2701_v58  ;;  %vm1670_vm4 = vcmp.eq.f32.partialorder %v1669_v13, 8.507059e+37  ;;  %v1684_v13 = vand.u32 2147483647, %v8366_v23 }
 0x573   : > { %2093 = vadd.xlane.f32.xlu0 %v8391_v16  ;;  %vm1695_vm14 = vweird.f32 %v8388_v25  ;;  %vm1710_vm3 = vweird.f32 %v8384_v63 }
 0x574   : > { %1778 = vmatmul.f32.gmra.mxu0 %v1644_v2  ;;  %v2024_v2 = vpop.xlane.xlu1 %2023  ;;  %vm1685_vm9 = vcmp.eq.f32.partialorder %v1684_v13, 8.507059e+37 }
 0x575   : > { %v2040_v62 = vsub.f32 %v8143_v41, %v2024_v2 }
 0x576   : > { %5739 = vrot.lane.b32.xlu1 %v7583_v43, %s6597_s22  ;;  %v1671_v43 = vand.u32 2147483648, %v8331_v27 }
 0x577   : > { %v8410_v24 = vpop.eup %5976 }
 0x578   : > { %v8406_v51 = vpop.xlane.xlu2 %2073  ;;  %v1691_v18 = vmul.f32 %v8410_v24, %v8388_v25  ;;  %v1672_v27 = vor.u32 1.1754944e-38, %v1671_v43  ;;  %vm1696_vm13 = vweird.f32 %v8410_v24 }
 0x579   : > { %5978 = vrcp.f32 %v8406_v51  ;;  %v8440_v34 = vpop.xlane.xlu0 %2077  ;;  %v2114_v41 = vand.u32 2147483647, %v8406_v51  ;;  %vm2110_vm10 = vweird.f32 %v8406_v51  ;;  %vm1697_vm15 = vmor %vm1695_vm14, %vm1696_vm13 }
 0x57a   : > { %5980 = vrcp.f32 %v8384_v63  ;;  %v1673_v22 = vsel %vm1670_vm4, %v1672_v27, %v1668_v50  ;;  %v1692_v30 = vsub.f32 1.0, %v1691_v18  ;;  %v1683_v18 = vsel %vm8446_vm7, %v8386_v20, %v1679_v52 }
 0x57b   : > { %2683 = vmax.xlane.f32.xlu0 %v8416_v42  ;;  %5982 = vpow2.f32 %v2067_v59  ;;  %v1674_v43 = vmul.f32 %v8165_v48, %v1673_v22  ;;  %v2116_v50 = vand.u32 2147483648, %v8406_v51  ;;  %v2071_v22 = vmul.f32 1.442695, %v2040_v62 }
 0x57c   : > { %5734 = vrot.lane.b32.xlu2 %v7668_v17, %s6598_s13  ;;  %1781 = vmatmul.f32.gmra.mxu0 %v1659_v3  ;;  %5984 = vpow2.f32 %v2719_v44  ;;  %v1693_v23 = vmul.f32 %v8410_v24, %v1692_v30  ;;  %v1687_v44 = vor.u32 1.1754944e-38, %v1686_v53  ;;  %v8464_v20 = vpop.xlane.xlu1 %3329  ;;  %vm2115_vm12 = vcmp.eq.f32.partialorder %v2114_v41, 8.507059e+37 }
 0x57d   : > { %5986 = vrcp.f32 %v8440_v34  ;;  %v2117_v3 = vor.u32 1.1754944e-38, %v2116_v50  ;;  %v1701_v53 = vand.u32 2147483648, %v8388_v25 }
 0x57e   : > { %5744 = vrot.lane.b32.xlu1 %v7611_v28, %s6598_s13  ;;  %v1694_v30 = vadd.f32 %v8410_v24, %v1693_v23 }
 0x57f   : > { %v5979_v49 = vpop.eup %5978 }
 0x580   : > { %v8433_v45 = vpop.eup %5980  ;;  %v2106_v5 = vmul.f32 %v5979_v49, %v8406_v51  ;;  %v8436_v33 = vpop.xlane.xlu2 %3325  ;;  %vm2111_vm8 = vweird.f32 %v5979_v49 }
 0x581   : > { %v8442_v59 = vpop.eup %5982  ;;  %v1706_v55 = vmul.f32 %v8433_v45, %v8384_v63  ;;  %vm2112_vm11 = vmor %vm2110_vm10, %vm2111_vm8  ;;  %v3357_v41 = vsub.f32 %v8153_v11, %v8436_v33  ;;  %vm1711_vm2 = vweird.f32 %v8433_v45 }
 0x582   : > { %v2107_v58 = vsub.f32 1.0, %v2106_v5  ;;  %v8462_v27 = vpop.eup %5984  ;;  %v1688_v5 = vsel %vm1685_vm9, %v1687_v44, %v1683_v18  ;;  %vm8499_vm4 = vmor %vm1710_vm3, %vm1711_vm2 }
 0x583   : > { %2099 = vadd.xlane.f32.xlu0 %v8442_v59  ;;  %v1707_v52 = vsub.f32 1.0, %v1706_v55  ;;  %v8472_v62 = vpop.eup %5986  ;;  %v3373_v11 = vmul.f32 1.442695, %v3357_v41 }
 0x584   : > { %1784 = vmatmul.f32.gmra.mxu0 %v1674_v43  ;;  %v2108_v48 = vmul.f32 %v5979_v49, %v2107_v58  ;;  %v1689_v43 = vmul.f32 %v8157_v38, %v1688_v5  ;;  %v1698_v38 = vsel %vm1697_vm15, %v8410_v24, %v1694_v30  ;;  %vm2141_vm10 = vweird.f32 %v8472_v62 }
 0x585   : > { %v1708_v55 = vmul.f32 %v8433_v45, %v1707_v52  ;;  %v1716_v52 = vand.u32 2147483648, %v8384_v63 }
 0x586   : > { %v2109_v2 = vadd.f32 %v5979_v49, %v2108_v48  ;;  %v1702_v48 = vor.u32 1.1754944e-38, %v1701_v53  ;;  %v1714_v53 = vand.u32 2147483647, %v8384_v63 }
 0x588   : > { %v8466_v14 = vpop.xlane.xlu2 %2075  ;;  %v2113_v58 = vsel %vm2112_vm11, %v5979_v49, %v2109_v2  ;;  %v1699_v49 = vand.u32 2147483647, %v8388_v25  ;;  %vm1715_vm6 = vcmp.eq.f32.partialorder %v1714_v53, 8.507059e+37  ;;  %vm2140_vm11 = vweird.f32 %v8440_v34 }
 0x589   : > { %5988 = vrcp.f32 %v8466_v14  ;;  %v2118_v51 = vsel %vm2115_vm12, %v2117_v3, %v2113_v58  ;;  %vm2125_vm7 = vweird.f32 %v8466_v14  ;;  %vm8535_vm13 = vmor %vm2140_vm11, %vm2141_vm10 }
 0x58a   : > { %v2119_v13 = vmul.f32 %v8190_v4, %v2118_v51  ;;  %5990 = vpow2.f32 %v2071_v22  ;;  %v2136_v4 = vmul.f32 %v8472_v62, %v8440_v34  ;;  %vm1700_vm0 = vcmp.eq.f32.partialorder %v1699_v49, 8.507059e+37 }
 0x58b   : > { %2751 = vadd.xlane.f32.xlu0 %v8462_v27  ;;  %v5730_v18 = vpop.permute.xlu0 %5729  ;;  %v1703_v2 = vsel %vm1700_vm0, %v1702_v48, %v1698_v38  ;;  %v1709_v22 = vadd.f32 %v8433_v45, %v1708_v55  ;;  %v2131_v49 = vand.u32 2147483648, %v8466_v14  ;;  %v1717_v55 = vor.u32 1.1754944e-38, %v1716_v52 }
 0x58c   : > { %v5731_v50 = vunpack.i.l.bf16 %v5730_v18  ;;  %1787 = vmatmul.f32.gmra.mxu0 %v1689_v43  ;;  %2425 = vmatmul.f32.vlgmr.msrb.gmra.mxu2 %v2119_v13  ;;  %v5732_v25 = vunpack.i.h.bf16 %v5730_v18  ;;  %v2137_v5 = vsub.f32 1.0, %v2136_v4  ;;  %v1704_v30 = vmul.f32 %v8186_v61, %v1703_v2 }
 0x58d   : > { %v1713_v43 = vsel %vm8499_vm4, %v8433_v45, %v1709_v22  ;;  %v2129_v18 = vand.u32 2147483647, %v8466_v14  ;;  %v2039_v4 = vsub.f32 %v8130_v31, %v8356_v6  ;;  %v2132_v22 = vor.u32 1.1754944e-38, %v2131_v49 }
 0x58e   : > { %3075 = vmatpush.msra.mxu0 %v5731_v50  ;;  %v2138_v61 = vmul.f32 %v8472_v62, %v2137_v5  ;;  %v1718_v38 = vsel %vm1715_vm6, %v1717_v55, %v1713_v43  ;;  %v2146_v31 = vand.u32 2147483648, %v8440_v34 }
 0x58f   : > { %v5989_v23 = vpop.eup %5988  ;;  %v8485_v44 = vpop.xlane.xlu1 %2079  ;;  %vm2130_vm9 = vcmp.eq.f32.partialorder %v2129_v18, 8.507059e+37  ;;  %v1719_v5 = vmul.f32 %v8180_v60, %v1718_v38  ;;  %v2069_v51 = vmul.f32 1.442695, %v2039_v4 }
 0x590   : > { %v2121_v33 = vmul.f32 %v5989_v23, %v8466_v14  ;;  %5992 = vrcp.f32 %v8485_v44  ;;  %v8491_v24 = vpop.xlane.xlu2 %1493  ;;  %3076 = vmatpush.msra.mxu0 %v5732_v25  ;;  %v8496_v3 = vpop.eup %5990  ;;  %vm2126_vm5 = vweird.f32 %v5989_v23  ;;  %v2147_v55 = vor.u32 1.1754944e-38, %v2146_v31 }
 0x591   : > { %5994 = vrcp.f32 %v8491_v24  ;;  %vm2127_vm8 = vmor %vm2125_vm7, %vm2126_vm5  ;;  %v1731_v6 = vand.u32 2147483648, %v8491_v24  ;;  %v1729_v43 = vand.u32 2147483647, %v8491_v24  ;;  %vm1725_vm14 = vweird.f32 %v8491_v24  ;;  %v8567_v31 = vpop.f32.mrf.mxu1 }
 0x592   : > { %v2122_v58 = vsub.f32 1.0, %v2121_v33  ;;  %5996 = vpow2.f32 %v3373_v11  ;;  %v2139_v33 = vadd.f32 %v8472_v62, %v2138_v61  ;;  %vm2155_vm4 = vweird.f32 %v8485_v44 }
 0x593   : > { %2103 = vadd.xlane.f32.xlu0 %v8496_v3  ;;  %v1732_v61 = vor.u32 1.1754944e-38, %v1731_v6  ;;  %5998 = vpow2.f32 %v2069_v51  ;;  %vm1730_vm2 = vcmp.eq.f32.partialorder %v1729_v43, 8.507059e+37 }
 0x594   : > { %v2123_v13 = vmul.f32 %v5989_v23, %v2122_v58  ;;  %1790 = vmatmul.f32.gmra.mxu0 %v1704_v30  ;;  %v2144_v30 = vand.u32 2147483647, %v8440_v34  ;;  %v3359_v34 = vsub.f32 %v8173_v26, %v8464_v20  ;;  %v2161_v20 = vand.u32 2147483648, %v8485_v44 }
 0x596   : > { %v8511_v41 = vpop.eup %5992  ;;  %v2124_v63 = vadd.f32 %v5989_v23, %v2123_v13  ;;  %vm2145_vm0 = vcmp.eq.f32.partialorder %v2144_v30, 8.507059e+37 }
 0x597   : > { %v5995_v50 = vpop.eup %5994  ;;  %v2151_v45 = vmul.f32 %v8511_v41, %v8485_v44  ;;  %vm2156_vm3 = vweird.f32 %v8511_v41 }
 0x598   : > { %v1721_v48 = vmul.f32 %v5995_v50, %v8491_v24  ;;  %v8519_v25 = vpop.xlane.xlu2 %2747  ;;  %v2128_v2 = vsel %vm2127_vm8, %v5989_v23, %v2124_v63  ;;  %v8523_v14 = vpop.eup %5996  ;;  %vm1726_vm12 = vweird.f32 %v5995_v50  ;;  %vm2157_vm5 = vmor %vm2155_vm4, %vm2156_vm3 }
 0x599   : > { %v2152_v11 = vsub.f32 1.0, %v2151_v45  ;;  %v2133_v58 = vsel %vm2130_vm9, %v2132_v22, %v2128_v2  ;;  %vm1727_vm15 = vmor %vm1725_vm14, %vm1726_vm12  ;;  %v8553_v2 = vpop.f32.mrf.mxu3  ;;  %v8557_v22 = vpop.eup %5998 }
 0x59a   : > { %v1722_v52 = vsub.f32 1.0, %v1721_v48  ;;  %v2134_v23 = vmul.f32 %v8204_v7, %v2133_v58  ;;  %v2143_v7 = vsel %vm8535_vm13, %v8472_v62, %v2139_v33  ;;  %v3377_v62 = vmul.f32 1.442695, %v3359_v34 }
 0x59b   : > { %3405 = vadd.xlane.f32.xlu0 %v8523_v14  ;;  %v2153_v13 = vmul.f32 %v8511_v41, %v2152_v11  ;;  %v2148_v45 = vsel %vm2145_vm0, %v2147_v55, %v2143_v7  ;;  %v2159_v48 = vand.u32 2147483647, %v8485_v44  ;;  %v2162_v11 = vor.u32 1.1754944e-38, %v2161_v20  ;;  %v10375_v20 = vld [vmem:[#allocation52_spill] sm:$0xff] }
 0x59c   : > { %v1723_v53 = vmul.f32 %v5995_v50, %v1722_v52  ;;  %1793 = vmatmul.f32.gmra.mxu0 %v1719_v5  ;;  %2428 = vmatmul.f32.gmra.mxu2 %v2134_v23  ;;  %v2149_v24 = vmul.f32 %v8192_v32, %v2148_v45  ;;  %6000 = vpow2.f32 %v3377_v62  ;;  %v10373_v52 = vld [vmem:[#allocation46_spill] sm:$0xff] }
 0x59d   : > { %v2154_v4 = vadd.f32 %v8511_v41, %v2153_v13  ;;  %vm2160_vm6 = vcmp.eq.f32.partialorder %v2159_v48, 8.507059e+37  ;;  %v10374_v45 = vld [vmem:[#allocation30_spill] sm:$0xff] }
 0x59e   : > { %v1724_v49 = vadd.f32 %v5995_v50, %v1723_v53  ;;  %v3336_v53 = vpop.xlane.xlu1 %3335 }
 0x5a0   : > { %v3332_v18 = vpop.xlane.xlu2 %3331  ;;  %v1728_v63 = vsel %vm1727_vm15, %v5995_v50, %v1724_v49  ;;  %v2158_v50 = vsel %vm2157_vm5, %v8511_v41, %v2154_v4 }
 0x5a1   : > { %v1733_v38 = vsel %vm1730_vm2, %v1732_v61, %v1728_v63  ;;  %v2163_v44 = vsel %vm2160_vm6, %v2162_v11, %v2158_v50  ;;  %v8576_v63 = vpop.f32.mrf.mxu1 }
 0x5a2   : > { %v1734_v26 = vmul.f32 %v8214_v47, %v1733_v38  ;;  %v3360_v47 = vsub.f32 %v8197_v29, %v3332_v18  ;;  %v2164_v5 = vmul.f32 %v10373_v52, %v2163_v44  ;;  %v8562_v58 = vpop.eup %6000  ;;  %v2703_v38 = vsub.f32 %v10374_v45, %v8260_v0 }
 0x5a4   : > { %1796 = vmatmul.f32.gmra.mxu0 %v1734_v26  ;;  %2431 = vmatmul.f32.gmra.mxu2 %v2149_v24  ;;  %v3379_v33 = vmul.f32 1.442695, %v3360_v47  ;;  %v2723_v62 = vmul.f32 1.442695, %v2703_v38  ;;  %v3362_v24 = vsub.f32 %v10375_v20, %v3336_v53 }
 0x5a5   : > { %2685 = vmax.xlane.f32.xlu2 %v8553_v2 }
 0x5a6   : > { %v8581_v4 = vpop.xlane.xlu1 %3337  ;;  %v3383_v44 = vmul.f32 1.442695, %v3362_v24 }
 0x5a8   : > { %2101 = vadd.xlane.f32.xlu1 %v8557_v22  ;;  %v2082_v32 = vpop.xlane.xlu2 %2081 }
 0x5a9   : > { %6002 = vrcp.f32 %v2082_v32  ;;  %v2176_v51 = vand.u32 2147483648, %v2082_v32  ;;  %v2174_v43 = vand.u32 2147483647, %v2082_v32  ;;  %vm2170_vm8 = vweird.f32 %v2082_v32 }
 0x5aa   : > { %6004 = vpow2.f32 %v3379_v33 }
 0x5ab   : > { %v2177_v34 = vor.u32 1.1754944e-38, %v2176_v51  ;;  %vm2175_vm10 = vcmp.eq.f32.partialorder %v2174_v43, 8.507059e+37  ;;  %v10377_v51 = vld [vmem:[#allocation42_spill] sm:$0xff] }
 0x5ac   : > { %2434 = vmatmul.f32.gmra.mxu2 %v2164_v5  ;;  %v2704_v53 = vsub.f32 %v10377_v51, %v8245_v37 }
 0x5ad   : > { %3409 = vadd.xlane.f32.xlu2 %v8562_v58 }
 0x5ae   : > { %v2725_v37 = vmul.f32 1.442695, %v2704_v53 }
 0x5af   : > { %v6003_v41 = vpop.eup %6002  ;;  %5754 = vrot.lane.b32.xlu0 %v7611_v28, %s6597_s22 }
 0x5b0   : > { %v2166_v29 = vmul.f32 %v6003_v41, %v2082_v32  ;;  %v8569_v23 = vpop.eup %6004  ;;  %vm2171_vm7 = vweird.f32 %v6003_v41  ;;  %v8573_v61 = vpop.xlane.xlu2 %2681  ;;  %v10376_v32 = vld [vmem:[#allocation24_spill] sm:$0xff] }
 0x5b1   : > { %vm2172_vm9 = vmor %vm2170_vm8, %vm2171_vm7 }
 0x5b2   : > { %v2167_v6 = vsub.f32 1.0, %v2166_v29 }
 0x5b4   : > { %v2168_v30 = vmul.f32 %v6003_v41, %v2167_v6 }
 0x5b5   : > { %3411 = vadd.xlane.f32.xlu2 %v8569_v23 }
 0x5b6   : > { %v3334_v60 = vpop.xlane.xlu0 %3333  ;;  %v2169_v13 = vadd.f32 %v6003_v41, %v2168_v30 }
 0x5b7   : > { %v3361_v7 = vsub.f32 %v8208_v35, %v3334_v60 }
 0x5b8   : > { %v2173_v28 = vsel %vm2172_vm9, %v6003_v41, %v2169_v13  ;;  %v8588_v48 = vpop.xlane.xlu2 %2749 }
 0x5b9   : > { %v3381_v49 = vmul.f32 1.442695, %v3361_v7  ;;  %v2178_v55 = vsel %vm2175_vm10, %v2177_v34, %v2173_v28 }
 0x5ba   : > { %v2179_v18 = vmul.f32 %v8253_v15, %v2178_v55 }
 0x5bb   : > { %6006 = vpow2.f32 %v3381_v49  ;;  %v8605_v49 = vpop.f32.mrf.mxu3 }
 0x5bc   : > { %2437 = vmatmul.f32.gmra.mxu2 %v2179_v18 }
 0x5bd   : > { %3345 = vmax.xlane.f32.xlu2 %v8576_v63 }
 0x5be   : > { %v2084_v35 = vpop.xlane.xlu0 %2083 }
 0x5bf   : > { %6008 = vrcp.f32 %v2084_v35  ;;  %v2191_v33 = vand.u32 2147483648, %v2084_v35  ;;  %v2189_v5 = vand.u32 2147483647, %v2084_v35  ;;  %vm2185_vm12 = vweird.f32 %v2084_v35 }
 0x5c0   : > { %6010 = vpow2.f32 %v2723_v62  ;;  %v8601_v7 = vpop.xlane.xlu2 %2091 }
 0x5c1   : > { %5749 = vrot.lane.b32.xlu1 %v7668_v17, %s6597_s22  ;;  %v8585_v26 = vpop.eup %6006  ;;  %v2702_v17 = vsub.f32 %v10376_v32, %v8235_v57  ;;  %v2192_v57 = vor.u32 1.1754944e-38, %v2191_v33  ;;  %vm2190_vm14 = vcmp.eq.f32.partialorder %v2189_v5, 8.507059e+37 }
 0x5c3   : > { %v2721_v30 = vmul.f32 1.442695, %v2702_v17 }
 0x5c5   : > { %v6009_v15 = vpop.eup %6008  ;;  %3413 = vadd.xlane.f32.xlu2 %v8585_v26 }
 0x5c6   : > { %v2181_v0 = vmul.f32 %v6009_v15, %v2084_v35  ;;  %v2086_v50 = vpop.xlane.xlu0 %2085  ;;  %vm2186_vm11 = vweird.f32 %v6009_v15  ;;  %v8596_v41 = vpop.eup %6010 }
 0x5c7   : > { %6012 = vrcp.f32 %v2086_v50  ;;  %v8591_v47 = vpop.xlane.xlu1 %2089  ;;  %vm2187_vm13 = vmor %vm2185_vm12, %vm2186_vm11  ;;  %v2206_v45 = vand.u32 2147483648, %v2086_v50  ;;  %v2204_v35 = vand.u32 2147483647, %v2086_v50  ;;  %vm2200_vm0 = vweird.f32 %v2086_v50 }
 0x5c8   : > { %v2182_v11 = vsub.f32 1.0, %v2181_v0  ;;  %6014 = vrcp.f32 %v8591_v47  ;;  %vm2230_vm9 = vweird.f32 %v8591_v47 }
 0x5c9   : > { %6016 = vpow2.f32 %v3383_v44  ;;  %v2207_v0 = vor.u32 1.1754944e-38, %v2206_v45  ;;  %vm2205_vm3 = vcmp.eq.f32.partialorder %v2204_v35, 8.507059e+37 }
 0x5ca   : > { %v2183_v52 = vmul.f32 %v6009_v15, %v2182_v11 }
 0x5cc   : > { %v2184_v29 = vadd.f32 %v6009_v15, %v2183_v52 }
 0x5cd   : > { %v6013_v6 = vpop.eup %6012  ;;  %2755 = vadd.xlane.f32.xlu2 %v8596_v41 }
 0x5ce   : > { %v2196_v43 = vmul.f32 %v6013_v6, %v2086_v50  ;;  %v2088_v60 = vpop.xlane.xlu0 %2087  ;;  %v2188_v13 = vsel %vm2187_vm13, %v6009_v15, %v2184_v29  ;;  %v8603_v34 = vpop.eup %6014  ;;  %vm2201_vm15 = vweird.f32 %v6013_v6  ;;  %vm2245_vm13 = vweird.f32 %v8601_v7 }
 0x5cf   : > { %6018 = vrcp.f32 %v2088_v60  ;;  %v2193_v28 = vsel %vm2190_vm14, %v2192_v57, %v2188_v13  ;;  %v2226_v62 = vmul.f32 %v8603_v34, %v8591_v47  ;;  %v8611_v15 = vpop.eup %6016  ;;  %vm2202_vm2 = vmor %vm2200_vm0, %vm2201_vm15  ;;  %v2221_v57 = vand.u32 2147483648, %v2088_v60 }
 0x5d0   : > { %v2197_v55 = vsub.f32 1.0, %v2196_v43  ;;  %6020 = vpow2.f32 %v2721_v30  ;;  %v2194_v18 = vmul.f32 %v8300_v8, %v2193_v28  ;;  %v8614_v8 = vpop.f32.mrf.mxu1  ;;  %v10378_v30 = vld [vmem:[#allocation39_spill] sm:$0xff]  ;;  %v8626_v43 = vpop.f32.mrf.mxu3  ;;  %vm2215_vm5 = vweird.f32 %v2088_v60 }
 0x5d1   : > { %6022 = vrcp.f32 %v8601_v7  ;;  %v2227_v33 = vsub.f32 1.0, %v2226_v62  ;;  %v2705_v51 = vsub.f32 %v10378_v30, %v8267_v9  ;;  %vm2231_vm8 = vweird.f32 %v8603_v34 }
 0x5d2   : > { %v2198_v38 = vmul.f32 %v6013_v6, %v2197_v55  ;;  %2440 = vmatmul.f32.gmra.mxu2 %v2194_v18  ;;  %6024 = vpow2.f32 %v2725_v37  ;;  %v2219_v55 = vand.u32 2147483647, %v2088_v60  ;;  %vm2232_vm10 = vmor %vm2230_vm9, %vm2231_vm8 }
 0x5d3   : > { %v2228_v18 = vmul.f32 %v8603_v34, %v2227_v33 }
 0x5d4   : > { %v2199_v20 = vadd.f32 %v6013_v6, %v2198_v38  ;;  %v2222_v38 = vor.u32 1.1754944e-38, %v2221_v57  ;;  %vm2220_vm7 = vcmp.eq.f32.partialorder %v2219_v55, 8.507059e+37 }
 0x5d5   : > { %v6019_v24 = vpop.eup %6018  ;;  %3415 = vadd.xlane.f32.xlu2 %v8611_v15 }
 0x5d6   : > { %v2211_v11 = vmul.f32 %v6019_v24, %v2088_v60  ;;  %v3340_v32 = vpop.xlane.xlu0 %3339  ;;  %v2203_v17 = vsel %vm2202_vm2, %v6013_v6, %v2199_v20  ;;  %v8616_v44 = vpop.eup %6020  ;;  %v10379_v6 = vld [vmem:[#allocation56_spill] sm:$0xff]  ;;  %vm2216_vm4 = vweird.f32 %v6019_v24 }
 0x5d7   : > { %v8618_v52 = vpop.xlane.xlu2 %2097  ;;  %v2208_v5 = vsel %vm2205_vm3, %v2207_v0, %v2203_v17  ;;  %v8620_v29 = vpop.eup %6022  ;;  %v3358_v13 = vsub.f32 %v10379_v6, %v8404_v46  ;;  %vm2217_vm6 = vmor %vm2215_vm5, %vm2216_vm4  ;;  %v3364_v46 = vsub.f32 %v8343_v12, %v3340_v32  ;;  %v2234_v12 = vand.u32 2147483647, %v8591_v47 }
 0x5d8   : > { %v2212_v50 = vsub.f32 1.0, %v2211_v11  ;;  %v2209_v53 = vmul.f32 %v8318_v19, %v2208_v5  ;;  %v2241_v37 = vmul.f32 %v8620_v29, %v8601_v7  ;;  %v8633_v9 = vpop.eup %6024  ;;  %v2727_v19 = vmul.f32 1.442695, %v2705_v51  ;;  %v8637_v11 = vpop.xlane.xlu1 %2095 }
 0x5d9   : > { %2753 = vadd.xlane.f32.xlu0 %v8616_v44  ;;  %v3375_v35 = vmul.f32 1.442695, %v3358_v13  ;;  %v2229_v5 = vadd.f32 %v8603_v34, %v2228_v18  ;;  %v8641_v60 = vpop.f32.mrf.mxu1  ;;  %vm2235_vm11 = vcmp.eq.f32.partialorder %v2234_v12, 8.507059e+37  ;;  %vm2246_vm12 = vweird.f32 %v8620_v29 }
 0x5da   : > { %v2213_v28 = vmul.f32 %v6019_v24, %v2212_v50  ;;  %2443 = vmatmul.f32.gmra.mxu2 %v2209_v53  ;;  %v2242_v0 = vsub.f32 1.0, %v2241_v37  ;;  %v2236_v50 = vand.u32 2147483648, %v8591_v47  ;;  %6026 = vpow2.f32 %v2727_v19  ;;  %vm2247_vm14 = vmor %vm2245_vm13, %vm2246_vm12 }
 0x5db   : > { %6028 = vrcp.f32 %v8637_v11  ;;  %v2233_v57 = vsel %vm2232_vm10, %v8603_v34, %v2229_v5  ;;  %v2251_v18 = vand.u32 2147483648, %v8601_v7  ;;  %vm2290_vm10 = vweird.f32 %v8618_v52 }
 0x5dc   : > { %v2214_v45 = vadd.f32 %v6019_v24, %v2213_v28  ;;  %6030 = vpow2.f32 %v3375_v35  ;;  %v2243_v53 = vmul.f32 %v8620_v29, %v2242_v0  ;;  %v2237_v6 = vor.u32 1.1754944e-38, %v2236_v50 }
 0x5dd   : > { %2757 = vadd.xlane.f32.xlu2 %v8633_v9 }
 0x5de   : > { %v3342_v62 = vpop.xlane.xlu0 %3341  ;;  %v2218_v20 = vsel %vm2217_vm6, %v6019_v24, %v2214_v45  ;;  %v3387_v24 = vmul.f32 1.442695, %v3364_v46  ;;  %v2238_v13 = vsel %vm2235_vm11, %v2237_v6, %v2233_v57  ;;  %v2244_v37 = vadd.f32 %v8620_v29, %v2243_v53 }
 0x5df   : > { %v5735_v17 = vpop.permute.xlu2 %5734  ;;  %v2223_v33 = vsel %vm2220_vm7, %v2222_v38, %v2218_v20  ;;  %v3365_v38 = vsub.f32 %v8375_v56, %v3342_v62  ;;  %v2239_v35 = vmul.f32 %v8321_v1, %v2238_v13  ;;  %v2249_v46 = vand.u32 2147483647, %v8601_v7 }
 0x5e0   : > { %v5736_v30 = vunpack.i.l.bf16 %v5735_v17  ;;  %v2224_v51 = vmul.f32 %v8333_v10, %v2223_v33  ;;  %v5737_v32 = vunpack.i.h.bf16 %v5735_v17  ;;  %v8651_v10 = vpop.f32.mrf.mxu3  ;;  %6032 = vpow2.f32 %v3387_v24  ;;  %v8656_v28 = vpop.eup %6026 }
 0x5e1   : > { %3349 = vmax.xlane.f32.xlu0 %v8641_v60  ;;  %v8661_v34 = vpop.eup %6028  ;;  %v8671_v20 = vpop.f32.mrf.mxu1  ;;  %v2248_v62 = vsel %vm2247_vm14, %v8620_v29, %v2244_v37  ;;  %v2252_v7 = vor.u32 1.1754944e-38, %v2251_v18  ;;  %v3389_v33 = vmul.f32 1.442695, %v3365_v38  ;;  %vm2250_vm15 = vcmp.eq.f32.partialorder %v2249_v46, 8.507059e+37 }
 0x5e2   : > { %3737 = vmatpush.msra.mxu2 %v5736_v30  ;;  %v8664_v19 = vpop.eup %6030  ;;  %v2271_v56 = vmul.f32 %v8661_v34, %v8637_v11  ;;  %vm2276_vm5 = vweird.f32 %v8661_v34  ;;  %vm2275_vm6 = vweird.f32 %v8637_v11 }
 0x5e3   : > { %2446 = vmatmul.f32.gmra.mxu2 %v2224_v51  ;;  %v2253_v30 = vsel %vm2250_vm15, %v2252_v7, %v2248_v62  ;;  %vm2277_vm7 = vmor %vm2275_vm6, %vm2276_vm5 }
 0x5e4   : > { %3738 = vmatpush.msra.mxu2 %v5737_v32  ;;  %v2272_v51 = vsub.f32 1.0, %v2271_v56  ;;  %v2254_v13 = vmul.f32 %v8309_v54, %v2253_v30 }
 0x5e5   : > { %2691 = vmax.xlane.f32.xlu2 %v8651_v10 }
 0x5e6   : > { %v8654_v47 = vpop.xlane.xlu0 %2093  ;;  %v8680_v1 = vpop.eup %6032 }
 0x5e7   : > { %6034 = vrcp.f32 %v8654_v47  ;;  %v2266_v6 = vand.u32 2147483648, %v8654_v47  ;;  %vm2260_vm2 = vweird.f32 %v8654_v47 }
 0x5e8   : > { %v5740_v55 = vpop.permute.xlu1 %5739  ;;  %6036 = vrcp.f32 %v8618_v52  ;;  %v8687_v29 = vpop.f32.mrf.mxu3 }
 0x5e9   : > { %v5741_v45 = vunpack.i.l.bf16 %v5740_v55  ;;  %2759 = vadd.xlane.f32.xlu0 %v8656_v28  ;;  %v5742_v0 = vunpack.i.h.bf16 %v5740_v55  ;;  %6038 = vpow2.f32 %v3389_v33  ;;  %v2264_v55 = vand.u32 2147483647, %v8654_v47 }
 0x5ea   : > { %v2267_v46 = vor.u32 1.1754944e-38, %v2266_v6 }
 0x5eb   : > { %3407 = vadd.xlane.f32.xlu1 %v8664_v19  ;;  %3077 = vmatpush.msra.mxu0 %v5741_v45  ;;  %vm2265_vm4 = vcmp.eq.f32.partialorder %v2264_v55, 8.507059e+37  ;;  %v2296_v55 = vand.u32 2147483648, %v8618_v52 }
 0x5ec   : > { %2449 = vmatmul.f32.gmra.mxu2 %v2239_v35  ;;  %v8697_v35 = vpop.f32.mrf.mxu1 }
 0x5ed   : > { %3078 = vmatpush.msra.mxu0 %v5742_v0  ;;  %v6035_v17 = vpop.eup %6034  ;;  %3419 = vadd.xlane.f32.xlu2 %v8680_v1 }
 0x5ee   : > { %v2256_v5 = vmul.f32 %v6035_v17, %v8654_v47  ;;  %v2684_v50 = vpop.xlane.xlu0 %2683  ;;  %v8685_v32 = vpop.eup %6036  ;;  %vm2261_vm0 = vweird.f32 %v6035_v17  ;;  %v2281_v47 = vand.u32 2147483648, %v8637_v11 }
 0x5ef   : > { %v2707_v12 = vsub.f32 %v8416_v42, %v2684_v50  ;;  %v2273_v42 = vmul.f32 %v8661_v34, %v2272_v51  ;;  %v2286_v38 = vmul.f32 %v8685_v32, %v8618_v52  ;;  %vm2262_vm3 = vmor %vm2260_vm2, %vm2261_vm0  ;;  %v8702_v62 = vpop.eup %6038  ;;  %vm2291_vm9 = vweird.f32 %v8685_v32 }
 0x5f0   : > { %v5745_v24 = vpop.permute.xlu1 %5744  ;;  %v2257_v53 = vsub.f32 1.0, %v2256_v5  ;;  %v8710_v30 = vpop.f32.mrf.mxu3  ;;  %vm2292_vm11 = vmor %vm2290_vm10, %vm2291_vm9 }
 0x5f1   : > { %v5746_v57 = vunpack.i.l.bf16 %v5745_v24  ;;  %2693 = vmax.xlane.f32.xlu0 %v8687_v29  ;;  %v2731_v18 = vmul.f32 1.442695, %v2707_v12  ;;  %v5747_v45 = vunpack.i.h.bf16 %v5745_v24  ;;  %v2287_v7 = vsub.f32 1.0, %v2286_v38 }
 0x5f2   : > { %v2258_v37 = vmul.f32 %v6035_v17, %v2257_v53  ;;  %v2274_v5 = vadd.f32 %v8661_v34, %v2273_v42  ;;  %v2282_v53 = vor.u32 1.1754944e-38, %v2281_v47 }
 0x5f3   : > { %3343 = vmax.xlane.f32.xlu1 %v8567_v31  ;;  %3739 = vmatpush.msra.mxu2 %v5746_v57  ;;  %6040 = vpow2.f32 %v2731_v18  ;;  %v2288_v51 = vmul.f32 %v8685_v32, %v2287_v7  ;;  %v2294_v18 = vand.u32 2147483647, %v8618_v52 }
 0x5f4   : > { %2452 = vmatmul.f32.gmra.mxu2 %v2254_v13  ;;  %v2259_v54 = vadd.f32 %v6035_v17, %v2258_v37  ;;  %v2278_v12 = vsel %vm2277_vm7, %v8661_v34, %v2274_v5  ;;  %v8720_v13 = vpop.f32.mrf.mxu1 }
 0x5f5   : > { %3740 = vmatpush.msra.mxu2 %v5747_v45  ;;  %3353 = vmax.xlane.f32.xlu2 %v8697_v35  ;;  %v3363_v45 = vsub.f32 %v8237_v21, %v8581_v4  ;;  %vm2295_vm12 = vcmp.eq.f32.partialorder %v2294_v18, 8.507059e+37 }
 0x5f6   : > { %v2100_v0 = vpop.xlane.xlu0 %2099  ;;  %v2263_v56 = vsel %vm2262_vm3, %v6035_v17, %v2259_v54  ;;  %v2279_v17 = vand.u32 2147483647, %v8637_v11  ;;  %v2289_v11 = vadd.f32 %v8685_v32, %v2288_v51 }
 0x5f7   : > { %6042 = vrcp.f32 %v2100_v0  ;;  %v2268_v33 = vsel %vm2265_vm4, %v2267_v46, %v2263_v56  ;;  %v2297_v46 = vor.u32 1.1754944e-38, %v2296_v55  ;;  %v3385_v52 = vmul.f32 1.442695, %v3363_v45 }
 0x5f8   : > { %v2269_v50 = vmul.f32 %v8391_v16, %v2268_v33  ;;  %vm2280_vm8 = vcmp.eq.f32.partialorder %v2279_v17, 8.507059e+37  ;;  %v2293_v38 = vsel %vm2292_vm11, %v8685_v32, %v2289_v11  ;;  %v8731_v54 = vpop.f32.mrf.mxu3  ;;  %v2311_v33 = vand.u32 2147483648, %v2100_v0  ;;  %v8759_v11 = vpop.f32.mrf.mxu0 }
 0x5f9   : > { %3421 = vadd.xlane.f32.xlu0 %v8702_v62  ;;  %v8715_v24 = vpop.eup %6040  ;;  %v2283_v6 = vsel %vm2280_vm8, %v2282_v53, %v2278_v12  ;;  %vm2305_vm14 = vweird.f32 %v2100_v0  ;;  %v2309_v4 = vand.u32 2147483647, %v2100_v0  ;;  %6044 = vpow2.f32 %v3385_v52 }
 0x5fa   : > { %v2284_v34 = vmul.f32 %v8335_v39, %v2283_v6  ;;  %v2298_v39 = vsel %vm2295_vm12, %v2297_v46, %v2293_v38  ;;  %v2312_v5 = vor.u32 1.1754944e-38, %v2311_v33  ;;  %v2706_v12 = vsub.f32 %v8270_v40, %v8573_v61 }
 0x5fb   : > { %2687 = vmax.xlane.f32.xlu1 %v8605_v49  ;;  %v2299_v21 = vmul.f32 %v8353_v36, %v2298_v39  ;;  %vm2310_vm0 = vcmp.eq.f32.partialorder %v2309_v4, 8.507059e+37  ;;  %vm2784_vm11 = vweird.f32 %v8519_v25 }
 0x5fc   : > { %2455 = vmatmul.f32.gmra.mxu2 %v2269_v50  ;;  %v2729_v36 = vmul.f32 1.442695, %v2706_v12 }
 0x5fd   : > { %v6043_v16 = vpop.eup %6042  ;;  %2763 = vadd.xlane.f32.xlu2 %v8715_v24 }
 0x5fe   : > { %v2301_v57 = vmul.f32 %v6043_v16, %v2100_v0  ;;  %v8733_v56 = vpop.xlane.xlu0 %2751  ;;  %vm2306_vm13 = vweird.f32 %v6043_v16 }
 0x5ff   : > { %vm2307_vm15 = vmor %vm2305_vm14, %vm2306_vm13  ;;  %v8740_v17 = vpop.eup %6044 }
 0x600   : > { %v2302_v37 = vsub.f32 1.0, %v2301_v57 }
 0x601   : > { %3355 = vmax.xlane.f32.xlu0 %v8720_v13 }
 0x602   : > { %v2303_v42 = vmul.f32 %v6043_v16, %v2302_v37 }
 0x603   : > { %3347 = vmax.xlane.f32.xlu1 %v8614_v8 }
 0x604   : > { %2458 = vmatmul.f32.gmra.mxu2 %v2284_v34  ;;  %v2304_v7 = vadd.f32 %v6043_v16, %v2303_v42 }
 0x605   : > { %2697 = vmax.xlane.f32.xlu2 %v8731_v54 }
 0x606   : > { %v2308_v32 = vsel %vm2307_vm15, %v6043_v16, %v2304_v7  ;;  %v8738_v50 = vpop.xlane.xlu0 %2103 }
 0x607   : > { %v2313_v47 = vsel %vm2310_vm0, %v2312_v5, %v2308_v32  ;;  %6046 = vrcp.f32 %v8738_v50  ;;  %v8777_v32 = vpop.f32.mrf.mxu0  ;;  %vm2335_vm7 = vweird.f32 %v8738_v50 }
 0x608   : > { %v2314_v51 = vmul.f32 %v8442_v59, %v2313_v47  ;;  %6048 = vrcp.f32 %v8519_v25 }
 0x609   : > { %6050 = vpow2.f32 %v2729_v36 }
 0x60b   : > { %2689 = vmax.xlane.f32.xlu1 %v8626_v43 }
 0x60c   : > { %2461 = vmatmul.f32.gmra.mxu2 %v2299_v21 }
 0x60d   : > { %v8751_v57 = vpop.eup %6046 }
 0x60e   : > { %v8748_v53 = vpop.xlane.xlu0 %3405  ;;  %v2331_v61 = vmul.f32 %v8751_v57, %v8738_v50  ;;  %v8757_v6 = vpop.eup %6048  ;;  %vm2336_vm5 = vweird.f32 %v8751_v57 }
 0x60f   : > { %v8761_v55 = vpop.eup %6050  ;;  %v2780_v34 = vmul.f32 %v8757_v6, %v8519_v25  ;;  %vm2337_vm8 = vmor %vm2335_vm7, %vm2336_vm5  ;;  %vm2785_vm9 = vweird.f32 %v8757_v6  ;;  %vm3442_vm14 = vweird.f32 %v8748_v53 }
 0x610   : > { %v2332_v18 = vsub.f32 1.0, %v2331_v61  ;;  %vm8806_vm12 = vmor %vm2784_vm11, %vm2785_vm9 }
 0x611   : > { %v2781_v39 = vsub.f32 1.0, %v2780_v34 }
 0x612   : > { %v2333_v52 = vmul.f32 %v8751_v57, %v2332_v18 }
 0x613   : > { %3417 = vadd.xlane.f32.xlu1 %v8740_v17  ;;  %v2782_v12 = vmul.f32 %v8757_v6, %v2781_v39 }
 0x614   : > { %2464 = vmatmul.f32.gmra.mxu2 %v2314_v51 }
 0x615   : > { %v2783_v39 = vadd.f32 %v8757_v6, %v2782_v12 }
 0x618   : > { %v2686_v0 = vpop.xlane.xlu2 %2685 }
 0x619   : > { %v2708_v16 = vsub.f32 %v8553_v2, %v2686_v0 }
 0x61b   : > { %v2102_v59 = vpop.xlane.xlu1 %2101  ;;  %3351 = vmax.xlane.f32.xlu1 %v8671_v20  ;;  %v2733_v40 = vmul.f32 1.442695, %v2708_v16 }
 0x61c   : > { %6052 = vrcp.f32 %v2102_v59  ;;  %v2326_v7 = vand.u32 2147483648, %v2102_v59  ;;  %v2324_v4 = vand.u32 2147483647, %v2102_v59  ;;  %vm2320_vm3 = vweird.f32 %v2102_v59 }
 0x61d   : > { %6054 = vrcp.f32 %v8748_v53 }
 0x61e   : > { %6056 = vpow2.f32 %v2733_v40  ;;  %v2327_v36 = vor.u32 1.1754944e-38, %v2326_v7  ;;  %vm2325_vm6 = vcmp.eq.f32.partialorder %v2324_v4, 8.507059e+37  ;;  %v2334_v40 = vadd.f32 %v8751_v57, %v2333_v52 }
 0x61f   : > { %6058 = vrcp.f32 %v8588_v48 }
 0x620   : > { %v8763_v2 = vpop.xlane.xlu2 %3409  ;;  %6060 = vrcp.f32 %v8733_v56 }
 0x622   : > { %v6053_v37 = vpop.eup %6052 }
 0x623   : > { %v8767_v45 = vpop.eup %6054  ;;  %v2316_v42 = vmul.f32 %v6053_v37, %v2102_v59  ;;  %2761 = vadd.xlane.f32.xlu1 %v8761_v55  ;;  %vm2321_vm2 = vweird.f32 %v6053_v37  ;;  %v2341_v59 = vand.u32 2147483648, %v8738_v50 }
 0x624   : > { %v8771_v38 = vpop.eup %6056  ;;  %v3438_v33 = vmul.f32 %v8767_v45, %v8748_v53  ;;  %vm2322_vm4 = vmor %vm2320_vm3, %vm2321_vm2  ;;  %vm3443_vm13 = vweird.f32 %v8767_v45 }
 0x625   : > { %v2317_v46 = vsub.f32 1.0, %v2316_v42  ;;  %2765 = vadd.xlane.f32.xlu0 %v8771_v38  ;;  %v8779_v5 = vpop.eup %6058  ;;  %v2339_v42 = vand.u32 2147483647, %v8738_v50  ;;  %v2342_v7 = vor.u32 1.1754944e-38, %v2341_v59  ;;  %v8804_v50 = vpop.f32.mrf.mxu0  ;;  %vm8823_vm15 = vmor %vm3442_vm14, %vm3443_vm13 }
 0x626   : > { %v3439_v0 = vsub.f32 1.0, %v3438_v33  ;;  %v2795_v61 = vmul.f32 %v8779_v5, %v8588_v48  ;;  %10380 = vst [vmem:[#allocation35_spill] sm:$0xff] %v8804_v50  ;;  %vm2800_vm3 = vweird.f32 %v8779_v5 }
 0x627   : > { %v2318_v21 = vmul.f32 %v6053_v37, %v2317_v46  ;;  %v2338_v46 = vsel %vm2337_vm8, %v8751_v57, %v2334_v40  ;;  %vm2340_vm10 = vcmp.eq.f32.partialorder %v2339_v42, 8.507059e+37  ;;  %v3448_v40 = vand.u32 2147483648, %v8748_v53 }
 0x628   : > { %v8781_v47 = vpop.xlane.xlu2 %3411  ;;  %v2796_v52 = vsub.f32 1.0, %v2795_v61  ;;  %v2343_v4 = vsel %vm2340_vm10, %v2342_v7, %v2338_v46  ;;  %vm2814_vm8 = vweird.f32 %v8733_v56 }
 0x629   : > { %v2319_v51 = vadd.f32 %v6053_v37, %v2318_v21  ;;  %v8800_v21 = vpop.eup %6060 }
 0x62a   : > { %v2810_v59 = vmul.f32 %v8800_v21, %v8733_v56  ;;  %vm2815_vm7 = vweird.f32 %v8800_v21 }
 0x62b   : > { %2695 = vmax.xlane.f32.xlu1 %v8710_v30  ;;  %v2323_v16 = vsel %vm2322_vm4, %v6053_v37, %v2319_v51  ;;  %v3440_v37 = vmul.f32 %v8767_v45, %v3439_v0  ;;  %v2788_v51 = vand.u32 2147483647, %v8519_v25  ;;  %v2787_v0 = vsel %vm8806_vm12, %v8757_v6, %v2783_v39  ;;  %vm2816_vm9 = vmor %vm2814_vm8, %vm2815_vm7 }
 0x62c   : > { %v2328_v34 = vsel %vm2325_vm6, %v2327_v36, %v2323_v16  ;;  %v2797_v16 = vmul.f32 %v8779_v5, %v2796_v52  ;;  %v3449_v52 = vor.u32 1.1754944e-38, %v3448_v40  ;;  %vm2799_vm4 = vweird.f32 %v8588_v48 }
 0x62d   : > { %v2329_v18 = vmul.f32 %v8557_v22, %v2328_v34  ;;  %v2790_v22 = vand.u32 2147483648, %v8519_v25  ;;  %v3441_v12 = vadd.f32 %v8767_v45, %v3440_v37  ;;  %v3446_v25 = vand.u32 2147483647, %v8748_v53  ;;  %v5755_v34 = vpop.permute.xlu0 %5754  ;;  %vm2801_vm5 = vmor %vm2799_vm4, %vm2800_vm3 }
 0x62e   : > { %vm2789_vm0 = vcmp.eq.f32.partialorder %v2788_v51, 8.507059e+37  ;;  %v5756_v7 = vunpack.i.l.bf16 %v5755_v34  ;;  %v2811_v53 = vsub.f32 1.0, %v2810_v59  ;;  %v5757_v51 = vunpack.i.h.bf16 %v5755_v34 }
 0x62f   : > { %2467 = vmatmul.f32.gmra.mxu2 %v2329_v18  ;;  %v2344_v18 = vmul.f32 %v8496_v3, %v2343_v4  ;;  %v2791_v42 = vor.u32 1.1754944e-38, %v2790_v22  ;;  %v3445_v46 = vsel %vm8823_vm15, %v8767_v45, %v3441_v12  ;;  %vm3447_vm2 = vcmp.eq.f32.partialorder %v3446_v25, 8.507059e+37  ;;  %v10385_v45 = vld [vmem:[#allocation55_spill] sm:$0xff] }
 0x630   : > { %v8798_v33 = vpop.xlane.xlu2 %3345  ;;  %v2798_v22 = vadd.f32 %v8779_v5, %v2797_v16  ;;  %v2805_v4 = vand.u32 2147483648, %v8588_v48  ;;  %v3450_v57 = vsel %vm3447_vm2, %v3449_v52, %v3445_v46  ;;  %v2812_v40 = vmul.f32 %v8800_v21, %v2811_v53 }
 0x631   : > { %v2792_v39 = vsel %vm2789_vm0, %v2791_v42, %v2787_v0  ;;  %v8838_v0 = vpop.f32.mrf.mxu0  ;;  %v3451_v16 = vmul.f32 %v8523_v14, %v3450_v57  ;;  %v10387_v42 = vld [vmem:[#allocation43_spill] sm:$0xff]  ;;  %v2818_v14 = vand.u32 2147483647, %v8733_v56 }
 0x632   : > { %v2793_v12 = vmul.f32 %v10385_v45, %v2792_v39  ;;  %10386 = vst [vmem:[#allocation54_spill] sm:$0xff] %v8838_v0  ;;  %v2806_v59 = vor.u32 1.1754944e-38, %v2805_v4 }
 0x633   : > { %v5750_v36 = vpop.permute.xlu1 %5749  ;;  %vm2819_vm10 = vcmp.eq.f32.partialorder %v2818_v14, 8.507059e+37 }
 0x634   : > { %v5751_v61 = vunpack.i.l.bf16 %v5750_v36  ;;  %v5752_v6 = vunpack.i.h.bf16 %v5750_v36  ;;  %v2803_v36 = vand.u32 2147483647, %v8588_v48  ;;  %v2820_v48 = vand.u32 2147483648, %v8733_v56 }
 0x636   : > { %3079 = vmatpush.msra.mxu0 %v5751_v61  ;;  %v2802_v61 = vsel %vm2801_vm5, %v8779_v5, %v2798_v22  ;;  %vm2804_vm6 = vcmp.eq.f32.partialorder %v2803_v36, 8.507059e+37  ;;  %v2821_v46 = vor.u32 1.1754944e-38, %v2820_v48  ;;  %v8866_v36 = vpop.f32.mrf.mxu2 }
 0x637   : > { %2470 = vmatmul.f32.gmra.mxu2 %v2344_v18  ;;  %v2807_v25 = vsel %vm2804_vm6, %v2806_v59, %v2802_v61  ;;  %v2813_v18 = vadd.f32 %v8800_v21, %v2812_v40 }
 0x638   : > { %3080 = vmatpush.msra.mxu0 %v5752_v6  ;;  %v8830_v3 = vpop.xlane.xlu2 %3413  ;;  %v2808_v37 = vmul.f32 %v10387_v42, %v2807_v25 }
 0x639   : > { %v2817_v5 = vsel %vm2816_vm9, %v8800_v21, %v2813_v18  ;;  %v8852_v6 = vpop.f32.mrf.mxu0 }
 0x63a   : > { %3081 = vmatpush.msra.mxu0 %v5756_v7  ;;  %10388 = vst [vmem:[#allocation33_spill] sm:$0xff] %v8852_v6  ;;  %v2822_v39 = vsel %vm2819_vm10, %v2821_v46, %v2817_v5 }
 0x63b   : > { %v2823_v7 = vmul.f32 %v8462_v27, %v2822_v39 }
 0x63c   : > { %3082 = vmatpush.msra.mxu0 %v5757_v51 }
 0x63d   : > { %3083 = vmatmul.f32.vlgmr.msra.gmra.mxu0 %v2793_v12 }
 0x63f   : > { %3741 = vmatmul.f32.vlgmr.msra.gmra.mxu2 %v3451_v16 }
 0x640   : > { %v8843_v34 = vpop.xlane.xlu2 %2755 }
 0x641   : > { %6062 = vrcp.f32 %v8843_v34  ;;  %v8858_v56 = vpop.f32.mrf.mxu0  ;;  %vm2844_vm0 = vweird.f32 %v8843_v34 }
 0x642   : > { %10389 = vst [vmem:[#allocation28_spill] sm:$0xff] %v8858_v56 }
 0x645   : > { %3086 = vmatmul.f32.gmra.mxu0 %v2808_v37 }
 0x647   : > { %v6063_v53 = vpop.eup %6062 }
 0x648   : > { %v8855_v52 = vpop.xlane.xlu2 %3415  ;;  %v2840_v4 = vmul.f32 %v6063_v53, %v8843_v34  ;;  %vm2845_vm14 = vweird.f32 %v6063_v53 }
 0x649   : > { %v8873_v48 = vpop.f32.mrf.mxu0  ;;  %vm2846_vm2 = vmor %vm2844_vm0, %vm2845_vm14 }
 0x64a   : > { %v2841_v51 = vsub.f32 1.0, %v2840_v4  ;;  %10390 = vst [vmem:[#allocation57_spill] sm:$0xff] %v8873_v48  ;;  %v8879_v4 = vpop.f32.mrf.mxu2 }
 0x64c   : > { %v2754_v22 = vpop.xlane.xlu0 %2753  ;;  %v2842_v16 = vmul.f32 %v6063_v53, %v2841_v51  ;;  %v2850_v51 = vand.u32 2147483648, %v8843_v34 }
 0x64d   : > { %3089 = vmatmul.f32.gmra.mxu0 %v2823_v7  ;;  %6064 = vrcp.f32 %v2754_v22  ;;  %v2835_v61 = vand.u32 2147483648, %v2754_v22  ;;  %v2833_v18 = vand.u32 2147483647, %v2754_v22  ;;  %vm2829_vm12 = vweird.f32 %v2754_v22 }
 0x64e   : > { %v2843_v7 = vadd.f32 %v6063_v53, %v2842_v16 }
 0x64f   : > { %v2836_v37 = vor.u32 1.1754944e-38, %v2835_v61  ;;  %vm2834_vm15 = vcmp.eq.f32.partialorder %v2833_v18, 8.507059e+37 }
 0x650   : > { %v8861_v21 = vpop.xlane.xlu2 %2757 }
 0x651   : > { %6066 = vrcp.f32 %v8861_v21  ;;  %v8896_v18 = vpop.f32.mrf.mxu0  ;;  %v2865_v56 = vand.u32 2147483648, %v8861_v21  ;;  %vm2859_vm6 = vweird.f32 %v8861_v21 }
 0x652   : > { %6068 = vrcp.f32 %v8763_v2  ;;  %10391 = vst [vmem:[#allocation31_spill] sm:$0xff] %v8896_v18 }
 0x653   : > { %v6065_v57 = vpop.eup %6064  ;;  %6070 = vrcp.f32 %v8781_v47 }
 0x654   : > { %v2825_v45 = vmul.f32 %v6065_v57, %v2754_v22  ;;  %v8864_v12 = vpop.xlane.xlu0 %3349  ;;  %vm2830_vm11 = vweird.f32 %v6065_v57 }
 0x655   : > { %vm2831_vm13 = vmor %vm2829_vm12, %vm2830_vm11 }
 0x656   : > { %v2826_v27 = vsub.f32 1.0, %v2825_v45 }
 0x657   : > { %v8869_v40 = vpop.eup %6066 }
 0x658   : > { %v2827_v59 = vmul.f32 %v6065_v57, %v2826_v27  ;;  %v2855_v25 = vmul.f32 %v8869_v40, %v8861_v21  ;;  %v8875_v14 = vpop.eup %6068  ;;  %v8886_v27 = vpop.xlane.xlu2 %2691  ;;  %vm2860_vm4 = vweird.f32 %v8869_v40 }
 0x659   : > { %v3468_v16 = vmul.f32 %v8875_v14, %v8763_v2  ;;  %vm3473_vm5 = vweird.f32 %v8875_v14  ;;  %vm8922_vm7 = vmor %vm2859_vm6, %vm2860_vm4  ;;  %vm3487_vm6 = vweird.f32 %v8781_v47 }
 0x65a   : > { %v2828_v42 = vadd.f32 %v6065_v57, %v2827_v59  ;;  %v2856_v5 = vsub.f32 1.0, %v2855_v25  ;;  %v2847_v25 = vsel %vm2846_vm2, %v6063_v53, %v2843_v7  ;;  %v2863_v7 = vand.u32 2147483647, %v8861_v21 }
 0x65c   : > { %v8877_v46 = vpop.xlane.xlu0 %2759  ;;  %v2832_v39 = vsel %vm2831_vm13, %v6065_v57, %v2828_v42  ;;  %v2848_v57 = vand.u32 2147483647, %v8843_v34  ;;  %v2857_v59 = vmul.f32 %v8869_v40, %v2856_v5  ;;  %v2851_v42 = vor.u32 1.1754944e-38, %v2850_v51 }
 0x65d   : > { %v2837_v22 = vsel %vm2834_vm15, %v2836_v37, %v2832_v39  ;;  %6072 = vrcp.f32 %v8877_v46  ;;  %v8898_v37 = vpop.eup %6070  ;;  %vm2864_vm8 = vcmp.eq.f32.partialorder %v2863_v7, 8.507059e+37  ;;  %vm2874_vm12 = vweird.f32 %v8877_v46 }
 0x65e   : > { %v8883_v45 = vpop.xlane.xlu1 %3407  ;;  %v2838_v61 = vmul.f32 %v8616_v44, %v2837_v22  ;;  %vm2849_vm3 = vcmp.eq.f32.partialorder %v2848_v57, 8.507059e+37  ;;  %v3469_v44 = vsub.f32 1.0, %v3468_v16  ;;  %v2858_v22 = vadd.f32 %v8869_v40, %v2857_v59  ;;  %v8914_v59 = vpop.f32.mrf.mxu2 }
 0x65f   : > { %6074 = vrcp.f32 %v8883_v45  ;;  %v2852_v39 = vsel %vm2849_vm3, %v2851_v42, %v2847_v25  ;;  %v3483_v25 = vmul.f32 %v8898_v37, %v8781_v47  ;;  %v3367_v42 = vsub.f32 %v8576_v63, %v8798_v33 }
 0x660   : > { %3092 = vmatmul.f32.gmra.mxu0 %v2838_v61  ;;  %v2853_v57 = vmul.f32 %v8596_v41, %v2852_v39  ;;  %v3470_v16 = vmul.f32 %v8875_v14, %v3469_v44  ;;  %6076 = vrcp.f32 %v8830_v3  ;;  %v8927_v41 = vpop.xlane.xlu2 %3419  ;;  %v2862_v39 = vsel %vm8922_vm7, %v8869_v40, %v2858_v22 }
 0x661   : > { %v3463_v33 = vand.u32 2147483648, %v8883_v45  ;;  %v3461_v6 = vand.u32 2147483647, %v8883_v45  ;;  %v3484_v0 = vsub.f32 1.0, %v3483_v25  ;;  %vm3457_vm10 = vweird.f32 %v8883_v45 }
 0x662   : > { %v3471_v50 = vadd.f32 %v8875_v14, %v3470_v16  ;;  %v2880_v22 = vand.u32 2147483648, %v8877_v46  ;;  %v2878_v25 = vand.u32 2147483647, %v8877_v46  ;;  %vm3472_vm15 = vweird.f32 %v8763_v2 }
 0x663   : > { %v8900_v34 = vpop.eup %6072  ;;  %v3464_v7 = vor.u32 1.1754944e-38, %v3463_v33  ;;  %vm3462_vm14 = vcmp.eq.f32.partialorder %v3461_v6, 8.507059e+37  ;;  %vm8969_vm2 = vmor %vm3472_vm15, %vm3473_vm5  ;;  %vm3488_vm5 = vweird.f32 %v8898_v37 }
 0x664   : > { %v2870_v53 = vmul.f32 %v8900_v34, %v8877_v46  ;;  %vm2875_vm11 = vweird.f32 %v8900_v34  ;;  %v3476_v46 = vand.u32 2147483647, %v8763_v2  ;;  %vm2879_vm3 = vcmp.eq.f32.partialorder %v2878_v25, 8.507059e+37  ;;  %vm3489_vm7 = vmor %vm3487_vm6, %vm3488_vm5 }
 0x665   : > { %v6075_v48 = vpop.eup %6074  ;;  %vm8955_vm0 = vmor %vm2874_vm12, %vm2875_vm11 }
 0x666   : > { %v3344_v5 = vpop.xlane.xlu1 %3343  ;;  %v3453_v51 = vmul.f32 %v6075_v48, %v8883_v45  ;;  %v2871_v18 = vsub.f32 1.0, %v2870_v53  ;;  %vm3458_vm9 = vweird.f32 %v6075_v48  ;;  %v8947_v16 = vpop.eup %6076  ;;  %vm3477_vm4 = vcmp.eq.f32.partialorder %v3476_v46, 8.507059e+37 }
 0x667   : > { %v3366_v61 = vsub.f32 %v8567_v31, %v3344_v5  ;;  %v2866_v5 = vor.u32 1.1754944e-38, %v2865_v56  ;;  %v8939_v56 = vpop.xlane.xlu0 %2693  ;;  %vm3459_vm13 = vmor %vm3457_vm10, %vm3458_vm9  ;;  %v8973_v33 = vpop.f32.mrf.mxu2  ;;  %v3491_v46 = vand.u32 2147483647, %v8781_v47  ;;  %vm3503_vm9 = vweird.f32 %v8947_v16 }
 0x668   : > { %v3454_v31 = vsub.f32 1.0, %v3453_v51  ;;  %3095 = vmatmul.f32.gmra.mxu0 %v2853_v57  ;;  %v2872_v63 = vmul.f32 %v8900_v34, %v2871_v18  ;;  %v8935_v51 = vpop.f32.mrf.mxu0  ;;  %vm3502_vm10 = vweird.f32 %v8830_v3 }
 0x669   : > { %v3391_v44 = vmul.f32 1.442695, %v3366_v61  ;;  %v3393_v61 = vmul.f32 1.442695, %v3367_v42  ;;  %v2867_v57 = vsel %vm2864_vm8, %v2866_v5, %v2862_v39  ;;  %vm3492_vm8 = vcmp.eq.f32.partialorder %v3491_v46, 8.507059e+37  ;;  %vm3504_vm11 = vmor %vm3502_vm10, %vm3503_vm9 }
 0x66a   : > { %v3455_v53 = vmul.f32 %v6075_v48, %v3454_v31  ;;  %v2873_v18 = vadd.f32 %v8900_v34, %v2872_v63  ;;  %v2868_v42 = vmul.f32 %v8633_v9, %v2867_v57  ;;  %v3498_v57 = vmul.f32 %v8947_v16, %v8830_v3 }
 0x66b   : > { %6078 = vpow2.f32 %v3391_v44  ;;  %v3478_v44 = vand.u32 2147483648, %v8763_v2  ;;  %v3369_v2 = vsub.f32 %v8641_v60, %v8864_v12 }
 0x66c   : > { %v3456_v40 = vadd.f32 %v6075_v48, %v3455_v53  ;;  %6080 = vrcp.f32 %v8855_v52  ;;  %v2877_v6 = vsel %vm8955_vm0, %v8900_v34, %v2873_v18  ;;  %v2881_v53 = vor.u32 1.1754944e-38, %v2880_v22 }
 0x66d   : > { %6082 = vpow2.f32 %v3393_v61  ;;  %v3485_v34 = vmul.f32 %v8898_v37, %v3484_v0  ;;  %v3479_v61 = vor.u32 1.1754944e-38, %v3478_v44  ;;  %v3397_v12 = vmul.f32 1.442695, %v3369_v2 }
 0x66e   : > { %v2688_v21 = vpop.xlane.xlu1 %2687  ;;  %v3460_v31 = vsel %vm3459_vm13, %v6075_v48, %v3456_v40  ;;  %v8984_v40 = vpop.xlane.xlu2 %3353  ;;  %v2882_v18 = vsel %vm2879_vm3, %v2881_v53, %v2877_v6  ;;  %v3499_v0 = vsub.f32 1.0, %v3498_v57  ;;  %v2712_v6 = vsub.f32 %v8687_v29, %v8939_v56 }
 0x66f   : > { %v2709_v45 = vsub.f32 %v8605_v49, %v2688_v21  ;;  %v3465_v39 = vsel %vm3462_vm14, %v3464_v7, %v3460_v31  ;;  %v3486_v25 = vadd.f32 %v8898_v37, %v3485_v34  ;;  %v3493_v31 = vand.u32 2147483648, %v8781_v47 }
 0x670   : > { %3098 = vmatmul.f32.gmra.mxu0 %v2868_v42  ;;  %v3466_v9 = vmul.f32 %v8664_v19, %v3465_v39  ;;  %v3475_v19 = vsel %vm8969_vm2, %v8875_v14, %v3471_v50  ;;  %v8986_v60 = vpop.f32.mrf.mxu0  ;;  %v8991_v14 = vpop.xlane.xlu0 %3421  ;;  %v2741_v29 = vmul.f32 1.442695, %v2712_v6  ;;  %vm3517_vm14 = vweird.f32 %v8855_v52 }
 0x671   : > { %v8960_v63 = vpop.eup %6078  ;;  %v2735_v49 = vmul.f32 1.442695, %v2709_v45  ;;  %v3480_v7 = vsel %vm3477_vm4, %v3479_v61, %v3475_v19  ;;  %v2883_v45 = vmul.f32 %v8656_v28, %v2882_v18  ;;  %v2711_v28 = vsub.f32 %v8651_v10, %v8886_v27 }
 0x672   : > { %3423 = vadd.xlane.f32.xlu1 %v8960_v63  ;;  %3744 = vmatmul.f32.gmra.mxu2 %v3466_v9  ;;  %v8989_v50 = vpop.eup %6080  ;;  %v3481_v5 = vmul.f32 %v8562_v58, %v3480_v7  ;;  %v3500_v58 = vmul.f32 %v8947_v16, %v3499_v0  ;;  %v3490_v47 = vsel %vm3489_vm7, %v8898_v37, %v3486_v25  ;;  %v3494_v9 = vor.u32 1.1754944e-38, %v3493_v31 }
 0x673   : > { %6084 = vpow2.f32 %v2735_v49  ;;  %v8996_v42 = vpop.eup %6082  ;;  %v9004_v49 = vpop.f32.mrf.mxu2  ;;  %v2739_v27 = vmul.f32 1.442695, %v2711_v28  ;;  %v3508_v61 = vand.u32 2147483648, %v8830_v3  ;;  %vm3518_vm13 = vweird.f32 %v8989_v50 }
 0x674   : > { %6086 = vpow2.f32 %v3397_v12  ;;  %v3495_v53 = vsel %vm3492_vm8, %v3494_v9, %v3490_v47  ;;  %v3501_v34 = vadd.f32 %v8947_v16, %v3500_v58  ;;  %vm9063_vm15 = vmor %vm3517_vm14, %vm3518_vm13  ;;  %v3553_v9 = vand.u32 2147483648, %v8927_v41 }
 0x675   : > { %vm3547_vm7 = vweird.f32 %v8927_v41 }
 0x676   : > { %v3348_v22 = vpop.xlane.xlu1 %3347  ;;  %v9018_v48 = vpop.xlane.xlu2 %2763 }
 0x677   : > { %v3368_v21 = vsub.f32 %v8614_v8, %v3348_v22  ;;  %v3513_v8 = vmul.f32 %v8989_v50, %v8855_v52  ;;  %v3506_v22 = vand.u32 2147483647, %v8830_v3  ;;  %v3509_v3 = vor.u32 1.1754944e-38, %v3508_v61 }
 0x678   : > { %3101 = vmatmul.f32.gmra.mxu0 %v2883_v45  ;;  %v9025_v37 = vpop.f32.mrf.mxu0  ;;  %v3356_v18 = vpop.xlane.xlu0 %3355 }
 0x679   : > { %v8999_v44 = vpop.eup %6084  ;;  %v3395_v39 = vmul.f32 1.442695, %v3368_v21  ;;  %v3514_v10 = vsub.f32 1.0, %v3513_v8  ;;  %v3371_v21 = vsub.f32 %v8697_v35, %v8984_v40  ;;  %v3372_v45 = vsub.f32 %v8720_v13, %v3356_v18 }
 0x67a   : > { %3425 = vadd.xlane.f32.xlu1 %v8996_v42  ;;  %2767 = vadd.xlane.f32.xlu2 %v8999_v44  ;;  %v9023_v57 = vpop.eup %6086  ;;  %vm3507_vm12 = vcmp.eq.f32.partialorder %v3506_v22, 8.507059e+37  ;;  %v3523_v35 = vand.u32 2147483648, %v8855_v52  ;;  %v3521_v8 = vand.u32 2147483647, %v8855_v52 }
 0x67b   : > { %6088 = vpow2.f32 %v3395_v39  ;;  %3747 = vmatmul.f32.gmra.mxu2 %v3481_v5  ;;  %v3515_v7 = vmul.f32 %v8989_v50, %v3514_v10  ;;  %v9035_v0 = vpop.f32.mrf.mxu2  ;;  %v3401_v40 = vmul.f32 1.442695, %v3371_v21  ;;  %v3403_v13 = vmul.f32 1.442695, %v3372_v45 }
 0x67c   : > { %6090 = vrcp.f32 %v8927_v41  ;;  %vm3522_vm0 = vcmp.eq.f32.partialorder %v3521_v8, 8.507059e+37 }
 0x67d   : > { %6092 = vpow2.f32 %v2739_v27  ;;  %v3516_v5 = vadd.f32 %v8989_v50, %v3515_v7 }
 0x67e   : > { %v2690_v2 = vpop.xlane.xlu1 %2689  ;;  %v2698_v46 = vpop.xlane.xlu2 %2697 }
 0x67f   : > { %v2710_v19 = vsub.f32 %v8626_v43, %v2690_v2  ;;  %v3496_v43 = vmul.f32 %v8569_v23, %v3495_v53  ;;  %v3505_v23 = vsel %vm3504_vm11, %v8947_v16, %v3501_v34  ;;  %v2714_v27 = vsub.f32 %v8731_v54, %v2698_v46 }
 0x680   : > { %v3510_v39 = vsel %vm3507_vm12, %v3509_v3, %v3505_v23  ;;  %v9069_v10 = vpop.f32.mrf.mxu0  ;;  %v3520_v52 = vsel %vm9063_vm15, %v8989_v50, %v3516_v5  ;;  %v3524_v2 = vor.u32 1.1754944e-38, %v3523_v35  ;;  %vm3562_vm11 = vweird.f32 %v8991_v14 }
 0x681   : > { %v9029_v56 = vpop.eup %6088  ;;  %v2737_v12 = vmul.f32 1.442695, %v2710_v19  ;;  %v3511_v47 = vmul.f32 %v8585_v26, %v3510_v39  ;;  %v2745_v61 = vmul.f32 1.442695, %v2714_v27 }
 0x682   : > { %3427 = vadd.xlane.f32.xlu0 %v9029_v56  ;;  %3429 = vadd.xlane.f32.xlu2 %v9023_v57  ;;  %v9045_v25 = vpop.eup %6090  ;;  %v3525_v54 = vsel %vm3522_vm0, %v3524_v2, %v3520_v52 }
 0x683   : > { %6094 = vpow2.f32 %v2737_v12  ;;  %3750 = vmatmul.f32.gmra.mxu2 %v3496_v43  ;;  %v9053_v16 = vpop.eup %6092  ;;  %v3543_v58 = vmul.f32 %v9045_v25, %v8927_v41  ;;  %v9078_v26 = vpop.f32.mrf.mxu2  ;;  %v3526_v43 = vmul.f32 %v8611_v15, %v3525_v54  ;;  %vm3548_vm6 = vweird.f32 %v9045_v25 }
 0x684   : > { %6096 = vpow2.f32 %v2741_v29  ;;  %vm3549_vm8 = vmor %vm3547_vm7, %vm3548_vm6 }
 0x685   : > { %v3544_v19 = vsub.f32 1.0, %v3543_v58 }
 0x686   : > { %v9047_v31 = vpop.xlane.xlu1 %3417 }
 0x687   : > { %6098 = vrcp.f32 %v9047_v31  ;;  %v3545_v7 = vmul.f32 %v9045_v25, %v3544_v19  ;;  %v3538_v23 = vand.u32 2147483648, %v9047_v31  ;;  %vm3532_vm3 = vweird.f32 %v9047_v31 }
 0x688   : > { %6100 = vrcp.f32 %v8991_v14  ;;  %v9097_v15 = vpop.f32.mrf.mxu0  ;;  %v3551_v19 = vand.u32 2147483647, %v8927_v41 }
 0x689   : > { %v9058_v28 = vpop.eup %6094  ;;  %6102 = vpow2.f32 %v3401_v40  ;;  %v3539_v40 = vor.u32 1.1754944e-38, %v3538_v23 }
 0x68a   : > { %v9067_v6 = vpop.eup %6096  ;;  %2769 = vadd.xlane.f32.xlu1 %v9058_v28  ;;  %2771 = vadd.xlane.f32.xlu0 %v9053_v16  ;;  %6104 = vpow2.f32 %v3403_v13  ;;  %vm3552_vm9 = vcmp.eq.f32.partialorder %v3551_v19, 8.507059e+37 }
 0x68b   : > { %2773 = vadd.xlane.f32.xlu2 %v9067_v6  ;;  %3753 = vmatmul.f32.gmra.mxu2 %v3511_v47  ;;  %6106 = vrcp.f32 %v9018_v48  ;;  %v9102_v13 = vpop.f32.mrf.mxu2  ;;  %v3546_v47 = vadd.f32 %v9045_v25, %v3545_v7 }
 0x68c   : > { %6108 = vpow2.f32 %v2745_v61 }
 0x68d   : > { %v6099_v53 = vpop.eup %6098 }
 0x68e   : > { %v9080_v34 = vpop.eup %6100  ;;  %v3528_v29 = vmul.f32 %v6099_v53, %v9047_v31  ;;  %v3352_v18 = vpop.xlane.xlu1 %3351  ;;  %vm3533_vm2 = vweird.f32 %v6099_v53 }
 0x68f   : > { %v3370_v50 = vsub.f32 %v8671_v20, %v3352_v18  ;;  %v9086_v22 = vpop.eup %6102  ;;  %v3558_v21 = vmul.f32 %v9080_v34, %v8991_v14  ;;  %v3536_v20 = vand.u32 2147483647, %v9047_v31  ;;  %vm3534_vm4 = vmor %vm3532_vm3, %vm3533_vm2  ;;  %v3554_v18 = vor.u32 1.1754944e-38, %v3553_v9 }
 0x690   : > { %v3529_v12 = vsub.f32 1.0, %v3528_v29  ;;  %v9092_v45 = vpop.eup %6104  ;;  %v3550_v29 = vsel %vm3549_vm8, %v9045_v25, %v3546_v47  ;;  %vm3563_vm10 = vweird.f32 %v9080_v34  ;;  %v3568_v25 = vand.u32 2147483648, %v8991_v14 }
 0x691   : > { %v3399_v3 = vmul.f32 1.442695, %v3370_v50  ;;  %v3559_v35 = vsub.f32 1.0, %v3558_v21  ;;  %v9100_v46 = vpop.eup %6106  ;;  %vm3537_vm5 = vcmp.eq.f32.partialorder %v3536_v20, 8.507059e+37  ;;  %v3555_v50 = vsel %vm3552_vm9, %v3554_v18, %v3550_v29  ;;  %vm9135_vm12 = vmor %vm3562_vm11, %vm3563_vm10 }
 0x692   : > { %v3530_v39 = vmul.f32 %v6099_v53, %v3529_v12  ;;  %3433 = vadd.xlane.f32.xlu0 %v9086_v22  ;;  %v9107_v31 = vpop.eup %6108  ;;  %v2900_v61 = vmul.f32 %v9100_v46, %v9018_v48  ;;  %v3569_v19 = vor.u32 1.1754944e-38, %v3568_v25  ;;  %vm2905_vm2 = vweird.f32 %v9100_v46 }
 0x693   : > { %6110 = vpow2.f32 %v3399_v3  ;;  %3435 = vadd.xlane.f32.xlu2 %v9092_v45  ;;  %3756 = vmatmul.f32.gmra.mxu2 %v3526_v43  ;;  %v3560_v54 = vmul.f32 %v9080_v34, %v3559_v35  ;;  %v9125_v43 = vpop.f32.mrf.mxu0 }
 0x694   : > { %v3531_v5 = vadd.f32 %v6099_v53, %v3530_v39  ;;  %v2901_v41 = vsub.f32 1.0, %v2900_v61  ;;  %v9132_v39 = vpop.f32.mrf.mxu2 }
 0x695   : > { %v3561_v12 = vadd.f32 %v9080_v34, %v3560_v54 }
 0x696   : > { %v2762_v8 = vpop.xlane.xlu1 %2761  ;;  %v3535_v58 = vsel %vm3534_vm4, %v6099_v53, %v3531_v5  ;;  %v3556_v5 = vmul.f32 %v8680_v1, %v3555_v50  ;;  %vm2904_vm4 = vweird.f32 %v9018_v48 }
 0x697   : > { %6112 = vrcp.f32 %v2762_v8  ;;  %v3540_v27 = vsel %vm3537_vm5, %v3539_v40, %v3535_v58  ;;  %v3566_v40 = vand.u32 2147483647, %v8991_v14  ;;  %v2902_v58 = vmul.f32 %v9100_v46, %v2901_v41  ;;  %vm2906_vm5 = vmor %vm2904_vm4, %vm2905_vm2 }
 0x698   : > { %v9110_v52 = vpop.xlane.xlu0 %2765  ;;  %v3541_v2 = vmul.f32 %v8740_v17, %v3540_v27  ;;  %v2895_v47 = vand.u32 2147483648, %v2762_v8  ;;  %v3565_v27 = vsel %vm9135_vm12, %v9080_v34, %v3561_v12  ;;  %v2893_v1 = vand.u32 2147483647, %v2762_v8 }
 0x699   : > { %v9114_v53 = vpop.eup %6110  ;;  %6114 = vrcp.f32 %v9110_v52  ;;  %vm2889_vm14 = vweird.f32 %v2762_v8  ;;  %vm3567_vm15 = vcmp.eq.f32.partialorder %v3566_v40, 8.507059e+37  ;;  %v2903_v34 = vadd.f32 %v9100_v46, %v2902_v58 }
 0x69a   : > { %3431 = vadd.xlane.f32.xlu1 %v9114_v53  ;;  %2777 = vadd.xlane.f32.xlu0 %v9107_v31  ;;  %v2896_v14 = vor.u32 1.1754944e-38, %v2895_v47  ;;  %v3570_v61 = vsel %vm3567_vm15, %v3569_v19, %v3565_v27  ;;  %vm2894_vm3 = vcmp.eq.f32.partialorder %v2893_v1, 8.507059e+37  ;;  %v2910_v41 = vand.u32 2147483648, %v9018_v48 }
 0x69b   : > { %3759 = vmatmul.f32.gmra.mxu2 %v3541_v2  ;;  %v9149_v12 = vpop.f32.mrf.mxu0  ;;  %v3571_v25 = vmul.f32 %v8702_v62, %v3570_v61  ;;  %vm2919_vm8 = vweird.f32 %v9110_v52  ;;  %v2923_v40 = vand.u32 2147483647, %v9110_v52 }
 0x69d   : > { %v6113_v17 = vpop.eup %6112  ;;  %vm2924_vm10 = vcmp.eq.f32.partialorder %v2923_v40, 8.507059e+37 }
 0x69e   : > { %v2885_v7 = vmul.f32 %v6113_v17, %v2762_v8  ;;  %v2696_v21 = vpop.xlane.xlu1 %2695  ;;  %vm2890_vm13 = vweird.f32 %v6113_v17 }
 0x69f   : > { %v9127_v23 = vpop.eup %6114  ;;  %v2713_v3 = vsub.f32 %v8710_v30, %v2696_v21  ;;  %vm2891_vm0 = vmor %vm2889_vm14, %vm2890_vm13 }
 0x6a0   : > { %v2886_v20 = vsub.f32 1.0, %v2885_v7  ;;  %v2915_v2 = vmul.f32 %v9127_v23, %v9110_v52  ;;  %v2908_v7 = vand.u32 2147483647, %v9018_v48  ;;  %vm2920_vm7 = vweird.f32 %v9127_v23 }
 0x6a1   : > { %v2743_v9 = vmul.f32 1.442695, %v2713_v3  ;;  %v2925_v48 = vand.u32 2147483648, %v9110_v52  ;;  %vm2921_vm9 = vmor %vm2919_vm8, %vm2920_vm7 }
 0x6a2   : > { %v2887_v30 = vmul.f32 %v6113_v17, %v2886_v20  ;;  %v2916_v29 = vsub.f32 1.0, %v2915_v2  ;;  %v2907_v20 = vsel %vm2906_vm5, %v9100_v46, %v2903_v34  ;;  %vm2909_vm6 = vcmp.eq.f32.partialorder %v2908_v7, 8.507059e+37 }
 0x6a3   : > { %6116 = vpow2.f32 %v2743_v9  ;;  %3762 = vmatmul.f32.gmra.mxu2 %v3556_v5  ;;  %v2911_v5 = vor.u32 1.1754944e-38, %v2910_v41  ;;  %v9166_v58 = vpop.f32.mrf.mxu0  ;;  %v2926_v47 = vor.u32 1.1754944e-38, %v2925_v48 }
 0x6a4   : > { %v2888_v54 = vadd.f32 %v6113_v17, %v2887_v30  ;;  %v2917_v3 = vmul.f32 %v9127_v23, %v2916_v29 }
 0x6a5   : > { %v2912_v35 = vsel %vm2909_vm6, %v2911_v5, %v2907_v20 }
 0x6a6   : > { %v2892_v18 = vsel %vm2891_vm0, %v6113_v17, %v2888_v54  ;;  %v2453_v17 = vpop.f32.mrf.mxu2  ;;  %v2913_v62 = vmul.f32 %v8715_v24, %v2912_v35  ;;  %v5758_v24 = vpack.i.bf16 %v8879_v4, %v8866_v36  ;;  %v5803_v36 = vpack.i.bf16 %v9102_v13, %v9078_v26 }
 0x6a7   : > { %v2897_v50 = vsel %vm2894_vm3, %v2896_v14, %v2892_v18  ;;  %v5818_v61 = vpack.i.bf16 %v2453_v17, %v9132_v39 }
 0x6a8   : > { %v2898_v8 = vmul.f32 %v8761_v55, %v2897_v50  ;;  %v2918_v55 = vadd.f32 %v9127_v23, %v2917_v3 }
 0x6a9   : > { %v9154_v21 = vpop.eup %6116 }
 0x6aa   : > { %2775 = vadd.xlane.f32.xlu1 %v9154_v21  ;;  %3104 = vmatmul.f32.gmra.mxu0 %v2898_v8  ;;  %v2922_v46 = vsel %vm2921_vm9, %v9127_v23, %v2918_v55  ;;  %v5773_v23 = vpack.i.bf16 %v8973_v33, %v8914_v59 }
 0x6ab   : > { %3765 = vmatmul.f32.gmra.mxu2 %v3571_v25  ;;  %v2927_v27 = vsel %vm2924_vm10, %v2926_v47, %v2922_v46 }
 0x6ac   : > { %v2928_v30 = vmul.f32 %v8771_v38, %v2927_v27  ;;  %v5788_v38 = vpack.i.bf16 %v9035_v0, %v9004_v49 }
 0x6ae   : > { %v2456_v9 = vpop.f32.mrf.mxu2 }
 0x6b2   : > { %3107 = vmatmul.f32.gmra.mxu0 %v2913_v62 }
 0x6b6   : > { %v2459_v1 = vpop.f32.mrf.mxu2 }
 0x6b7   : > { %v5833_v49 = vpack.i.bf16 %v2459_v1, %v2456_v9 }
 0x6ba   : > { %v3084_v2 = vpop.f32.mrf.mxu0  ;;  %3110 = vmatmul.f32.gmra.mxu0 %v2928_v30 }
 0x6be   : > { %v9174_v54 = vpop.f32.mrf.mxu2 }
 0x6c2   : > { %v3087_v19 = vpop.f32.mrf.mxu0 }
 0x6c3   : > { %v5763_v52 = vpack.i.bf16 %v3087_v19, %v3084_v2  ;;  %5759 = vrot.lane.b32.xlu1 %v5758_v24, %s6598_s13 }
 0x6c5   : > { %5764 = vrot.lane.b32.xlu2 %v5763_v52, %s6597_s22 }
 0x6c6   : > { %v9181_v14 = vpop.f32.mrf.mxu2 }
 0x6ca   : > { %v9193_v29 = vpop.f32.mrf.mxu0 }
 0x6cb   : > { %5774 = vrot.lane.b32.xlu1 %v5773_v23, %s6598_s13 }
 0x6ce   : > { %v9186_v4 = vpop.f32.mrf.mxu2 }
 0x6d3   : > { %5789 = vrot.lane.b32.xlu1 %v5788_v38, %s6598_s13 }
 0x6d6   : > { %v9191_v59 = vpop.f32.mrf.mxu2 }
 0x6db   : > { %5804 = vrot.lane.b32.xlu1 %v5803_v36, %s6598_s13 }
 0x6dd   : > { %v9200_v41 = vpop.f32.mrf.mxu0 }
 0x6de   : > { %v3742_v34 = vpop.f32.mrf.mxu2 }
 0x6e3   : > { %5819 = vrot.lane.b32.xlu1 %v5818_v61, %s6598_s13 }
 0x6e5   : > { %v3424_v33 = vpop.xlane.xlu1 %3423  ;;  %v9218_v9 = vpop.f32.mrf.mxu0 }
 0x6e6   : > { %6118 = vrcp.f32 %v3424_v33  ;;  %v3583_v8 = vand.u32 2147483648, %v3424_v33  ;;  %vm3577_vm12 = vweird.f32 %v3424_v33  ;;  %v3581_v25 = vand.u32 2147483647, %v3424_v33 }
 0x6e8   : > { %v3584_v62 = vor.u32 1.1754944e-38, %v3583_v8  ;;  %vm3582_vm14 = vcmp.eq.f32.partialorder %v3581_v25, 8.507059e+37 }
 0x6eb   : > { %5834 = vrot.lane.b32.xlu1 %v5833_v49, %s6598_s13 }
 0x6ec   : > { %v6119_v0 = vpop.eup %6118 }
 0x6ed   : > { %v3573_v18 = vmul.f32 %v6119_v0, %v3424_v33  ;;  %v9196_v26 = vpop.xlane.xlu1 %3425  ;;  %v9198_v13 = vpop.xlane.xlu2 %2767  ;;  %vm3578_vm11 = vweird.f32 %v6119_v0 }
 0x6ee   : > { %6120 = vrcp.f32 %v9196_v26  ;;  %vm9204_vm13 = vmor %vm3577_vm12, %vm3578_vm11  ;;  %v3598_v52 = vand.u32 2147483648, %v9196_v26  ;;  %vm3592_vm0 = vweird.f32 %v9196_v26  ;;  %v2940_v36 = vand.u32 2147483648, %v9198_v13 }
 0x6ef   : > { %v3574_v39 = vsub.f32 1.0, %v3573_v18  ;;  %6122 = vrcp.f32 %v9198_v13  ;;  %v2938_v61 = vand.u32 2147483647, %v9198_v13  ;;  %vm2934_vm4 = vweird.f32 %v9198_v13 }
 0x6f0   : > { %v3599_v25 = vor.u32 1.1754944e-38, %v3598_v52 }
 0x6f1   : > { %v3575_v50 = vmul.f32 %v6119_v0, %v3574_v39  ;;  %vm2939_vm6 = vcmp.eq.f32.partialorder %v2938_v61, 8.507059e+37 }
 0x6f3   : > { %v3576_v7 = vadd.f32 %v6119_v0, %v3575_v50 }
 0x6f4   : > { %v6121_v17 = vpop.eup %6120 }
 0x6f5   : > { %v6123_v20 = vpop.eup %6122  ;;  %v3588_v5 = vmul.f32 %v6121_v17, %v9196_v26  ;;  %v9209_v35 = vpop.xlane.xlu2 %3429  ;;  %v3580_v48 = vsel %vm9204_vm13, %v6119_v0, %v3576_v7  ;;  %vm3593_vm15 = vweird.f32 %v6121_v17  ;;  %v5778_v7 = vpack.i.bf16 %v9200_v41, %v9193_v29 }
 0x6f6   : > { %v9211_v55 = vpop.xlane.xlu0 %3427  ;;  %v2930_v40 = vmul.f32 %v6123_v20, %v9198_v13  ;;  %6124 = vrcp.f32 %v9209_v35  ;;  %v3745_v46 = vpop.f32.mrf.mxu2  ;;  %v3585_v2 = vsel %vm3582_vm14, %v3584_v62, %v3580_v48  ;;  %vm2935_vm2 = vweird.f32 %v6123_v20  ;;  %vm9241_vm3 = vmor %vm3592_vm0, %vm3593_vm15 }
 0x6f7   : > { %v3589_v47 = vsub.f32 1.0, %v3588_v5  ;;  %6126 = vrcp.f32 %v9211_v55  ;;  %v5768_v30 = vpack.i.bf16 %v3745_v46, %v3742_v34  ;;  %v3586_v24 = vmul.f32 %v8960_v63, %v3585_v2  ;;  %vm2936_vm5 = vmor %vm2934_vm4, %vm2935_vm2  ;;  %v3099_v29 = vpop.f32.mrf.mxu0 }
 0x6f8   : > { %v2931_v27 = vsub.f32 1.0, %v2930_v40  ;;  %v3596_v34 = vand.u32 2147483647, %v9196_v26  ;;  %v2941_v5 = vor.u32 1.1754944e-38, %v2940_v36  ;;  %v3613_v40 = vand.u32 2147483648, %v9211_v55 }
 0x6f9   : > { %v3590_v1 = vmul.f32 %v6121_v17, %v3589_v47  ;;  %5769 = vrot.lane.b32.xlu0 %v5768_v30, %s6596_s17  ;;  %3768 = vmatmul.f32.gmra.mxu2 %v3586_v24  ;;  %vm3622_vm9 = vweird.f32 %v9209_v35  ;;  %vm3607_vm10 = vweird.f32 %v9211_v55 }
 0x6fa   : > { %v2932_v19 = vmul.f32 %v6123_v20, %v2931_v27  ;;  %vm3597_vm7 = vcmp.eq.f32.partialorder %v3596_v34, 8.507059e+37 }
 0x6fb   : > { %v3591_v23 = vadd.f32 %v6121_v17, %v3590_v1  ;;  %v5793_v1 = vpack.i.bf16 %v3099_v29, %v9218_v9  ;;  %v3614_v9 = vor.u32 1.1754944e-38, %v3613_v40 }
 0x6fc   : > { %v9223_v38 = vpop.eup %6124  ;;  %v2933_v18 = vadd.f32 %v6123_v20, %v2932_v19 }
 0x6fd   : > { %v9228_v33 = vpop.eup %6126  ;;  %v3618_v63 = vmul.f32 %v9223_v38, %v9209_v35  ;;  %v9232_v49 = vpop.xlane.xlu1 %2769  ;;  %v3595_v26 = vsel %vm9241_vm3, %v6121_v17, %v3591_v23  ;;  %vm3623_vm13 = vweird.f32 %v9223_v38 }
 0x6fe   : > { %v9234_v0 = vpop.xlane.xlu0 %2771  ;;  %v3603_v39 = vmul.f32 %v9228_v33, %v9211_v55  ;;  %6128 = vrcp.f32 %v9232_v49  ;;  %v3748_v50 = vpop.f32.mrf.mxu2  ;;  %v2937_v46 = vsel %vm2936_vm5, %v6123_v20, %v2933_v18  ;;  %v3600_v17 = vsel %vm3597_vm7, %v3599_v25, %v3595_v26  ;;  %vm9301_vm0 = vmor %vm3622_vm9, %vm3623_vm13 }
 0x6ff   : > { %v9248_v3 = vpop.xlane.xlu2 %2773  ;;  %v3619_v48 = vsub.f32 1.0, %v3618_v63  ;;  %6130 = vrcp.f32 %v9234_v0  ;;  %v2942_v41 = vsel %vm2939_vm6, %v2941_v5, %v2937_v46  ;;  %v3601_v27 = vmul.f32 %v8996_v42, %v3600_v17 }
 0x700   : > { %v3604_v62 = vsub.f32 1.0, %v3603_v39  ;;  %6132 = vrcp.f32 %v9248_v3  ;;  %v2943_v47 = vmul.f32 %v8999_v44, %v2942_v41  ;;  %v3611_v20 = vand.u32 2147483647, %v9211_v55 }
 0x701   : > { %5779 = vrot.lane.b32.xlu0 %v5778_v7, %s6597_s22  ;;  %v3620_v2 = vmul.f32 %v9223_v38, %v3619_v48  ;;  %3771 = vmatmul.f32.gmra.mxu2 %v3601_v27  ;;  %vm3608_vm8 = vweird.f32 %v9228_v33  ;;  %v3628_v44 = vand.u32 2147483648, %v9209_v35  ;;  %v3626_v63 = vand.u32 2147483647, %v9209_v35 }
 0x702   : > { %v3605_v13 = vmul.f32 %v9228_v33, %v3604_v62  ;;  %3113 = vmatmul.f32.gmra.mxu0 %v2943_v47  ;;  %vm3609_vm11 = vmor %vm3607_vm10, %vm3608_vm8  ;;  %vm3612_vm12 = vcmp.eq.f32.partialorder %v3611_v20, 8.507059e+37  ;;  %vm2949_vm15 = vweird.f32 %v9232_v49  ;;  %v2955_v25 = vand.u32 2147483648, %v9232_v49  ;;  %v4047_v20 = vld [vmem:[#allocation10 + $0x78] sm:$0xff] }
 0x703   : > { %v3621_v39 = vadd.f32 %v9223_v38, %v3620_v2  ;;  %v2953_v26 = vand.u32 2147483647, %v9232_v49  ;;  %vm3627_vm4 = vcmp.eq.f32.partialorder %v3626_v63, 8.507059e+37  ;;  %4052 = vmatpush.msra.mxu3 %v4047_v20  ;;  %vm2964_vm6 = vweird.f32 %v9234_v0 }
 0x704   : > { %v9260_v30 = vpop.eup %6128  ;;  %v3606_v52 = vadd.f32 %v9228_v33, %v3605_v13  ;;  %v3629_v13 = vor.u32 1.1754944e-38, %v3628_v44  ;;  %v2956_v17 = vor.u32 1.1754944e-38, %v2955_v25  ;;  %v2968_v44 = vand.u32 2147483647, %v9234_v0 }
 0x705   : > { %v2945_v24 = vmul.f32 %v9260_v30, %v9232_v49  ;;  %v9271_v42 = vpop.eup %6130  ;;  %vm2950_vm14 = vweird.f32 %v9260_v30  ;;  %v3625_v41 = vsel %vm9301_vm0, %v9223_v38, %v3621_v39  ;;  %vm2954_vm3 = vcmp.eq.f32.partialorder %v2953_v26, 8.507059e+37 }
 0x706   : > { %v9267_v19 = vpop.xlane.xlu0 %3433  ;;  %v3751_v23 = vpop.f32.mrf.mxu2  ;;  %v2960_v61 = vmul.f32 %v9271_v42, %v9234_v0  ;;  %v3610_v7 = vsel %vm3609_vm11, %v9228_v33, %v3606_v52  ;;  %vm9307_vm2 = vmor %vm2949_vm15, %vm2950_vm14  ;;  %vm2965_vm5 = vweird.f32 %v9271_v42  ;;  %vm2969_vm8 = vcmp.eq.f32.partialorder %v2968_v44, 8.507059e+37 }
 0x707   : > { %v2946_v36 = vsub.f32 1.0, %v2945_v24  ;;  %6134 = vrcp.f32 %v9267_v19  ;;  %v9280_v18 = vpop.eup %6132  ;;  %v5783_v34 = vpack.i.bf16 %v3751_v23, %v3748_v50  ;;  %v3615_v50 = vsel %vm3612_vm12, %v3614_v9, %v3610_v7  ;;  %v9305_v46 = vpop.xlane.xlu2 %3435  ;;  %vm9331_vm7 = vmor %vm2964_vm6, %vm2965_vm5 }
 0x708   : > { %v2961_v8 = vsub.f32 1.0, %v2960_v61  ;;  %v2975_v5 = vmul.f32 %v9280_v18, %v9248_v3  ;;  %v3616_v33 = vmul.f32 %v9029_v56, %v3615_v50  ;;  %v3630_v24 = vsel %vm3627_vm4, %v3629_v13, %v3625_v41 }
 0x709   : > { %v2947_v55 = vmul.f32 %v9260_v30, %v2946_v36  ;;  %5794 = vrot.lane.b32.xlu0 %v5793_v1, %s6597_s22  ;;  %5784 = vrot.lane.b32.xlu2 %v5783_v34, %s6596_s17  ;;  %v3631_v36 = vmul.f32 %v9023_v57, %v3630_v24  ;;  %vm2979_vm9 = vweird.f32 %v9248_v3  ;;  %v2983_v25 = vand.u32 2147483647, %v9248_v3  ;;  %v4045_v24 = vld [vmem:[#allocation10 + $0x68] sm:$0xff] }
 0x70a   : > { %v2962_v48 = vmul.f32 %v9271_v42, %v2961_v8  ;;  %3774 = vmatmul.f32.gmra.mxu2 %v3616_v33  ;;  %v2976_v27 = vsub.f32 1.0, %v2975_v5  ;;  %v2985_v8 = vand.u32 2147483648, %v9248_v3  ;;  %vm2980_vm10 = vweird.f32 %v9280_v18 }
 0x70b   : > { %v2948_v62 = vadd.f32 %v9260_v30, %v2947_v55  ;;  %vm9360_vm12 = vmor %vm2979_vm9, %vm2980_vm10  ;;  %vm2984_vm14 = vcmp.eq.f32.partialorder %v2983_v25, 8.507059e+37  ;;  %v3656_v9 = vand.u32 2147483647, %v9267_v19 }
 0x70c   : > { %v2963_v2 = vadd.f32 %v9271_v42, %v2962_v48  ;;  %v2977_v23 = vmul.f32 %v9280_v18, %v2976_v27 }
 0x70d   : > { %v9311_v29 = vpop.eup %6134  ;;  %v9313_v56 = vpop.xlane.xlu1 %3431  ;;  %v2952_v35 = vsel %vm9307_vm2, %v9260_v30, %v2948_v62  ;;  %v2970_v30 = vand.u32 2147483648, %v9234_v0  ;;  %v4046_v62 = vld [vmem:[#allocation10 + $0x70] sm:$0xff]  ;;  %vm3657_vm5 = vcmp.eq.f32.partialorder %v3656_v9, 8.507059e+37 }
 0x70e   : > { %6136 = vrcp.f32 %v9313_v56  ;;  %v3754_v47 = vpop.f32.mrf.mxu2  ;;  %v3648_v1 = vmul.f32 %v9311_v29, %v9267_v19  ;;  %v2957_v38 = vsel %vm2954_vm3, %v2956_v17, %v2952_v35  ;;  %v2967_v61 = vsel %vm9331_vm7, %v9271_v42, %v2963_v2  ;;  %v9343_v0 = vpop.xlane.xlu0 %2777  ;;  %4053 = vmatpush.msra.mxu3 %v4046_v62 }
 0x70f   : > { %6138 = vrcp.f32 %v9305_v46  ;;  %v2958_v52 = vmul.f32 %v9058_v28, %v2957_v38  ;;  %v2971_v34 = vor.u32 1.1754944e-38, %v2970_v30  ;;  %v2978_v26 = vadd.f32 %v9280_v18, %v2977_v23 }
 0x710   : > { %v3649_v39 = vsub.f32 1.0, %v3648_v1  ;;  %v3643_v33 = vand.u32 2147483648, %v9313_v56  ;;  %6140 = vrcp.f32 %v9343_v0  ;;  %v3641_v13 = vand.u32 2147483647, %v9313_v56  ;;  %4054 = vmatpush.msra.mxu3 %v4045_v24  ;;  %v4042_v24 = vld [vmem:[#allocation10 + $0x50] sm:$0xff] }
 0x711   : > { %3116 = vmatmul.f32.gmra.mxu0 %v2958_v52  ;;  %v2972_v7 = vsel %vm2969_vm8, %v2971_v34, %v2967_v61  ;;  %vm3637_vm13 = vweird.f32 %v9313_v56  ;;  %v2982_v41 = vsel %vm9360_vm12, %v9280_v18, %v2978_v26  ;;  %vm3653_vm2 = vweird.f32 %v9311_v29  ;;  %v3102_v52 = vpop.f32.mrf.mxu0 }
 0x712   : > { %3777 = vmatmul.f32.gmra.mxu2 %v3631_v36  ;;  %v3650_v48 = vmul.f32 %v9311_v29, %v3649_v39  ;;  %v2973_v49 = vmul.f32 %v9053_v16, %v2972_v7  ;;  %v3644_v27 = vor.u32 1.1754944e-38, %v3643_v33  ;;  %vm3642_vm0 = vcmp.eq.f32.partialorder %v3641_v13, 8.507059e+37 }
 0x713   : > { %vm3652_vm3 = vweird.f32 %v9267_v19  ;;  %vm3667_vm7 = vweird.f32 %v9305_v46 }
 0x714   : > { %v6137_v63 = vpop.eup %6136  ;;  %v3651_v3 = vadd.f32 %v9311_v29, %v3650_v48  ;;  %vm3654_vm4 = vmor %vm3652_vm3, %vm3653_vm2  ;;  %vm3998_vm3 = vcmask 523264  }
 0x715   : > { %v9340_v55 = vpop.eup %6138  ;;  %v3633_v28 = vmul.f32 %v6137_v63, %v9313_v56  ;;  %vm3638_vm11 = vweird.f32 %v6137_v63  ;;  %v3658_v56 = vand.u32 2147483648, %v9267_v19 }
 0x716   : > { %v3757_v57 = vpop.f32.mrf.mxu2  ;;  %v3663_v5 = vmul.f32 %v9340_v55, %v9305_v46  ;;  %vm3639_vm15 = vmor %vm3637_vm13, %vm3638_vm11  ;;  %v9370_v30 = vpop.eup %6140  ;;  %vm3668_vm6 = vweird.f32 %v9340_v55 }
 0x717   : > { %v3634_v42 = vsub.f32 1.0, %v3633_v28  ;;  %v5798_v50 = vpack.i.bf16 %v3757_v57, %v3754_v47  ;;  %v2986_v47 = vor.u32 1.1754944e-38, %v2985_v8  ;;  %v3005_v36 = vmul.f32 %v9370_v30, %v9343_v0  ;;  %vm9386_vm8 = vmor %vm3667_vm7, %vm3668_vm6 }
 0x718   : > { %v3664_v16 = vsub.f32 1.0, %v3663_v5  ;;  %v3659_v34 = vor.u32 1.1754944e-38, %v3658_v56  ;;  %v3673_v57 = vand.u32 2147483648, %v9305_v46  ;;  %v3671_v5 = vand.u32 2147483647, %v9305_v46 }
 0x719   : > { %v3635_v40 = vmul.f32 %v6137_v63, %v3634_v42  ;;  %5799 = vrot.lane.b32.xlu2 %v5798_v50, %s6596_s17  ;;  %3119 = vmatmul.f32.gmra.mxu0 %v2973_v49  ;;  %v2987_v18 = vsel %vm2984_vm14, %v2986_v47, %v2982_v41  ;;  %v3006_v19 = vsub.f32 1.0, %v3005_v36  ;;  %vm3010_vm14 = vweird.f32 %v9370_v30  ;;  %v4036_v36 = vld [vmem:[#allocation10 + $0x20] sm:$0xff] }
 0x71a   : > { %v3665_v23 = vmul.f32 %v9340_v55, %v3664_v16  ;;  %v2988_v61 = vmul.f32 %v9067_v6, %v2987_v18  ;;  %v4044_v6 = vld [vmem:[#allocation10 + $0x60] sm:$0xff]  ;;  %v3674_v13 = vor.u32 1.1754944e-38, %v3673_v57  ;;  %vm3672_vm11 = vcmp.eq.f32.partialorder %v3671_v5, 8.507059e+37 }
 0x71b   : > { %v3636_v17 = vadd.f32 %v6137_v63, %v3635_v40  ;;  %4055 = vmatpush.msra.mxu3 %v4044_v6  ;;  %v3007_v40 = vmul.f32 %v9370_v30, %v3006_v19  ;;  %v3015_v47 = vand.u32 2147483648, %v9343_v0  ;;  %v3013_v56 = vand.u32 2147483647, %v9343_v0 }
 0x71d   : > { %v2776_v2 = vpop.xlane.xlu1 %2775  ;;  %v3640_v20 = vsel %vm3639_vm15, %v6137_v63, %v3636_v17  ;;  %v3655_v63 = vsel %vm3654_vm4, %v9311_v29, %v3651_v3  ;;  %vm3009_vm15 = vweird.f32 %v9343_v0  ;;  %v3016_v18 = vor.u32 1.1754944e-38, %v3015_v47  ;;  %v4038_v0 = vld [vmem:[#allocation10 + $0x30] sm:$0xff] }
 0x71e   : > { %6142 = vrcp.f32 %v2776_v2  ;;  %v3760_v1 = vpop.f32.mrf.mxu2  ;;  %v3645_v38 = vsel %vm3642_vm0, %v3644_v27, %v3640_v20  ;;  %v3660_v28 = vsel %vm3657_vm5, %v3659_v34, %v3655_v63  ;;  %v3000_v48 = vand.u32 2147483648, %v2776_v2  ;;  %v4043_v27 = vld [vmem:[#allocation10 + $0x58] sm:$0xff]  ;;  %vm3011_vm0 = vmor %vm3009_vm15, %vm3010_vm14  ;;  %v4034_v63 = vld [vmem:[#allocation10 + $0x10] sm:$0xff] }
 0x71f   : > { %v3646_v44 = vmul.f32 %v9114_v53, %v3645_v38  ;;  %v3666_v53 = vadd.f32 %v9340_v55, %v3665_v23  ;;  %v3661_v50 = vmul.f32 %v9086_v22, %v3660_v28  ;;  %v2998_v22 = vand.u32 2147483647, %v2776_v2  ;;  %4056 = vmatpush.msra.mxu3 %v4043_v27  ;;  %v4040_v23 = vld [vmem:[#allocation10 + $0x40] sm:$0xff] }
 0x720   : > { %vm2994_vm10 = vweird.f32 %v2776_v2  ;;  %v3001_v35 = vor.u32 1.1754944e-38, %v3000_v48  ;;  %vm3014_vm2 = vcmp.eq.f32.partialorder %v3013_v56, 8.507059e+37  ;;  %v4032_v34 = vld [vmem:[#allocation10] sm:$0xff]  ;;  %vm4015_vm4 = vcmask 785408  }
 0x721   : > { %3780 = vmatmul.f32.gmra.mxu2 %v3646_v44  ;;  %3122 = vmatmul.f32.gmra.mxu0 %v2988_v61  ;;  %v3670_v62 = vsel %vm9386_vm8, %v9340_v55, %v3666_v53  ;;  %vm2999_vm13 = vcmp.eq.f32.partialorder %v2998_v22, 8.507059e+37  ;;  %v3008_v55 = vadd.f32 %v9370_v30, %v3007_v40  ;;  %v4035_v61 = vld [vmem:[#allocation10 + $0x18] sm:$0xff]  ;;  %v5765_v53 = vpop.permute.xlu2 %5764 }
 0x722   : > { %v3675_v41 = vsel %vm3672_vm11, %v3674_v13, %v3670_v62  ;;  %4057 = vmatpush.msra.mxu3 %v4042_v24  ;;  %v5767_v26 = vunpack.i.h.bf16 %v5765_v53  ;;  %v10416_v13 = vld [vmem:[#allocation35_spill] sm:$0xff]  ;;  %v10417_v27 = vld [vmem:[#allocation54_spill] sm:$0xff] }
 0x723   : > { %v3676_v3 = vmul.f32 %v9092_v45, %v3675_v41  ;;  %v4039_v45 = vld [vmem:[#allocation10 + $0x38] sm:$0xff] }
 0x724   : > { %v6143_v39 = vpop.eup %6142 }
 0x725   : > { %v2990_v8 = vmul.f32 %v6143_v39, %v2776_v2  ;;  %vm2995_vm9 = vweird.f32 %v6143_v39 }
 0x726   : > { %v3763_v7 = vpop.f32.mrf.mxu2  ;;  %vm2996_vm12 = vmor %vm2994_vm10, %vm2995_vm9 }
 0x727   : > { %v2991_v25 = vsub.f32 1.0, %v2990_v8  ;;  %v5813_v42 = vpack.i.bf16 %v3763_v7, %v3760_v1  ;;  %v3105_v29 = vpop.f32.mrf.mxu0  ;;  %v3012_v1 = vsel %vm3011_vm0, %v9370_v30, %v3008_v55  ;;  %v4037_v30 = vld [vmem:[#allocation10 + $0x28] sm:$0xff]  ;;  %v5766_v8 = vunpack.i.l.bf16 %v5765_v53 }
 0x728   : > { %v5808_v33 = vpack.i.bf16 %v3105_v29, %v3102_v52  ;;  %v3017_v38 = vsel %vm3014_vm2, %v3016_v18, %v3012_v1  ;;  %v4041_v52 = vld [vmem:[#allocation10 + $0x48] sm:$0xff] }
 0x729   : > { %v2992_v49 = vmul.f32 %v6143_v39, %v2991_v25  ;;  %5814 = vrot.lane.b32.xlu2 %v5813_v42, %s6596_s17  ;;  %3783 = vmatmul.f32.gmra.mxu2 %v3661_v50  ;;  %v3018_v9 = vmul.f32 %v9107_v31, %v3017_v38  ;;  %v4033_v31 = vld [vmem:[#allocation10 + $0x8] sm:$0xff] }
 0x72a   : > { %5809 = vrot.lane.b32.xlu0 %v5808_v33, %s6597_s22  ;;  %4058 = vmatpush.msra.mxu3 %v4041_v52 }
 0x72b   : > { %v2993_v46 = vadd.f32 %v6143_v39, %v2992_v49 }
 0x72c   : > { %4059 = vmatpush.msra.mxu3 %v4040_v23 }
 0x72d   : > { %v2997_v17 = vsel %vm2996_vm12, %v6143_v39, %v2993_v46 }
 0x72e   : > { %v3002_v16 = vsel %vm2999_vm13, %v3001_v35, %v2997_v17  ;;  %4060 = vmatpush.msra.mxu3 %v4039_v45  ;;  %v3766_v33 = vpop.f32.mrf.mxu2 }
 0x72f   : > { %v3108_v20 = vpop.f32.mrf.mxu0  ;;  %v3003_v2 = vmul.f32 %v9154_v21, %v3002_v16 }
 0x730   : > { %4061 = vmatpush.msra.mxu3 %v4038_v0 }
 0x731   : > { %3125 = vmatmul.f32.gmra.mxu0 %v3003_v2  ;;  %3786 = vmatmul.f32.gmra.mxu2 %v3676_v3 }
 0x732   : > { %4062 = vmatpush.msra.mxu3 %v4037_v30 }
 0x734   : > { %4063 = vmatpush.msra.mxu3 %v4036_v36 }
 0x735   : > { %v5760_v39 = vpop.permute.xlu1 %5759 }
 0x736   : > { %4064 = vmatpush.msra.mxu3 %v4035_v61  ;;  %v5761_v28 = vunpack.i.l.bf16 %v5760_v39  ;;  %v5762_v25 = vunpack.i.h.bf16 %v5760_v39  ;;  %v10419_v39 = vld [vmem:[#allocation28_spill] sm:$0xff] }
 0x737   : > { %v3111_v44 = vpop.f32.mrf.mxu0 }
 0x738   : > { %v5823_v21 = vpack.i.bf16 %v3111_v44, %v3108_v20  ;;  %4065 = vmatpush.msra.mxu3 %v4034_v63  ;;  %v3982_v19 = vsel %vm1221_vm1, %v8759_v11, %v5761_v28  ;;  %v3983_v50 = vsel %vm1221_vm1, %v8777_v32, %v5762_v25  ;;  %v5843_v25 = vpack.i.bf16 %v9181_v14, %v9174_v54 }
 0x739   : > { %3128 = vmatmul.f32.gmra.mxu0 %v3018_v9  ;;  %v3999_v6 = vsel %vm3998_vm3, %v3982_v19, %v5766_v8  ;;  %v4000_v11 = vsel %vm3998_vm3, %v3983_v50, %v5767_v26 }
 0x73a   : > { %5824 = vrot.lane.b32.xlu0 %v5823_v21, %s6597_s22  ;;  %4066 = vmatpush.msra.mxu3 %v4033_v31  ;;  %v10418_v21 = vld [vmem:[#allocation33_spill] sm:$0xff] }
 0x73c   : > { %4067 = vmatpush.msra.mxu3 %v4032_v34 }
 0x73d   : > { %v5775_v5 = vpop.permute.xlu1 %5774 }
 0x73e   : > { %v5776_v62 = vunpack.i.l.bf16 %v5775_v5  ;;  %v5777_v32 = vunpack.i.h.bf16 %v5775_v5 }
 0x740   : > { %v3984_v46 = vsel %vm1221_vm1, %v10416_v13, %v5776_v62  ;;  %v3985_v20 = vsel %vm1221_vm1, %v10417_v27, %v5777_v32 }
 0x745   : > { %v5790_v2 = vpop.permute.xlu1 %5789 }
 0x746   : > { %v5791_v18 = vunpack.i.l.bf16 %v5790_v2  ;;  %v5792_v30 = vunpack.i.h.bf16 %v5790_v2 }
 0x748   : > { %v3986_v23 = vsel %vm1221_vm1, %v10418_v21, %v5791_v18  ;;  %v3987_v28 = vsel %vm1221_vm1, %v10419_v39, %v5792_v30  ;;  %v9466_v21 = vld [vmem:[#allocation11] ss:$0 sm:$0xff] }
 0x74d   : > { %v5805_v8 = vpop.permute.xlu1 %5804 }
 0x74e   : > { %v5807_v62 = vunpack.i.h.bf16 %v5805_v8 }
 0x763   : > { %v5785_v22 = vpop.permute.xlu2 %5784 }
 0x764   : > { %v5786_v41 = vunpack.i.l.bf16 %v5785_v22  ;;  %v5787_v56 = vunpack.i.h.bf16 %v5785_v22  ;;  %v10421_v22 = vld [vmem:[#allocation31_spill] sm:$0xff] }
 0x765   : > { %v3989_v13 = vsel %vm1221_vm1, %v10421_v22, %v5807_v62 }
 0x76b   : > { %v5770_v57 = vpop.permute.xlu0 %5769 }
 0x76c   : > { %v5771_v7 = vunpack.i.l.bf16 %v5770_v57  ;;  %v5772_v29 = vunpack.i.h.bf16 %v5770_v57 }
 0x76e   : > { %v4016_v42 = vsel %vm4015_vm4, %v3999_v6, %v5771_v7  ;;  %v4017_v40 = vsel %vm4015_vm4, %v4000_v11, %v5772_v29 }
 0x76f   : > { %4068 = vmatmul.f32.vlgmr.msra.gmra.mxu3 %v4016_v42  ;;  %v5806_v42 = vunpack.i.l.bf16 %v5805_v8 }
 0x773   : > { %v5780_v48 = vpop.permute.xlu0 %5779  ;;  %v5800_v9 = vpop.permute.xlu2 %5799 }
 0x774   : > { %v5781_v49 = vunpack.i.l.bf16 %v5780_v48  ;;  %v5782_v16 = vunpack.i.h.bf16 %v5780_v48  ;;  %v5801_v0 = vunpack.i.l.bf16 %v5800_v9  ;;  %v5802_v19 = vunpack.i.h.bf16 %v5800_v9  ;;  %v10420_v48 = vld [vmem:[#allocation57_spill] sm:$0xff] }
 0x776   : > { %v4001_v35 = vsel %vm3998_vm3, %v3984_v46, %v5781_v49  ;;  %v4002_v3 = vsel %vm3998_vm3, %v3985_v20, %v5782_v16 }
 0x777   : > { %4071 = vmatmul.f32.gmra.mxu3 %v4017_v40  ;;  %v4018_v47 = vsel %vm4015_vm4, %v4001_v35, %v5786_v41  ;;  %v4019_v38 = vsel %vm4015_vm4, %v4002_v3, %v5787_v56 }
 0x77b   : > { %v5795_v1 = vpop.permute.xlu0 %5794 }
 0x77c   : > { %v3769_v17 = vpop.f32.mrf.mxu2  ;;  %v5796_v24 = vunpack.i.l.bf16 %v5795_v1  ;;  %v5797_v61 = vunpack.i.h.bf16 %v5795_v1 }
 0x77d   : > { %v5828_v55 = vpack.i.bf16 %v3769_v17, %v3766_v33  ;;  %v3988_v33 = vsel %vm1221_vm1, %v10420_v48, %v5806_v42 }
 0x77e   : > { %v4003_v45 = vsel %vm3998_vm3, %v3986_v23, %v5796_v24  ;;  %v4004_v53 = vsel %vm3998_vm3, %v3987_v28, %v5797_v61 }
 0x77f   : > { %4074 = vmatmul.f32.gmra.mxu3 %v4018_v47  ;;  %5829 = vrot.lane.b32.xlu2 %v5828_v55, %s6596_s17  ;;  %v3114_v52 = vpop.f32.mrf.mxu0  ;;  %v4020_v36 = vsel %vm4015_vm4, %v4003_v45, %v5801_v0  ;;  %v4021_v57 = vsel %vm4015_vm4, %v4004_v53, %v5802_v19  ;;  %v5820_v47 = vpop.permute.xlu1 %5819  ;;  %v6240_v45 = vld [vmem:[%s6813_s21] sm:$0xff]  ;;  %v6242_v53 = vld [vmem:[%s6813_s21 + $0x10] sm:$0xff] }
 0x780   : > { %v5821_v27 = vunpack.i.l.bf16 %v5820_v47  ;;  %v5822_v18 = vunpack.i.h.bf16 %v5820_v47 }
 0x782   : > { %v3990_v3 = vsel %vm1221_vm1, %v8935_v51, %v5821_v27 }
 0x783   : > { %v5815_v29 = vpop.permute.xlu2 %5814 }
 0x784   : > { %v3772_v44 = vpop.f32.mrf.mxu2  ;;  %v5816_v5 = vunpack.i.l.bf16 %v5815_v29  ;;  %v5817_v35 = vunpack.i.h.bf16 %v5815_v29 }
 0x787   : > { %4077 = vmatmul.f32.gmra.mxu3 %v4019_v38  ;;  %3954 = vrot.lane.b32.xlu2 %v3772_v44, %s6596_s17 }
 0x78d   : > { %v3775_v63 = vpop.f32.mrf.mxu2 }
 0x78e   : > { %v3117_v31 = vpop.f32.mrf.mxu0  ;;  %3956 = vrot.lane.b32.xlu1 %v3775_v63, %s6596_s17  ;;  %v5835_v63 = vpop.permute.xlu1 %5834 }
 0x78f   : > { %4080 = vmatmul.f32.gmra.mxu3 %v4020_v36  ;;  %v5838_v34 = vpack.i.bf16 %v3117_v31, %v3114_v52  ;;  %v3991_v52 = vsel %vm1221_vm1, %v8986_v60, %v5822_v18  ;;  %v6241_v60 = vld [vmem:[%s6813_s21 + $0x8] sm:$0xff]  ;;  %v5836_v31 = vunpack.i.l.bf16 %v5835_v63 }
 0x791   : > { %5839 = vrot.lane.b32.xlu0 %v5838_v34, %s6597_s22 }
 0x795   : > { %v3778_v7 = vpop.f32.mrf.mxu2 }
 0x796   : > { %v3120_v6 = vpop.f32.mrf.mxu0  ;;  %3958 = vrot.lane.b32.xlu1 %v3778_v7, %s6596_s17 }
 0x797   : > { %4083 = vmatmul.f32.gmra.mxu3 %v4021_v57  ;;  %3894 = vrot.lane.b32.xlu2 %v3120_v6, %s6597_s22  ;;  %v3992_v57 = vsel %vm1221_vm1, %v9025_v37, %v5836_v31  ;;  %v6243_v37 = vld [vmem:[%s6813_s21 + $0x18] sm:$0xff] }
 0x799   : > { %5844 = vrot.lane.b32.xlu0 %v5843_v25, %s6598_s13  ;;  %v5837_v25 = vunpack.i.h.bf16 %v5835_v63  ;;  %v10422_v63 = vld [vmem:[#allocation23_spill] sm:$0xff] }
 0x79c   : > { %v5810_v50 = vpop.permute.xlu0 %5809 }
 0x79d   : > { %v5811_v26 = vunpack.i.l.bf16 %v5810_v50  ;;  %v5812_v54 = vunpack.i.h.bf16 %v5810_v50 }
 0x79e   : > { %3834 = vrot.lane.b32.xlu1 %v9186_v4, %s6598_s13  ;;  %v3123_v14 = vpop.f32.mrf.mxu0 }
 0x79f   : > { %v4005_v11 = vsel %vm3998_vm3, %v3988_v33, %v5811_v26  ;;  %v4006_v46 = vsel %vm3998_vm3, %v3989_v13, %v5812_v54  ;;  %v3993_v33 = vsel %vm1221_vm1, %v9069_v10, %v5837_v25 }
 0x7a0   : > { %v4022_v40 = vsel %vm4015_vm4, %v4005_v11, %v5816_v5  ;;  %v4023_v41 = vsel %vm4015_vm4, %v4006_v46, %v5817_v35  ;;  %v6244_v46 = vld [vmem:[%s6813_s21 + $0x20] sm:$0xff] }
 0x7a1   : > { %4086 = vmatmul.f32.gmra.mxu3 %v4022_v40  ;;  %3896 = vrot.lane.b32.xlu0 %v3123_v14, %s6597_s22 }
 0x7a4   : > { %v3781_v49 = vpop.f32.mrf.mxu2 }
 0x7a5   : > { %3960 = vrot.lane.b32.xlu2 %v3781_v49, %s6596_s17 }
 0x7a6   : > { %3836 = vrot.lane.b32.xlu1 %v9191_v59, %s6598_s13  ;;  %s6518_s13 = scalar_lea.hbm %s10429_s20, 256 }
 0x7a9   : > { %4089 = vmatmul.f32.gmra.mxu3 %v4023_v41 }
 0x7ac   : > { %v3784_v4 = vpop.f32.mrf.mxu2  ;;  %v5825_v16 = vpop.permute.xlu0 %5824 }
 0x7ad   : > { %3962 = vrot.lane.b32.xlu2 %v3784_v4, %s6596_s17  ;;  %v5826_v20 = vunpack.i.l.bf16 %v5825_v16  ;;  %v5827_v38 = vunpack.i.h.bf16 %v5825_v16 }
 0x7ae   : > { %v3126_v17 = vpop.f32.mrf.mxu0 }
 0x7af   : > { %3898 = vrot.lane.b32.xlu0 %v3126_v17, %s6597_s22  ;;  %v4007_v56 = vsel %vm3998_vm3, %v3990_v3, %v5826_v20  ;;  %v4008_v44 = vsel %vm3998_vm3, %v3991_v52, %v5827_v38  ;;  %v6245_v20 = vld [vmem:[%s6813_s21 + $0x28] sm:$0xff]  ;;  %v6246_v52 = vld [vmem:[%s6813_s21 + $0x30] sm:$0xff] }
 0x7b4   : > { %v3787_v32 = vpop.f32.mrf.mxu2 }
 0x7b5   : > { %3964 = vrot.lane.b32.xlu2 %v3787_v32, %s6596_s17 }
 0x7b6   : > { %v3129_v55 = vpop.f32.mrf.mxu0 }
 0x7b7   : > { %3900 = vrot.lane.b32.xlu0 %v3129_v55, %s6597_s22 }
 0x7d9   : > { %v5830_v2 = vpop.permute.xlu2 %5829 }
 0x7da   : > { %v5831_v59 = vunpack.i.l.bf16 %v5830_v2  ;;  %v5832_v24 = vunpack.i.h.bf16 %v5830_v2 }
 0x7dc   : > { %v4024_v1 = vsel %vm4015_vm4, %v4007_v56, %v5831_v59  ;;  %v4025_v9 = vsel %vm4015_vm4, %v4008_v44, %v5832_v24 }
 0x7dd   : > { %4092 = vmatmul.f32.gmra.mxu3 %v4024_v1 }
 0x7e1   : > { %v3955_v7 = vpop.permute.xlu2 %3954 }
 0x7e5   : > { %4095 = vmatmul.f32.gmra.mxu3 %v4025_v9 }
 0x7f1   : > { %v3895_v22 = vpop.permute.xlu2 %3894 }
 0x7f2   : > { %v4069_v51 = vpop.f32.mrf.mxu3 }
 0x7f3   : > { %v4070_v23 = vadd.f32 %v9466_v21, %v4069_v51 }
 0x7f5   : > { %v9470_v0 = vadd.f32 %v6240_v45, %v4070_v23 }
 0x7f7   : > { %4133 = vadd.xlane.f32.xlu1 %v9470_v0 }
 0x7fa   : > { %v4072_v30 = vpop.f32.mrf.mxu3 }
 0x7fb   : > { %v4073_v36 = vadd.f32 %v9466_v21, %v4072_v30 }
 0x7fd   : > { %v9475_v61 = vadd.f32 %v6241_v60, %v4073_v36 }
 0x7ff   : > { %4135 = vadd.xlane.f32.xlu0 %v9475_v61  ;;  %v3961_v47 = vpop.permute.xlu2 %3960 }
 0x800   : > { %v3957_v26 = vpop.permute.xlu1 %3956 }
 0x802   : > { %v4075_v34 = vpop.f32.mrf.mxu3 }
 0x803   : > { %v4076_v39 = vadd.f32 %v9466_v21, %v4075_v34  ;;  %v5840_v28 = vpop.permute.xlu0 %5839 }
 0x804   : > { %v5841_v8 = vunpack.i.l.bf16 %v5840_v28  ;;  %v5842_v29 = vunpack.i.h.bf16 %v5840_v28 }
 0x805   : > { %v9480_v19 = vadd.f32 %v6242_v53, %v4076_v39 }
 0x806   : > { %v4009_v6 = vsel %vm3998_vm3, %v3992_v57, %v5841_v8  ;;  %v4010_v62 = vsel %vm3998_vm3, %v3993_v33, %v5842_v29 }
 0x807   : > { %4137 = vadd.xlane.f32.xlu2 %v9480_v19  ;;  %v4026_v42 = vsel %vm4015_vm4, %v4009_v6, %v3955_v7  ;;  %v4027_v54 = vsel %vm4015_vm4, %v4010_v62, %v3957_v26  ;;  %v3963_v24 = vpop.permute.xlu2 %3962  ;;  %v6247_v6 = vld [vmem:[%s6813_s21 + $0x38] sm:$0xff] }
 0x808   : > { %4098 = vmatmul.f32.gmra.mxu3 %v4026_v42  ;;  %v3959_v10 = vpop.permute.xlu1 %3958 }
 0x80a   : > { %v4078_v50 = vpop.f32.mrf.mxu3 }
 0x80b   : > { %v4079_v5 = vadd.f32 %v9466_v21, %v4078_v50  ;;  %v5845_v48 = vpop.permute.xlu0 %5844 }
 0x80c   : > { %v5846_v40 = vunpack.i.l.bf16 %v5845_v48  ;;  %v5847_v4 = vunpack.i.h.bf16 %v5845_v48  ;;  %v6248_v48 = vld [vmem:[%s6813_s21 + $0x40] sm:$0xff] }
 0x80d   : > { %v9491_v11 = vadd.f32 %v6243_v37, %v4079_v5 }
 0x80e   : > { %v3994_v49 = vsel %vm1221_vm1, %v9097_v15, %v5846_v40  ;;  %v3995_v16 = vsel %vm1221_vm1, %v9125_v43, %v5847_v4 }
 0x80f   : > { %4139 = vadd.xlane.f32.xlu1 %v9491_v11  ;;  %v4011_v41 = vsel %vm3998_vm3, %v3994_v49, %v3895_v22  ;;  %v3965_v30 = vpop.permute.xlu2 %3964  ;;  %v6249_v22 = vld [vmem:[%s6813_s21 + $0x48] sm:$0xff] }
 0x810   : > { %4101 = vmatmul.f32.gmra.mxu3 %v4027_v54  ;;  %v4028_v32 = vsel %vm4015_vm4, %v4011_v41, %v3959_v10  ;;  %v3835_v59 = vpop.permute.xlu1 %3834 }
 0x811   : > { %v3996_v18 = vsel %vm1221_vm1, %v9149_v12, %v3835_v59 }
 0x812   : > { %v4081_v14 = vpop.f32.mrf.mxu3 }
 0x813   : > { %v4082_v13 = vadd.f32 %v9466_v21, %v4081_v14  ;;  %v3897_v17 = vpop.permute.xlu0 %3896 }
 0x814   : > { %v4012_v27 = vsel %vm3998_vm3, %v3995_v16, %v3897_v17 }
 0x815   : > { %v9500_v35 = vadd.f32 %v6244_v46, %v4082_v13  ;;  %v4029_v3 = vsel %vm4015_vm4, %v4012_v27, %v3961_v47 }
 0x817   : > { %4141 = vadd.xlane.f32.xlu2 %v9500_v35 }
 0x818   : > { %4104 = vmatmul.f32.gmra.mxu3 %v4028_v32  ;;  %v3837_v51 = vpop.permute.xlu1 %3836 }
 0x819   : > { %v3997_v45 = vsel %vm1221_vm1, %v9166_v58, %v3837_v51 }
 0x81a   : > { %v4084_v55 = vpop.f32.mrf.mxu3 }
 0x81b   : > { %v4085_v15 = vadd.f32 %v9466_v21, %v4084_v55  ;;  %v6250_v55 = vld [vmem:[%s6813_s21 + $0x50] sm:$0xff] }
 0x81d   : > { %v9510_v2 = vadd.f32 %v6245_v20, %v4085_v15 }
 0x81f   : > { %4143 = vadd.xlane.f32.xlu0 %v9510_v2 }
 0x820   : > { %4107 = vmatmul.f32.gmra.mxu3 %v4029_v3 }
 0x821   : > { %v3899_v56 = vpop.permute.xlu0 %3898 }
 0x822   : > { %v4013_v43 = vsel %vm3998_vm3, %v3996_v18, %v3899_v56  ;;  %v6251_v56 = vld [vmem:[%s6813_s21 + $0x58] sm:$0xff] }
 0x823   : > { %v4030_v9 = vsel %vm4015_vm4, %v4013_v43, %v3963_v24  ;;  %v4524_v24 = vld [vmem:[#allocation13 + $0xf8] sm:$0xff]  ;;  %v4521_v43 = vld [vmem:[#allocation13 + $0xe0] sm:$0xff] }
 0x824   : > { %v4087_v1 = vpop.f32.mrf.mxu3  ;;  %4596 = vmatpush.msrb.mxu1 %v4524_v24 }
 0x825   : > { %v4088_v38 = vadd.f32 %v9466_v21, %v4087_v1 }
 0x827   : > { %v9519_v44 = vadd.f32 %v6246_v52, %v4088_v38  ;;  %v4523_v38 = vld [vmem:[#allocation13 + $0xf0] sm:$0xff]  ;;  %v4522_v52 = vld [vmem:[#allocation13 + $0xe8] sm:$0xff] }
 0x828   : > { %4110 = vmatmul.f32.gmra.mxu3 %v4030_v9  ;;  %4531 = vmatpush.msrb.mxu0 %v4523_v38  ;;  %v4496_v38 = vld [vmem:[#allocation13 + $0x18] sm:$0xff] }
 0x829   : > { %4145 = vadd.xlane.f32.xlu2 %v9519_v44  ;;  %v3901_v23 = vpop.permute.xlu0 %3900  ;;  %4597 = vmatpush.msrb.mxu1 %v4522_v52 }
 0x82a   : > { %v4014_v12 = vsel %vm3998_vm3, %v3997_v45, %v3901_v23  ;;  %4532 = vmatpush.msrb.mxu0 %v4521_v43 }
 0x82b   : > { %v4031_v36 = vsel %vm4015_vm4, %v4014_v12, %v3965_v30  ;;  %v6252_v30 = vld [vmem:[%s6813_s21 + $0x60] sm:$0xff] }
 0x82c   : > { %v4090_v39 = vpop.f32.mrf.mxu3 }
 0x82d   : > { %v4091_v53 = vadd.f32 %v9466_v21, %v4090_v39 }
 0x82f   : > { %v9539_v25 = vadd.f32 %v6247_v6, %v4091_v53  ;;  %v4519_v53 = vld [vmem:[#allocation13 + $0xd0] sm:$0xff]  ;;  %v4518_v6 = vld [vmem:[#allocation13 + $0xc8] sm:$0xff] }
 0x830   : > { %4113 = vmatmul.f32.gmra.mxu3 %v4031_v36  ;;  %4533 = vmatpush.msrb.mxu0 %v4519_v53 }
 0x860   : > { %v4093_v7 = vpop.f32.mrf.mxu3 }
 0x861   : > { %v4094_v50 = vadd.f32 %v9466_v21, %v4093_v7  ;;  %v4517_v7 = vld [vmem:[#allocation13 + $0xc0] sm:$0xff] }
 0x862   : > { %4534 = vmatpush.msrb.mxu0 %v4517_v7 }
 0x863   : > { %v9550_v33 = vadd.f32 %v6248_v48, %v4094_v50  ;;  %v4513_v50 = vld [vmem:[#allocation13 + $0xa0] sm:$0xff]  ;;  %v4511_v48 = vld [vmem:[#allocation13 + $0x90] sm:$0xff] }
 0x868   : > { %v4096_v62 = vpop.f32.mrf.mxu3 }
 0x869   : > { %v4097_v54 = vadd.f32 %v9466_v21, %v4096_v62  ;;  %v4509_v62 = vld [vmem:[#allocation13 + $0x80] sm:$0xff] }
 0x86a   : > { %v4134_v60 = vpop.xlane.xlu1 %4133 }
 0x86b   : > { %v4165_v31 = vmul.f32 %v4134_v60, %v10422_v63  ;;  %v9561_v13 = vadd.f32 %v6249_v22, %v4097_v54  ;;  %v4507_v54 = vld [vmem:[#allocation13 + $0x70] sm:$0xff]  ;;  %v4505_v22 = vld [vmem:[#allocation13 + $0x60] sm:$0xff] }
 0x86d   : > { %v9529_v34 = vsub.f32 %v9470_v0, %v4165_v31 }
 0x86f   : > { %v4197_v28 = vmul.f32 %v9529_v34, %v9529_v34 }
 0x871   : > { %4213 = vadd.xlane.f32.xlu1 %v4197_v28  ;;  %v6253_v28 = vld [vmem:[%s6813_s21 + $0x68] sm:$0xff] }
 0x872   : > { %v4136_v58 = vpop.xlane.xlu0 %4135 }
 0x873   : > { %v4166_v8 = vmul.f32 %v4136_v58, %v10422_v63 }
 0x875   : > { %v9536_v57 = vsub.f32 %v9475_v61, %v4166_v8  ;;  %v4520_v8 = vld [vmem:[#allocation13 + $0xd8] sm:$0xff] }
 0x876   : > { %4598 = vmatpush.msrb.mxu1 %v4520_v8 }
 0x877   : > { %v4198_v42 = vmul.f32 %v9536_v57, %v9536_v57 }
 0x878   : > { %4599 = vmatpush.msrb.mxu1 %v4518_v6 }
 0x879   : > { %4215 = vadd.xlane.f32.xlu0 %v4198_v42  ;;  %4147 = vadd.xlane.f32.xlu1 %v9539_v25  ;;  %v4515_v42 = vld [vmem:[#allocation13 + $0xb0] sm:$0xff] }
 0x87a   : > { %v4138_v29 = vpop.xlane.xlu2 %4137  ;;  %4535 = vmatpush.msrb.mxu0 %v4515_v42 }
 0x87b   : > { %v4167_v26 = vmul.f32 %v4138_v29, %v10422_v63  ;;  %v4516_v29 = vld [vmem:[#allocation13 + $0xb8] sm:$0xff] }
 0x87c   : > { %4600 = vmatpush.msrb.mxu1 %v4516_v29  ;;  %4536 = vmatpush.msrb.mxu0 %v4513_v50 }
 0x87d   : > { %v9547_v5 = vsub.f32 %v9480_v19, %v4167_v26  ;;  %v4514_v26 = vld [vmem:[#allocation13 + $0xa8] sm:$0xff] }
 0x87e   : > { %4601 = vmatpush.msrb.mxu1 %v4514_v26  ;;  %4537 = vmatpush.msrb.mxu0 %v4511_v48 }
 0x87f   : > { %v4199_v37 = vmul.f32 %v9547_v5, %v9547_v5 }
 0x880   : > { %4538 = vmatpush.msrb.mxu0 %v4509_v62 }
 0x881   : > { %4149 = vadd.xlane.f32.xlu0 %v9550_v33  ;;  %4217 = vadd.xlane.f32.xlu2 %v4199_v37  ;;  %v4512_v37 = vld [vmem:[#allocation13 + $0x98] sm:$0xff] }
 0x882   : > { %v4140_v40 = vpop.xlane.xlu1 %4139  ;;  %4602 = vmatpush.msrb.mxu1 %v4512_v37  ;;  %4539 = vmatpush.msrb.mxu0 %v4507_v54 }
 0x883   : > { %v4168_v14 = vmul.f32 %v4140_v40, %v10422_v63  ;;  %v4510_v40 = vld [vmem:[#allocation13 + $0x88] sm:$0xff] }
 0x884   : > { %4603 = vmatpush.msrb.mxu1 %v4510_v40  ;;  %4540 = vmatpush.msrb.mxu0 %v4505_v22 }
 0x885   : > { %v9558_v49 = vsub.f32 %v9491_v11, %v4168_v14  ;;  %v4508_v14 = vld [vmem:[#allocation13 + $0x78] sm:$0xff] }
 0x886   : > { %4604 = vmatpush.msrb.mxu1 %v4508_v14  ;;  %v6254_v14 = vld [vmem:[%s6813_s21 + $0x70] sm:$0xff] }
 0x887   : > { %v4200_v10 = vmul.f32 %v9558_v49, %v9558_v49 }
 0x889   : > { %4219 = vadd.xlane.f32.xlu1 %v4200_v10  ;;  %4151 = vadd.xlane.f32.xlu2 %v9561_v13  ;;  %v4506_v10 = vld [vmem:[#allocation13 + $0x68] sm:$0xff] }
 0x88a   : > { %v4142_v46 = vpop.xlane.xlu2 %4141  ;;  %4605 = vmatpush.msrb.mxu1 %v4506_v10  ;;  %v9624_v10 = vld [vmem:[%s10233_s7] ss:$0 sm:$0xff] }
 0x88b   : > { %v4169_v41 = vmul.f32 %v4142_v46, %v10422_v63  ;;  %v4099_v4 = vpop.f32.mrf.mxu3  ;;  %v4503_v46 = vld [vmem:[#allocation13 + $0x50] sm:$0xff] }
 0x88c   : > { %v4100_v32 = vadd.f32 %v9466_v21, %v4099_v4  ;;  %4541 = vmatpush.msrb.mxu0 %v4503_v46 }
 0x88d   : > { %v9568_v17 = vsub.f32 %v9500_v35, %v4169_v41  ;;  %v4504_v41 = vld [vmem:[#allocation13 + $0x58] sm:$0xff] }
 0x88e   : > { %v9572_v47 = vadd.f32 %v6250_v55, %v4100_v32  ;;  %4606 = vmatpush.msrb.mxu1 %v4504_v41  ;;  %v4501_v55 = vld [vmem:[#allocation13 + $0x40] sm:$0xff] }
 0x88f   : > { %v4201_v15 = vmul.f32 %v9568_v17, %v9568_v17  ;;  %4542 = vmatpush.msrb.mxu0 %v4501_v55 }
 0x891   : > { %4153 = vadd.xlane.f32.xlu1 %v9572_v47  ;;  %4221 = vadd.xlane.f32.xlu0 %v4201_v15  ;;  %v4502_v15 = vld [vmem:[#allocation13 + $0x48] sm:$0xff] }
 0x892   : > { %v4144_v16 = vpop.xlane.xlu0 %4143  ;;  %4607 = vmatpush.msrb.mxu1 %v4502_v15  ;;  %v9633_v15 = vld [vmem:[%s10234_s8] ss:$0 sm:$0xff] }
 0x893   : > { %v4170_v27 = vmul.f32 %v4144_v16, %v10422_v63  ;;  %v4102_v20 = vpop.f32.mrf.mxu3 }
 0x894   : > { %v4103_v3 = vadd.f32 %v9466_v21, %v4102_v20  ;;  %v4500_v20 = vld [vmem:[#allocation13 + $0x38] sm:$0xff] }
 0x895   : > { %v9579_v59 = vsub.f32 %v9510_v2, %v4170_v27  ;;  %v4499_v27 = vld [vmem:[#allocation13 + $0x30] sm:$0xff]  ;;  %4608 = vmatpush.msrb.mxu1 %v4500_v20 }
 0x896   : > { %v9583_v1 = vadd.f32 %v6251_v56, %v4103_v3  ;;  %4543 = vmatpush.msrb.mxu0 %v4499_v27  ;;  %v4497_v3 = vld [vmem:[#allocation13 + $0x20] sm:$0xff]  ;;  %v4498_v56 = vld [vmem:[#allocation13 + $0x28] sm:$0xff] }
 0x897   : > { %v4202_v18 = vmul.f32 %v9579_v59, %v9579_v59  ;;  %4609 = vmatpush.msrb.mxu1 %v4498_v56 }
 0x898   : > { %4544 = vmatpush.msrb.mxu0 %v4497_v3 }
 0x899   : > { %4223 = vadd.xlane.f32.xlu2 %v4202_v18  ;;  %4155 = vadd.xlane.f32.xlu0 %v9583_v1  ;;  %v4495_v18 = vld [vmem:[#allocation13 + $0x10] sm:$0xff] }
 0x89a   : > { %4545 = vmatpush.msrb.mxu0 %v4495_v18  ;;  %4610 = vmatpush.msrb.mxu1 %v4496_v38 }
 0x89b   : > { %v4105_v51 = vpop.f32.mrf.mxu3 }
 0x89c   : > { %v4146_v9 = vpop.xlane.xlu2 %4145  ;;  %v4106_v45 = vadd.f32 %v9466_v21, %v4105_v51  ;;  %v4493_v51 = vld [vmem:[#allocation13] sm:$0xff] }
 0x89d   : > { %v4171_v23 = vmul.f32 %v4146_v9, %v10422_v63  ;;  %4546 = vmatpush.msrb.mxu0 %v4493_v51 }
 0x89e   : > { %v9594_v36 = vadd.f32 %v6252_v30, %v4106_v45 }
 0x89f   : > { %v9591_v12 = vsub.f32 %v9519_v44, %v4171_v23  ;;  %v4494_v23 = vld [vmem:[#allocation13 + $0x8] sm:$0xff] }
 0x8a0   : > { %4611 = vmatpush.msrb.mxu1 %v4494_v23 }
 0x8a1   : > { %v4203_v60 = vmul.f32 %v9591_v12, %v9591_v12  ;;  %4157 = vadd.xlane.f32.xlu2 %v9594_v36 }
 0x8a3   : > { %4225 = vadd.xlane.f32.xlu1 %v4203_v60  ;;  %v4108_v31 = vpop.f32.mrf.mxu3 }
 0x8a4   : > { %v4109_v39 = vadd.f32 %v9466_v21, %v4108_v31 }
 0x8a6   : > { %v9601_v58 = vadd.f32 %v6253_v28, %v4109_v39 }
 0x8ab   : > { %4159 = vadd.xlane.f32.xlu1 %v9601_v58  ;;  %v4111_v31 = vpop.f32.mrf.mxu3 }
 0x8ac   : > { %v4112_v42 = vadd.f32 %v9466_v21, %v4111_v31 }
 0x8ae   : > { %v9619_v22 = vadd.f32 %v6254_v14, %v4112_v42 }
 0x8b3   : > { %v4114_v41 = vpop.f32.mrf.mxu3 }
 0x8b4   : > { %v4115_v3 = vadd.f32 %v9466_v21, %v4114_v41 }
 0x8e4   : > { %v4214_v4 = vpop.xlane.xlu1 %4213 }
 0x8e5   : > { %v4245_v32 = vmul.f32 %v4214_v4, %v10422_v63 }
 0x8e7   : > { %v4261_v16 = vadd.f32 1e-05, %v4245_v32 }
 0x8e9   : > { %6144 = vrsqrt.f32 %v4261_v16  ;;  %vm4283_vm5 = vweird.f32 %v4261_v16 }
 0x8ec   : > { %v4216_v24 = vpop.xlane.xlu0 %4215  ;;  %v4148_v43 = vpop.xlane.xlu1 %4147 }
 0x8ed   : > { %v4246_v52 = vmul.f32 %v4216_v24, %v10422_v63  ;;  %v4172_v9 = vmul.f32 %v4148_v43, %v10422_v63 }
 0x8ef   : > { %v6145_v45 = vpop.eup %6144  ;;  %v4262_v30 = vadd.f32 1e-05, %v4246_v52  ;;  %v9608_v60 = vsub.f32 %v9539_v25, %v4172_v9 }
 0x8f0   : > { %v4278_v39 = vmul.f32 %v6145_v45, %v4261_v16  ;;  %vm4284_vm1 = vweird.f32 %v6145_v45 }
 0x8f1   : > { %6146 = vrsqrt.f32 %v4262_v30  ;;  %v4204_v28 = vmul.f32 %v9608_v60, %v9608_v60  ;;  %vm4285_vm6 = vmor %vm4283_vm5, %vm4284_vm1  ;;  %vm4293_vm8 = vweird.f32 %v4262_v30 }
 0x8f2   : > { %v4279_v53 = vmul.f32 %v6145_v45, %v4278_v39 }
 0x8f3   : > { %4227 = vadd.xlane.f32.xlu0 %v4204_v28 }
 0x8f4   : > { %v4280_v8 = vmul.f32 0.5, %v4279_v53  ;;  %v4150_v7 = vpop.xlane.xlu0 %4149  ;;  %v4218_v6 = vpop.xlane.xlu2 %4217 }
 0x8f5   : > { %v4173_v29 = vmul.f32 %v4150_v7, %v10422_v63  ;;  %v4247_v50 = vmul.f32 %v4218_v6, %v10422_v63 }
 0x8f6   : > { %v4281_v26 = vsub.f32 1.5, %v4280_v8 }
 0x8f7   : > { %v6147_v48 = vpop.eup %6146  ;;  %v9616_v37 = vsub.f32 %v9550_v33, %v4173_v29  ;;  %v4263_v62 = vadd.f32 1e-05, %v4247_v50 }
 0x8f8   : > { %v4282_v40 = vmul.f32 %v6145_v45, %v4281_v26  ;;  %v4288_v54 = vmul.f32 %v6147_v48, %v4262_v30  ;;  %vm4294_vm7 = vweird.f32 %v6147_v48 }
 0x8f9   : > { %6148 = vrsqrt.f32 %v4263_v62  ;;  %v4205_v46 = vmul.f32 %v9616_v37, %v9616_v37  ;;  %vm4295_vm9 = vmor %vm4293_vm8, %vm4294_vm7  ;;  %vm4303_vm11 = vweird.f32 %v4263_v62 }
 0x8fa   : > { %v4286_v4 = vsel %vm4285_vm6, %v6145_v45, %v4282_v40  ;;  %v4289_v32 = vmul.f32 %v6147_v48, %v4288_v54  ;;  %v6255_v45 = vld [vmem:[%s6813_s21 + $0x78] sm:$0xff]  ;;  %s5162_s21 = sshll.u32 %s5159_s30, 4  ;;  %s5163_s21 = int_to_ptr.hbm [resolvable:$true] %s5162_s21 }
 0x8fb   : > { %v4437_v55 = vmul.f32 %v4286_v4, %v9529_v34  ;;  %4229 = vadd.xlane.f32.xlu2 %v4205_v46  ;;  %4161 = vadd.xlane.f32.xlu0 %v9619_v22  ;;  %v9644_v21 = vadd.f32 %v6255_v45, %v4115_v3  ;;  %s6512_s16 = sshra.s32 %s5163_s21, 4  ;;  %s6513_s16 = int_to_ptr.hbm [resolvable:$true] %s6512_s16 }
 0x8fc   : > { %v4290_v16 = vmul.f32 0.5, %v4289_v32  ;;  %v4220_v27 = vpop.xlane.xlu1 %4219  ;;  %v4152_v20 = vpop.xlane.xlu2 %4151  ;;  %s6514_s3 = scalar_lea.hbm %s6513_s16, 128  ;;  %p6519_p12 = scmp.lt.s32.totalorder %s6513_s16, %s10429_s20 }
 0x8fd   : > { %v4457_v56 = vmul.f32 %v9624_v10, %v4437_v55  ;;  %v4248_v18 = vmul.f32 %v4220_v27, %v10422_v63  ;;  %v4174_v34 = vmul.f32 %v4152_v20, %v10422_v63  ;;  %p6515_p1 = scmp.ne.s32.totalorder %s6513_s16, %s6514_s3  ;;  %p6520_p8 = scmp.lt.s32.totalorder %s6518_s13, %s6514_s3 }
 0x8fe   : > { %v4291_v38 = vsub.f32 1.5, %v4290_v16 }
 0x8ff   : > { %v6149_v24 = vpop.eup %6148  ;;  %v4264_v43 = vadd.f32 1e-05, %v4248_v18  ;;  %v9640_v52 = vsub.f32 %v9561_v13, %v4174_v34  ;;  %v4477_v9 = vadd.f32 %v9633_v15, %v4457_v56  ;;  %p6516_p3 = pnand %p6515_p1, %p6773_p13  ;;  %p6521_p7 = por %p6520_p8, %p6519_p12 }
 0x900   : > { %v4292_v51 = vmul.f32 %v6147_v48, %v4291_v38  ;;  %v4298_v23 = vmul.f32 %v6149_v24, %v4263_v62  ;;  %vm4304_vm10 = vweird.f32 %v6149_v24 }
 0x901   : > { %6150 = vrsqrt.f32 %v4264_v43  ;;  %4547 = vmatmul.f32.vlgmr.msrb.gmra.mxu0 %v4477_v9  ;;  %4612 = vmatmul.f32.vlgmr.msrb.gmra.mxu1 %v4477_v9  ;;  %v4206_v31 = vmul.f32 %v9640_v52, %v9640_v52  ;;  %vm4305_vm12 = vmor %vm4303_vm11, %vm4304_vm10  ;;  %vm4313_vm14 = vweird.f32 %v4264_v43  ;;  %p6517_p4 = pneg %p6516_p3 }
 0x902   : > { %v4296_v39 = vsel %vm4295_vm9, %v6147_v48, %v4292_v51  ;;  %v4299_v28 = vmul.f32 %v6149_v24, %v4298_v23 }
 0x903   : > { %4163 = vadd.xlane.f32.xlu2 %v9644_v21  ;;  %4231 = vadd.xlane.f32.xlu1 %v4206_v31  ;;  %v4438_v53 = vmul.f32 %v4296_v39, %v9536_v57  ;;  %p6522_p9 = pnand %p6521_p7, %p6517_p4 }
 0x904   : > { %v4300_v8 = vmul.f32 0.5, %v4299_v28  ;;  %v4154_v30 = vpop.xlane.xlu1 %4153  ;;  %v4222_v7 = vpop.xlane.xlu0 %4221 }
 0x905   : > { %v4175_v6 = vmul.f32 %v4154_v30, %v10422_v63  ;;  %v4249_v42 = vmul.f32 %v4222_v7, %v10422_v63  ;;  %v4458_v29 = vmul.f32 %v9624_v10, %v4438_v53 }
 0x906   : > { %v4301_v50 = vsub.f32 1.5, %v4300_v8 }
 0x907   : > { %v6151_v26 = vpop.eup %6150  ;;  %v9654_v48 = vsub.f32 %v9572_v47, %v4175_v6  ;;  %v4265_v40 = vadd.f32 1e-05, %v4249_v42  ;;  %v4478_v54 = vadd.f32 %v9633_v15, %v4458_v29 }
 0x908   : > { %v4302_v14 = vmul.f32 %v6149_v24, %v4301_v50  ;;  %v4308_v57 = vmul.f32 %v6151_v26, %v4264_v43  ;;  %vm4314_vm13 = vweird.f32 %v6151_v26 }
 0x909   : > { %6152 = vrsqrt.f32 %v4265_v40  ;;  %4550 = vmatmul.f32.gmra.mxu0 %v4478_v54  ;;  %4615 = vmatmul.f32.gmra.mxu1 %v4478_v54  ;;  %v4207_v46 = vmul.f32 %v9654_v48, %v9654_v48  ;;  %vm4315_vm15 = vmor %vm4313_vm14, %vm4314_vm13  ;;  %vm4323_vm2 = vweird.f32 %v4265_v40 }
 0x90a   : > { %v4306_v41 = vsel %vm4305_vm12, %v6149_v24, %v4302_v14  ;;  %v4309_v4 = vmul.f32 %v6151_v26, %v4308_v57 }
 0x90b   : > { %4233 = vadd.xlane.f32.xlu0 %v4207_v46  ;;  %v4439_v32 = vmul.f32 %v4306_v41, %v9547_v5 }
 0x90c   : > { %v4310_v55 = vmul.f32 0.5, %v4309_v4  ;;  %v4156_v16 = vpop.xlane.xlu0 %4155  ;;  %v4224_v27 = vpop.xlane.xlu2 %4223 }
 0x90d   : > { %v4176_v20 = vmul.f32 %v4156_v16, %v10422_v63  ;;  %v4250_v62 = vmul.f32 %v4224_v27, %v10422_v63  ;;  %v4459_v3 = vmul.f32 %v9624_v10, %v4439_v32 }
 0x90e   : > { %v4311_v56 = vsub.f32 1.5, %v4310_v55 }
 0x90f   : > { %v6153_v18 = vpop.eup %6152  ;;  %v9664_v34 = vsub.f32 %v9583_v1, %v4176_v20  ;;  %v4266_v38 = vadd.f32 1e-05, %v4250_v62  ;;  %v4479_v24 = vadd.f32 %v9633_v15, %v4459_v3 }
 0x910   : > { %v4312_v9 = vmul.f32 %v6151_v26, %v4311_v56  ;;  %v4318_v5 = vmul.f32 %v6153_v18, %v4265_v40  ;;  %vm4324_vm0 = vweird.f32 %v6153_v18 }
 0x911   : > { %6154 = vrsqrt.f32 %v4266_v38  ;;  %4553 = vmatmul.f32.gmra.mxu0 %v4479_v24  ;;  %4618 = vmatmul.f32.gmra.mxu1 %v4479_v24  ;;  %v4208_v51 = vmul.f32 %v9664_v34, %v9664_v34  ;;  %vm4325_vm3 = vmor %vm4323_vm2, %vm4324_vm0  ;;  %vm4333_vm1 = vweird.f32 %v4266_v38 }
 0x912   : > { %v4316_v23 = vsel %vm4315_vm15, %v6151_v26, %v4312_v9  ;;  %v4319_v45 = vmul.f32 %v6153_v18, %v4318_v5 }
 0x913   : > { %4235 = vadd.xlane.f32.xlu1 %v4208_v51  ;;  %v4440_v31 = vmul.f32 %v4316_v23, %v9558_v49 }
 0x914   : > { %v4320_v39 = vmul.f32 0.5, %v4319_v45  ;;  %v4158_v28 = vpop.xlane.xlu2 %4157 }
 0x915   : > { %v4177_v53 = vmul.f32 %v4158_v28, %v10422_v63  ;;  %v4460_v43 = vmul.f32 %v9624_v10, %v4440_v31  ;;  %v4964_v28 = vld [vmem:[#allocation14 + $0x78] sm:$0xff] }
 0x916   : > { %v4226_v8 = vpop.xlane.xlu1 %4225  ;;  %v4321_v30 = vsub.f32 1.5, %v4320_v39  ;;  %4985 = vmatpush.msrb.mxu2 %v4964_v28 }
 0x917   : > { %v4251_v7 = vmul.f32 %v4226_v8, %v10422_v63  ;;  %v6155_v6 = vpop.eup %6154  ;;  %v9674_v42 = vsub.f32 %v9594_v36, %v4177_v53  ;;  %v4480_v29 = vadd.f32 %v9633_v15, %v4460_v43  ;;  %v4963_v8 = vld [vmem:[#allocation14 + $0x70] sm:$0xff] }
 0x918   : > { %v4322_v50 = vmul.f32 %v6153_v18, %v4321_v30  ;;  %v4328_v49 = vmul.f32 %v6155_v6, %v4266_v38  ;;  %vm4334_vm4 = vweird.f32 %v6155_v6  ;;  %4986 = vmatpush.msrb.mxu2 %v4963_v8  ;;  %v4962_v30 = vld [vmem:[#allocation14 + $0x68] sm:$0xff] }
 0x919   : > { %v4267_v26 = vadd.f32 1e-05, %v4251_v7  ;;  %4556 = vmatmul.f32.gmra.mxu0 %v4480_v29  ;;  %4621 = vmatmul.f32.gmra.mxu1 %v4480_v29  ;;  %v4209_v54 = vmul.f32 %v9674_v42, %v9674_v42  ;;  %vm4335_vm5 = vmor %vm4333_vm1, %vm4334_vm4 }
 0x91a   : > { %v4326_v14 = vsel %vm4325_vm3, %v6153_v18, %v4322_v50  ;;  %v4329_v57 = vmul.f32 %v6155_v6, %v4328_v49  ;;  %4987 = vmatpush.msrb.mxu2 %v4962_v30  ;;  %v4959_v49 = vld [vmem:[#allocation14 + $0x50] sm:$0xff]  ;;  %v9728_v30 = vld [vmem:[#allocation14 + $0xf8] sm:$0xff] }
 0x91b   : > { %6156 = vrsqrt.f32 %v4267_v26  ;;  %4237 = vadd.xlane.f32.xlu2 %v4209_v54  ;;  %v4441_v46 = vmul.f32 %v4326_v14, %v9568_v17  ;;  %vm4343_vm7 = vweird.f32 %v4267_v26  ;;  %v4958_v14 = vld [vmem:[#allocation14 + $0x48] sm:$0xff]  ;;  %5463 = vmatpush.msrb.mxu3 %v9728_v30 }
 0x91c   : > { %v4330_v41 = vmul.f32 0.5, %v4329_v57  ;;  %5050 = vmatpush.msra.mxu0 %v9728_v30  ;;  %5461 = vmatpush.msra.mxu1 %v9728_v30 }
 0x91d   : > { %v4461_v32 = vmul.f32 %v9624_v10, %v4441_v46 }
 0x91e   : > { %v4160_v4 = vpop.xlane.xlu1 %4159  ;;  %v4331_v55 = vsub.f32 1.5, %v4330_v41 }
 0x91f   : > { %v4178_v40 = vmul.f32 %v4160_v4, %v10422_v63  ;;  %v4481_v16 = vadd.f32 %v9633_v15, %v4461_v32  ;;  %v4957_v32 = vld [vmem:[#allocation14 + $0x40] sm:$0xff] }
 0x920   : > { %v4332_v20 = vmul.f32 %v6155_v6, %v4331_v55 }
 0x921   : > { %v6157_v27 = vpop.eup %6156  ;;  %v9684_v62 = vsub.f32 %v9601_v58, %v4178_v40  ;;  %4559 = vmatmul.f32.gmra.mxu0 %v4481_v16  ;;  %4624 = vmatmul.f32.gmra.mxu1 %v4481_v16  ;;  %v4956_v16 = vld [vmem:[#allocation14 + $0x38] sm:$0xff] }
 0x922   : > { %v4338_v3 = vmul.f32 %v6157_v27, %v4267_v26  ;;  %v4336_v17 = vsel %vm4335_vm5, %v6155_v6, %v4332_v20  ;;  %vm4344_vm6 = vweird.f32 %v6157_v27  ;;  %v4961_v6 = vld [vmem:[#allocation14 + $0x60] sm:$0xff] }
 0x923   : > { %v4210_v56 = vmul.f32 %v9684_v62, %v9684_v62  ;;  %v4442_v24 = vmul.f32 %v4336_v17, %v9579_v59  ;;  %vm4345_vm8 = vmor %vm4343_vm7, %vm4344_vm6  ;;  %4988 = vmatpush.msrb.mxu2 %v4961_v6  ;;  %v4955_v17 = vld [vmem:[#allocation14 + $0x30] sm:$0xff] }
 0x924   : > { %v4339_v18 = vmul.f32 %v6157_v27, %v4338_v3 }
 0x925   : > { %4239 = vadd.xlane.f32.xlu0 %v4210_v56  ;;  %v4462_v5 = vmul.f32 %v9624_v10, %v4442_v24 }
 0x926   : > { %v4340_v9 = vmul.f32 0.5, %v4339_v18 }
 0x927   : > { %v4482_v38 = vadd.f32 %v9633_v15, %v4462_v5  ;;  %v4954_v5 = vld [vmem:[#allocation14 + $0x28] sm:$0xff] }
 0x928   : > { %v4341_v51 = vsub.f32 1.5, %v4340_v9  ;;  %v9710_v9 = vld [vmem:[%s10423_s5] sm:$0x3]  ;;  %s5160_s5 = sshll.u32 %s10126_s14, 4  ;;  %s5161_s5 = int_to_ptr.vmem [resolvable:$true] %s5160_s5 }
 0x929   : > { %4562 = vmatmul.f32.gmra.mxu0 %v4482_v38  ;;  %4627 = vmatmul.f32.gmra.mxu1 %v4482_v38  ;;  %v9725_v28 = vperm.slane %v9710_v9, 0 }
 0x92a   : > { %v4342_v23 = vmul.f32 %v6157_v27, %v4341_v51 }
 0x92c   : > { %v4346_v45 = vsel %vm4345_vm8, %v6157_v27, %v4342_v23 }
 0x92d   : > { %v4443_v31 = vmul.f32 %v4346_v45, %v9591_v12  ;;  %v4960_v12 = vld [vmem:[#allocation14 + $0x58] sm:$0xff] }
 0x92e   : > { %4989 = vmatpush.msrb.mxu2 %v4960_v12 }
 0x92f   : > { %v4463_v39 = vmul.f32 %v9624_v10, %v4443_v31 }
 0x930   : > { %4990 = vmatpush.msrb.mxu2 %v4959_v49  ;;  %v9734_v49 = vld [vmem:[#allocation14 + $0xf0] sm:$0xff] }
 0x931   : > { %v4483_v59 = vadd.f32 %v9633_v15, %v4463_v39  ;;  %v4953_v39 = vld [vmem:[#allocation14 + $0x20] sm:$0xff]  ;;  %5466 = vmatpush.msrb.mxu3 %v9734_v49  ;;  %5051 = vmatpush.msra.mxu0 %v9734_v49 }
 0x932   : > { %4991 = vmatpush.msrb.mxu2 %v4958_v14  ;;  %5464 = vmatpush.msra.mxu1 %v9734_v49 }
 0x933   : > { %4565 = vmatmul.f32.gmra.mxu0 %v4483_v59  ;;  %4630 = vmatmul.f32.gmra.mxu1 %v4483_v59 }
 0x934   : > { %4992 = vmatpush.msrb.mxu2 %v4957_v32  ;;  %v9745_v32 = vld [vmem:[#allocation14 + $0xe8] sm:$0xff] }
 0x935   : > { %5469 = vmatpush.msrb.mxu3 %v9745_v32  ;;  %5052 = vmatpush.msra.mxu0 %v9745_v32 }
 0x936   : > { %4993 = vmatpush.msrb.mxu2 %v4956_v16  ;;  %5467 = vmatpush.msra.mxu1 %v9745_v32 }
 0x938   : > { %4994 = vmatpush.msrb.mxu2 %v4955_v17  ;;  %v9759_v17 = vld [vmem:[#allocation14 + $0xe0] sm:$0xff] }
 0x939   : > { %5472 = vmatpush.msrb.mxu3 %v9759_v17  ;;  %5053 = vmatpush.msra.mxu0 %v9759_v17 }
 0x93a   : > { %4995 = vmatpush.msrb.mxu2 %v4954_v5  ;;  %v9771_v5 = vld [vmem:[#allocation14 + $0xd8] sm:$0xff]  ;;  %5470 = vmatpush.msra.mxu1 %v9759_v17 }
 0x93b   : > { %5475 = vmatpush.msrb.mxu3 %v9771_v5  ;;  %5054 = vmatpush.msra.mxu0 %v9771_v5 }
 0x93c   : > { %4996 = vmatpush.msrb.mxu2 %v4953_v39  ;;  %5473 = vmatpush.msra.mxu1 %v9771_v5 }
 0x966   : > { %v4228_v53 = vpop.xlane.xlu0 %4227 }
 0x967   : > { %v4252_v43 = vmul.f32 %v4228_v53, %v10422_v63 }
 0x969   : > { %v4268_v7 = vadd.f32 1e-05, %v4252_v43  ;;  %v4952_v43 = vld [vmem:[#allocation14 + $0x18] sm:$0xff] }
 0x96a   : > { %4997 = vmatpush.msrb.mxu2 %v4952_v43 }
 0x96b   : > { %6158 = vrsqrt.f32 %v4268_v7  ;;  %vm4353_vm10 = vweird.f32 %v4268_v7 }
 0x96e   : > { %v4162_v29 = vpop.xlane.xlu0 %4161  ;;  %v4230_v50 = vpop.xlane.xlu2 %4229 }
 0x96f   : > { %v4179_v26 = vmul.f32 %v4162_v29, %v10422_v63  ;;  %v4253_v54 = vmul.f32 %v4230_v50, %v10422_v63  ;;  %v4951_v50 = vld [vmem:[#allocation14 + $0x10] sm:$0xff] }
 0x970   : > { %4998 = vmatpush.msrb.mxu2 %v4951_v50  ;;  %v9791_v50 = vld [vmem:[#allocation14 + $0xc8] sm:$0xff] }
 0x971   : > { %v6159_v57 = vpop.eup %6158  ;;  %v9698_v46 = vsub.f32 %v9619_v22, %v4179_v26  ;;  %v9700_v41 = vadd.f32 1e-05, %v4253_v54 }
 0x972   : > { %v4348_v4 = vmul.f32 %v6159_v57, %v4268_v7  ;;  %vm4354_vm9 = vweird.f32 %v6159_v57 }
 0x973   : > { %6160 = vrsqrt.f32 %v9700_v41  ;;  %v4211_v55 = vmul.f32 %v9698_v46, %v9698_v46  ;;  %vm4355_vm11 = vmor %vm4353_vm10, %vm4354_vm9  ;;  %vm4363_vm13 = vweird.f32 %v9700_v41 }
 0x974   : > { %v4349_v40 = vmul.f32 %v6159_v57, %v4348_v4  ;;  %v4950_v4 = vld [vmem:[#allocation14 + $0x8] sm:$0xff] }
 0x975   : > { %4241 = vadd.xlane.f32.xlu1 %v4211_v55  ;;  %4999 = vmatpush.msrb.mxu2 %v4950_v4 }
 0x976   : > { %v4350_v27 = vmul.f32 0.5, %v4349_v40  ;;  %v4232_v20 = vpop.xlane.xlu1 %4231  ;;  %v4164_v3 = vpop.xlane.xlu2 %4163 }
 0x977   : > { %v4254_v56 = vmul.f32 %v4232_v20, %v10422_v63  ;;  %v4180_v18 = vmul.f32 %v4164_v3, %v10422_v63  ;;  %v4949_v3 = vld [vmem:[#allocation14] sm:$0xff] }
 0x978   : > { %v4351_v24 = vsub.f32 1.5, %v4350_v27  ;;  %5000 = vmatpush.msrb.mxu2 %v4949_v3 }
 0x979   : > { %v9712_v51 = vpop.eup %6160  ;;  %v9714_v38 = vadd.f32 1e-05, %v4254_v56  ;;  %v9717_v23 = vsub.f32 %v9644_v21, %v4180_v18 }
 0x97a   : > { %v4352_v45 = vmul.f32 %v6159_v57, %v4351_v24  ;;  %v4358_v31 = vmul.f32 %v9712_v51, %v9700_v41  ;;  %vm4364_vm12 = vweird.f32 %v9712_v51  ;;  %5462 = vmatpush.msra.mxu2 %v9728_v30 }
 0x97b   : > { %6162 = vrsqrt.f32 %v9714_v38  ;;  %v4212_v59 = vmul.f32 %v9717_v23, %v9717_v23  ;;  %vm4365_vm14 = vmor %vm4363_vm13, %vm4364_vm12  ;;  %vm4373_vm0 = vweird.f32 %v9714_v38 }
 0x97c   : > { %v4356_v53 = vsel %vm4355_vm11, %v6159_v57, %v4352_v45  ;;  %v4359_v8 = vmul.f32 %v9712_v51, %v4358_v31  ;;  %5465 = vmatpush.msra.mxu2 %v9734_v49 }
 0x97d   : > { %4243 = vadd.xlane.f32.xlu2 %v4212_v59  ;;  %v4444_v7 = vmul.f32 %v4356_v53, %v9608_v60 }
 0x97e   : > { %v4360_v6 = vmul.f32 0.5, %v4359_v8  ;;  %v4548_v12 = vpop.f32.mrf.mxu0  ;;  %v9731_v29 = vpop.f32.mrf.mxu1  ;;  %5468 = vmatpush.msra.mxu2 %v9745_v32 }
 0x97f   : > { %v9738_v26 = vadd.f32 %v4548_v12, %v9725_v28  ;;  %v4234_v54 = vpop.xlane.xlu0 %4233  ;;  %v4464_v14 = vmul.f32 %v9624_v10, %v4444_v7 }
 0x980   : > { %v4361_v60 = vsub.f32 1.5, %v4360_v6  ;;  %v4255_v57 = vmul.f32 %v4234_v54, %v10422_v63  ;;  %5471 = vmatpush.msra.mxu2 %v9759_v17 }
 0x981   : > { %v9748_v55 = vpop.eup %6162  ;;  %v4693_v40 = vmul.f32 0.044715, %v9738_v26  ;;  %v4484_v18 = vadd.f32 %v9633_v15, %v4464_v14 }
 0x982   : > { %v4362_v16 = vmul.f32 %v9712_v51, %v4361_v60  ;;  %v4368_v27 = vmul.f32 %v9748_v55, %v9714_v38  ;;  %v9756_v20 = vadd.f32 1e-05, %v4255_v57  ;;  %vm4374_vm15 = vweird.f32 %v9748_v55  ;;  %5474 = vmatpush.msra.mxu2 %v9771_v5 }
 0x983   : > { %v4725_v56 = vmul.f32 %v4693_v40, %v9738_v26  ;;  %4568 = vmatmul.f32.gmra.mxu0 %v4484_v18  ;;  %4633 = vmatmul.f32.gmra.mxu1 %v4484_v18  ;;  %v9804_v40 = vld [vmem:[#allocation14 + $0xc0] sm:$0xff]  ;;  %vm4375_vm2 = vmor %vm4373_vm0, %vm4374_vm15 }
 0x984   : > { %v4366_v41 = vsel %vm4365_vm14, %v9712_v51, %v4362_v16  ;;  %v4369_v24 = vmul.f32 %v9748_v55, %v4368_v27  ;;  %6164 = vrsqrt.f32 %v9756_v20  ;;  %v9779_v51 = vld [vmem:[#allocation14 + $0xd0] sm:$0xff]  ;;  %v9816_v27 = vld [vmem:[#allocation14 + $0xb8] sm:$0xff]  ;;  %vm4383_vm4 = vweird.f32 %v9756_v20 }
 0x985   : > { %v4757_v45 = vmul.f32 %v4725_v56, %v9738_v26  ;;  %v4445_v31 = vmul.f32 %v4366_v41, %v9616_v37  ;;  %5478 = vmatpush.msrb.mxu3 %v9779_v51  ;;  %5055 = vmatpush.msra.mxu0 %v9779_v51 }
 0x986   : > { %v4370_v39 = vmul.f32 0.5, %v4369_v24  ;;  %v4551_v59 = vpop.f32.mrf.mxu0  ;;  %v9776_v53 = vpop.f32.mrf.mxu1  ;;  %5476 = vmatpush.msra.mxu1 %v9779_v51  ;;  %5477 = vmatpush.msra.mxu2 %v9779_v51 }
 0x987   : > { %v4789_v8 = vadd.f32 %v4757_v45, %v9738_v26  ;;  %v9784_v43 = vadd.f32 %v4551_v59, %v9725_v28  ;;  %v4236_v7 = vpop.xlane.xlu1 %4235  ;;  %v4465_v12 = vmul.f32 %v9624_v10, %v4445_v31  ;;  %5481 = vmatpush.msrb.mxu3 %v9791_v50  ;;  %5056 = vmatpush.msra.mxu0 %v9791_v50  ;;  %v9833_v59 = vld [vmem:[#allocation14 + $0xa8] sm:$0xff] }
 0x988   : > { %v4371_v6 = vsub.f32 1.5, %v4370_v39  ;;  %v4256_v37 = vmul.f32 %v4236_v7, %v10422_v63  ;;  %5479 = vmatpush.msra.mxu1 %v9791_v50  ;;  %5480 = vmatpush.msra.mxu2 %v9791_v50 }
 0x989   : > { %v4821_v54 = vmul.f32 0.7978846, %v4789_v8  ;;  %v4695_v57 = vmul.f32 0.044715, %v9784_v43  ;;  %v4485_v16 = vadd.f32 %v9633_v15, %v4465_v12  ;;  %5484 = vmatpush.msrb.mxu3 %v9804_v40  ;;  %5057 = vmatpush.msra.mxu0 %v9804_v40 }
 0x98a   : > { %v9796_v14 = vpop.eup %6164  ;;  %v4372_v60 = vmul.f32 %v9748_v55, %v4371_v6  ;;  %v9801_v4 = vadd.f32 1e-05, %v4256_v37  ;;  %5482 = vmatpush.msra.mxu1 %v9804_v40  ;;  %v9842_v37 = vld [vmem:[#allocation14 + $0xa0] sm:$0xff]  ;;  %5483 = vmatpush.msra.mxu2 %v9804_v40 }
 0x98b   : > { %6166 = vtanh.f32 %v4821_v54  ;;  %v4378_v30 = vmul.f32 %v9796_v14, %v9756_v20  ;;  %4571 = vmatmul.f32.gmra.mxu0 %v4485_v16  ;;  %4636 = vmatmul.f32.gmra.mxu1 %v4485_v16  ;;  %v4727_v49 = vmul.f32 %v4695_v57, %v9784_v43  ;;  %vm4384_vm3 = vweird.f32 %v9796_v14 }
 0x98c   : > { %v4376_v38 = vsel %vm4375_vm2, %v9748_v55, %v4372_v60  ;;  %6168 = vrsqrt.f32 %v9801_v4  ;;  %5487 = vmatpush.msrb.mxu3 %v9816_v27  ;;  %v9826_v55 = vld [vmem:[#allocation14 + $0xb0] sm:$0xff]  ;;  %5058 = vmatpush.msra.mxu0 %v9816_v27  ;;  %vm4385_vm1 = vmor %vm4383_vm4, %vm4384_vm3  ;;  %vm4393_vm6 = vweird.f32 %v9801_v4 }
 0x98d   : > { %v4379_v3 = vmul.f32 %v9796_v14, %v4378_v30  ;;  %v4446_v56 = vmul.f32 %v4376_v38, %v9640_v52  ;;  %v4759_v8 = vmul.f32 %v4727_v49, %v9784_v43  ;;  %5485 = vmatpush.msra.mxu1 %v9816_v27  ;;  %v4661_v30 = vmul.f32 0.5, %v9738_v26  ;;  %v9858_v38 = vld [vmem:[#allocation14 + $0x98] sm:$0xff]  ;;  %5486 = vmatpush.msra.mxu2 %v9816_v27 }
 0x98e   : > { %v4554_v18 = vpop.f32.mrf.mxu0  ;;  %v9822_v41 = vpop.f32.mrf.mxu1  ;;  %5490 = vmatpush.msrb.mxu3 %v9826_v55  ;;  %5059 = vmatpush.msra.mxu0 %v9826_v55  ;;  %v9869_v26 = vperm.slane %v9710_v9, 1 }
 0x98f   : > { %v4380_v24 = vmul.f32 0.5, %v4379_v3  ;;  %v9830_v45 = vadd.f32 %v4554_v18, %v9725_v28  ;;  %v4238_v31 = vpop.xlane.xlu2 %4237  ;;  %v4466_v39 = vmul.f32 %v9624_v10, %v4446_v56  ;;  %v4791_v17 = vadd.f32 %v4759_v8, %v9784_v43  ;;  %5488 = vmatpush.msra.mxu1 %v9826_v55  ;;  %v9873_v56 = vld [vmem:[#allocation14 + $0x90] sm:$0xff]  ;;  %5489 = vmatpush.msra.mxu2 %v9826_v55 }
 0x990   : > { %v4257_v52 = vmul.f32 %v4238_v31, %v10422_v63  ;;  %5493 = vmatpush.msrb.mxu3 %v9833_v59  ;;  %5060 = vmatpush.msra.mxu0 %v9833_v59 }
 0x991   : > { %v6167_v7 = vpop.eup %6166  ;;  %v4381_v6 = vsub.f32 1.5, %v4380_v24  ;;  %v4697_v32 = vmul.f32 0.044715, %v9830_v45  ;;  %v4486_v54 = vadd.f32 %v9633_v15, %v4466_v39  ;;  %v4823_v39 = vmul.f32 0.7978846, %v4791_v17  ;;  %5491 = vmatpush.msra.mxu1 %v9833_v59  ;;  %5492 = vmatpush.msra.mxu2 %v9833_v59 }
 0x992   : > { %v9847_v12 = vadd.f32 1e-05, %v4257_v52  ;;  %v4885_v60 = vadd.f32 1.0, %v6167_v7  ;;  %v9852_v57 = vpop.eup %6168  ;;  %5496 = vmatpush.msrb.mxu3 %v9842_v37  ;;  %v9886_v7 = vld [vmem:[#allocation14 + $0x88] sm:$0xff]  ;;  %5061 = vmatpush.msra.mxu0 %v9842_v37 }
 0x993   : > { %v4382_v16 = vmul.f32 %v9796_v14, %v4381_v6  ;;  %v4388_v3 = vmul.f32 %v9852_v57, %v9801_v4  ;;  %4574 = vmatmul.f32.gmra.mxu0 %v4486_v54  ;;  %4639 = vmatmul.f32.gmra.mxu1 %v4486_v54  ;;  %v4729_v52 = vmul.f32 %v4697_v32, %v9830_v45  ;;  %vm4394_vm5 = vweird.f32 %v9852_v57 }
 0x994   : > { %6170 = vrsqrt.f32 %v9847_v12  ;;  %v4917_v5 = vmul.f32 %v4885_v60, %v4661_v30  ;;  %5499 = vmatpush.msrb.mxu3 %v9858_v38  ;;  %5494 = vmatpush.msra.mxu1 %v9842_v37  ;;  %v9896_v30 = vld [vmem:[#allocation14 + $0x80] sm:$0xff]  ;;  %vm9921_vm7 = vmor %vm4393_vm6, %vm4394_vm5  ;;  %vm4403_vm9 = vweird.f32 %v9847_v12 }
 0x995   : > { %v4386_v20 = vsel %vm4385_vm1, %v9796_v14, %v4382_v16  ;;  %v4389_v18 = vmul.f32 %v9852_v57, %v4388_v3  ;;  %6172 = vtanh.f32 %v4823_v39  ;;  %v4761_v60 = vmul.f32 %v4729_v52, %v9830_v45  ;;  %5062 = vmatpush.msra.mxu0 %v9858_v38  ;;  %5495 = vmatpush.msra.mxu2 %v9842_v37 }
 0x996   : > { %v4557_v49 = vpop.f32.mrf.mxu0  ;;  %v4622_v24 = vpop.f32.mrf.mxu1  ;;  %v4447_v31 = vmul.f32 %v4386_v20, %v9654_v48  ;;  %5001 = vmatmul.f32.vlgmr.msrb.gmra.mxu2 %v4917_v5  ;;  %5502 = vmatpush.msrb.mxu3 %v9873_v56 }
 0x997   : > { %v9881_v9 = vadd.f32 %v4557_v49, %v9725_v28  ;;  %v9884_v14 = vadd.f32 %v4622_v24, %v9869_v26  ;;  %v4390_v48 = vmul.f32 0.5, %v4389_v18  ;;  %5497 = vmatpush.msra.mxu1 %v9858_v38  ;;  %v4793_v18 = vadd.f32 %v4761_v60, %v9830_v45  ;;  %5063 = vmatpush.msra.mxu0 %v9873_v56 }
 0x998   : > { %v4240_v8 = vpop.xlane.xlu0 %4239  ;;  %v4467_v32 = vmul.f32 %v9624_v10, %v4447_v31  ;;  %5505 = vmatpush.msrb.mxu3 %v9886_v7  ;;  %v4663_v60 = vmul.f32 0.5, %v9784_v43  ;;  %5498 = vmatpush.msra.mxu2 %v9858_v38 }
 0x999   : > { %v4258_v6 = vmul.f32 %v4240_v8, %v10422_v63  ;;  %v4699_v54 = vmul.f32 0.044715, %v9881_v9  ;;  %v4391_v16 = vsub.f32 1.5, %v4390_v48  ;;  %v4700_v17 = vmul.f32 0.044715, %v9884_v14  ;;  %5500 = vmatpush.msra.mxu1 %v9873_v56  ;;  %5064 = vmatpush.msra.mxu0 %v9886_v7 }
 0x99a   : > { %v4487_v20 = vadd.f32 %v9633_v15, %v4467_v32  ;;  %v9906_v5 = vpop.eup %6170  ;;  %5508 = vmatpush.msrb.mxu3 %v9896_v30  ;;  %v4825_v50 = vmul.f32 0.7978846, %v4793_v18  ;;  %5501 = vmatpush.msra.mxu2 %v9873_v56  ;;  %v4667_v38 = vmul.f32 0.5, %v9881_v9 }
 0x99b   : > { %v9901_v3 = vadd.f32 1e-05, %v4258_v6  ;;  %v4731_v49 = vmul.f32 %v4699_v54, %v9881_v9  ;;  %v4392_v51 = vmul.f32 %v9852_v57, %v4391_v16  ;;  %v4398_v24 = vmul.f32 %v9906_v5, %v9847_v12  ;;  %v6173_v52 = vpop.eup %6172  ;;  %5503 = vmatpush.msra.mxu1 %v9886_v7  ;;  %5065 = vmatpush.msra.mxu0 %v9896_v30 }
 0x99c   : > { %v4732_v31 = vmul.f32 %v4700_v17, %v9884_v14  ;;  %4577 = vmatmul.f32.gmra.mxu0 %v4487_v20  ;;  %4642 = vmatmul.f32.gmra.mxu1 %v4487_v20  ;;  %v4887_v20 = vadd.f32 1.0, %v6173_v52  ;;  %vm4404_vm8 = vweird.f32 %v9906_v5 }
 0x99d   : > { %6174 = vrsqrt.f32 %v9901_v3  ;;  %v4763_v4 = vmul.f32 %v4731_v49, %v9881_v9  ;;  %v4396_v8 = vsel %vm9921_vm7, %v9852_v57, %v4392_v51  ;;  %v4399_v48 = vmul.f32 %v9906_v5, %v4398_v24  ;;  %5506 = vmatpush.msra.mxu1 %v9896_v30  ;;  %vm9962_vm10 = vmor %vm4403_vm9, %vm4404_vm8  ;;  %5504 = vmatpush.msra.mxu2 %v9886_v7 }
 0x99e   : > { %v4764_v6 = vmul.f32 %v4732_v31, %v9884_v14  ;;  %v4560_v32 = vpop.f32.mrf.mxu0  ;;  %v4625_v54 = vpop.f32.mrf.mxu1  ;;  %v4448_v57 = vmul.f32 %v4396_v8, %v9664_v34  ;;  %6176 = vtanh.f32 %v4825_v50  ;;  %v4919_v31 = vmul.f32 %v4887_v20, %v4663_v60 }
 0x99f   : > { %v9936_v16 = vadd.f32 %v4560_v32, %v9725_v28  ;;  %v9939_v17 = vadd.f32 %v4625_v54, %v9869_v26  ;;  %v4400_v18 = vmul.f32 0.5, %v4399_v48  ;;  %v4795_v43 = vadd.f32 %v4763_v4, %v9881_v9  ;;  %5507 = vmatpush.msra.mxu2 %v9896_v30 }
 0x9a0   : > { %v4796_v49 = vadd.f32 %v4764_v6, %v9884_v14  ;;  %v4468_v39 = vmul.f32 %v9624_v10, %v4448_v57  ;;  %5004 = vmatmul.f32.gmra.mxu2 %v4919_v31  ;;  %vm4413_vm12 = vweird.f32 %v9901_v3 }
 0x9a1   : > { %v4701_v51 = vmul.f32 0.044715, %v9936_v16  ;;  %v4702_v24 = vmul.f32 0.044715, %v9939_v17  ;;  %v4401_v34 = vsub.f32 1.5, %v4400_v18 }
 0x9a2   : > { %v4828_v40 = vmul.f32 0.7978846, %v4796_v49  ;;  %v4827_v50 = vmul.f32 0.7978846, %v4795_v43  ;;  %v4488_v4 = vadd.f32 %v9633_v15, %v4468_v39  ;;  %v4665_v49 = vmul.f32 0.5, %v9830_v45 }
 0x9a3   : > { %v9952_v52 = vpop.eup %6174  ;;  %v4733_v8 = vmul.f32 %v4701_v51, %v9936_v16  ;;  %v4734_v48 = vmul.f32 %v4702_v24, %v9939_v17  ;;  %v4402_v6 = vmul.f32 %v9906_v5, %v4401_v34  ;;  %v4668_v39 = vmul.f32 0.5, %v9884_v14 }
 0x9a4   : > { %6178 = vtanh.f32 %v4828_v40  ;;  %v4408_v27 = vmul.f32 %v9952_v52, %v9901_v3  ;;  %4580 = vmatmul.f32.gmra.mxu0 %v4488_v4  ;;  %4645 = vmatmul.f32.gmra.mxu1 %v4488_v4  ;;  %v6177_v20 = vpop.eup %6176  ;;  %vm4414_vm11 = vweird.f32 %v9952_v52 }
 0x9a5   : > { %6180 = vtanh.f32 %v4827_v50  ;;  %v4765_v54 = vmul.f32 %v4733_v8, %v9936_v16  ;;  %v4766_v60 = vmul.f32 %v4734_v48, %v9939_v17  ;;  %v4406_v12 = vsel %vm9962_vm10, %v9906_v5, %v4402_v6  ;;  %vm4415_vm13 = vmor %vm4413_vm12, %vm4414_vm11 }
 0x9a6   : > { %v4409_v57 = vmul.f32 %v9952_v52, %v4408_v27  ;;  %v4563_v18 = vpop.f32.mrf.mxu0  ;;  %v4628_v55 = vpop.f32.mrf.mxu1  ;;  %v4889_v24 = vadd.f32 1.0, %v6177_v20  ;;  %v4449_v31 = vmul.f32 %v4406_v12, %v9674_v42 }
 0x9a7   : > { %v9975_v43 = vadd.f32 %v4563_v18, %v9725_v28  ;;  %v9978_v51 = vadd.f32 %v4628_v55, %v9869_v26  ;;  %v4797_v34 = vadd.f32 %v4765_v54, %v9936_v16  ;;  %v4798_v40 = vadd.f32 %v4766_v60, %v9939_v17 }
 0x9a8   : > { %v4410_v5 = vmul.f32 0.5, %v4409_v57  ;;  %v4921_v50 = vmul.f32 %v4889_v24, %v4665_v49  ;;  %v4469_v4 = vmul.f32 %v9624_v10, %v4449_v31 }
 0x9a9   : > { %v4703_v45 = vmul.f32 0.044715, %v9975_v43  ;;  %v4704_v59 = vmul.f32 0.044715, %v9978_v51  ;;  %v4829_v42 = vmul.f32 0.7978846, %v4797_v34 }
 0x9aa   : > { %v6179_v8 = vpop.eup %6178  ;;  %v4411_v48 = vsub.f32 1.5, %v4410_v5  ;;  %v4830_v14 = vmul.f32 0.7978846, %v4798_v40  ;;  %5007 = vmatmul.f32.gmra.mxu2 %v4921_v50  ;;  %v4489_v37 = vadd.f32 %v9633_v15, %v4469_v4 }
 0x9ab   : > { %v6181_v6 = vpop.eup %6180  ;;  %v4892_v27 = vadd.f32 1.0, %v6179_v8  ;;  %v4735_v32 = vmul.f32 %v4703_v45, %v9975_v43  ;;  %6182 = vtanh.f32 %v4829_v42  ;;  %v4736_v20 = vmul.f32 %v4704_v59, %v9978_v51 }
 0x9ac   : > { %v4412_v54 = vmul.f32 %v9952_v52, %v4411_v48  ;;  %v4891_v60 = vadd.f32 1.0, %v6181_v6  ;;  %4583 = vmatmul.f32.gmra.mxu0 %v4489_v37  ;;  %4648 = vmatmul.f32.gmra.mxu1 %v4489_v37  ;;  %6184 = vtanh.f32 %v4830_v14  ;;  %v4670_v8 = vmul.f32 0.5, %v9939_v17 }
 0x9ad   : > { %v4924_v3 = vmul.f32 %v4892_v27, %v4668_v39  ;;  %v4767_v12 = vmul.f32 %v4735_v32, %v9975_v43  ;;  %v4768_v18 = vmul.f32 %v4736_v20, %v9978_v51 }
 0x9ae   : > { %v4416_v57 = vsel %vm4415_vm13, %v9952_v52, %v4412_v54  ;;  %v4923_v55 = vmul.f32 %v4891_v60, %v4667_v38  ;;  %v4672_v38 = vmul.f32 0.5, %v9978_v51 }
 0x9af   : > { %5075 = vmatmul.f32.vlgmr.msrb.gmra.mxu3 %v4924_v3  ;;  %v4450_v24 = vmul.f32 %v4416_v57, %v9684_v62  ;;  %v4799_v31 = vadd.f32 %v4767_v12, %v9975_v43  ;;  %v4800_v5 = vadd.f32 %v4768_v18, %v9978_v51 }
 0x9b0   : > { %v4566_v56 = vpop.f32.mrf.mxu0  ;;  %v4631_v49 = vpop.f32.mrf.mxu1 }
 0x9b1   : > { %v4567_v9 = vadd.f32 %v4566_v56, %v9725_v28  ;;  %v4632_v39 = vadd.f32 %v4631_v49, %v9869_v26  ;;  %v4470_v52 = vmul.f32 %v9624_v10, %v4450_v24  ;;  %v4831_v34 = vmul.f32 0.7978846, %v4799_v31  ;;  %v6183_v7 = vpop.eup %6182 }
 0x9b2   : > { %v4832_v59 = vmul.f32 0.7978846, %v4800_v5  ;;  %v6185_v50 = vpop.eup %6184  ;;  %5010 = vmatmul.f32.gmra.mxu2 %v4923_v55  ;;  %v4893_v4 = vadd.f32 1.0, %v6183_v7  ;;  %v4669_v10 = vmul.f32 0.5, %v9936_v16  ;;  %v4671_v16 = vmul.f32 0.5, %v9975_v43 }
 0x9b3   : > { %v4705_v40 = vmul.f32 0.044715, %v4567_v9  ;;  %v4706_v45 = vmul.f32 0.044715, %v4632_v39  ;;  %v4490_v62 = vadd.f32 %v9633_v15, %v4470_v52  ;;  %6186 = vtanh.f32 %v4831_v34 }
 0x9b4   : > { %v4894_v48 = vadd.f32 1.0, %v6185_v50  ;;  %6188 = vtanh.f32 %v4832_v59  ;;  %v4925_v37 = vmul.f32 %v4893_v4, %v4669_v10  ;;  %v4674_v24 = vmul.f32 0.5, %v4632_v39 }
 0x9b5   : > { %v4737_v42 = vmul.f32 %v4705_v40, %v4567_v9  ;;  %4586 = vmatmul.f32.gmra.mxu0 %v4490_v62  ;;  %4651 = vmatmul.f32.gmra.mxu1 %v4490_v62  ;;  %v4738_v30 = vmul.f32 %v4706_v45, %v4632_v39  ;;  %v4673_v5 = vmul.f32 0.5, %v4567_v9  ;;  %v10018_v43 = vadd.f32 %v9731_v29, %v9869_v26 }
 0x9b6   : > { %v4926_v14 = vmul.f32 %v4894_v48, %v4670_v8  ;;  %v10022_v45 = vadd.f32 %v9776_v53, %v9869_v26 }
 0x9b7   : > { %v4769_v6 = vmul.f32 %v4737_v42, %v4567_v9  ;;  %v4770_v27 = vmul.f32 %v4738_v30, %v4632_v39 }
 0x9b8   : > { %5078 = vmatmul.f32.gmra.mxu3 %v4926_v14  ;;  %v4696_v59 = vmul.f32 0.044715, %v10022_v45 }
 0x9b9   : > { %v4801_v32 = vadd.f32 %v4769_v6, %v4567_v9  ;;  %v6187_v54 = vpop.eup %6186  ;;  %v4802_v15 = vadd.f32 %v4770_v27, %v4632_v39  ;;  %v4694_v39 = vmul.f32 0.044715, %v10018_v43 }
 0x9ba   : > { %v6189_v60 = vpop.eup %6188  ;;  %5013 = vmatmul.f32.gmra.mxu2 %v4925_v37  ;;  %v4895_v17 = vadd.f32 1.0, %v6187_v54  ;;  %v4728_v29 = vmul.f32 %v4696_v59, %v10022_v45 }
 0x9bb   : > { %v4833_v20 = vmul.f32 0.7978846, %v4801_v32  ;;  %v4896_v3 = vadd.f32 1.0, %v6189_v60  ;;  %v4834_v12 = vmul.f32 0.7978846, %v4802_v15  ;;  %v4726_v8 = vmul.f32 %v4694_v39, %v10018_v43 }
 0x9bc   : > { %v4927_v18 = vmul.f32 %v4895_v17, %v4671_v16  ;;  %v4760_v30 = vmul.f32 %v4728_v29, %v10022_v45 }
 0x9bd   : > { %6190 = vtanh.f32 %v4833_v20  ;;  %v4928_v57 = vmul.f32 %v4896_v3, %v4672_v38  ;;  %v4758_v53 = vmul.f32 %v4726_v8, %v10018_v43  ;;  %v6256_v3 = vld [vmem:[%s10233_s7] ss:$0 sm:$0xff] }
 0x9be   : > { %6192 = vtanh.f32 %v4834_v12  ;;  %v4792_v32 = vadd.f32 %v4760_v30, %v10022_v45 }
 0x9bf   : > { %v4790_v37 = vadd.f32 %v4758_v53, %v10018_v43 }
 0x9c0   : > { %5081 = vmatmul.f32.gmra.mxu3 %v4928_v57  ;;  %v4824_v38 = vmul.f32 0.7978846, %v4792_v32  ;;  %v4662_v32 = vmul.f32 0.5, %v10018_v43 }
 0x9c1   : > { %v4822_v20 = vmul.f32 0.7978846, %v4790_v37 }
 0x9c2   : > { %5016 = vmatmul.f32.gmra.mxu2 %v4927_v18 }
 0x9c3   : > { %v6191_v55 = vpop.eup %6190 }
 0x9c4   : > { %v6193_v56 = vpop.eup %6192  ;;  %v4897_v49 = vadd.f32 1.0, %v6191_v55 }
 0x9c5   : > { %v4898_v31 = vadd.f32 1.0, %v6193_v56 }
 0x9c6   : > { %v4929_v34 = vmul.f32 %v4897_v49, %v4673_v5 }
 0x9c7   : > { %v4930_v52 = vmul.f32 %v4898_v31, %v4674_v24 }
 0x9c9   : > { %5084 = vmatmul.f32.gmra.mxu3 %v4930_v52 }
 0x9ca   : > { %5019 = vmatmul.f32.gmra.mxu2 %v4929_v34 }
 0x9e8   : > { %v4242_v51 = vpop.xlane.xlu1 %4241 }
 0x9e9   : > { %v4259_v7 = vmul.f32 %v4242_v51, %v10422_v63 }
 0x9eb   : > { %v4275_v40 = vadd.f32 1e-05, %v4259_v7 }
 0x9ed   : > { %6194 = vrsqrt.f32 %v4275_v40  ;;  %vm4423_vm15 = vweird.f32 %v4275_v40 }
 0x9f0   : > { %v4244_v9 = vpop.xlane.xlu2 %4243 }
 0x9f1   : > { %v4260_v50 = vmul.f32 %v4244_v9, %v10422_v63 }
 0x9f3   : > { %v6195_v62 = vpop.eup %6194  ;;  %v4276_v4 = vadd.f32 1e-05, %v4260_v50 }
 0x9f4   : > { %v4418_v48 = vmul.f32 %v6195_v62, %v4275_v40  ;;  %vm4424_vm14 = vweird.f32 %v6195_v62 }
 0x9f5   : > { %6196 = vrsqrt.f32 %v4276_v4  ;;  %vm4425_vm0 = vmor %vm4423_vm15, %vm4424_vm14  ;;  %vm4433_vm3 = vweird.f32 %v4276_v4 }
 0x9f6   : > { %v4419_v42 = vmul.f32 %v6195_v62, %v4418_v48  ;;  %6198 = vtanh.f32 %v4822_v20 }
 0x9f7   : > { %6200 = vtanh.f32 %v4824_v38 }
 0x9f8   : > { %v4420_v10 = vmul.f32 0.5, %v4419_v42 }
 0x9fa   : > { %v4421_v14 = vsub.f32 1.5, %v4420_v10 }
 0x9fb   : > { %v6197_v6 = vpop.eup %6196 }
 0x9fc   : > { %v4422_v63 = vmul.f32 %v6195_v62, %v4421_v14  ;;  %v4428_v27 = vmul.f32 %v6197_v6, %v4276_v4  ;;  %vm4434_vm2 = vweird.f32 %v6197_v6  ;;  %v6199_v59 = vpop.eup %6198 }
 0x9fd   : > { %vm4435_vm4 = vmor %vm4433_vm3, %vm4434_vm2  ;;  %v6201_v8 = vpop.eup %6200  ;;  %v4886_v14 = vadd.f32 1.0, %v6199_v59 }
 0x9fe   : > { %v4426_v54 = vsel %vm4425_vm0, %v6195_v62, %v4422_v63  ;;  %v4429_v15 = vmul.f32 %v6197_v6, %v4428_v27 }
 0x9ff   : > { %v4451_v60 = vmul.f32 %v4426_v54, %v9698_v46  ;;  %v6257_v46 = vld [vmem:[%s10234_s8] ss:$0 sm:$0xff]  ;;  %v4664_v54 = vmul.f32 0.5, %v10022_v45  ;;  %v4918_v38 = vmul.f32 %v4886_v14, %v4662_v32 }
 0xa00   : > { %v4430_v17 = vmul.f32 0.5, %v4429_v15  ;;  %v4569_v57 = vpop.f32.mrf.mxu0  ;;  %v4634_v18 = vpop.f32.mrf.mxu1 }
 0xa01   : > { %v4471_v12 = vmul.f32 %v6256_v3, %v4451_v60  ;;  %v4570_v55 = vadd.f32 %v4569_v57, %v9725_v28  ;;  %v4635_v56 = vadd.f32 %v4634_v18, %v9869_v26 }
 0xa02   : > { %v4431_v16 = vsub.f32 1.5, %v4430_v17 }
 0xa03   : > { %v4491_v49 = vadd.f32 %v6257_v46, %v4471_v12  ;;  %v4707_v31 = vmul.f32 0.044715, %v4570_v55  ;;  %v4708_v5 = vmul.f32 0.044715, %v4635_v56 }
 0xa04   : > { %v4432_v24 = vmul.f32 %v6197_v6, %v4431_v16 }
 0xa05   : > { %4589 = vmatmul.f32.gmra.mxu0 %v4491_v49  ;;  %4654 = vmatmul.f32.gmra.mxu1 %v4491_v49  ;;  %v4739_v51 = vmul.f32 %v4707_v31, %v4570_v55  ;;  %v4740_v7 = vmul.f32 %v4708_v5, %v4635_v56  ;;  %v4675_v31 = vmul.f32 0.5, %v4570_v55 }
 0xa06   : > { %v4436_v52 = vsel %vm4435_vm4, %v6197_v6, %v4432_v24  ;;  %v4888_v6 = vadd.f32 1.0, %v6201_v8 }
 0xa07   : > { %v4452_v34 = vmul.f32 %v4436_v52, %v9717_v23  ;;  %v4771_v39 = vmul.f32 %v4739_v51, %v4570_v55  ;;  %v4772_v9 = vmul.f32 %v4740_v7, %v4635_v56  ;;  %v4676_v52 = vmul.f32 0.5, %v4635_v56 }
 0xa08   : > { %v4572_v50 = vpop.f32.mrf.mxu0  ;;  %v4637_v62 = vpop.f32.mrf.mxu1 }
 0xa09   : > { %v4472_v40 = vmul.f32 %v6256_v3, %v4452_v34  ;;  %v4573_v4 = vadd.f32 %v4572_v50, %v9725_v28  ;;  %v10045_v48 = vadd.f32 %v4637_v62, %v9869_v26  ;;  %v4803_v42 = vadd.f32 %v4771_v39, %v4570_v55 }
 0xa0a   : > { %v4804_v53 = vadd.f32 %v4772_v9, %v4635_v56  ;;  %v4920_v3 = vmul.f32 %v4888_v6, %v4664_v54 }
 0xa0b   : > { %v4492_v29 = vadd.f32 %v6257_v46, %v4472_v40  ;;  %v4709_v10 = vmul.f32 0.044715, %v4573_v4  ;;  %v4710_v23 = vmul.f32 0.044715, %v10045_v48  ;;  %v4835_v30 = vmul.f32 0.7978846, %v4803_v42 }
 0xa0c   : > { %v4836_v37 = vmul.f32 0.7978846, %v4804_v53 }
 0xa0d   : > { %4592 = vmatmul.f32.gmra.mxu0 %v4492_v29  ;;  %4657 = vmatmul.f32.gmra.mxu1 %v4492_v29  ;;  %6202 = vtanh.f32 %v4835_v30  ;;  %v4741_v63 = vmul.f32 %v4709_v10, %v4573_v4  ;;  %v4742_v27 = vmul.f32 %v4710_v23, %v10045_v48 }
 0xa0e   : > { %6204 = vtanh.f32 %v4836_v37  ;;  %v4677_v37 = vmul.f32 0.5, %v4573_v4 }
 0xa0f   : > { %v4773_v15 = vmul.f32 %v4741_v63, %v4573_v4  ;;  %v4774_v60 = vmul.f32 %v4742_v27, %v10045_v48  ;;  %v4678_v27 = vmul.f32 0.5, %v10045_v48 }
 0xa10   : > { %v4575_v20 = vpop.f32.mrf.mxu0  ;;  %v4640_v17 = vpop.f32.mrf.mxu1 }
 0xa11   : > { %v10053_v12 = vadd.f32 %v4575_v20, %v9725_v28  ;;  %v10056_v16 = vadd.f32 %v4640_v17, %v9869_v26  ;;  %v4805_v57 = vadd.f32 %v4773_v15, %v4573_v4  ;;  %v4806_v18 = vadd.f32 %v4774_v60, %v10045_v48 }
 0xa13   : > { %v6203_v43 = vpop.eup %6202  ;;  %v4711_v45 = vmul.f32 0.044715, %v10053_v12  ;;  %v4712_v46 = vmul.f32 0.044715, %v10056_v16  ;;  %v4837_v49 = vmul.f32 0.7978846, %v4805_v57 }
 0xa14   : > { %v6205_v24 = vpop.eup %6204  ;;  %v4899_v5 = vadd.f32 1.0, %v6203_v43  ;;  %v4838_v34 = vmul.f32 0.7978846, %v4806_v18 }
 0xa15   : > { %5066 = vmatmul.f32.vlgmr.msra.gmra.mxu0 %v4918_v38  ;;  %5069 = vmatmul.f32.vlgmr.msra.gmra.mxu1 %v4920_v3  ;;  %v4900_v51 = vadd.f32 1.0, %v6205_v24  ;;  %6206 = vtanh.f32 %v4837_v49  ;;  %v4743_v7 = vmul.f32 %v4711_v45, %v10053_v12  ;;  %v4744_v40 = vmul.f32 %v4712_v46, %v10056_v16 }
 0xa16   : > { %v4931_v39 = vmul.f32 %v4899_v5, %v4675_v31  ;;  %6208 = vtanh.f32 %v4838_v34  ;;  %v4679_v34 = vmul.f32 0.5, %v10053_v12 }
 0xa17   : > { %v4932_v9 = vmul.f32 %v4900_v51, %v4676_v52  ;;  %v4775_v59 = vmul.f32 %v4743_v7, %v10053_v12  ;;  %v4776_v50 = vmul.f32 %v4744_v40, %v10056_v16  ;;  %v4680_v40 = vmul.f32 0.5, %v10056_v16 }
 0xa18   : > { %5022 = vmatmul.f32.gmra.mxu2 %v4931_v39 }
 0xa19   : > { %v4578_v62 = vpop.f32.mrf.mxu0  ;;  %v4643_v8 = vpop.f32.mrf.mxu1  ;;  %5087 = vmatmul.f32.gmra.mxu3 %v4932_v9  ;;  %v4807_v29 = vadd.f32 %v4775_v59, %v10053_v12  ;;  %v4808_v42 = vadd.f32 %v4776_v50, %v10056_v16 }
 0xa1a   : > { %v10066_v55 = vadd.f32 %v4578_v62, %v9725_v28  ;;  %v10069_v56 = vadd.f32 %v4643_v8, %v9869_v26  ;;  %v10073_v53 = vpop.f32.mrf.mxu2 }
 0xa1b   : > { %v6207_v10 = vpop.eup %6206  ;;  %v4839_v14 = vmul.f32 0.7978846, %v4807_v29  ;;  %v4840_v32 = vmul.f32 0.7978846, %v4808_v42 }
 0xa1c   : > { %v4713_v23 = vmul.f32 0.044715, %v10066_v55  ;;  %v4714_v30 = vmul.f32 0.044715, %v10069_v56  ;;  %v6209_v6 = vpop.eup %6208  ;;  %v4901_v63 = vadd.f32 1.0, %v6207_v10 }
 0xa1d   : > { %v4902_v54 = vadd.f32 1.0, %v6209_v6  ;;  %6210 = vtanh.f32 %v4839_v14 }
 0xa1e   : > { %v4745_v15 = vmul.f32 %v4713_v23, %v10066_v55  ;;  %v4746_v60 = vmul.f32 %v4714_v30, %v10069_v56  ;;  %v4933_v20 = vmul.f32 %v4901_v63, %v4677_v37  ;;  %6212 = vtanh.f32 %v4840_v32 }
 0xa1f   : > { %v4934_v17 = vmul.f32 %v4902_v54, %v4678_v27  ;;  %v4681_v54 = vmul.f32 0.5, %v10066_v55 }
 0xa20   : > { %v4777_v38 = vmul.f32 %v4745_v15, %v10066_v55  ;;  %v4778_v3 = vmul.f32 %v4746_v60, %v10069_v56  ;;  %5025 = vmatmul.f32.gmra.mxu2 %v4933_v20  ;;  %v4682_v20 = vmul.f32 0.5, %v10069_v56 }
 0xa21   : > { %v4581_v57 = vpop.f32.mrf.mxu0  ;;  %v4646_v18 = vpop.f32.mrf.mxu1  ;;  %5090 = vmatmul.f32.gmra.mxu3 %v4934_v17 }
 0xa22   : > { %v4582_v4 = vadd.f32 %v4581_v57, %v9725_v28  ;;  %v10084_v48 = vadd.f32 %v4646_v18, %v9869_v26  ;;  %v4809_v43 = vadd.f32 %v4777_v38, %v10066_v55  ;;  %v4810_v45 = vadd.f32 %v4778_v3, %v10069_v56 }
 0xa23   : > { %v6211_v46 = vpop.eup %6210  ;;  %v10089_v52 = vpop.f32.mrf.mxu2 }
 0xa24   : > { %v4715_v49 = vmul.f32 0.044715, %v4582_v4  ;;  %v4716_v24 = vmul.f32 0.044715, %v10084_v48  ;;  %v4841_v31 = vmul.f32 0.7978846, %v4809_v43  ;;  %v6213_v5 = vpop.eup %6212 }
 0xa25   : > { %v4903_v51 = vadd.f32 1.0, %v6211_v46  ;;  %v4842_v7 = vmul.f32 0.7978846, %v4810_v45  ;;  %v4904_v39 = vadd.f32 1.0, %v6213_v5 }
 0xa26   : > { %6214 = vtanh.f32 %v4841_v31  ;;  %v4747_v9 = vmul.f32 %v4715_v49, %v4582_v4  ;;  %v4748_v50 = vmul.f32 %v4716_v24, %v10084_v48  ;;  %v10117_v24 = vld [vmem:[%s10428_s29] ss:$0 sm:$0xff] }
 0xa27   : > { %v4935_v59 = vmul.f32 %v4903_v51, %v4679_v34  ;;  %6216 = vtanh.f32 %v4842_v7  ;;  %v4936_v62 = vmul.f32 %v4904_v39, %v4680_v40  ;;  %v4683_v40 = vmul.f32 0.5, %v4582_v4 }
 0xa28   : > { %v4779_v8 = vmul.f32 %v4747_v9, %v4582_v4  ;;  %v4780_v10 = vmul.f32 %v4748_v50, %v10084_v48 }
 0xa29   : > { %v4584_v29 = vpop.f32.mrf.mxu0  ;;  %v4649_v42 = vpop.f32.mrf.mxu1  ;;  %5028 = vmatmul.f32.gmra.mxu2 %v4935_v59  ;;  %5093 = vmatmul.f32.gmra.mxu3 %v4936_v62 }
 0xa2a   : > { %v10096_v12 = vadd.f32 %v4584_v29, %v9725_v28  ;;  %v10099_v23 = vadd.f32 %v4649_v42, %v9869_v26  ;;  %v4811_v16 = vadd.f32 %v4779_v8, %v4582_v4  ;;  %v4812_v30 = vadd.f32 %v4780_v10, %v10084_v48 }
 0xa2b   : > { %v4684_v8 = vmul.f32 0.5, %v10084_v48 }
 0xa2c   : > { %v6215_v14 = vpop.eup %6214  ;;  %v4717_v6 = vmul.f32 0.044715, %v10096_v12  ;;  %v4718_v37 = vmul.f32 0.044715, %v10099_v23  ;;  %v4843_v63 = vmul.f32 0.7978846, %v4811_v16 }
 0xa2d   : > { %v6217_v27 = vpop.eup %6216  ;;  %v10104_v32 = vpop.f32.mrf.mxu2  ;;  %v4905_v15 = vadd.f32 1.0, %v6215_v14  ;;  %v4844_v60 = vmul.f32 0.7978846, %v4812_v30 }
 0xa2e   : > { %v4906_v17 = vadd.f32 1.0, %v6217_v27  ;;  %6218 = vtanh.f32 %v4843_v63  ;;  %v4749_v38 = vmul.f32 %v4717_v6, %v10096_v12  ;;  %v4750_v57 = vmul.f32 %v4718_v37, %v10099_v23 }
 0xa2f   : > { %v4937_v3 = vmul.f32 %v4905_v15, %v4681_v54  ;;  %6220 = vtanh.f32 %v4844_v60 }
 0xa30   : > { %v4938_v18 = vmul.f32 %v4906_v17, %v4682_v20  ;;  %v4781_v43 = vmul.f32 %v4749_v38, %v10096_v12  ;;  %v4782_v46 = vmul.f32 %v4750_v57, %v10099_v23 }
 0xa31   : > { %5031 = vmatmul.f32.gmra.mxu2 %v4937_v3  ;;  %v4685_v3 = vmul.f32 0.5, %v10096_v12 }
 0xa32   : > { %v4587_v45 = vpop.f32.mrf.mxu0  ;;  %5096 = vmatmul.f32.gmra.mxu3 %v4938_v18  ;;  %v4652_v49 = vpop.f32.mrf.mxu1  ;;  %v4813_v56 = vadd.f32 %v4781_v43, %v10096_v12  ;;  %v4814_v34 = vadd.f32 %v4782_v46, %v10099_v23  ;;  %v4686_v43 = vmul.f32 0.5, %v10099_v23 }
 0xa33   : > { %v4588_v55 = vadd.f32 %v4587_v45, %v9725_v28  ;;  %v5076_v31 = vpop.f32.mrf.mxu3  ;;  %v4653_v5 = vadd.f32 %v4652_v49, %v9869_v26 }
 0xa34   : > { %v6219_v51 = vpop.eup %6218  ;;  %v4845_v39 = vmul.f32 0.7978846, %v4813_v56  ;;  %v4846_v29 = vmul.f32 0.7978846, %v4814_v34 }
 0xa35   : > { %v4719_v7 = vmul.f32 0.044715, %v4588_v55  ;;  %v6221_v9 = vpop.eup %6220  ;;  %v5011_v59 = vpop.f32.mrf.mxu2  ;;  %v4720_v50 = vmul.f32 0.044715, %v4653_v5  ;;  %v4907_v62 = vadd.f32 1.0, %v6219_v51  ;;  %v4688_v23 = vmul.f32 0.5, %v4653_v5 }
 0xa36   : > { %v5012_v42 = vadd.f32 %v10117_v24, %v5011_v59  ;;  %v4908_v10 = vadd.f32 1.0, %v6221_v9  ;;  %6222 = vtanh.f32 %v4845_v39 }
 0xa37   : > { %v4751_v16 = vmul.f32 %v4719_v7, %v4588_v55  ;;  %v4939_v30 = vmul.f32 %v4907_v62, %v4683_v40  ;;  %6224 = vtanh.f32 %v4846_v29  ;;  %v4752_v14 = vmul.f32 %v4720_v50, %v4653_v5 }
 0xa38   : > { %v5077_v6 = vadd.f32 %v5076_v31, %v5012_v42  ;;  %v4940_v37 = vmul.f32 %v4908_v10, %v4684_v8  ;;  %v4687_v7 = vmul.f32 0.5, %v4588_v55 }
 0xa39   : > { %v4783_v4 = vmul.f32 %v4751_v16, %v4588_v55  ;;  %5034 = vmatmul.f32.gmra.mxu2 %v4939_v30  ;;  %v4784_v63 = vmul.f32 %v4752_v14, %v4653_v5 }
 0xa3a   : > { %v5118_v27 = vadd.f32 %v5077_v6, %v9491_v11  ;;  %5099 = vmatmul.f32.gmra.mxu3 %v4940_v37 }
 0xa3b   : > { %v4815_v54 = vadd.f32 %v4783_v4, %v4588_v55  ;;  %v4816_v48 = vadd.f32 %v4784_v63, %v4653_v5  ;;  %v5079_v38 = vpop.f32.mrf.mxu3  ;;  %v10142_v5 = vadd.f32 %v9822_v41, %v9869_v26 }
 0xa3c   : > { %v6223_v15 = vpop.eup %6222  ;;  %5134 = vst [vmem:[%s10126_s14 + $0x18] sm:$0xff] %v5118_v27 }
 0xa3d   : > { %v4847_v60 = vmul.f32 0.7978846, %v4815_v54  ;;  %v6225_v20 = vpop.eup %6224  ;;  %v5014_v17 = vpop.f32.mrf.mxu2  ;;  %v4909_v57 = vadd.f32 1.0, %v6223_v15  ;;  %v4848_v18 = vmul.f32 0.7978846, %v4816_v48 }
 0xa3e   : > { %v5015_v11 = vadd.f32 %v10117_v24, %v5014_v17  ;;  %v4910_v45 = vadd.f32 1.0, %v6225_v20  ;;  %v4698_v63 = vmul.f32 0.044715, %v10142_v5 }
 0xa3f   : > { %6226 = vtanh.f32 %v4847_v60  ;;  %v4941_v46 = vmul.f32 %v4909_v57, %v4685_v3 }
 0xa40   : > { %6228 = vtanh.f32 %v4848_v18  ;;  %v5080_v49 = vadd.f32 %v5079_v38, %v5015_v11  ;;  %v4942_v56 = vmul.f32 %v4910_v45, %v4686_v43 }
 0xa41   : > { %5037 = vmatmul.f32.gmra.mxu2 %v4941_v46 }
 0xa42   : > { %v5119_v31 = vadd.f32 %v5080_v49, %v9500_v35  ;;  %5102 = vmatmul.f32.gmra.mxu3 %v4942_v56  ;;  %v5003_v56 = vadd.f32 %v10117_v24, %v10073_v53 }
 0xa43   : > { %v5082_v59 = vpop.f32.mrf.mxu3 }
 0xa44   : > { %5135 = vst [vmem:[%s10126_s14 + $0x20] sm:$0xff] %v5119_v31 }
 0xa45   : > { %v6227_v34 = vpop.eup %6226  ;;  %v5017_v51 = vpop.f32.mrf.mxu2 }
 0xa46   : > { %v6229_v12 = vpop.eup %6228  ;;  %v4911_v40 = vadd.f32 1.0, %v6227_v34  ;;  %v5018_v39 = vadd.f32 %v10117_v24, %v5017_v51 }
 0xa47   : > { %v4912_v9 = vadd.f32 1.0, %v6229_v12 }
 0xa48   : > { %v4943_v50 = vmul.f32 %v4911_v40, %v4687_v7  ;;  %v5083_v62 = vadd.f32 %v5082_v59, %v5018_v39 }
 0xa49   : > { %v4944_v8 = vmul.f32 %v4912_v9, %v4688_v23 }
 0xa4a   : > { %5040 = vmatmul.f32.gmra.mxu2 %v4943_v50  ;;  %v5120_v35 = vadd.f32 %v5083_v62, %v9510_v2 }
 0xa4b   : > { %5105 = vmatmul.f32.gmra.mxu3 %v4944_v8 }
 0xa4c   : > { %5136 = vst [vmem:[%s10126_s14 + $0x28] sm:$0xff] %v5120_v35  ;;  %v5085_v10 = vpop.f32.mrf.mxu3 }
 0xa4d   : > { %v5020_v29 = vpop.f32.mrf.mxu2 }
 0xa4e   : > { %v5021_v42 = vadd.f32 %v10117_v24, %v5020_v29 }
 0xa50   : > { %v5086_v55 = vadd.f32 %v5085_v10, %v5021_v42 }
 0xa52   : > { %v5121_v16 = vadd.f32 %v5086_v55, %v9519_v44  ;;  %v4730_v44 = vmul.f32 %v4698_v63, %v10142_v5 }
 0xa54   : > { %5137 = vst [vmem:[%s10126_s14 + $0x30] sm:$0xff] %v5121_v16  ;;  %v4762_v43 = vmul.f32 %v4730_v44, %v10142_v5 }
 0xa56   : > { %v4794_v34 = vadd.f32 %v4762_v43, %v10142_v5 }
 0xa58   : > { %v4826_v29 = vmul.f32 0.7978846, %v4794_v34 }
 0xa82   : > { %v4590_v30 = vpop.f32.mrf.mxu0  ;;  %v4655_v14 = vpop.f32.mrf.mxu1 }
 0xa83   : > { %v4591_v6 = vadd.f32 %v4590_v30, %v9725_v28  ;;  %v4656_v2 = vadd.f32 %v4655_v14, %v9869_v26 }
 0xa85   : > { %v4721_v37 = vmul.f32 0.044715, %v4591_v6  ;;  %v4722_v4 = vmul.f32 0.044715, %v4656_v2  ;;  %v4689_v8 = vmul.f32 0.5, %v4591_v6  ;;  %v4690_v42 = vmul.f32 0.5, %v4656_v2 }
 0xa87   : > { %v4753_v27 = vmul.f32 %v4721_v37, %v4591_v6  ;;  %v4754_v54 = vmul.f32 %v4722_v4, %v4656_v2 }
 0xa89   : > { %v4785_v48 = vmul.f32 %v4753_v27, %v4591_v6  ;;  %v4786_v15 = vmul.f32 %v4754_v54, %v4656_v2 }
 0xa8a   : > { %v4593_v60 = vpop.f32.mrf.mxu0  ;;  %v4658_v20 = vpop.f32.mrf.mxu1 }
 0xa8b   : > { %v4594_v41 = vadd.f32 %v4593_v60, %v9725_v28  ;;  %v4659_v17 = vadd.f32 %v4658_v20, %v9869_v26  ;;  %v4817_v38 = vadd.f32 %v4785_v48, %v4591_v6  ;;  %v4818_v3 = vadd.f32 %v4786_v15, %v4656_v2 }
 0xa8c   : > { %v5006_v28 = vadd.f32 %v10117_v24, %v10089_v52 }
 0xa8d   : > { %v4723_v57 = vmul.f32 0.044715, %v4594_v41  ;;  %v4724_v18 = vmul.f32 0.044715, %v4659_v17  ;;  %v4849_v11 = vmul.f32 0.7978846, %v4817_v38 }
 0xa8e   : > { %v4850_v45 = vmul.f32 0.7978846, %v4818_v3  ;;  %v4691_v37 = vmul.f32 0.5, %v4594_v41  ;;  %v4692_v63 = vmul.f32 0.5, %v4659_v17  ;;  %v4666_v38 = vmul.f32 0.5, %v10142_v5 }
 0xa8f   : > { %6230 = vtanh.f32 %v4849_v11  ;;  %v4755_v46 = vmul.f32 %v4723_v57, %v4594_v41  ;;  %v4756_v49 = vmul.f32 %v4724_v18, %v4659_v17 }
 0xa90   : > { %6232 = vtanh.f32 %v4850_v45 }
 0xa91   : > { %v4787_v31 = vmul.f32 %v4755_v46, %v4594_v41  ;;  %v4788_v26 = vmul.f32 %v4756_v49, %v4659_v17 }
 0xa92   : > { %v5067_v12 = vpop.f32.mrf.mxu0  ;;  %v5070_v51 = vpop.f32.mrf.mxu1 }
 0xa93   : > { %v5068_v7 = vadd.f32 %v5067_v12, %v5003_v56  ;;  %v5071_v40 = vadd.f32 %v5070_v51, %v5006_v28  ;;  %v4819_v39 = vadd.f32 %v4787_v31, %v4594_v41  ;;  %v4820_v23 = vadd.f32 %v4788_v26, %v4659_v17 }
 0xa95   : > { %v6231_v9 = vpop.eup %6230  ;;  %v5115_v59 = vadd.f32 %v5068_v7, %v9470_v0  ;;  %v5116_v53 = vadd.f32 %v5071_v40, %v9475_v61  ;;  %v4851_v50 = vmul.f32 0.7978846, %v4819_v39  ;;  %v4852_v62 = vmul.f32 0.7978846, %v4820_v23 }
 0xa96   : > { %v6233_v52 = vpop.eup %6232  ;;  %v4913_v35 = vadd.f32 1.0, %v6231_v9 }
 0xa97   : > { %5131 = vst [vmem:[%s10126_s14] sm:$0xff] %v5115_v59  ;;  %v4914_v10 = vadd.f32 1.0, %v6233_v52  ;;  %6234 = vtanh.f32 %v4851_v50 }
 0xa98   : > { %5132 = vst [vmem:[%s10126_s14 + $0x8] sm:$0xff] %v5116_v53  ;;  %v4945_v55 = vmul.f32 %v4913_v35, %v4689_v8  ;;  %6236 = vtanh.f32 %v4852_v62 }
 0xa99   : > { %v4946_v16 = vmul.f32 %v4914_v10, %v4690_v42  ;;  %6238 = vtanh.f32 %v4826_v29 }
 0xa9a   : > { %5043 = vmatmul.f32.gmra.mxu2 %v4945_v55  ;;  %v5009_v55 = vadd.f32 %v10117_v24, %v10104_v32 }
 0xa9b   : > { %5108 = vmatmul.f32.gmra.mxu3 %v4946_v16  ;;  %v5023_v61 = vpop.f32.mrf.mxu2 }
 0xa9c   : > { %v5024_v14 = vadd.f32 %v10117_v24, %v5023_v61  ;;  %v5088_v6 = vpop.f32.mrf.mxu3 }
 0xa9d   : > { %v6235_v0 = vpop.eup %6234 }
 0xa9e   : > { %v6237_v30 = vpop.eup %6236  ;;  %v4915_v4 = vadd.f32 1.0, %v6235_v0  ;;  %v5089_v27 = vadd.f32 %v5088_v6, %v5024_v14 }
 0xa9f   : > { %v4916_v2 = vadd.f32 1.0, %v6237_v30  ;;  %v6239_v48 = vpop.eup %6238 }
 0xaa0   : > { %v4947_v54 = vmul.f32 %v4915_v4, %v4691_v37  ;;  %v5122_v44 = vadd.f32 %v5089_v27, %v9539_v25  ;;  %v4890_v60 = vadd.f32 1.0, %v6239_v48 }
 0xaa1   : > { %v4948_v15 = vmul.f32 %v4916_v2, %v4692_v63 }
 0xaa2   : > { %5046 = vmatmul.f32.gmra.mxu2 %v4947_v54  ;;  %5138 = vst [vmem:[%s10126_s14 + $0x38] sm:$0xff] %v5122_v44  ;;  %v4922_v57 = vmul.f32 %v4890_v60, %v4666_v38 }
 0xaa3   : > { %5111 = vmatmul.f32.gmra.mxu3 %v4948_v15  ;;  %v5026_v20 = vpop.f32.mrf.mxu2 }
 0xaa4   : > { %v5027_v41 = vadd.f32 %v10117_v24, %v5026_v20  ;;  %v5091_v3 = vpop.f32.mrf.mxu3 }
 0xaa6   : > { %v5092_v17 = vadd.f32 %v5091_v3, %v5027_v41 }
 0xaa8   : > { %v5123_v18 = vadd.f32 %v5092_v17, %v9550_v33 }
 0xaaa   : > { %5072 = vmatmul.f32.vlgmr.msra.gmra.mxu2 %v4922_v57  ;;  %5139 = vst [vmem:[%s10126_s14 + $0x40] sm:$0xff] %v5123_v18 }
 0xaac   : > { %v5029_v11 = vpop.f32.mrf.mxu2  ;;  %v5094_v43 = vpop.f32.mrf.mxu3 }
 0xaad   : > { %v5030_v25 = vadd.f32 %v10117_v24, %v5029_v11 }
 0xaaf   : > { %v5095_v45 = vadd.f32 %v5094_v43, %v5030_v25 }
 0xab1   : > { %v5124_v46 = vadd.f32 %v5095_v45, %v9561_v13 }
 0xab3   : > { %5140 = vst [vmem:[%s10126_s14 + $0x48] sm:$0xff] %v5124_v46 }
 0xab4   : > { %v5032_v5 = vpop.f32.mrf.mxu2 }
 0xab5   : > { %v5033_v49 = vadd.f32 %v10117_v24, %v5032_v5  ;;  %v5097_v56 = vpop.f32.mrf.mxu3 }
 0xab7   : > { %v5098_v28 = vadd.f32 %v5097_v56, %v5033_v49 }
 0xab9   : > { %v5125_v31 = vadd.f32 %v5098_v28, %v9572_v47 }
 0xabb   : > { %5141 = vst [vmem:[%s10126_s14 + $0x50] sm:$0xff] %v5125_v31 }
 0xabc   : > { %v5035_v33 = vpop.f32.mrf.mxu2 }
 0xabd   : > { %v5036_v26 = vadd.f32 %v10117_v24, %v5035_v33  ;;  %v5100_v34 = vpop.f32.mrf.mxu3 }
 0xabf   : > { %v5101_v12 = vadd.f32 %v5100_v34, %v5036_v26 }
 0xac1   : > { %v5126_v51 = vadd.f32 %v5101_v12, %v9583_v1 }
 0xac3   : > { %5142 = vst [vmem:[%s10126_s14 + $0x58] sm:$0xff] %v5126_v51 }
 0xac4   : > { %v5038_v13 = vpop.f32.mrf.mxu2 }
 0xac5   : > { %v5039_v7 = vadd.f32 %v10117_v24, %v5038_v13  ;;  %v5103_v40 = vpop.f32.mrf.mxu3 }
 0xac7   : > { %v5104_v39 = vadd.f32 %v5103_v40, %v5039_v7 }
 0xac9   : > { %v5127_v23 = vadd.f32 %v5104_v39, %v9594_v36 }
 0xacb   : > { %5143 = vst [vmem:[%s10126_s14 + $0x60] sm:$0xff] %v5127_v23 }
 0xacd   : > { %v5041_v47 = vpop.f32.mrf.mxu2 }
 0xace   : > { %v5042_v9 = vadd.f32 %v10117_v24, %v5041_v47  ;;  %v5106_v59 = vpop.f32.mrf.mxu3 }
 0xad0   : > { %v5107_v53 = vadd.f32 %v5106_v59, %v5042_v9 }
 0xad2   : > { %v5128_v50 = vadd.f32 %v5107_v53, %v9601_v58 }
 0xad4   : > { %5144 = vst [vmem:[%s10126_s14 + $0x68] sm:$0xff] %v5128_v50 }
 0xb1d   : > { %v5044_v1 = vpop.f32.mrf.mxu2 }
 0xb1e   : > { %v5045_v62 = vadd.f32 %v10117_v24, %v5044_v1  ;;  %v5109_v52 = vpop.f32.mrf.mxu3 }
 0xb20   : > { %v5110_v8 = vadd.f32 %v5109_v52, %v5045_v62 }
 0xb22   : > { %v5129_v35 = vadd.f32 %v5110_v8, %v9619_v22 }
 0xb24   : > { %5145 = vst [vmem:[%s10126_s14 + $0x70] sm:$0xff] %v5129_v35 }
 0xb25   : > { %v5047_v36 = vpop.f32.mrf.mxu2 }
 0xb26   : > { %v5048_v29 = vadd.f32 %v10117_v24, %v5047_v36  ;;  %v5112_v42 = vpop.f32.mrf.mxu3 }
 0xb28   : > { %v5113_v10 = vadd.f32 %v5112_v42, %v5048_v29 }
 0xb2a   : > { %v5130_v58 = vadd.f32 %v5113_v10, %v9644_v21 }
 0xb2c   : > { %5146 = vst [vmem:[%s10126_s14 + $0x78] sm:$0xff] %v5130_v58 }
 0xb2d   : > { %v5073_v22 = vpop.f32.mrf.mxu2 }
 0xb2e   : > { %v5074_v16 = vadd.f32 %v5073_v22, %v5009_v55 }
 0xb30   : > { %v5117_v0 = vadd.f32 %v5074_v16, %v9480_v19 }
 0xb32   : > { %5133 = vst [vmem:[%s10126_s14 + $0x10] sm:$0xff] %v5117_v0 }
 0xb33   : > { %6525 = shalt.err (!%p6522_p9)
}
 0xb34   : > { %s6599_s18 = smov 128   ;;  %s6600_s14 = smov 8  }
 0xb35   : > { %5539 = dma.vmem_to_hbm [thread:$0]  (%p6773_p13), %s5161_s5, 2048, %s5163_s21, %s5148_s15, %s6599_s18, %s6599_s18, %s6600_s14  }
 0xb36 PF: > { %s5177_s24 = sand.u32 1, %s6568_s25   ;;  %p10430_p10 = scmp.ge.s32.totalorder %s6580_s28, 2 }
 0xb37   : > { %s5178_s1 = scalar_lea.sflag [#allocation4], %s5177_s24 }
 0xb38   : > { %p5568_p11 = pnand %p10430_p10, %p6778_p5 }
 0xb3a   : > { %p5569_p0 = pneg %p5568_p11 }
 0xb3c   : > { %6563 = dma.done.wait (%p5569_p0), %s5178_s1, 2048  }
 0xb3d   : > { %6565 = vsyncadd (%p5569_p0), %s5178_s1, 4294965248  ;;  %p30_p2 = scmp.ge.s32.totalorder %s6753_s12, 4   ;;  %s10431_s25 = smov %s6572_s26 }
 0xb3e   : > { %s10432_s26 = smov %s6576_s27  ;;  %s10433_s27 = smov %s6765_s10 }
 0xb3f   : > { %s10434_s28 = smov %s6753_s12  ;;  %32 = sbr.rel (!%p30_p2) target bundleno = 17 (0x11), region = 145 }
 0xb44   :  { %5184 = vsyncpa [#allocation3], 1 }
 0xb45   :  { %5186 = vsyncpa [#allocation3 + $0x1], 1 }
 0xb46   :  { %5187 = vsyncpa [#allocation6], 1 }
 0xb47   :  { %5188 = vsyncpa [#allocation9], 1 }
 0xb48   :  { %5189 = vsyncpa [#allocation12], 1 }
 0xb49   :  { %5190 = vsyncpa [#allocation15], 1 }
 0xb4a   :  { %5191 = vsyncpa [#allocation4], 1 }
 0xb4b   :  { %5193 = vsyncpa [#allocation4 + $0x1], 1 }

</bundles_post_ra>
